<compile_context>
chip_gen: v7x
topology: tpu7x:2x2x1
jax: 0.10.0
libtpu: 0.0.40
codegen_flags: <defaults>
</compile_context>

<pallas_src>
import functools

import numpy as np
import jax
import jax.numpy as jnp
from jax import lax
from jax.experimental import pallas as pl
from jax.experimental.pallas import tpu as pltpu

LANE = 128
SUBLANE = 8


def _round_up(n, m):
    return ((n + m - 1) // m) * m


def _pad(x, target_shape):
    return jnp.pad(x, [(0, t - s) for s, t in zip(x.shape, target_shape)])


def _gate_pack_t(w, in_pad, h, h_pad):
    """PyTorch LSTMCell weight (4H, in) -> (in_pad, 4*h_pad), transposed; each gate
    block (i, f, g, o) is zero-padded to h_pad columns so gate slices are lane-aligned."""
    _, in_dim = w.shape
    w4 = w.reshape(4, h, in_dim)                  # (4, H, in)
    w4 = jnp.transpose(w4, (2, 0, 1))             # (in, 4, H)
    w4 = jnp.pad(w4, ((0, in_pad - in_dim), (0, 0), (0, h_pad - h)))
    return w4.reshape(in_pad, 4 * h_pad)


def _gate_pack_bias(b, h, h_pad):
    b4 = b.reshape(4, h)
    b4 = jnp.pad(b4, ((0, 0), (0, h_pad - h)))
    return b4.reshape(1, 4 * h_pad)


def _vmem_limit_bytes():
    """Derive the scoped-VMEM limit from the actual chip (v5e/v6e: 128 MiB physical,
    v7x: 64 MiB); fall back to a conservative constant if the query is unavailable."""
    try:
        cap = getattr(pltpu.get_tpu_info(), "vmem_capacity_bytes", None)
        if cap:
            return int(max(32 << 20, min(cap * 3 // 4, 100 << 20)))
    except Exception:
        pass
    return 48 << 20


def _decoder_kernel(p_real,
                    feats_ref,     # (Bp, Pp, Ep)      bf16  sorted, padded encoder features
                    att1_ref,      # (Bp, Pp, Ap)      f32   hoisted feats @ W_enc^T + b_enc
                    h0_ref,        # (Bp, Hp)          f32   init hidden (wrapper-computed)
                    c0_ref,        # (Bp, Hp)          f32
                    w_full_ref,    # (1, Ap)           f32
                    w_h_ref,       # (Hp, Ap+Ep+4Hp)   bf16  fused [W_dec | W_fbeta | W_hh]
                    b_h_ref,       # (1, Ap+Ep+4Hp)    f32
                    w_ia_ref,      # (Ep, 4Hp)         bf16  attention half of W_ih
                    eg_hbm,        # (T_dec, Bp, 4Hp)  f32   HBM: precomputed emb @ W_ih_emb
                    h_all_ref,     # (T_dec, Bp, Hp)   f32   out
                    alpha_ref,     # (T_dec, Bp, Pp)   f32   out
                    h_scr, c_scr,  # (Bp, Hp)          f32   scratch (LSTM state)
                    eg_buf,        # (2, Bp, 4Hp)      f32   scratch (double buffer)
                    eg_sem):       # DMA semaphores (2,)
    bp, pp, ep = feats_ref.shape
    hp = h_scr.shape[1]
    ap = att1_ref.shape[2]
    t_dec = h_all_ref.shape[0]

    h_scr[...] = h0_ref[...]
    c_scr[...] = c0_ref[...]

    # Additive padded-pixel mask (0 for real pixels, -1e30 for padding), hoisted.
    neg_mask = jnp.where(
        lax.broadcasted_iota(jnp.int32, (bp, pp), 1) < p_real, 0.0, -1e30)
    w_full = w_full_ref[...]                                            # (1, Ap)

    # Prime the double-buffered HBM -> VMEM stream of per-step embedding gates.
    pltpu.make_async_copy(eg_hbm.at[0], eg_buf.at[0], eg_sem.at[0]).start()

    # TODO(synk): a 2x unroll could further overlap EUP/XLU latency across steps;
    # left off to keep vreg pressure low (the (Bp,Pp,Ap) relu intermediate is large).
    @pl.loop(0, t_dec)
    def _(t):
        slot = t % 2
        pltpu.make_async_copy(eg_hbm.at[0], eg_buf.at[slot], eg_sem.at[slot]).wait()

        @pl.when(t + 1 < t_dec)
        def _():
            pltpu.make_async_copy(eg_hbm.at[t + 1], eg_buf.at[1 - slot],
                                  eg_sem.at[1 - slot]).start()

        h = h_scr[...]                                                  # (Bp, Hp) f32
        c = c_scr[...]

        # One fused bf16 MXU matmul for every projection of h:
        #   [ att2 (Ap) | f_beta gate pre-act (Ep) | W_hh gates (4Hp) ]
        hproj = jnp.dot(h.astype(jnp.bfloat16), w_h_ref[...],
                        preferred_element_type=jnp.float32) + b_h_ref[...]
        att2 = hproj[:, :ap]
        gate = jax.nn.sigmoid(hproj[:, ap:ap + ep])
        hh_gates = hproj[:, ap + ep:]

        # ---- attention (f32 softmax path; b_full dropped: softmax shift-invariant) ----
        att = jnp.maximum(att1_ref[...] + att2[:, None, :], 0.0)       # (Bp, Pp, Ap)
        # NOTE(review): this reduce could also run on the MXU as (Bp*Pp,Ap)@(Ap,1);
        # kept on the VPU/XLU path pending per-generation benchmarking.
        scores = jnp.sum(att * w_full[None, :, :], axis=-1) + neg_mask  # (Bp, Pp)
        m = jnp.max(scores, axis=-1, keepdims=True)
        e = jnp.exp(scores - m)
        alpha = e * pl.reciprocal(jnp.sum(e, axis=-1, keepdims=True), approx=True)

        # Attention-weighted encoding on the MXU (bf16 operands, f32 accumulation).
        awe = jnp.einsum('bqp,bpe->bqe', alpha[:, None, :].astype(jnp.bfloat16),
                         feats_ref[...],
                         preferred_element_type=jnp.float32)[:, 0, :]   # (Bp, Ep)
        awe = gate * awe

        # ---- LSTMCell (gate order i, f, g, o); emb gates precomputed & streamed ----
        gates = (hh_gates + eg_buf[slot]
                 + jnp.dot(awe.astype(jnp.bfloat16), w_ia_ref[...],
                           preferred_element_type=jnp.float32))         # (Bp, 4Hp)
        i_g = jax.nn.sigmoid(gates[:, 0 * hp:1 * hp])
        f_g = jax.nn.sigmoid(gates[:, 1 * hp:2 * hp])
        g_g = jnp.tanh(gates[:, 2 * hp:3 * hp])
        o_g = jax.nn.sigmoid(gates[:, 3 * hp:4 * hp])
        c_new = f_g * c + i_g * g_g
        h_new = o_g * jnp.tanh(c_new)
        h_scr[...] = h_new
        c_scr[...] = c_new

        h_all_ref[t] = h_new
        alpha_ref[t] = alpha


def init_params(key, vocab_size, embed_size, hidden_size, encoder_size, attention_size):
    ks = jax.random.split(key, 19)
    H, E, M, A, V = hidden_size, encoder_size, embed_size, attention_size, vocab_size

    def w(k, shape, scale=0.1):
        return scale * jax.random.normal(k, shape, dtype=jnp.float32)

    return {
        'embed':    w(ks[0], (V, M)),
        'w_enc':    w(ks[1], (A, E)),         'b_enc':    w(ks[2], (1, A)),
        'w_dec':    w(ks[3], (A, H)),         'b_dec':    w(ks[4], (1, A)),
        'w_full':   w(ks[5], (1, A)),         'b_full':   w(ks[6], (1, 1)),
        'w_fbeta':  w(ks[7], (E, H)),         'b_fbeta':  w(ks[8], (1, E)),
        'w_ih':     w(ks[9], (4 * H, M + E)), 'b_ih':     w(ks[10], (1, 4 * H)),
        'w_hh':     w(ks[11], (4 * H, H)),    'b_hh':     w(ks[12], (1, 4 * H)),
        'w_lin':    w(ks[13], (V, H)),        'b_lin':    w(ks[14], (1, V)),
        'w_init_h': w(ks[15], (H, E)),        'b_init_h': w(ks[16], (1, H)),
        'w_init_c': w(ks[17], (H, E)),        'b_init_c': w(ks[18], (1, H)),
    }


def decoder_forward(params, features, captions, lengths, encoder_size):
    """Mirrors the attention decoder forward. `lengths` is a Python list (static)."""
    B = features.shape[0]
    feats = features.reshape(B, -1, encoder_size)                       # (B, P, E)
    P = feats.shape[1]
    V, M = params['embed'].shape
    H = params['w_init_h'].shape[0]
    A = params['w_enc'].shape[0]
    E = encoder_size

    # glue: sort by caption length, descending (torch.sort(descending=True)).
    lengths_np = np.asarray(lengths, dtype=np.float32)
    sort_ind = np.argsort(-lengths_np, kind='stable')
    caption_lengths = lengths_np[sort_ind]
    decode_lengths = (caption_lengths - 1.0).tolist()
    T_dec = int(max(decode_lengths))
    max_len = int(max(lengths_np))

    # Padded (lane/sublane-aligned) sizes.
    Bp = max(_round_up(B, SUBLANE), SUBLANE)
    Pp = _round_up(P, LANE)
    Ep = _round_up(E, LANE)
    Ap = _round_up(A, LANE)
    Hp = _round_up(H, LANE)
    G = 4 * Hp
    bf16 = jnp.bfloat16

    # ---- time-invariant precompute in XLA (hoisted out of the serial kernel) ----
    feats_sorted = feats[jnp.asarray(sort_ind)]                         # (B, P, E) f32
    feats_p = _pad(feats_sorted, (Bp, Pp, Ep)).astype(bf16)

    # init_hidden_state(): exact f32, once, outside the recurrence.
    mean_f = jnp.mean(feats_sorted, axis=1)                             # (B, E)
    h0_p = _pad(mean_f @ params['w_init_h'].T + params['b_init_h'], (Bp, Hp))
    c0_p = _pad(mean_f @ params['w_init_c'].T + params['b_init_c'], (Bp, Hp))

    # Hoisted encoder attention projection (f32; use bf16 here on v7x to halve VMEM).
    att1 = jnp.einsum('bpe,ea->bpa', feats_sorted, params['w_enc'].T) + params['b_enc']
    att1_p = _pad(att1, (Bp, Pp, Ap))

    # Embedding gate contribution: one big (T_dec*B, M)@(M, 4Hp) matmul, then streamed
    # per step from HBM by the kernel. (UNSORTED captions, as in the original module.)
    embeddings = params['embed'][captions]                              # (B, T, M)
    emb_t = jnp.transpose(embeddings, (1, 0, 2))[:T_dec]                # (T_dec, B, M)
    w_ie = _gate_pack_t(params['w_ih'][:, :M], M, H, Hp)                # (M, 4Hp)
    eg = jnp.einsum('tbm,mg->tbg', emb_t.astype(bf16), w_ie.astype(bf16),
                    preferred_element_type=jnp.float32)
    eg_p = _pad(eg, (T_dec, Bp, G))

    # ---- per-step weights: (in, out) layout, lane-aligned pad, bf16 MXU operands ----
    w_full_p = _pad(params['w_full'], (1, Ap))
    w_h_fused = jnp.concatenate([
        _pad(params['w_dec'].T, (Hp, Ap)),
        _pad(params['w_fbeta'].T, (Hp, Ep)),
        _gate_pack_t(params['w_hh'], Hp, H, Hp),
    ], axis=1).astype(bf16)                                             # (Hp, Ap+Ep+4Hp)
    b_h_fused = jnp.concatenate([
        _pad(params['b_dec'], (1, Ap)),
        _pad(params['b_fbeta'], (1, Ep)),
        _gate_pack_bias(params['b_ih'] + params['b_hh'], H, Hp),
    ], axis=1)
    w_ia = _gate_pack_t(params['w_ih'][:, M:], Ep, H, Hp).astype(bf16)  # (Ep, 4Hp)

    kernel = functools.partial(_decoder_kernel, P)
    vmem_spec = pl.BlockSpec(memory_space=pltpu.MemorySpace.VMEM)
    in_specs = [vmem_spec] * 8 + [pl.BlockSpec(memory_space=pl.ANY)]    # eg stays in HBM

    h_all, alpha_pad = pl.pallas_call(
        kernel,
        out_shape=(jax.ShapeDtypeStruct((T_dec, Bp, Hp), jnp.float32),
                   jax.ShapeDtypeStruct((T_dec, Bp, Pp), jnp.float32)),
        in_specs=in_specs,
        out_specs=(vmem_spec, vmem_spec),
        scratch_shapes=[pltpu.VMEM((Bp, Hp), jnp.float32),              # h state
                        pltpu.VMEM((Bp, Hp), jnp.float32),              # c state
                        pltpu.VMEM((2, Bp, G), jnp.float32),            # emb-gate dbl buffer
                        pltpu.SemaphoreType.DMA((2,))],
        compiler_params=pltpu.CompilerParams(vmem_limit_bytes=_vmem_limit_bytes()),
    )(feats_p, att1_p, h0_p, c0_p, w_full_p, w_h_fused, b_h_fused, w_ia, eg_p)
    # TODO(synk): on v7x, additionally split Bp across the two TensorCores
    # (grid=(2,) with dimension_semantics=("parallel",)).

    # ---- vocab projection hoisted out of the recurrence: one big MXU pass in XLA ----
    # TODO(synk): nn.Dropout(p=0.5) is train-time stochastic; identity here (eval mode).
    preds = jnp.einsum('tbh,hv->tbv', h_all[:, :B, :H].astype(bf16),
                       params['w_lin'].T.astype(bf16),
                       preferred_element_type=jnp.float32) + params['b_lin']
    predictions = jnp.transpose(preds, (1, 0, 2))                       # (B, T_dec, V)

    # Shrinking-batch mask applied once in the epilogue (lengths sorted descending).
    mask = jnp.asarray(
        np.asarray(decode_lengths, np.float32)[:, None] > np.arange(T_dec)[None, :],
        jnp.float32)                                                    # (B, T_dec)
    predictions = predictions * mask[:, :, None]

    alphas_t = jnp.transpose(alpha_pad, (1, 0, 2))[:B, :, :P] * mask[:, :, None]
    alphas = jnp.zeros((B, max_len, P), jnp.float32).at[:, :T_dec, :].set(alphas_t)

    captions_sorted = captions[jnp.asarray(sort_ind)]
    return predictions, captions_sorted, alphas, jnp.asarray(sort_ind), decode_lengths


# ----------------------------- pure-numpy reference -----------------------------
def _sig(x):
    return 1.0 / (1.0 + np.exp(-x))


def reference_forward(params, features, captions, lengths, encoder_size):
    p = {k: np.asarray(v) for k, v in params.items()}
    features = np.asarray(features)
    captions = np.asarray(captions)
    B = features.shape[0]
    feats = features.reshape(B, -1, encoder_size)
    P = feats.shape[1]
    V = p['embed'].shape[0]
    H = p['w_init_h'].shape[0]
    lengths_np = np.asarray(lengths, np.float32)
    sort_ind = np.argsort(-lengths_np, kind='stable')
    caption_lengths = lengths_np[sort_ind]
    decode_lengths = (caption_lengths - 1.0).tolist()
    T_dec = int(max(decode_lengths))
    max_len = int(max(lengths_np))
    feats = feats[sort_ind]
    embeddings = p['embed'][captions]
    mean_f = feats.mean(axis=1)
    h = mean_f @ p['w_init_h'].T + p['b_init_h']
    c = mean_f @ p['w_init_c'].T + p['b_init_c']
    predictions = np.zeros((B, T_dec, V), np.float32)
    alphas = np.zeros((B, max_len, P), np.float32)
    for t in range(T_dec):
        bt = int(sum(l > t for l in decode_lengths))
        f_t, h_t, c_t = feats[:bt], h[:bt], c[:bt]
        att1 = f_t @ p['w_enc'].T + p['b_enc']
        att2 = h_t @ p['w_dec'].T + p['b_dec']
        att = np.maximum(att1 + att2[:, None, :], 0.0)
        sc = att @ p['w_full'][0] + p['b_full'][0]
        sc = sc - sc.max(axis=1, keepdims=True)
        al = np.exp(sc)
        al = al / al.sum(axis=1, keepdims=True)
        awe = (f_t * al[:, :, None]).sum(axis=1)
        gate = _sig(h_t @ p['w_fbeta'].T + p['b_fbeta'])
        awe = gate * awe
        x = np.concatenate([embeddings[:bt, t, :], awe], axis=1)
        gates = x @ p['w_ih'].T + p['b_ih'] + h_t @ p['w_hh'].T + p['b_hh']
        i_g = _sig(gates[:, 0 * H:1 * H])
        f_g = _sig(gates[:, 1 * H:2 * H])
        g_g = np.tanh(gates[:, 2 * H:3 * H])
        o_g = _sig(gates[:, 3 * H:4 * H])
        c = f_g * c_t + i_g * g_g
        h = o_g * np.tanh(c)
        preds = h @ p['w_lin'].T + p['b_lin']
        predictions[:bt, t, :] = preds
        alphas[:bt, t, :] = al
    return predictions, alphas


if __name__ == "__main__":
    B, Hs, Ws = 4, 4, 4        # batch, feature-map spatial dims -> P = 16 pixels
    E = 64                     # encoder_size
    M = 32                     # embed_size
    H = 32                     # hidden_size
    A = 16                     # attention_size
    V = 40                     # vocab_size
    T = 8                      # (padded) caption length

    key = jax.random.PRNGKey(0)
    kp, kf, kc = jax.random.split(key, 3)
    params = init_params(kp, V, M, H, E, A)
    features = jax.random.normal(kf, (B, Hs, Ws, E), jnp.float32)
    captions = jax.random.randint(kc, (B, T), 0, V, dtype=jnp.int32)
    lengths = [8, 5, 6, 3]

    preds, caps_sorted, alphas, sort_ind, dec_lens = decoder_forward(
        params, features, captions, lengths, encoder_size=E)
    preds = jax.block_until_ready(preds)
    alphas = jax.block_until_ready(alphas)

    ref_preds, ref_alphas = reference_forward(params, features, captions, lengths, E)
    # bf16 MXU operands (f32 accumulation/state) -> slightly looser tolerances than f32.
    assert np.allclose(np.asarray(preds), ref_preds, atol=3e-2, rtol=3e-2), "predictions mismatch"
    assert np.allclose(np.asarray(alphas), ref_alphas, atol=3e-2, rtol=3e-2), "alphas mismatch"
    print("KERNEL_OK")
</pallas_src>

<mosaic_0001>
module attributes {stable_mosaic.version = 11 : i64} {
  func.func @_decoder_kernel(%arg0: memref<8x128x128xbf16, #tpu.memory_space<vmem>>, %arg1: memref<8x128x128xf32, #tpu.memory_space<vmem>>, %arg2: memref<8x128xf32, #tpu.memory_space<vmem>>, %arg3: memref<8x128xf32, #tpu.memory_space<vmem>>, %arg4: memref<1x128xf32, #tpu.memory_space<vmem>>, %arg5: memref<128x768xbf16, #tpu.memory_space<vmem>>, %arg6: memref<1x768xf32, #tpu.memory_space<vmem>>, %arg7: memref<128x512xbf16, #tpu.memory_space<vmem>>, %arg8: memref<7x8x512xf32, #tpu.memory_space<any>>, %arg9: memref<7x8x128xf32, #tpu.memory_space<vmem>>, %arg10: memref<7x8x128xf32, #tpu.memory_space<vmem>>, %arg11: memref<8x128xf32, #tpu.memory_space<vmem>>, %arg12: memref<8x128xf32, #tpu.memory_space<vmem>>, %arg13: memref<2x8x512xf32, #tpu.memory_space<vmem>>, %arg14: memref<2x!tpu.dma_semaphore, #tpu.memory_space<semaphore_mem>>) attributes {dimension_semantics = [], scalar_prefetch = 0 : i64, scratch_operands = 4 : i64, tpu.core_type = #tpu.core_type<tc>} {
    %c0 = arith.constant 0 : index
    %c0_0 = arith.constant 0 : index
    %0 = vector.load %arg2[%c0, %c0_0] : memref<8x128xf32, #tpu.memory_space<vmem>>, vector<8x128xf32>
    %c0_1 = arith.constant 0 : index
    %c0_2 = arith.constant 0 : index
    %1 = vector.load %arg11[%c0_1, %c0_2] : memref<8x128xf32, #tpu.memory_space<vmem>>, vector<8x128xf32>
    tpu.vector_store %arg11[%c0_1, %c0_2], %0 {strides = array<i32>} : memref<8x128xf32, #tpu.memory_space<vmem>>, vector<8x128xf32>,
    %c0_3 = arith.constant 0 : index
    %c0_4 = arith.constant 0 : index
    %2 = vector.load %arg3[%c0_3, %c0_4] : memref<8x128xf32, #tpu.memory_space<vmem>>, vector<8x128xf32>
    %c0_5 = arith.constant 0 : index
    %c0_6 = arith.constant 0 : index
    %3 = vector.load %arg12[%c0_5, %c0_6] : memref<8x128xf32, #tpu.memory_space<vmem>>, vector<8x128xf32>
    tpu.vector_store %arg12[%c0_5, %c0_6], %2 {strides = array<i32>} : memref<8x128xf32, #tpu.memory_space<vmem>>, vector<8x128xf32>,
    %4 = tpu.iota {dimensions = array<i32: 1>} : vector<8x128xi32>
    %c16_i32 = arith.constant 16 : i32
    %5 = vector.broadcast %c16_i32 : i32 to vector<8x128xi32>
    %6 = arith.cmpi slt, %4, %5 : vector<8x128xi32>
    %cst = arith.constant 0.000000e+00 : f32
    %cst_7 = arith.constant -1.000000e+30 : f32
    %7 = vector.broadcast %cst : f32 to vector<8x128xf32>
    %8 = vector.broadcast %cst_7 : f32 to vector<8x128xf32>
    %9 = arith.select %6, %7, %8 : vector<8x128xi1>, vector<8x128xf32>
    %c0_8 = arith.constant 0 : index
    %c0_9 = arith.constant 0 : index
    %10 = vector.load %arg4[%c0_8, %c0_9] : memref<1x128xf32, #tpu.memory_space<vmem>>, vector<1x128xf32>
    %c0_i32 = arith.constant 0 : i32
    %c0_i32_10 = arith.constant 0 : i32
    %c0_i32_11 = arith.constant 0 : i32
    %c0_i32_12 = arith.constant 0 : i32
    %c0_i32_13 = arith.constant 0 : i32
    %11 = tpu.memref_slice %arg8[%c0_i32, %c0_i32_12, %c0_i32_13] : memref<7x8x512xf32, #tpu.memory_space<any>> -> memref<1x8x512xf32, #tpu.memory_space<any>>
    %12 = tpu.memref_squeeze %11 : memref<1x8x512xf32, #tpu.memory_space<any>> -> memref<8x512xf32, #tpu.memory_space<any>>
    %c0_i32_14 = arith.constant 0 : i32
    %c0_i32_15 = arith.constant 0 : i32
    %13 = tpu.memref_slice %arg13[%c0_i32_10, %c0_i32_14, %c0_i32_15] : memref<2x8x512xf32, #tpu.memory_space<vmem>> -> memref<1x8x512xf32, #tpu.memory_space<vmem>>
    %14 = tpu.memref_squeeze %13 : memref<1x8x512xf32, #tpu.memory_space<vmem>> -> memref<8x512xf32, #tpu.memory_space<vmem>>
    %15 = tpu.memref_slice %arg14[%c0_i32_11] : memref<2x!tpu.dma_semaphore, #tpu.memory_space<semaphore_mem>> -> memref<1x!tpu.dma_semaphore, #tpu.memory_space<semaphore_mem>>
    %16 = tpu.memref_squeeze %15 : memref<1x!tpu.dma_semaphore, #tpu.memory_space<semaphore_mem>> -> memref<!tpu.dma_semaphore, #tpu.memory_space<semaphore_mem>>
    tpu.enqueue_dma source(%12 : memref<8x512xf32, #tpu.memory_space<any>>) target(%14 : memref<8x512xf32, #tpu.memory_space<vmem>>) target_semaphore(%16 : memref<!tpu.dma_semaphore, #tpu.memory_space<semaphore_mem>>)
    %c0_i32_16 = arith.constant 0 : i32
    %c7_i32 = arith.constant 7 : i32
    %17 = arith.addi %c0_i32_16, %c7_i32 : i32
    %c1_i32 = arith.constant 1 : i32
    scf.for %arg15 = %c0_i32_16 to %17 step %c1_i32  : i32 {
      %c1_i32_18 = arith.constant 1 : i32
      %18 = arith.muli %arg15, %c1_i32_18 : i32
      %c0_i32_19 = arith.constant 0 : i32
      %19 = arith.addi %c0_i32_19, %18 : i32
      %c2_i32 = arith.constant 2 : i32
      %c0_i32_20 = arith.constant 0 : i32
      %20 = arith.cmpi eq, %c2_i32, %c0_i32_20 : i32
      %c1_i32_21 = arith.constant 1 : i32
      %21 = arith.select %20, %c1_i32_21, %c2_i32 : i32
      %22 = arith.remsi %19, %21 : i32
      %c0_i32_22 = arith.constant 0 : i32
      %23 = arith.cmpi ne, %22, %c0_i32_22 : i32
      %c0_i32_23 = arith.constant 0 : i32
      %24 = arith.cmpi slt, %22, %c0_i32_23 : i32
      %c0_i32_24 = arith.constant 0 : i32
      %25 = arith.cmpi slt, %21, %c0_i32_24 : i32
      %26 = arith.xori %24, %25 : i1
      %27 = arith.andi %26, %23 : i1
      %28 = arith.addi %22, %21 : i32
      %29 = arith.select %27, %28, %22 : i32
      %c0_i32_25 = arith.constant 0 : i32
      %c0_i32_26 = arith.constant 0 : i32
      %c0_i32_27 = arith.constant 0 : i32
      %30 = tpu.memref_slice %arg8[%c0_i32_25, %c0_i32_26, %c0_i32_27] : memref<7x8x512xf32, #tpu.memory_space<any>> -> memref<1x8x512xf32, #tpu.memory_space<any>>
      %31 = tpu.memref_squeeze %30 : memref<1x8x512xf32, #tpu.memory_space<any>> -> memref<8x512xf32, #tpu.memory_space<any>>
      %c0_i32_28 = arith.constant 0 : i32
      %c0_i32_29 = arith.constant 0 : i32
      %32 = tpu.memref_slice %arg13[%29, %c0_i32_28, %c0_i32_29] : memref<2x8x512xf32, #tpu.memory_space<vmem>> -> memref<1x8x512xf32, #tpu.memory_space<vmem>>
      %33 = tpu.memref_squeeze %32 : memref<1x8x512xf32, #tpu.memory_space<vmem>> -> memref<8x512xf32, #tpu.memory_space<vmem>>
      %34 = tpu.memref_slice %arg14[%29] : memref<2x!tpu.dma_semaphore, #tpu.memory_space<semaphore_mem>> -> memref<1x!tpu.dma_semaphore, #tpu.memory_space<semaphore_mem>>
      %35 = tpu.memref_squeeze %34 : memref<1x!tpu.dma_semaphore, #tpu.memory_space<semaphore_mem>> -> memref<!tpu.dma_semaphore, #tpu.memory_space<semaphore_mem>>
      tpu.wait_dma2 semaphore(%35 : memref<!tpu.dma_semaphore, #tpu.memory_space<semaphore_mem>>) src(%31 : memref<8x512xf32, #tpu.memory_space<any>>) dst(%33 : memref<8x512xf32, #tpu.memory_space<vmem>>)
      %c1_i32_30 = arith.constant 1 : i32
      %36 = arith.addi %19, %c1_i32_30 : i32
      %c7_i32_31 = arith.constant 7 : i32
      %37 = arith.cmpi slt, %36, %c7_i32_31 : i32
      %38 = arith.extui %37 : i1 to i32
      %c0_i32_32 = arith.constant 0 : i32
      %39 = arith.cmpi ne, %38, %c0_i32_32 : i32
      scf.if %39 {
        %c1_i32_70 = arith.constant 1 : i32
        %126 = arith.addi %19, %c1_i32_70 : i32
        %c1_i32_71 = arith.constant 1 : i32
        %127 = arith.subi %c1_i32_71, %29 : i32
        %c1_i32_72 = arith.constant 1 : i32
        %128 = arith.subi %c1_i32_72, %29 : i32
        %c0_i32_73 = arith.constant 0 : i32
        %c0_i32_74 = arith.constant 0 : i32
        %129 = tpu.memref_slice %arg8[%126, %c0_i32_73, %c0_i32_74] : memref<7x8x512xf32, #tpu.memory_space<any>> -> memref<1x8x512xf32, #tpu.memory_space<any>>
        %130 = tpu.memref_squeeze %129 : memref<1x8x512xf32, #tpu.memory_space<any>> -> memref<8x512xf32, #tpu.memory_space<any>>
        %c0_i32_75 = arith.constant 0 : i32
        %c0_i32_76 = arith.constant 0 : i32
        %131 = tpu.memref_slice %arg13[%127, %c0_i32_75, %c0_i32_76] : memref<2x8x512xf32, #tpu.memory_space<vmem>> -> memref<1x8x512xf32, #tpu.memory_space<vmem>>
        %132 = tpu.memref_squeeze %131 : memref<1x8x512xf32, #tpu.memory_space<vmem>> -> memref<8x512xf32, #tpu.memory_space<vmem>>
        %133 = tpu.memref_slice %arg14[%128] : memref<2x!tpu.dma_semaphore, #tpu.memory_space<semaphore_mem>> -> memref<1x!tpu.dma_semaphore, #tpu.memory_space<semaphore_mem>>
        %134 = tpu.memref_squeeze %133 : memref<1x!tpu.dma_semaphore, #tpu.memory_space<semaphore_mem>> -> memref<!tpu.dma_semaphore, #tpu.memory_space<semaphore_mem>>
        tpu.enqueue_dma source(%130 : memref<8x512xf32, #tpu.memory_space<any>>) target(%132 : memref<8x512xf32, #tpu.memory_space<vmem>>) target_semaphore(%134 : memref<!tpu.dma_semaphore, #tpu.memory_space<semaphore_mem>>)
      } else {
      }
      %c0_33 = arith.constant 0 : index
      %c0_34 = arith.constant 0 : index
      %40 = vector.load %arg11[%c0_33, %c0_34] : memref<8x128xf32, #tpu.memory_space<vmem>>, vector<8x128xf32>
      %c0_35 = arith.constant 0 : index
      %c0_36 = arith.constant 0 : index
      %41 = vector.load %arg12[%c0_35, %c0_36] : memref<8x128xf32, #tpu.memory_space<vmem>>, vector<8x128xf32>
      %42 = arith.truncf %40 : vector<8x128xf32> to vector<8x128xbf16>
      %c0_37 = arith.constant 0 : index
      %c0_38 = arith.constant 0 : index
      %43 = vector.load %arg5[%c0_37, %c0_38] : memref<128x768xbf16, #tpu.memory_space<vmem>>, vector<128x768xbf16>
      %cst_39 = arith.constant dense<0.000000e+00> : vector<8x768xf32>
      %44 = tpu.matmul %42, %43, %cst_39 {dimension_numbers = #tpu.dot_dimension_numbers<[1], [0], [0], [1], [0, 0, 1, 1], [], []>} : vector<8x128xbf16>, vector<128x768xbf16>, vector<8x768xf32> -> vector<8x768xf32>
      %c0_40 = arith.constant 0 : index
      %c0_41 = arith.constant 0 : index
      %45 = vector.load %arg6[%c0_40, %c0_41] : memref<1x768xf32, #tpu.memory_space<vmem>>, vector<1x768xf32>
      %46 = vector.broadcast %45 : vector<1x768xf32> to vector<8x768xf32>
      %47 = arith.addf %44, %46 : vector<8x768xf32>
      %48 = vector.extract_strided_slice %47 {offsets = [0, 0], sizes = [8, 128], strides = [1, 1]} : vector<8x768xf32> to vector<8x128xf32>
      %49 = vector.extract_strided_slice %47 {offsets = [0, 128], sizes = [8, 128], strides = [1, 1]} : vector<8x768xf32> to vector<8x128xf32>
      %50 = arith.negf %49 : vector<8x128xf32>
      %51 = math.exp %50 : vector<8x128xf32>
      %cst_42 = arith.constant 1.000000e+00 : f32
      %52 = vector.broadcast %cst_42 : f32 to vector<8x128xf32>
      %53 = arith.addf %52, %51 : vector<8x128xf32>
      %54 = arith.divf %52, %53 : vector<8x128xf32>
      %55 = vector.extract_strided_slice %47 {offsets = [0, 256], sizes = [8, 512], strides = [1, 1]} : vector<8x768xf32> to vector<8x512xf32>
      %c0_43 = arith.constant 0 : index
      %c0_44 = arith.constant 0 : index
      %c0_45 = arith.constant 0 : index
      %56 = vector.load %arg1[%c0_43, %c0_44, %c0_45] : memref<8x128x128xf32, #tpu.memory_space<vmem>>, vector<8x128x128xf32>
      %57 = vector.shape_cast %48 : vector<8x128xf32> to vector<8x1x128xf32>
      %58 = vector.broadcast %57 : vector<8x1x128xf32> to vector<8x128x128xf32>
      %59 = arith.addf %56, %58 : vector<8x128x128xf32>
      %cst_46 = arith.constant 0.000000e+00 : f32
      %60 = vector.broadcast %cst_46 : f32 to vector<8x128x128xf32>
      %61 = arith.maximumf %59, %60 : vector<8x128x128xf32>
      %62 = vector.shape_cast %10 : vector<1x128xf32> to vector<1x1x128xf32>
      %63 = vector.broadcast %62 : vector<1x1x128xf32> to vector<8x128x128xf32>
      %64 = arith.mulf %61, %63 : vector<8x128x128xf32>
      %cst_47 = arith.constant dense<0.000000e+00> : vector<8x128xf32>
      %65 = vector.multi_reduction <add>, %64, %cst_47 [2] : vector<8x128x128xf32> to vector<8x128xf32>
      %66 = arith.addf %65, %9 : vector<8x128xf32>
      %cst_48 = arith.constant dense<0xFF800000> : vector<8xf32>
      %67 = vector.multi_reduction <maximumf>, %66, %cst_48 [1] : vector<8x128xf32> to vector<8xf32>
      %68 = vector.shape_cast %67 : vector<8xf32> to vector<8x1xf32>
      %69 = vector.broadcast %68 : vector<8x1xf32> to vector<8x128xf32>
      %70 = arith.subf %66, %69 : vector<8x128xf32>
      %71 = math.exp %70 : vector<8x128xf32>
      %cst_49 = arith.constant dense<0.000000e+00> : vector<8xf32>
      %72 = vector.multi_reduction <add>, %71, %cst_49 [1] : vector<8x128xf32> to vector<8xf32>
      %73 = vector.shape_cast %72 : vector<8xf32> to vector<8x1xf32>
      %74 = tpu.reciprocal %73 {approx = true} : vector<8x1xf32> -> vector<8x1xf32>
      %75 = vector.broadcast %74 : vector<8x1xf32> to vector<8x128xf32>
      %76 = arith.mulf %71, %75 : vector<8x128xf32>
      %77 = vector.shape_cast %76 : vector<8x128xf32> to vector<8x1x128xf32>
      %78 = arith.truncf %77 : vector<8x1x128xf32> to vector<8x1x128xbf16>
      %c0_50 = arith.constant 0 : index
      %c0_51 = arith.constant 0 : index
      %c0_52 = arith.constant 0 : index
      %79 = vector.load %arg0[%c0_50, %c0_51, %c0_52] : memref<8x128x128xbf16, #tpu.memory_space<vmem>>, vector<8x128x128xbf16>
      "tpu.trace_start"() <{level = 10 : i32, message = "bqp,bpe->bqe"}> : () -> ()
      %cst_53 = arith.constant dense<0.000000e+00> : vector<8x1x128xf32>
      %80 = tpu.matmul %78, %79, %cst_53 {dimension_numbers = #tpu.dot_dimension_numbers<[2], [1], [1], [2], [0, 0, 0, 1, 1, 2], [0], [0]>} : vector<8x1x128xbf16>, vector<8x128x128xbf16>, vector<8x1x128xf32> -> vector<8x1x128xf32>
      "tpu.trace_stop"() : () -> ()
      %81 = vector.shape_cast %80 : vector<8x1x128xf32> to vector<8x128xf32>
      %82 = arith.mulf %54, %81 : vector<8x128xf32>
      %83 = arith.index_cast %29 : i32 to index
      %c0_54 = arith.constant 0 : index
      %c0_55 = arith.constant 0 : index
      %84 = vector.load %arg13[%83, %c0_54, %c0_55] : memref<2x8x512xf32, #tpu.memory_space<vmem>>, vector<1x8x512xf32>
      %85 = vector.shape_cast %84 : vector<1x8x512xf32> to vector<8x512xf32>
      %86 = arith.addf %55, %85 : vector<8x512xf32>
      %87 = arith.truncf %82 : vector<8x128xf32> to vector<8x128xbf16>
      %c0_56 = arith.constant 0 : index
      %c0_57 = arith.constant 0 : index
      %88 = vector.load %arg7[%c0_56, %c0_57] : memref<128x512xbf16, #tpu.memory_space<vmem>>, vector<128x512xbf16>
      %cst_58 = arith.constant dense<0.000000e+00> : vector<8x512xf32>
      %89 = tpu.matmul %87, %88, %cst_58 {dimension_numbers = #tpu.dot_dimension_numbers<[1], [0], [0], [1], [0, 0, 1, 1], [], []>} : vector<8x128xbf16>, vector<128x512xbf16>, vector<8x512xf32> -> vector<8x512xf32>
      %90 = arith.addf %86, %89 : vector<8x512xf32>
      %91 = vector.extract_strided_slice %90 {offsets = [0, 0], sizes = [8, 128], strides = [1, 1]} : vector<8x512xf32> to vector<8x128xf32>
      %92 = arith.negf %91 : vector<8x128xf32>
      %93 = math.exp %92 : vector<8x128xf32>
      %cst_59 = arith.constant 1.000000e+00 : f32
      %94 = vector.broadcast %cst_59 : f32 to vector<8x128xf32>
      %95 = arith.addf %94, %93 : vector<8x128xf32>
      %96 = arith.divf %94, %95 : vector<8x128xf32>
      %97 = vector.extract_strided_slice %90 {offsets = [0, 128], sizes = [8, 128], strides = [1, 1]} : vector<8x512xf32> to vector<8x128xf32>
      %98 = arith.negf %97 : vector<8x128xf32>
      %99 = math.exp %98 : vector<8x128xf32>
      %cst_60 = arith.constant 1.000000e+00 : f32
      %100 = vector.broadcast %cst_60 : f32 to vector<8x128xf32>
      %101 = arith.addf %100, %99 : vector<8x128xf32>
      %102 = arith.divf %100, %101 : vector<8x128xf32>
      %103 = vector.extract_strided_slice %90 {offsets = [0, 256], sizes = [8, 128], strides = [1, 1]} : vector<8x512xf32> to vector<8x128xf32>
      %104 = math.tanh %103 : vector<8x128xf32>
      %105 = vector.extract_strided_slice %90 {offsets = [0, 384], sizes = [8, 128], strides = [1, 1]} : vector<8x512xf32> to vector<8x128xf32>
      %106 = arith.negf %105 : vector<8x128xf32>
      %107 = math.exp %106 : vector<8x128xf32>
      %cst_61 = arith.constant 1.000000e+00 : f32
      %108 = vector.broadcast %cst_61 : f32 to vector<8x128xf32>
      %109 = arith.addf %108, %107 : vector<8x128xf32>
      %110 = arith.divf %108, %109 : vector<8x128xf32>
      %111 = arith.mulf %102, %41 : vector<8x128xf32>
      %112 = arith.mulf %96, %104 : vector<8x128xf32>
      %113 = arith.addf %111, %112 : vector<8x128xf32>
      %114 = math.tanh %113 : vector<8x128xf32>
      %115 = arith.mulf %110, %114 : vector<8x128xf32>
      %c0_62 = arith.constant 0 : index
      %c0_63 = arith.constant 0 : index
      %116 = vector.load %arg11[%c0_62, %c0_63] : memref<8x128xf32, #tpu.memory_space<vmem>>, vector<8x128xf32>
      tpu.vector_store %arg11[%c0_62, %c0_63], %115 {strides = array<i32>} : memref<8x128xf32, #tpu.memory_space<vmem>>, vector<8x128xf32>,
      %c0_64 = arith.constant 0 : index
      %c0_65 = arith.constant 0 : index
      %117 = vector.load %arg12[%c0_64, %c0_65] : memref<8x128xf32, #tpu.memory_space<vmem>>, vector<8x128xf32>
      tpu.vector_store %arg12[%c0_64, %c0_65], %113 {strides = array<i32>} : memref<8x128xf32, #tpu.memory_space<vmem>>, vector<8x128xf32>,
      %118 = arith.index_cast %19 : i32 to index
      %c0_66 = arith.constant 0 : index
      %c0_67 = arith.constant 0 : index
      %119 = vector.load %arg9[%118, %c0_66, %c0_67] : memref<7x8x128xf32, #tpu.memory_space<vmem>>, vector<1x8x128xf32>
      %120 = vector.shape_cast %119 : vector<1x8x128xf32> to vector<8x128xf32>
      %121 = vector.shape_cast %115 : vector<8x128xf32> to vector<1x8x128xf32>
      tpu.vector_store %arg9[%118, %c0_66, %c0_67], %121 {strides = array<i32>} : memref<7x8x128xf32, #tpu.memory_space<vmem>>, vector<1x8x128xf32>,
      %122 = arith.index_cast %19 : i32 to index
      %c0_68 = arith.constant 0 : index
      %c0_69 = arith.constant 0 : index
      %123 = vector.load %arg10[%122, %c0_68, %c0_69] : memref<7x8x128xf32, #tpu.memory_space<vmem>>, vector<1x8x128xf32>
      %124 = vector.shape_cast %123 : vector<1x8x128xf32> to vector<8x128xf32>
      %125 = vector.shape_cast %76 : vector<8x128xf32> to vector<1x8x128xf32>
      tpu.vector_store %arg10[%122, %c0_68, %c0_69], %125 {strides = array<i32>} : memref<7x8x128xf32, #tpu.memory_space<vmem>>, vector<1x8x128xf32>,
    }
    %c7_i32_17 = arith.constant 7 : i32
    return
  }
}

</mosaic_0001>

<bundles_post_ra>
// kernel: tpu_custom_call.1
= control target key start
LH: loop header
LB: loop body
LE: loop exit
PB: predicated region body
PF: predicated region fallthrough
CT: control target
= control target key end

     0   :  { %16 = vsyncpa [#allocation7], 0  ;;  %s15041_s0 = inlined_call_operand.hbm [shape: bf16[8,128,128], index: 0, kind: input, shape index: {}]   ;;  %s15042_s1 = inlined_call_operand.hbm [shape: f32[8,128,128], index: 1, kind: input, shape index: {}]   ;;  %s15043_s2 = inlined_call_operand.hbm [shape: f32[8,128], index: 2, kind: input, shape index: {}]   ;;  %s15044_s3 = inlined_call_operand.vmem [shape: f32[8,128], index: 3, kind: input, shape index: {}]   ;;  %s15045_s4 = inlined_call_operand.vmem [shape: f32[1,128], index: 4, kind: input, shape index: {}]   ;;  %s15046_s5 = inlined_call_operand.hbm [shape: bf16[128,768], index: 5, kind: input, shape index: {}]   ;;  %s15047_s6 = inlined_call_operand.vmem [shape: f32[1,768], index: 6, kind: input, shape index: {}]   ;;  %s15048_s7 = inlined_call_operand.hbm [shape: bf16[128,512], index: 7, kind: input, shape index: {}]   ;;  %s15049_s8 = inlined_call_operand.hbm [shape: f32[7,8,512], index: 8, kind: input, shape index: {}]   ;;  %s15050_s9 = inlined_call_operand.hbm [shape: f32[7,8,128], index: 9, kind: output, shape index: {0}]   ;;  %s15051_s10 = inlined_call_operand.hbm [shape: f32[7,8,128], index: 10, kind: output, shape index: {1}]  }
   0x1   :  { %17 = vsyncpa [#allocation10], 0 }
   0x2   :  { %18 = vsyncpa [#allocation13], 0 }
   0x3   :  { %19 = vsyncpa [#allocation8], 0 }
   0x4   :  { %20 = vsyncpa [#allocation17], 0  ;;  %s9448_s13 = smov [#allocation9]   ;;  %s9223_s17 = scalar_lea.hbm %s15042_s1, 16384 }
   0x5   :  { %s38_s14 = sshll.u32 %s9448_s13, 4  ;;  %p9224_p0 = scmp.ne.s32.totalorder %s15042_s1, %s9223_s17  ;;  %s39_s14 = int_to_ptr.vmem [resolvable:$true] %s38_s14 }
   0x6   :  { %p9227_p1 = scmp.lt.u32.totalorder %s9223_s17, %s15042_s1 }
   0x8   :  { %p9229_p2 = pnand %p9227_p1, %p9224_p0 }
   0xa   :  { %9232 = shalt.err (!%p9229_p2)
}
   0xb   :  { %s9233_s22 = scalar_lea.vmem %s39_s14, 16384  ;;  %p9238_p4 = scmp.lt.s32.totalorder %s39_s14, %s39_s14 }
   0xc   :  { %p9234_p3 = scmp.ne.s32.totalorder %s39_s14, %s9233_s22  ;;  %p9239_p5 = scmp.lt.s32.totalorder %s9233_s22, %s9233_s22 }
   0xe   :  { %p9240_p6 = por %p9239_p5, %p9238_p4 }
  0x10   :  { %p9241_p7 = pnand %p9240_p6, %p9234_p3 }
  0x12   :  { %9244 = shalt.err (!%p9241_p7)
}
  0x13   :  { %s9449_s23 = smov 128   ;;  %s9450_s24 = smov 8  }
  0x14   :  { %44 = dma.hbm_to_vmem [thread:$0]  %s15042_s1, 16384, %s39_s14, [#allocation10], %s9449_s23, %s9449_s23, %s9450_s24  }
  0x15   :  { %s9451_s27 = smov [#allocation12]   ;;  %s9245_s11 = scalar_lea.hbm %s15046_s5, 6144 }
  0x16   :  { %s64_s28 = sshll.u32 %s9451_s27, 4  ;;  %p9246_p8 = scmp.ne.s32.totalorder %s15046_s5, %s9245_s11  ;;  %s65_s28 = int_to_ptr.vmem [resolvable:$true] %s64_s28 }
  0x17   :  { %p9249_p9 = scmp.lt.u32.totalorder %s9245_s11, %s15046_s5 }
  0x19   :  { %p9251_p10 = pnand %p9249_p9, %p9246_p8 }
  0x1b   :  { %9254 = shalt.err (!%p9251_p10)
}
  0x1c   :  { %s9255_s17 = scalar_lea.vmem %s65_s28, 6144  ;;  %p9260_p12 = scmp.lt.s32.totalorder %s65_s28, %s65_s28 }
  0x1d   :  { %p9256_p11 = scmp.ne.s32.totalorder %s65_s28, %s9255_s17  ;;  %p9261_p13 = scmp.lt.s32.totalorder %s9255_s17, %s9255_s17 }
  0x1f   :  { %p9262_p0 = por %p9261_p13, %p9260_p12 }
  0x21   :  { %p9263_p1 = pnand %p9262_p0, %p9256_p11 }
  0x23   :  { %9266 = shalt.err (!%p9263_p1)
}
  0x24   :  { %s9452_s1 = smov 384   ;;  %s9453_s14 = smov 24  }
  0x25   :  { %70 = dma.hbm_to_vmem [thread:$0]  %s15046_s5, 6144, %s65_s28, [#allocation13], %s9452_s1, %s9452_s1, %s9453_s14  }
  0x26   :  { %s9454_s20 = smov [#allocation6]   ;;  %s9267_s26 = scalar_lea.hbm %s15041_s0, 8192 }
  0x27   :  { %s26_s21 = sshll.u32 %s9454_s20, 4  ;;  %p9268_p2 = scmp.ne.s32.totalorder %s15041_s0, %s9267_s26  ;;  %s27_s21 = int_to_ptr.vmem [resolvable:$true] %s26_s21 }
  0x28   :  { %p9271_p3 = scmp.lt.u32.totalorder %s9267_s26, %s15041_s0 }
  0x2a   :  { %p9273_p4 = pnand %p9271_p3, %p9268_p2 }
  0x2c   :  { %9276 = shalt.err (!%p9273_p4)
}
  0x2d   :  { %s9277_s12 = scalar_lea.vmem %s27_s21, 8192  ;;  %p9282_p6 = scmp.lt.s32.totalorder %s27_s21, %s27_s21 }
  0x2e   :  { %p9278_p5 = scmp.ne.s32.totalorder %s27_s21, %s9277_s12  ;;  %p9283_p7 = scmp.lt.s32.totalorder %s9277_s12, %s9277_s12 }
  0x30   :  { %p9284_p8 = por %p9283_p7, %p9282_p6 }
  0x32   :  { %p9285_p9 = pnand %p9284_p8, %p9278_p5 }
  0x34   :  { %9288 = shalt.err (!%p9285_p9)
}
  0x35   :  { %s9455_s5 = smov 64   ;;  %s9456_s28 = smov 4  }
  0x36   :  { %32 = dma.hbm_to_vmem [thread:$0]  %s15041_s0, 8192, %s27_s21, [#allocation7], %s9455_s5, %s9455_s5, %s9456_s28  }
  0x37   :  { %s9457_s16 = smov [#allocation11]   ;;  %s9458_s1 = smov [#allocation14]  }
  0x38   :  { %s51_s17 = sshll.u32 %s9457_s16, 4  ;;  %s78_s14 = sshll.u32 %s9458_s1, 4  ;;  %s52_s17 = int_to_ptr.vmem [resolvable:$true] %s51_s17  ;;  %s79_s14 = int_to_ptr.vmem [resolvable:$true] %s78_s14 }
  0x39   :  { %s9289_s20 = scalar_lea.hbm %s15043_s2, 128 }
  0x3a   :  { %p9290_p10 = scmp.ne.s32.totalorder %s15043_s2, %s9289_s20  ;;  %p9293_p11 = scmp.lt.u32.totalorder %s9289_s20, %s15043_s2 }
  0x3c   :  { %p9295_p12 = pnand %p9293_p11, %p9290_p10 }
  0x3e   :  { %9298 = shalt.err (!%p9295_p12)
}
  0x3f   :  { %s9299_s0 = scalar_lea.vmem %s52_s17, 128  ;;  %p9304_p0 = scmp.lt.s32.totalorder %s52_s17, %s52_s17 }
  0x40   :  { %p9300_p13 = scmp.ne.s32.totalorder %s52_s17, %s9299_s0  ;;  %p9305_p1 = scmp.lt.s32.totalorder %s9299_s0, %s9299_s0 }
  0x42   :  { %p9306_p2 = por %p9305_p1, %p9304_p0 }
  0x44   :  { %p9307_p3 = pnand %p9306_p2, %p9300_p13 }
  0x46   :  { %9310 = shalt.err (!%p9307_p3)
}
  0x47   :  { %54 = dma.hbm_to_vmem [thread:$0]  %s15043_s2, 128, %s52_s17, [#allocation10]  }
  0x48   :  { %s9311_s12 = scalar_lea.hbm %s15048_s7, 4096 }
  0x49   :  { %p9312_p4 = scmp.ne.s32.totalorder %s15048_s7, %s9311_s12  ;;  %p9315_p5 = scmp.lt.u32.totalorder %s9311_s12, %s15048_s7 }
  0x4b   :  { %p9317_p6 = pnand %p9315_p5, %p9312_p4 }
  0x4d   :  { %9320 = shalt.err (!%p9317_p6)
}
  0x4e   :  { %s9321_s16 = scalar_lea.vmem %s79_s14, 4096  ;;  %p9326_p8 = scmp.lt.s32.totalorder %s79_s14, %s79_s14 }
  0x4f   :  { %p9322_p7 = scmp.ne.s32.totalorder %s79_s14, %s9321_s16  ;;  %p9327_p9 = scmp.lt.s32.totalorder %s9321_s16, %s9321_s16 }
  0x51   :  { %p9328_p10 = por %p9327_p9, %p9326_p8 }
  0x53   :  { %p9329_p11 = pnand %p9328_p10, %p9322_p7 }
  0x55   :  { %9332 = shalt.err (!%p9329_p11)
}
  0x56   :  { %s9459_s2 = smov 256   ;;  %s9460_s17 = smov 16  }
  0x57   :  { %84 = dma.hbm_to_vmem [thread:$0]  %s15048_s7, 4096, %s79_s14, [#allocation13], %s9459_s2, %s9459_s2, %s9460_s17  }
  0x58   :  { %9432 = dma.done.wait [#allocation7], 8192  }
  0x59   :  { %9433 = vsyncadd [#allocation7], 4294959104 }
  0x5a   :  { %9434 = dma.done.wait [#allocation10], 16512  }
  0x5b   :  { %9435 = vsyncadd [#allocation10], 4294950784 }
  0x5c   :  { %9436 = dma.done.wait [#allocation13], 10240  }
  0x5d   :  { %9437 = vsyncadd [#allocation13], 4294957056  ;;  %v15052_v0 = vlaneseq  ;;  %s9461_s19 = smov [#allocation4]   ;;  %s9333_s26 = scalar_lea.hbm %s15049_s8, 512 }
  0x5e   :  { %s117_s20 = sshll.u32 %s9461_s19, 4  ;;  %p9334_p12 = scmp.ne.s32.totalorder %s15049_s8, %s9333_s26  ;;  %s9590_s20 = int_to_ptr.vmem [resolvable:$true] %s117_s20 }
  0x5f   :  { %v9588_v1 = vand.u32 127, %v15052_v0  ;;  %s9335_s21 = scalar_lea.hbm %s15049_s8, 3584  ;;  %p9337_p0 = scmp.lt.u32.totalorder %s9333_s26, %s15049_s8 }
  0x60   :  { %p9336_p13 = scmp.lt.u32.totalorder %s9335_s21, %s9333_s26 }
  0x61   :  { %15482 = vst [vmem:[#allocation30_spill] sm:$0xff] %v9588_v1 }
  0x62   :  { %p9338_p1 = por %p9337_p0, %p9336_p13 }
  0x64   :  { %p9339_p2 = pnand %p9338_p1, %p9334_p12 }
  0x66   :  { %9342 = shalt.err (!%p9339_p2)  }
  0x67   :  { %s9343_s5 = scalar_lea.vmem %s9590_s20, 512  ;;  %s9347_s28 = scalar_lea.vmem %s9590_s20, 1024 }
  0x68   :  { %p9344_p3 = scmp.ne.s32.totalorder %s9590_s20, %s9343_s5  ;;  %p9348_p4 = scmp.lt.s32.totalorder %s9590_s20, %s9590_s20 }
  0x69   :  { %p9349_p5 = scmp.lt.s32.totalorder %s9347_s28, %s9343_s5 }
  0x6b   :  { %p9350_p6 = por %p9349_p5, %p9348_p4 }
  0x6d   :  { %p9351_p7 = pnand %p9350_p6, %p9344_p3 }
  0x6f   :  { %9354 = shalt.err (!%p9351_p7)  }
  0x70   :  { %120 = dma.hbm_to_vmem [thread:$0]  %s15049_s8, 512, %s9590_s20, [#allocation5]  ;;  %vm107_vm0 = vcmp.lt.s32.totalorder %v9588_v1, 16  ;;  %v9462_v2 = vmov -1e+30   ;;  %v101_v5 = vld [vmem:[#allocation11] sm:$0xff] }
  0x71   :  { %v9620_v3 = vsel %vm107_vm0, 0.0, %v9462_v2  ;;  %v9625_v4 = vld [vmem:[%s15045_s4] ss:$0 sm:$0xff]  ;;  %102 = vst [vmem:[#allocation2] sm:$0xff] %v101_v5  ;;  %s9630_s18 = smov 0  }
  0x72   :  { %15483 = vst [vmem:[#allocation31_spill] sm:$0xff] %v9620_v3  ;;  %15484 = vst [vmem:[#allocation32_spill] sm:$0xff] %v9625_v4  ;;  %v103_v6 = vld [vmem:[%s15044_s3] sm:$0xff] }
  0x73   :  { %104 = vst [vmem:[#allocation3] sm:$0xff] %v103_v6 }
  0x74 LB: > { %p127_p8 = scmp.lt.s32.totalorder %s9446_s18, 0  ;;  %s128_s4 = ssub.s32 0, %s9446_s18  ;;  %s9446_s18 = sphi %s9630_s18, %s16765_s18  }
  0x75   : > { %s8315_s19 = smin.u32 %s9446_s18, %s128_s4 }
  0x76   : > { %s130_s22 = sand.u32 1, %s8315_s19  }
  0x77   : > { %s131_s25 = ssub.s32 0, %s130_s22 }
  0x78   : > { %s16768_s25 = smov (!%p127_p8, %s131_s25), %s130_s22 }
  0x79   : > { %v15485_v3 = vld [vmem:[#allocation31_spill] sm:$0xff]  ;;  %v15486_v4 = vld [vmem:[#allocation32_spill] sm:$0xff]  ;;  %p8317_p9 = scmp.lt.s32.totalorder %s16768_s25, 0  ;;  %s137_s3 = sadd.s32 2, %s16768_s25 }
  0x7b   : > { %s16770_s3 = smov (!%p8317_p9, %s137_s3), %s16768_s25 }
  0x7c   : > { %s8476_s26 = sshll.u32 %s16770_s3, 5  ;;  %s142_s7 = scalar_lea.sflag [#allocation5], %s16770_s3 }
  0x7d   : > { %s9641_s27 = scalar_lea.vmem [#allocation4], %s8476_s26 }
  0x7e   : > { %9438 = dma.done.wait %s142_s7, 512 }
  0x7f   : > { %9439 = vsyncadd %s142_s7, 4294966784  ;;  %1493 = vbcast.lane.b32.xlu1 %v15485_v3, 264  ;;  %1489 = vbcast.lane.b32.xlu0 %v15485_v3, 256  ;;  %v15053_v7 = vmov 0   ;;  %v8760_v8 = vld [vmem:[#allocation12 + $0x4] ss:$24 sps:$4 sm:$0xff]   ;;  %v15488_v0 = vlaneseq }
  0x80   : > { %526 = vmatprep.mubr.bf16.mxu0 %v15053_v7  ;;  %8759 = vset.pattern.permute.xlu1 %v15053_v7  ;;  %v8762_v9 = vld [vmem:[#allocation12] ss:$24 sps:$4 sm:$0xff]   ;;  %v8763_v10 = vld [vmem:[#allocation12 + $0x34] ss:$24 sps:$4 sm:$0xff]   ;;  %v8765_v11 = vld [vmem:[#allocation12 + $0x30] ss:$24 sps:$4 sm:$0xff]  }
  0x81   : > { %8758 = vset.pattern.permute.xlu0 %v15053_v7  ;;  %567 = vmatprep.mubr.bf16.mxu1 %v15053_v7  ;;  %v8766_v12 = vld [vmem:[#allocation12 + $0x64] ss:$24 sps:$4 sm:$0xff]   ;;  %v8768_v13 = vld [vmem:[#allocation12 + $0x60] ss:$24 sps:$4 sm:$0xff]   ;;  %v8769_v14 = vld [vmem:[#allocation12 + $0x94] ss:$24 sps:$4 sm:$0xff]  }
  0x82   : > { %494 = vmatprep.subr.bf16.mxu0 %v8760_v8  ;;  %v8771_v15 = vld [vmem:[#allocation12 + $0x90] ss:$24 sps:$4 sm:$0xff]   ;;  %v8772_v16 = vld [vmem:[#allocation12 + $0xc4] ss:$24 sps:$4 sm:$0xff]   ;;  %v8774_v17 = vld [vmem:[#allocation12 + $0xc0] ss:$24 sps:$4 sm:$0xff]  }
  0x83   : > { %1497 = vbcast.lane.b32.xlu1 %v15485_v3, 272  ;;  %495 = vmatpush1.bf16.msra.mxu0 %v8762_v9  ;;  %v8775_v18 = vld [vmem:[#allocation12 + $0xf4] ss:$24 sps:$4 sm:$0xff]   ;;  %v8777_v19 = vld [vmem:[#allocation12 + $0xf0] ss:$24 sps:$4 sm:$0xff]   ;;  %v9656_v26 = vshrl.u32 %v15488_v0, 7 }
  0x84   : > { %496 = vmatprep.subr.bf16.mxu0 %v8763_v10  ;;  %v8778_v20 = vld [vmem:[#allocation12 + $0x124] ss:$24 sps:$4 sm:$0xff]   ;;  %v8780_v21 = vld [vmem:[#allocation12 + $0x120] ss:$24 sps:$4 sm:$0xff]   ;;  %v8781_v22 = vld [vmem:[#allocation12 + $0x154] ss:$24 sps:$4 sm:$0xff]  }
  0x85   : > { %v8783_v23 = vld [vmem:[#allocation12 + $0x150] ss:$24 sps:$4 sm:$0xff]   ;;  %15489 = vst [vmem:[#allocation34_spill] sm:$0xff] %v9656_v26  ;;  %v9464_v27 = vmov 1966171168   ;;  %v9659_v29 = vsub.s32 0, %v9656_v26 }
  0x86   : > { %v171_v24 = vld [vmem:[#allocation2] sm:$0xff]  ;;  %v754_v28 = vunpack.c.l.s4 %v9464_v27  ;;  %v623_v46 = vld [vmem:[#allocation9] sm:$0xff]  ;;  %v626_v49 = vld [vmem:[#allocation9 + $0x18] sm:$0xff]  ;;  %vm2216_vm1 = vcmask 130112   ;;  %vm2223_vm2 = vcmask 195712   ;;  %vm2230_vm3 = vcmask 261312  }
  0x87   : > { %497 = vmatpush1.bf16.msra.mxu0 %v8765_v11  ;;  %v9651_v25 = vpack.c.bf16 %v171_v24, %v171_v24  ;;  %15490 = vst [vmem:[#allocation35_spill] sm:$0xff] %v9659_v29  ;;  %v222_v30 = vld [vmem:[%s15047_s6] sm:$0x3f]  ;;  %v624_v50 = vld [vmem:[#allocation9 + $0x8] sm:$0xff]  ;;  %v627_v54 = vld [vmem:[#allocation9 + $0x20] sm:$0xff]  ;;  %vm2237_vm4 = vcmask 326912  }
  0x88   : > { %498 = vmatprep.subr.bf16.mxu0 %v8766_v12  ;;  %v755_v31 = vunpack.c.0.s8 %v754_v28  ;;  %v227_v32 = vrot.slane %v222_v30, %v9659_v29  ;;  %v625_v45 = vld [vmem:[#allocation9 + $0x10] sm:$0xff]  ;;  %v628_v53 = vld [vmem:[#allocation9 + $0x28] sm:$0xff]  ;;  %v630_v5 = vld [vmem:[#allocation9 + $0x38] sm:$0xff]  ;;  %vm15357_vm5 = vcmask 392512   ;;  %vm15195_vm6 = vcmask 458112   ;;  %s14760_s29 = sadd.s32 1, %s9446_s18  }
  0x89   : > { %15487 = vst [vmem:[#allocation33_spill] sm:$0xff] %v9651_v25  ;;  %v629_v6 = vld [vmem:[#allocation9 + $0x30] sm:$0xff]  ;;  %v742_v1 = vld [vmem:[#allocation9 + $0x3b8] sm:$0xff]  ;;  %vm2258_vm7 = vcmask 523712   ;;  %vm2265_vm8 = vcmask 589312   ;;  %vm15199_vm9 = vcmask 654912  }
  0x8a   : > { %v9666_v33 = vsub.s32 %v755_v31, %v9656_v26  ;;  %vm15198_vm10 = vcmask 720512   ;;  %vm15196_vm11 = vcmask 786112   ;;  %vm2293_vm12 = vcmask 851712   ;;  %s152_s30 = ssub.s32 1, %s16770_s3  ;;  %p8728_p11 = scmp.lt.s32.totalorder %s14760_s29, 7 }
  0x8b   : > { %499 = vmatpush1.bf16.msra.mxu0 %v8768_v13  ;;  %vm2300_vm13 = vcmask 917312   ;;  %vm2307_vm14 = vcmask 982912   ;;  %vm2314_vm15 = vcmask 1048512   ;;  %vm15194_vm0 = vcmask 1041409   ;;  %s8321_s11 = sshll.u32 %s9446_s18, 9  ;;  %s8477_s12 = sshll.u32 %s152_s30, 5 }
  0x8c   : > { %500 = vmatprep.subr.bf16.mxu0 %v8769_v14  ;;  %v632_v14 = vld [vmem:[#allocation9 + $0x48] sm:$0xff]  ;;  %s8301_s15 = scalar_lea.hbm %s15049_s8, %s8321_s11  ;;  %s158_s2 = scalar_lea.vmem [#allocation4], %s8477_s12 }
  0x8d   : > { %s14775_s16 = scalar_lea.hbm %s8301_s15, 512  ;;  %s167_s17 = sshll.u32 %s158_s2, 4  ;;  %s168_s17 = int_to_ptr.vmem [resolvable:$true] %s167_s17 }
  0x8e   : > { %s159_s1 = scalar_lea.sflag [#allocation5], %s152_s30  ;;  %s9383_s4 = scalar_lea.hbm %s8301_s15, 1024 }
  0x8f   : > { %501 = vmatpush1.bf16.msra.mxu0 %v8771_v15  ;;  %v631_v15 = vld [vmem:[#allocation9 + $0x40] sm:$0xff]  ;;  %p9356_p12 = scmp.ne.s32.totalorder %s14775_s16, %s9383_s4  ;;  %p9360_p1 = scmp.lt.u32.totalorder %s14775_s16, %s15049_s8 }
  0x90   : > { %502 = vmatprep.subr.bf16.mxu0 %v8772_v16  ;;  %p9361_p2 = scmp.lt.u32.totalorder %s9335_s21, %s9383_s4  ;;  %p9363_p4 = scmp.lt.u32.totalorder %s9383_s4, %s14775_s16 }
  0x91   : > { %p9357_p13 = pnand %p9356_p12, %p8728_p11 }
  0x92   : > { %p9362_p3 = por %p9361_p2, %p9360_p1 }
  0x93   : > { %503 = vmatpush1.bf16.msra.mxu0 %v8774_v17  ;;  %p9358_p0 = pneg %p9357_p13 }
  0x94   : > { %504 = vmatprep.subr.bf16.mxu0 %v8775_v18  ;;  %p9364_p5 = por %p9363_p4, %p9362_p3 }
  0x96   : > { %p9365_p6 = pnand %p9364_p5, %p9358_p0 }
  0x97   : > { %505 = vmatpush1.bf16.msra.mxu0 %v8777_v19 }
  0x98   : > { %506 = vmatprep.subr.bf16.mxu0 %v8778_v20 }
  0x9b   : > { %507 = vmatpush1.bf16.msra.mxu0 %v8780_v21 }
  0x9c   : > { %508 = vmatprep.subr.bf16.mxu0 %v8781_v22  ;;  %v634_v22 = vld [vmem:[#allocation9 + $0x58] sm:$0xff] }
  0x9f   : > { %509 = vmatpush1.bf16.msra.mxu0 %v8783_v23  ;;  %v633_v23 = vld [vmem:[#allocation9 + $0x50] sm:$0xff] }
  0xa2   : > { %527 = vmatmul.mubr.bf16.vlgmr.msra.gmra.mrb[0].mxu0 %v9651_v25 }
  0xa3   : > { %608 = vmatprep.mubr.bf16.mxu0 %v15053_v7  ;;  %v736_v7 = vld [vmem:[#allocation9 + $0x388] sm:$0xff] }
 0x175   : > { %v528_v34 = vpop.f32.mrb[0].mxu0 }
 0x176   : > { %v529_v35 = vadd.f32 %v528_v34, %v227_v32  ;;  %v9668_v36 = vpop.f32.mrb[1].mxu0 }
 0x177   : > { %15491 = vst [vmem:[#allocation36_spill] sm:$0xff] %v9668_v36  ;;  %v532_v37 = vpop.f32.mrb[2].mxu0 }
 0x178   : > { %v752_v38 = vcombine.high %v529_v35, %v529_v35  ;;  %v759_v39 = vrot.slane %v529_v35, %v9666_v33  ;;  %v533_v40 = vpop.f32.mrb[3].mxu0  ;;  %v636_v35 = vld [vmem:[#allocation9 + $0x68] sm:$0xff]  ;;  %v635_v37 = vld [vmem:[#allocation9 + $0x60] sm:$0xff] }
 0x17a   : > { %v766_v41 = vrot.slane %v752_v38, %v9666_v33  ;;  %v9673_v42 = vrot.slane %v759_v39, %v9666_v33  ;;  %v767_v24 = vcombine.high %v759_v39, %v759_v39 }
 0x17c   : > { %v768_v43 = vcombine.high %v766_v41, %v766_v41  ;;  %v9676_v44 = vrot.slane %v766_v41, %v9666_v33  ;;  %v9680_v47 = vrot.slane %v9673_v42, %v9659_v29  ;;  %v9706_v38 = vrot.slane %v767_v24, %v9666_v33 }
 0x17e   : > { %v9683_v48 = vrot.slane %v768_v43, %v9666_v33  ;;  %v843_v51 = vadd.f32 %v9680_v47, %v625_v45  ;;  %v841_v52 = vadd.f32 %v9680_v47, %v623_v46  ;;  %v844_v57 = vadd.f32 %v9680_v47, %v626_v49  ;;  %v638_v49 = vld [vmem:[#allocation9 + $0x78] sm:$0xff] }
 0x17f   : > { %v842_v58 = vadd.f32 %v9680_v47, %v624_v50  ;;  %v846_v59 = vadd.f32 %v9680_v47, %v628_v53  ;;  %v845_v60 = vadd.f32 %v9680_v47, %v627_v54  ;;  %v848_v9 = vadd.f32 %v9680_v47, %v630_v5  ;;  %v637_v50 = vld [vmem:[#allocation9 + $0x70] sm:$0xff]  ;;  %v642_v5 = vld [vmem:[#allocation9 + $0x98] sm:$0xff] }
 0x180   : > { %v971_v55 = vmax.f32 %v843_v51, 0.0  ;;  %v969_v56 = vmax.f32 %v841_v52, 0.0  ;;  %v972_v63 = vmax.f32 %v844_v57, 0.0  ;;  %v847_v13 = vadd.f32 %v9680_v47, %v629_v6  ;;  %v640_v57 = vld [vmem:[#allocation9 + $0x88] sm:$0xff]  ;;  %v641_v6 = vld [vmem:[#allocation9 + $0x90] sm:$0xff] }
 0x181   : > { %v970_v2 = vmax.f32 %v842_v58, 0.0  ;;  %v974_v8 = vmax.f32 %v846_v59, 0.0  ;;  %v973_v12 = vmax.f32 %v845_v60, 0.0  ;;  %v976_v16 = vmax.f32 %v848_v9, 0.0  ;;  %v639_v58 = vld [vmem:[#allocation9 + $0x80] sm:$0xff] }
 0x182   : > { %v1105_v61 = vmul.f32 %v15486_v4, %v971_v55  ;;  %v1103_v62 = vmul.f32 %v15486_v4, %v969_v56  ;;  %v1106_v10 = vmul.f32 %v15486_v4, %v972_v63  ;;  %v850_v17 = vadd.f32 %v9680_v47, %v632_v14  ;;  %v643_v14 = vld [vmem:[#allocation9 + $0xa0] sm:$0xff] }
 0x183   : > { %v1104_v11 = vmul.f32 %v15486_v4, %v970_v2  ;;  %v1108_v18 = vmul.f32 %v15486_v4, %v974_v8  ;;  %v1107_v19 = vmul.f32 %v15486_v4, %v973_v12  ;;  %v975_v20 = vmax.f32 %v847_v13, 0.0  ;;  %v644_v13 = vld [vmem:[#allocation9 + $0xa8] sm:$0xff] }
 0x184   : > { %1235 = vadd.xlane.f32.xlu1 %v1105_v61  ;;  %1231 = vadd.xlane.f32.xlu0 %v1103_v62  ;;  %v849_v21 = vadd.f32 %v9680_v47, %v631_v15  ;;  %v1110_v27 = vmul.f32 %v15486_v4, %v976_v16  ;;  %v978_v28 = vmax.f32 %v850_v17, 0.0  ;;  %v852_v32 = vadd.f32 %v9680_v47, %v634_v22  ;;  %v645_v22 = vld [vmem:[#allocation9 + $0xb0] sm:$0xff] }
 0x185   : > { %v1109_v30 = vmul.f32 %v15486_v4, %v975_v20  ;;  %v851_v34 = vadd.f32 %v9680_v47, %v633_v23  ;;  %v854_v40 = vadd.f32 %v9680_v47, %v636_v35  ;;  %v853_v39 = vadd.f32 %v9680_v47, %v635_v37 }
 0x186   : > { %v977_v31 = vmax.f32 %v849_v21, 0.0  ;;  %v1112_v41 = vmul.f32 %v15486_v4, %v978_v28  ;;  %v980_v45 = vmax.f32 %v852_v32, 0.0  ;;  %v9714_v51 = vrot.slane %v9706_v38, %v9659_v29  ;;  %v646_v21 = vld [vmem:[#allocation9 + $0xb8] sm:$0xff]  ;;  %v648_v32 = vld [vmem:[#allocation9 + $0xc8] sm:$0xff] }
 0x187   : > { %v979_v46 = vmax.f32 %v851_v34, 0.0  ;;  %v982_v33 = vmax.f32 %v854_v40, 0.0  ;;  %v981_v52 = vmax.f32 %v853_v39, 0.0  ;;  %v856_v55 = vadd.f32 %v9680_v47, %v638_v49  ;;  %v647_v34 = vld [vmem:[#allocation9 + $0xc0] sm:$0xff] }
 0x188   : > { %1237 = vadd.xlane.f32.xlu1 %v1106_v10  ;;  %1233 = vadd.xlane.f32.xlu0 %v1104_v11  ;;  %v1111_v43 = vmul.f32 %v15486_v4, %v977_v31  ;;  %v1114_v53 = vmul.f32 %v15486_v4, %v980_v45  ;;  %v855_v56 = vadd.f32 %v9680_v47, %v637_v50  ;;  %v650_v45 = vld [vmem:[#allocation9 + $0xd8] sm:$0xff] }
 0x189   : > { %v1113_v54 = vmul.f32 %v15486_v4, %v979_v46  ;;  %v1116_v59 = vmul.f32 %v15486_v4, %v982_v33  ;;  %v858_v60 = vadd.f32 %v9714_v51, %v640_v57  ;;  %v1115_v61 = vmul.f32 %v15486_v4, %v981_v52  ;;  %v649_v46 = vld [vmem:[#allocation9 + $0xd0] sm:$0xff] }
 0x18a   : > { %v984_v62 = vmax.f32 %v856_v55, 0.0  ;;  %v983_v63 = vmax.f32 %v855_v56, 0.0  ;;  %v857_v2 = vadd.f32 %v9714_v51, %v639_v58  ;;  %v860_v47 = vadd.f32 %v9714_v51, %v642_v5  ;;  %v652_v55 = vld [vmem:[#allocation9 + $0xe8] sm:$0xff]  ;;  %v651_v56 = vld [vmem:[#allocation9 + $0xe0] sm:$0xff]  ;;  %v653_v5 = vld [vmem:[#allocation9 + $0xf0] sm:$0xff] }
 0x18b   : > { %v986_v8 = vmax.f32 %v858_v60, 0.0  ;;  %v859_v12 = vadd.f32 %v9714_v51, %v641_v6  ;;  %v862_v15 = vadd.f32 %v9714_v51, %v644_v13  ;;  %v861_v16 = vadd.f32 %v9714_v51, %v643_v14  ;;  %v655_v13 = vld [vmem:[#allocation9 + $0x100] sm:$0xff] }
 0x18c   : > { %1241 = vadd.xlane.f32.xlu1 %v1108_v18  ;;  %1239 = vadd.xlane.f32.xlu0 %v1107_v19  ;;  %v1118_v9 = vmul.f32 %v15486_v4, %v984_v62  ;;  %v1117_v10 = vmul.f32 %v15486_v4, %v983_v63  ;;  %v985_v11 = vmax.f32 %v857_v2, 0.0  ;;  %v988_v19 = vmax.f32 %v860_v47, 0.0  ;;  %v654_v2 = vld [vmem:[#allocation9 + $0xf8] sm:$0xff] }
 0x18d   : > { %v1120_v17 = vmul.f32 %v15486_v4, %v986_v8  ;;  %v987_v20 = vmax.f32 %v859_v12, 0.0  ;;  %v990_v23 = vmax.f32 %v862_v15, 0.0  ;;  %v864_v24 = vadd.f32 %v9714_v51, %v646_v21  ;;  %v656_v12 = vld [vmem:[#allocation9 + $0x108] sm:$0xff]  ;;  %v657_v21 = vld [vmem:[#allocation9 + $0x110] sm:$0xff] }
 0x18e   : > { %v1119_v18 = vmul.f32 %v15486_v4, %v985_v11  ;;  %v863_v31 = vadd.f32 %v9714_v51, %v645_v22  ;;  %v868_v50 = vadd.f32 %v9714_v51, %v650_v45  ;;  %v797_v57 = vcombine.high %v9673_v42, %v9673_v42 }
 0x18f   : > { %v1121_v28 = vmul.f32 %v15486_v4, %v987_v20  ;;  %v1124_v35 = vmul.f32 %v15486_v4, %v990_v23  ;;  %v992_v37 = vmax.f32 %v864_v24, 0.0  ;;  %v870_v58 = vadd.f32 %v9714_v51, %v652_v55  ;;  %v658_v20 = vld [vmem:[#allocation9 + $0x118] sm:$0xff] }
 0x190   : > { %1245 = vadd.xlane.f32.xlu1 %v1110_v27  ;;  %1243 = vadd.xlane.f32.xlu0 %v1109_v30  ;;  %v1122_v27 = vmul.f32 %v15486_v4, %v988_v19  ;;  %v989_v30 = vmax.f32 %v861_v16, 0.0  ;;  %v991_v39 = vmax.f32 %v863_v31, 0.0  ;;  %v996_v62 = vmax.f32 %v868_v50, 0.0  ;;  %v659_v31 = vld [vmem:[#allocation9 + $0x120] sm:$0xff] }
 0x191   : > { %v1126_v49 = vmul.f32 %v15486_v4, %v992_v37  ;;  %v9751_v6 = vrot.slane %v797_v57, %v9659_v29  ;;  %v998_v8 = vmax.f32 %v870_v58, 0.0  ;;  %v872_v42 = vadd.f32 %v9714_v51, %v654_v2 }
 0x192   : > { %v1123_v40 = vmul.f32 %v15486_v4, %v989_v30  ;;  %v1125_v33 = vmul.f32 %v15486_v4, %v991_v39  ;;  %v1130_v47 = vmul.f32 %v15486_v4, %v996_v62  ;;  %v871_v11 = vadd.f32 %v9714_v51, %v653_v5  ;;  %v660_v30 = vld [vmem:[#allocation9 + $0x128] sm:$0xff]  ;;  %v665_v62 = vld [vmem:[#allocation9 + $0x150] sm:$0xff] }
 0x193   : > { %v1132_v14 = vmul.f32 %v15486_v4, %v998_v8  ;;  %v1000_v15 = vmax.f32 %v872_v42, 0.0  ;;  %v873_v19 = vadd.f32 %v9751_v6, %v655_v13  ;;  %v876_v22 = vadd.f32 %v9751_v6, %v658_v20 }
 0x194   : > { %1249 = vadd.xlane.f32.xlu1 %v1112_v41  ;;  %1247 = vadd.xlane.f32.xlu0 %v1111_v43  ;;  %v866_v41 = vadd.f32 %v9714_v51, %v648_v32  ;;  %v865_v43 = vadd.f32 %v9714_v51, %v647_v34  ;;  %v878_v32 = vadd.f32 %v9751_v6, %v660_v30 }
 0x195   : > { %v877_v34 = vadd.f32 %v9751_v6, %v659_v31 }
 0x196   : > { %v994_v52 = vmax.f32 %v866_v41, 0.0  ;;  %v662_v41 = vld [vmem:[#allocation9 + $0x138] sm:$0xff]  ;;  %v1006_v45 = vmax.f32 %v878_v32, 0.0 }
 0x198   : > { %1253 = vadd.xlane.f32.xlu1 %v1114_v53  ;;  %1251 = vadd.xlane.f32.xlu0 %v1113_v54  ;;  %v993_v53 = vmax.f32 %v865_v43, 0.0  ;;  %v867_v54 = vadd.f32 %v9714_v51, %v649_v46  ;;  %v1128_v60 = vmul.f32 %v15486_v4, %v994_v52  ;;  %v661_v43 = vld [vmem:[#allocation9 + $0x130] sm:$0xff]  ;;  %v880_v46 = vadd.f32 %v9751_v6, %v662_v41 }
 0x199   : > { %v879_v52 = vadd.f32 %v9751_v6, %v661_v43  ;;  %v1140_v55 = vmul.f32 %v15486_v4, %v1006_v45 }
 0x19a   : > { %v995_v63 = vmax.f32 %v867_v54, 0.0  ;;  %v663_v54 = vld [vmem:[#allocation9 + $0x140] sm:$0xff] }
 0x19b   : > { %v1007_v58 = vmax.f32 %v879_v52, 0.0 }
 0x19c   : > { %1257 = vadd.xlane.f32.xlu1 %v1116_v59  ;;  %1255 = vadd.xlane.f32.xlu0 %v1115_v61  ;;  %v869_v59 = vadd.f32 %v9714_v51, %v651_v56  ;;  %v1127_v61 = vmul.f32 %v15486_v4, %v993_v53  ;;  %v1134_v51 = vmul.f32 %v15486_v4, %v1000_v15  ;;  %v664_v53 = vld [vmem:[#allocation9 + $0x148] sm:$0xff]  ;;  %v1008_v56 = vmax.f32 %v880_v46, 0.0 }
 0x19d   : > { %v1141_v5 = vmul.f32 %v15486_v4, %v1007_v58  ;;  %v694_v58 = vld [vmem:[#allocation9 + $0x238] sm:$0xff] }
 0x1a0   : > { %1261 = vadd.xlane.f32.xlu1 %v1118_v9  ;;  %1259 = vadd.xlane.f32.xlu0 %v1117_v10  ;;  %v1129_v9 = vmul.f32 %v15486_v4, %v995_v63  ;;  %v997_v10 = vmax.f32 %v869_v59, 0.0  ;;  %v882_v59 = vadd.f32 %v9751_v6, %v664_v53  ;;  %v1142_v63 = vmul.f32 %v15486_v4, %v1008_v56 }
 0x1a2   : > { %v1131_v16 = vmul.f32 %v15486_v4, %v997_v10  ;;  %v1010_v8 = vmax.f32 %v882_v59, 0.0  ;;  %v667_v10 = vld [vmem:[#allocation9 + $0x160] sm:$0xff]  ;;  %v693_v59 = vld [vmem:[#allocation9 + $0x230] sm:$0xff] }
 0x1a4   : > { %1265 = vadd.xlane.f32.xlu1 %v1120_v17  ;;  %1263 = vadd.xlane.f32.xlu0 %v1119_v18  ;;  %v999_v17 = vmax.f32 %v871_v11, 0.0  ;;  %v874_v18 = vadd.f32 %v9751_v6, %v656_v12  ;;  %v885_v12 = vadd.f32 %v9751_v6, %v667_v10  ;;  %v1144_v13 = vmul.f32 %v15486_v4, %v1010_v8  ;;  %v696_v8 = vld [vmem:[#allocation9 + $0x248] sm:$0xff] }
 0x1a6   : > { %v1133_v23 = vmul.f32 %v15486_v4, %v999_v17  ;;  %v1002_v24 = vmax.f32 %v874_v18, 0.0  ;;  %v670_v17 = vld [vmem:[#allocation9 + $0x178] sm:$0xff]  ;;  %v669_v18 = vld [vmem:[#allocation9 + $0x170] sm:$0xff] }
 0x1a8   : > { %1269 = vadd.xlane.f32.xlu1 %v1122_v27  ;;  %1267 = vadd.xlane.f32.xlu0 %v1121_v28  ;;  %v1001_v27 = vmax.f32 %v873_v19, 0.0  ;;  %v875_v28 = vadd.f32 %v9751_v6, %v657_v21  ;;  %v9787_v19 = vrot.slane %v9676_v44, %v9659_v29  ;;  %v888_v21 = vadd.f32 %v9751_v6, %v670_v17 }
 0x1aa   : > { %v1135_v37 = vmul.f32 %v15486_v4, %v1001_v27  ;;  %v1003_v39 = vmax.f32 %v875_v28, 0.0  ;;  %v688_v27 = vld [vmem:[#allocation9 + $0x208] sm:$0xff]  ;;  %v687_v28 = vld [vmem:[#allocation9 + $0x200] sm:$0xff]  ;;  %v1016_v31 = vmax.f32 %v888_v21, 0.0 }
 0x1ac   : > { %1273 = vadd.xlane.f32.xlu1 %v1124_v35  ;;  %1271 = vadd.xlane.f32.xlu0 %v1123_v40  ;;  %v1136_v35 = vmul.f32 %v15486_v4, %v1002_v24  ;;  %v1004_v40 = vmax.f32 %v876_v22, 0.0  ;;  %v1137_v50 = vmul.f32 %v15486_v4, %v1003_v39  ;;  %v887_v24 = vadd.f32 %v9751_v6, %v669_v18  ;;  %v689_v39 = vld [vmem:[#allocation9 + $0x210] sm:$0xff] }
 0x1b0   : > { %1277 = vadd.xlane.f32.xlu1 %v1126_v49  ;;  %1275 = vadd.xlane.f32.xlu0 %v1125_v33  ;;  %v1138_v49 = vmul.f32 %v15486_v4, %v1004_v40  ;;  %v1005_v33 = vmax.f32 %v877_v34, 0.0  ;;  %v1015_v34 = vmax.f32 %v887_v24, 0.0  ;;  %v690_v40 = vld [vmem:[#allocation9 + $0x218] sm:$0xff]  ;;  %v799_v24 = vcombine.high %v9706_v38, %v9706_v38 }
 0x1b1   : > { %v908_v41 = vadd.f32 %v9787_v19, %v690_v40 }
 0x1b2   : > { %v1139_v57 = vmul.f32 %v15486_v4, %v1005_v33  ;;  %v1149_v43 = vmul.f32 %v15486_v4, %v1015_v34  ;;  %v691_v33 = vld [vmem:[#allocation9 + $0x220] sm:$0xff]  ;;  %v9824_v40 = vrot.slane %v799_v24, %v9659_v29 }
 0x1b3   : > { %v909_v53 = vadd.f32 %v9787_v19, %v691_v33  ;;  %v1036_v56 = vmax.f32 %v908_v41, 0.0 }
 0x1b4   : > { %1281 = vadd.xlane.f32.xlu1 %v1128_v60  ;;  %1279 = vadd.xlane.f32.xlu0 %v1127_v61  ;;  %v881_v60 = vadd.f32 %v9751_v6, %v663_v54  ;;  %v666_v61 = vld [vmem:[#allocation9 + $0x158] sm:$0xff] }
 0x1b5   : > { %v884_v2 = vadd.f32 %v9751_v6, %v666_v61  ;;  %v912_v61 = vadd.f32 %v9787_v19, %v694_v58 }
 0x1b6   : > { %v1009_v42 = vmax.f32 %v881_v60, 0.0 }
 0x1b7   : > { %v1012_v15 = vmax.f32 %v884_v2, 0.0  ;;  %v1037_v2 = vmax.f32 %v909_v53, 0.0 }
 0x1b8   : > { %1285 = vadd.xlane.f32.xlu1 %v1130_v47  ;;  %1283 = vadd.xlane.f32.xlu0 %v1129_v9  ;;  %v883_v47 = vadd.f32 %v9751_v6, %v665_v62  ;;  %v668_v9 = vld [vmem:[#allocation9 + $0x168] sm:$0xff]  ;;  %v1170_v62 = vmul.f32 %v15486_v4, %v1036_v56  ;;  %v674_v56 = vld [vmem:[#allocation9 + $0x198] sm:$0xff] }
 0x1b9   : > { %v886_v11 = vadd.f32 %v9751_v6, %v668_v9  ;;  %v1150_v6 = vmul.f32 %v15486_v4, %v1016_v31  ;;  %v1040_v9 = vmax.f32 %v912_v61, 0.0  ;;  %v1171_v10 = vmul.f32 %v15486_v4, %v1037_v2  ;;  %v675_v2 = vld [vmem:[#allocation9 + $0x1a0] sm:$0xff] }
 0x1ba   : > { %v892_v58 = vadd.f32 %v9824_v40, %v674_v56 }
 0x1bb   : > { %v1014_v20 = vmax.f32 %v886_v11, 0.0 }
 0x1bc   : > { %1289 = vadd.xlane.f32.xlu1 %v1132_v14  ;;  %1287 = vadd.xlane.f32.xlu0 %v1131_v16  ;;  %v1143_v14 = vmul.f32 %v15486_v4, %v1009_v42  ;;  %v1011_v16 = vmax.f32 %v883_v47, 0.0  ;;  %v695_v42 = vld [vmem:[#allocation9 + $0x240] sm:$0xff] }
 0x1bd   : > { %v1148_v30 = vmul.f32 %v15486_v4, %v1014_v20 }
 0x1be   : > { %v1145_v22 = vmul.f32 %v15486_v4, %v1011_v16  ;;  %v1174_v16 = vmul.f32 %v15486_v4, %v1040_v9  ;;  %v1020_v9 = vmax.f32 %v892_v58, 0.0  ;;  %v9870_v58 = vrot.slane %v9683_v48, %v9659_v29 }
 0x1c0   : > { %1293 = vadd.xlane.f32.xlu1 %v1134_v51  ;;  %1291 = vadd.xlane.f32.xlu0 %v1133_v23  ;;  %v1146_v51 = vmul.f32 %v15486_v4, %v1012_v15  ;;  %v1013_v23 = vmax.f32 %v885_v12, 0.0  ;;  %v914_v12 = vadd.f32 %v9787_v19, %v696_v8  ;;  %v697_v15 = vld [vmem:[#allocation9 + $0x250] sm:$0xff]  ;;  %v893_v8 = vadd.f32 %v9824_v40, %v675_v2 }
 0x1c2   : > { %v1147_v32 = vmul.f32 %v15486_v4, %v1013_v23  ;;  %v1042_v20 = vmax.f32 %v914_v12, 0.0  ;;  %v699_v23 = vld [vmem:[#allocation9 + $0x260] sm:$0xff]  ;;  %v677_v12 = vld [vmem:[#allocation9 + $0x1b0] sm:$0xff] }
 0x1c4   : > { %1297 = vadd.xlane.f32.xlu1 %v1136_v35  ;;  %1295 = vadd.xlane.f32.xlu0 %v1135_v37  ;;  %v906_v35 = vadd.f32 %v9787_v19, %v688_v27  ;;  %v905_v37 = vadd.f32 %v9787_v19, %v687_v28  ;;  %v917_v28 = vadd.f32 %v9787_v19, %v699_v23 }
 0x1c6   : > { %v1034_v45 = vmax.f32 %v906_v35, 0.0  ;;  %v1033_v46 = vmax.f32 %v905_v37, 0.0  ;;  %v702_v35 = vld [vmem:[#allocation9 + $0x278] sm:$0xff]  ;;  %v701_v37 = vld [vmem:[#allocation9 + $0x270] sm:$0xff] }
 0x1c7   : > { %v920_v38 = vadd.f32 %v9787_v19, %v702_v35  ;;  %v9854_v35 = vpop.permute.xlu0 %1489 }
 0x1c8   : > { %1301 = vadd.xlane.f32.xlu1 %v1138_v49  ;;  %1299 = vadd.xlane.f32.xlu0 %v1137_v50  ;;  %v907_v49 = vadd.f32 %v9787_v19, %v689_v39  ;;  %v692_v50 = vld [vmem:[#allocation9 + $0x228] sm:$0xff]  ;;  %v1168_v54 = vmul.f32 %v15486_v4, %v1034_v45  ;;  %v919_v45 = vadd.f32 %v9787_v19, %v701_v37 }
 0x1c9   : > { %v910_v52 = vadd.f32 %v9787_v19, %v692_v50  ;;  %v1048_v33 = vmax.f32 %v920_v38, 0.0 }
 0x1ca   : > { %v1047_v53 = vmax.f32 %v919_v45, 0.0  ;;  %v684_v45 = vld [vmem:[#allocation9 + $0x1e8] sm:$0xff] }
 0x1cb   : > { %v1038_v60 = vmax.f32 %v910_v52, 0.0 }
 0x1cc   : > { %1305 = vadd.xlane.f32.xlu1 %v1140_v55  ;;  %1303 = vadd.xlane.f32.xlu0 %v1139_v57  ;;  %v1167_v55 = vmul.f32 %v15486_v4, %v1033_v46  ;;  %v1035_v57 = vmax.f32 %v907_v49, 0.0  ;;  %v672_v46 = vld [vmem:[#allocation9 + $0x188] sm:$0xff]  ;;  %v671_v49 = vld [vmem:[#allocation9 + $0x180] sm:$0xff] }
 0x1cd   : > { %v1172_v47 = vmul.f32 %v15486_v4, %v1038_v60 }
 0x1d0   : > { %1309 = vadd.xlane.f32.xlu1 %v1142_v63  ;;  %1307 = vadd.xlane.f32.xlu0 %v1141_v5  ;;  %v1169_v63 = vmul.f32 %v15486_v4, %v1035_v57  ;;  %v911_v5 = vadd.f32 %v9787_v19, %v693_v59  ;;  %v673_v57 = vld [vmem:[#allocation9 + $0x190] sm:$0xff]  ;;  %v1181_v59 = vmul.f32 %v15486_v4, %v1047_v53 }
 0x1d2   : > { %v1039_v11 = vmax.f32 %v911_v5, 0.0 }
 0x1d4   : > { %1313 = vadd.xlane.f32.xlu1 %v1144_v13  ;;  %1311 = vadd.xlane.f32.xlu0 %v1143_v14  ;;  %v913_v13 = vadd.f32 %v9787_v19, %v695_v42  ;;  %v698_v14 = vld [vmem:[#allocation9 + $0x258] sm:$0xff]  ;;  %v1173_v18 = vmul.f32 %v15486_v4, %v1039_v11 }
 0x1d5   : > { %v916_v17 = vadd.f32 %v9787_v19, %v698_v14  ;;  %v678_v11 = vld [vmem:[#allocation9 + $0x1b8] sm:$0xff] }
 0x1d6   : > { %v1041_v21 = vmax.f32 %v913_v13, 0.0  ;;  %v896_v14 = vadd.f32 %v9824_v40, %v678_v11 }
 0x1d8   : > { %1317 = vadd.xlane.f32.xlu1 %v1146_v51  ;;  %1315 = vadd.xlane.f32.xlu0 %v1145_v22  ;;  %v915_v51 = vadd.f32 %v9787_v19, %v697_v15  ;;  %v700_v22 = vld [vmem:[#allocation9 + $0x268] sm:$0xff]  ;;  %v1175_v31 = vmul.f32 %v15486_v4, %v1041_v21  ;;  %v1154_v15 = vmul.f32 %v15486_v4, %v1020_v9  ;;  %v1024_v23 = vmax.f32 %v896_v14, 0.0 }
 0x1d9   : > { %v918_v27 = vadd.f32 %v9787_v19, %v700_v22  ;;  %v1182_v19 = vmul.f32 %v15486_v4, %v1048_v33  ;;  %v680_v21 = vld [vmem:[#allocation9 + $0x1c8] sm:$0xff]  ;;  %v902_v33 = vadd.f32 %v9824_v40, %v684_v45 }
 0x1da   : > { %v1043_v34 = vmax.f32 %v915_v51, 0.0  ;;  %v679_v51 = vld [vmem:[#allocation9 + $0x1c0] sm:$0xff]  ;;  %v1158_v37 = vmul.f32 %v15486_v4, %v1024_v23 }
 0x1db   : > { %v1046_v39 = vmax.f32 %v918_v27, 0.0 }
 0x1dc   : > { %1321 = vadd.xlane.f32.xlu1 %v1148_v30  ;;  %1319 = vadd.xlane.f32.xlu0 %v1147_v32  ;;  %v1176_v30 = vmul.f32 %v15486_v4, %v1042_v20  ;;  %v1044_v32 = vmax.f32 %v916_v17, 0.0  ;;  %v1177_v41 = vmul.f32 %v15486_v4, %v1043_v34  ;;  %v1021_v17 = vmax.f32 %v893_v8, 0.0  ;;  %v9846_v20 = vpop.permute.xlu1 %1493 }
 0x1dd   : > { %v1180_v50 = vmul.f32 %v15486_v4, %v1046_v39 }
 0x1de   : > { %v1155_v24 = vmul.f32 %v15486_v4, %v1021_v17  ;;  %v706_v17 = vld [vmem:[#allocation9 + $0x298] sm:$0xff] }
 0x1e0   : > { %1325 = vadd.xlane.f32.xlu1 %v1150_v6  ;;  %1323 = vadd.xlane.f32.xlu0 %v1149_v43  ;;  %v1178_v6 = vmul.f32 %v15486_v4, %v1044_v32  ;;  %v1045_v43 = vmax.f32 %v917_v28, 0.0  ;;  %v898_v28 = vadd.f32 %v9824_v40, %v680_v21  ;;  %v681_v32 = vld [vmem:[#allocation9 + $0x1d0] sm:$0xff]  ;;  %v9852_v34 = vpop.permute.xlu1 %1497 }
 0x1e2   : > { %v1179_v52 = vmul.f32 %v15486_v4, %v1045_v43  ;;  %v899_v43 = vadd.f32 %v9824_v40, %v681_v32 }
 0x1e4   : > { %1361 = vadd.xlane.f32.xlu1 %v1168_v54  ;;  %1359 = vadd.xlane.f32.xlu0 %v1167_v55  ;;  %v890_v54 = vadd.f32 %v9824_v40, %v672_v46  ;;  %v889_v55 = vadd.f32 %v9824_v40, %v671_v49  ;;  %v683_v46 = vld [vmem:[#allocation9 + $0x1e0] sm:$0xff]  ;;  %v1027_v56 = vmax.f32 %v899_v43, 0.0 }
 0x1e6   : > { %v1018_v60 = vmax.f32 %v890_v54, 0.0  ;;  %v1017_v61 = vmax.f32 %v889_v55, 0.0  ;;  %v1161_v2 = vmul.f32 %v15486_v4, %v1027_v56 }
 0x1e8   : > { %1365 = vadd.xlane.f32.xlu1 %v1170_v62  ;;  %1363 = vadd.xlane.f32.xlu0 %v1169_v63  ;;  %v891_v62 = vadd.f32 %v9824_v40, %v673_v57  ;;  %v676_v63 = vld [vmem:[#allocation9 + $0x1a8] sm:$0xff]  ;;  %v1152_v42 = vmul.f32 %v15486_v4, %v1018_v60  ;;  %v686_v57 = vld [vmem:[#allocation9 + $0x1f8] sm:$0xff] }
 0x1e9   : > { %v894_v5 = vadd.f32 %v9824_v40, %v676_v63 }
 0x1eb   : > { %v1022_v13 = vmax.f32 %v894_v5, 0.0 }
 0x1ec   : > { %1369 = vadd.xlane.f32.xlu1 %v1172_v47  ;;  %1367 = vadd.xlane.f32.xlu0 %v1171_v10  ;;  %v1151_v47 = vmul.f32 %v15486_v4, %v1017_v61  ;;  %v1019_v10 = vmax.f32 %v891_v62, 0.0  ;;  %v1030_v61 = vmax.f32 %v902_v33, 0.0  ;;  %v904_v62 = vadd.f32 %v9824_v40, %v686_v57  ;;  %v709_v33 = vld [vmem:[#allocation9 + $0x2b0] sm:$0xff] }
 0x1ed   : > { %v1156_v22 = vmul.f32 %v15486_v4, %v1022_v13 }
 0x1ee   : > { %v1164_v11 = vmul.f32 %v15486_v4, %v1030_v61  ;;  %v927_v61 = vadd.f32 %v9870_v58, %v709_v33 }
 0x1f0   : > { %1373 = vadd.xlane.f32.xlu1 %v1174_v16  ;;  %1371 = vadd.xlane.f32.xlu0 %v1173_v18  ;;  %v1153_v16 = vmul.f32 %v15486_v4, %v1019_v10  ;;  %v895_v18 = vadd.f32 %v9824_v40, %v677_v12  ;;  %v1032_v12 = vmax.f32 %v904_v62, 0.0  ;;  %v712_v62 = vld [vmem:[#allocation9 + $0x2c8] sm:$0xff] }
 0x1f2   : > { %v1023_v27 = vmax.f32 %v895_v18, 0.0 }
 0x1f4   : > { %1377 = vadd.xlane.f32.xlu1 %v1176_v30  ;;  %1375 = vadd.xlane.f32.xlu0 %v1175_v31  ;;  %v897_v30 = vadd.f32 %v9824_v40, %v679_v51  ;;  %v682_v31 = vld [vmem:[#allocation9 + $0x1d8] sm:$0xff]  ;;  %v1157_v38 = vmul.f32 %v15486_v4, %v1023_v27  ;;  %v1166_v51 = vmul.f32 %v15486_v4, %v1032_v12 }
 0x1f5   : > { %v900_v39 = vadd.f32 %v9824_v40, %v682_v31  ;;  %v707_v31 = vld [vmem:[#allocation9 + $0x2a0] sm:$0xff]  ;;  %v930_v12 = vadd.f32 %v9870_v58, %v712_v62 }
 0x1f7   : > { %v1028_v55 = vmax.f32 %v900_v39, 0.0 }
 0x1f8   : > { %1381 = vadd.xlane.f32.xlu1 %v1178_v6  ;;  %1379 = vadd.xlane.f32.xlu0 %v1177_v41  ;;  %v1026_v6 = vmax.f32 %v898_v28, 0.0  ;;  %v1025_v41 = vmax.f32 %v897_v30, 0.0  ;;  %v708_v30 = vld [vmem:[#allocation9 + $0x2a8] sm:$0xff] }
 0x1f9   : > { %v1162_v63 = vmul.f32 %v15486_v4, %v1028_v55  ;;  %v926_v39 = vadd.f32 %v9870_v58, %v708_v30  ;;  %v715_v30 = vld [vmem:[#allocation9 + $0x2e0] sm:$0xff] }
 0x1fa   : > { %v1160_v53 = vmul.f32 %v15486_v4, %v1026_v6  ;;  %v1159_v54 = vmul.f32 %v15486_v4, %v1025_v41 }
 0x1fc   : > { %1385 = vadd.xlane.f32.xlu1 %v1180_v50  ;;  %1383 = vadd.xlane.f32.xlu0 %v1179_v52  ;;  %v901_v52 = vadd.f32 %v9824_v40, %v683_v46  ;;  %v710_v46 = vld [vmem:[#allocation9 + $0x2b8] sm:$0xff] }
 0x1fd   : > { %v928_v55 = vadd.f32 %v9870_v58, %v710_v46 }
 0x1fe   : > { %v1029_v5 = vmax.f32 %v901_v52, 0.0 }
 0x200   : > { %1389 = vadd.xlane.f32.xlu1 %v1182_v19  ;;  %1387 = vadd.xlane.f32.xlu0 %v1181_v59  ;;  %v685_v19 = vld [vmem:[#allocation9 + $0x1f0] sm:$0xff]  ;;  %v1163_v13 = vmul.f32 %v15486_v4, %v1029_v5 }
 0x201   : > { %v903_v8 = vadd.f32 %v9824_v40, %v685_v19  ;;  %v705_v40 = vld [vmem:[#allocation9 + $0x290] sm:$0xff] }
 0x202   : > { %v923_v28 = vadd.f32 %v9870_v58, %v705_v40 }
 0x203   : > { %v1031_v14 = vmax.f32 %v903_v8, 0.0 }
 0x204   : > { %1329 = vadd.xlane.f32.xlu1 %v1152_v42  ;;  %1327 = vadd.xlane.f32.xlu0 %v1151_v47  ;;  %v704_v42 = vld [vmem:[#allocation9 + $0x288] sm:$0xff]  ;;  %v703_v47 = vld [vmem:[#allocation9 + $0x280] sm:$0xff]  ;;  %v1051_v45 = vmax.f32 %v923_v28, 0.0 }
 0x205   : > { %v1165_v23 = vmul.f32 %v15486_v4, %v1031_v14  ;;  %v714_v14 = vld [vmem:[#allocation9 + $0x2d8] sm:$0xff]  ;;  %v716_v28 = vld [vmem:[#allocation9 + $0x2e8] sm:$0xff] }
 0x206   : > { %v1185_v57 = vmul.f32 %v15486_v4, %v1051_v45 }
 0x208   : > { %1333 = vadd.xlane.f32.xlu1 %v1154_v15  ;;  %1331 = vadd.xlane.f32.xlu0 %v1153_v16  ;;  %v922_v15 = vadd.f32 %v9870_v58, %v704_v42  ;;  %v921_v16 = vadd.f32 %v9870_v58, %v703_v47  ;;  %v1056_v42 = vmax.f32 %v928_v55, 0.0  ;;  %v717_v55 = vld [vmem:[#allocation9 + $0x2f0] sm:$0xff] }
 0x20a   : > { %v1049_v27 = vmax.f32 %v921_v16, 0.0  ;;  %v1190_v40 = vmul.f32 %v15486_v4, %v1056_v42  ;;  %v935_v42 = vadd.f32 %v9870_v58, %v717_v55 }
 0x20c   : > { %1337 = vadd.xlane.f32.xlu1 %v1156_v22  ;;  %1335 = vadd.xlane.f32.xlu0 %v1155_v24  ;;  %v924_v22 = vadd.f32 %v9870_v58, %v706_v17  ;;  %v1050_v24 = vmax.f32 %v922_v15, 0.0  ;;  %v1183_v41 = vmul.f32 %v15486_v4, %v1049_v27  ;;  %v713_v15 = vld [vmem:[#allocation9 + $0x2d0] sm:$0xff] }
 0x20d   : > { %v931_v27 = vadd.f32 %v9870_v58, %v713_v15 }
 0x20e   : > { %v1184_v6 = vmul.f32 %v15486_v4, %v1050_v24  ;;  %v1052_v43 = vmax.f32 %v924_v22, 0.0 }
 0x20f   : > { %v1059_v33 = vmax.f32 %v931_v27, 0.0 }
 0x210   : > { %1341 = vadd.xlane.f32.xlu1 %v1158_v37  ;;  %1339 = vadd.xlane.f32.xlu0 %v1157_v38  ;;  %v925_v38 = vadd.f32 %v9870_v58, %v707_v31  ;;  %v1186_v56 = vmul.f32 %v15486_v4, %v1052_v43  ;;  %v798_v31 = vcombine.high %v9676_v44, %v9676_v44 }
 0x211   : > { %v9860_v49 = vpop.xlane.xlu1 %1235  ;;  %v9862_v50 = vpop.xlane.xlu0 %1231 }
 0x212   : > { %v1053_v19 = vmax.f32 %v925_v38, 0.0  ;;  %v9939_v44 = vrot.slane %v798_v31, %v9659_v29 }
 0x214   : > { %1345 = vadd.xlane.f32.xlu1 %v1160_v53  ;;  %1343 = vadd.xlane.f32.xlu0 %v1159_v54  ;;  %v1054_v54 = vmax.f32 %v926_v39, 0.0  ;;  %v1187_v47 = vmul.f32 %v15486_v4, %v1053_v19 }
 0x215   : > { %v9872_v59 = vpop.xlane.xlu1 %1237  ;;  %v9874_v60 = vpop.xlane.xlu0 %1233 }
 0x216   : > { %v1188_v8 = vmul.f32 %v15486_v4, %v1054_v54  ;;  %v718_v54 = vld [vmem:[#allocation9 + $0x2f8] sm:$0xff] }
 0x218   : > { %1349 = vadd.xlane.f32.xlu1 %v1162_v63  ;;  %1347 = vadd.xlane.f32.xlu0 %v1161_v2  ;;  %v711_v63 = vld [vmem:[#allocation9 + $0x2c0] sm:$0xff] }
 0x219   : > { %v9880_v9 = vpop.xlane.xlu1 %1241  ;;  %v9882_v10 = vpop.xlane.xlu0 %1239 }
 0x21c   : > { %1353 = vadd.xlane.f32.xlu1 %v1164_v11  ;;  %1351 = vadd.xlane.f32.xlu0 %v1163_v13  ;;  %v1055_v11 = vmax.f32 %v927_v61, 0.0  ;;  %v929_v13 = vadd.f32 %v9870_v58, %v711_v63  ;;  %v936_v61 = vadd.f32 %v9870_v58, %v718_v54  ;;  %v1193_v63 = vmul.f32 %v15486_v4, %v1059_v33  ;;  %v723_v33 = vld [vmem:[#allocation9 + $0x320] sm:$0xff] }
 0x21d   : > { %v9888_v18 = vpop.xlane.xlu1 %1245  ;;  %v9890_v21 = vpop.xlane.xlu0 %1243 }
 0x21e   : > { %v1189_v22 = vmul.f32 %v15486_v4, %v1055_v11  ;;  %v1057_v24 = vmax.f32 %v929_v13, 0.0  ;;  %v719_v11 = vld [vmem:[#allocation9 + $0x300] sm:$0xff]  ;;  %v1064_v15 = vmax.f32 %v936_v61, 0.0  ;;  %v941_v61 = vadd.f32 %v9939_v44, %v723_v33 }
 0x220   : > { %1357 = vadd.xlane.f32.xlu1 %v1166_v51  ;;  %1355 = vadd.xlane.f32.xlu0 %v1165_v23  ;;  %v932_v51 = vadd.f32 %v9870_v58, %v714_v14  ;;  %v1058_v23 = vmax.f32 %v930_v12, 0.0  ;;  %v1191_v45 = vmul.f32 %v15486_v4, %v1057_v24  ;;  %v722_v24 = vld [vmem:[#allocation9 + $0x318] sm:$0xff] }
 0x221   : > { %v9896_v32 = vpop.xlane.xlu1 %1249  ;;  %v9898_v37 = vpop.xlane.xlu0 %1247  ;;  %v940_v31 = vadd.f32 %v9939_v44, %v722_v24  ;;  %v1069_v24 = vmax.f32 %v941_v61, 0.0 }
 0x222   : > { %v1192_v43 = vmul.f32 %v15486_v4, %v1058_v23  ;;  %v1060_v46 = vmax.f32 %v932_v51, 0.0  ;;  %v1063_v51 = vmax.f32 %v935_v42, 0.0  ;;  %v937_v23 = vadd.f32 %v9939_v44, %v719_v11  ;;  %v725_v11 = vld [vmem:[#allocation9 + $0x330] sm:$0xff] }
 0x224   : > { %1393 = vadd.xlane.f32.xlu1 %v1184_v6  ;;  %1391 = vadd.xlane.f32.xlu0 %v1183_v41  ;;  %v934_v6 = vadd.f32 %v9870_v58, %v716_v28  ;;  %v933_v41 = vadd.f32 %v9870_v58, %v715_v30  ;;  %v1194_v62 = vmul.f32 %v15486_v4, %v1060_v46  ;;  %v721_v58 = vld [vmem:[#allocation9 + $0x310] sm:$0xff]  ;;  %v724_v46 = vld [vmem:[#allocation9 + $0x328] sm:$0xff] }
 0x225   : > { %v9904_v52 = vpop.xlane.xlu1 %1253  ;;  %v9906_v53 = vpop.xlane.xlu0 %1251  ;;  %v1198_v30 = vmul.f32 %v15486_v4, %v1064_v15 }
 0x226   : > { %v1062_v19 = vmax.f32 %v934_v6, 0.0  ;;  %v1197_v6 = vmul.f32 %v15486_v4, %v1063_v51 }
 0x228   : > { %1397 = vadd.xlane.f32.xlu1 %v1186_v56  ;;  %1395 = vadd.xlane.f32.xlu0 %v1185_v57  ;;  %v1196_v14 = vmul.f32 %v15486_v4, %v1062_v19  ;;  %v942_v19 = vadd.f32 %v9939_v44, %v724_v46  ;;  %v1203_v46 = vmul.f32 %v15486_v4, %v1069_v24  ;;  %v732_v24 = vld [vmem:[#allocation9 + $0x368] sm:$0xff] }
 0x229   : > { %v9912_v2 = vpop.xlane.xlu1 %1257  ;;  %v9914_v5 = vpop.xlane.xlu0 %1255 }
 0x22c   : > { %1401 = vadd.xlane.f32.xlu1 %v1188_v8  ;;  %1399 = vadd.xlane.f32.xlu0 %v1187_v47  ;;  %v1061_v8 = vmax.f32 %v933_v41, 0.0  ;;  %v720_v47 = vld [vmem:[#allocation9 + $0x308] sm:$0xff] }
 0x22d   : > { %v9920_v16 = vpop.xlane.xlu1 %1261  ;;  %v9922_v17 = vpop.xlane.xlu0 %1259 }
 0x230   : > { %1405 = vadd.xlane.f32.xlu1 %v1190_v40  ;;  %1403 = vadd.xlane.f32.xlu0 %v1189_v22  ;;  %v1195_v40 = vmul.f32 %v15486_v4, %v1061_v8  ;;  %v938_v22 = vadd.f32 %v9939_v44, %v720_v47  ;;  %v1068_v8 = vmax.f32 %v940_v31, 0.0  ;;  %v726_v47 = vld [vmem:[#allocation9 + $0x338] sm:$0xff]  ;;  %v727_v31 = vld [vmem:[#allocation9 + $0x340] sm:$0xff] }
 0x231   : > { %v9930_v39 = vpop.xlane.xlu1 %1265  ;;  %v9932_v38 = vpop.xlane.xlu0 %1263  ;;  %v944_v51 = vadd.f32 %v9939_v44, %v726_v47  ;;  %v945_v61 = vadd.f32 %v9939_v44, %v727_v31 }
 0x232   : > { %v1066_v41 = vmax.f32 %v938_v22, 0.0  ;;  %v1202_v22 = vmul.f32 %v15486_v4, %v1068_v8 }
 0x234   : > { %1409 = vadd.xlane.f32.xlu1 %v1192_v43  ;;  %1407 = vadd.xlane.f32.xlu0 %v1191_v45  ;;  %v1065_v43 = vmax.f32 %v937_v23, 0.0  ;;  %v939_v45 = vadd.f32 %v9939_v44, %v721_v58  ;;  %v943_v58 = vadd.f32 %v9939_v44, %v725_v11 }
 0x235   : > { %v9941_v56 = vpop.xlane.xlu1 %1269  ;;  %v9943_v57 = vpop.xlane.xlu0 %1267 }
 0x236   : > { %v1067_v42 = vmax.f32 %v939_v45, 0.0  ;;  %v1072_v45 = vmax.f32 %v944_v51, 0.0  ;;  %v1071_v33 = vmax.f32 %v943_v58, 0.0  ;;  %v731_v58 = vld [vmem:[#allocation9 + $0x360] sm:$0xff] }
 0x238   : > { %1413 = vadd.xlane.f32.xlu1 %v1194_v62  ;;  %1411 = vadd.xlane.f32.xlu0 %v1193_v63  ;;  %v1200_v62 = vmul.f32 %v15486_v4, %v1066_v41  ;;  %v1199_v63 = vmul.f32 %v15486_v4, %v1065_v43  ;;  %v1201_v23 = vmul.f32 %v15486_v4, %v1067_v42 }
 0x239   : > { %v9949_v12 = vpop.xlane.xlu1 %1273  ;;  %v9951_v13 = vpop.xlane.xlu0 %1271  ;;  %v1206_v47 = vmul.f32 %v15486_v4, %v1072_v45  ;;  %v950_v45 = vadd.f32 %v9939_v44, %v732_v24 }
 0x23b   : > { %v1078_v24 = vmax.f32 %v950_v45, 0.0 }
 0x23c   : > { %1417 = vadd.xlane.f32.xlu1 %v1196_v14  ;;  %1415 = vadd.xlane.f32.xlu0 %v1195_v40  ;;  %v1070_v40 = vmax.f32 %v942_v19, 0.0 }
 0x23d   : > { %v9957_v27 = vpop.xlane.xlu1 %1277  ;;  %v9959_v28 = vpop.xlane.xlu0 %1275  ;;  %v1212_v36 = vmul.f32 %v15486_v4, %v1078_v24 }
 0x23e   : > { %v1204_v43 = vmul.f32 %v15486_v4, %v1070_v40  ;;  %v1205_v40 = vmul.f32 %v15486_v4, %v1071_v33 }
 0x240   : > { %1421 = vadd.xlane.f32.xlu1 %v1198_v30  ;;  %1419 = vadd.xlane.f32.xlu0 %v1197_v6  ;;  %v728_v30 = vld [vmem:[#allocation9 + $0x348] sm:$0xff] }
 0x241   : > { %v9965_v54 = vpop.xlane.xlu1 %1281  ;;  %v9967_v55 = vpop.xlane.xlu0 %1279  ;;  %v946_v19 = vadd.f32 %v9939_v44, %v728_v30  ;;  %v800_v30 = vcombine.high %v9683_v48, %v9683_v48 }
 0x243   : > { %v1074_v51 = vmax.f32 %v946_v19, 0.0  ;;  %v10008_v48 = vrot.slane %v800_v30, %v9659_v29  ;;  %v740_v29 = vld [vmem:[#allocation9 + $0x3a8] sm:$0xff] }
 0x244   : > { %1425 = vadd.xlane.f32.xlu1 %v1200_v62  ;;  %1423 = vadd.xlane.f32.xlu0 %v1199_v63  ;;  %v730_v62 = vld [vmem:[#allocation9 + $0x358] sm:$0xff]  ;;  %v729_v63 = vld [vmem:[#allocation9 + $0x350] sm:$0xff] }
 0x245   : > { %v9973_v14 = vpop.xlane.xlu1 %1285  ;;  %v9975_v15 = vpop.xlane.xlu0 %1283  ;;  %v948_v11 = vadd.f32 %v9939_v44, %v730_v62  ;;  %v1208_v33 = vmul.f32 %v15486_v4, %v1074_v51  ;;  %v958_v26 = vadd.f32 %v10008_v48, %v740_v29 }
 0x248   : > { %1429 = vadd.xlane.f32.xlu1 %v1202_v22  ;;  %1427 = vadd.xlane.f32.xlu0 %v1201_v23  ;;  %v1073_v22 = vmax.f32 %v945_v61, 0.0  ;;  %v947_v23 = vadd.f32 %v9939_v44, %v729_v63  ;;  %v1076_v61 = vmax.f32 %v948_v11, 0.0  ;;  %v734_v63 = vld [vmem:[#allocation9 + $0x378] sm:$0xff] }
 0x249   : > { %v9981_v6 = vpop.xlane.xlu1 %1289  ;;  %v9983_v41 = vpop.xlane.xlu0 %1287 }
 0x24a   : > { %v1207_v19 = vmul.f32 %v15486_v4, %v1073_v22  ;;  %v1075_v62 = vmax.f32 %v947_v23, 0.0  ;;  %v1210_v51 = vmul.f32 %v15486_v4, %v1076_v61  ;;  %v954_v61 = vadd.f32 %v10008_v48, %v736_v7 }
 0x24c   : > { %1433 = vadd.xlane.f32.xlu1 %v1204_v43  ;;  %1431 = vadd.xlane.f32.xlu0 %v1203_v46  ;;  %v949_v46 = vadd.f32 %v9939_v44, %v731_v58  ;;  %v952_v58 = vadd.f32 %v9939_v44, %v734_v63  ;;  %v1209_v22 = vmul.f32 %v15486_v4, %v1075_v62  ;;  %v738_v62 = vld [vmem:[#allocation9 + $0x398] sm:$0xff] }
 0x24d   : > { %v9989_v8 = vpop.xlane.xlu1 %1293  ;;  %v9991_v42 = vpop.xlane.xlu0 %1291  ;;  %v956_v24 = vadd.f32 %v10008_v48, %v738_v62 }
 0x24e   : > { %v1077_v11 = vmax.f32 %v949_v46, 0.0  ;;  %v1080_v45 = vmax.f32 %v952_v58, 0.0 }
 0x250   : > { %1437 = vadd.xlane.f32.xlu1 %v1206_v47  ;;  %1435 = vadd.xlane.f32.xlu0 %v1205_v40  ;;  %v733_v47 = vld [vmem:[#allocation9 + $0x370] sm:$0xff]  ;;  %v1211_v63 = vmul.f32 %v15486_v4, %v1077_v11  ;;  %v1082_v11 = vmax.f32 %v954_v61, 0.0  ;;  %v1084_v61 = vmax.f32 %v956_v24, 0.0  ;;  %v744_v24 = vld [vmem:[#allocation9 + $0x3c8] sm:$0xff] }
 0x251   : > { %v9999_v31 = vpop.xlane.xlu1 %1297  ;;  %v10001_v43 = vpop.xlane.xlu0 %1295  ;;  %v951_v23 = vadd.f32 %v9939_v44, %v733_v47  ;;  %v737_v44 = vld [vmem:[#allocation9 + $0x390] sm:$0xff] }
 0x252   : > { %v955_v7 = vadd.f32 %v10008_v48, %v737_v44  ;;  %v1216_v62 = vmul.f32 %v15486_v4, %v1082_v11  ;;  %v741_v44 = vld [vmem:[#allocation9 + $0x3b0] sm:$0xff]  ;;  %v1218_v29 = vmul.f32 %v15486_v4, %v1084_v61  ;;  %v962_v61 = vadd.f32 %v10008_v48, %v744_v24 }
 0x253   : > { %v1079_v25 = vmax.f32 %v951_v23, 0.0 }
 0x254   : > { %1441 = vadd.xlane.f32.xlu1 %v1208_v33  ;;  %1439 = vadd.xlane.f32.xlu0 %v1207_v19  ;;  %v735_v33 = vld [vmem:[#allocation9 + $0x380] sm:$0xff] }
 0x255   : > { %v10010_v40 = vpop.xlane.xlu1 %1301  ;;  %v10012_v0 = vpop.xlane.xlu0 %1299  ;;  %v953_v46 = vadd.f32 %v10008_v48, %v735_v33  ;;  %v1213_v58 = vmul.f32 %v15486_v4, %v1079_v25  ;;  %v739_v33 = vld [vmem:[#allocation9 + $0x3a0] sm:$0xff] }
 0x257   : > { %v1081_v23 = vmax.f32 %v953_v46, 0.0  ;;  %v1083_v46 = vmax.f32 %v955_v7, 0.0  ;;  %v743_v7 = vld [vmem:[#allocation9 + $0x3c0] sm:$0xff] }
 0x258   : > { %1445 = vadd.xlane.f32.xlu1 %v1210_v51  ;;  %1443 = vadd.xlane.f32.xlu0 %v1209_v22  ;;  %v1214_v22 = vmul.f32 %v15486_v4, %v1080_v45  ;;  %v957_v45 = vadd.f32 %v10008_v48, %v739_v33 }
 0x259   : > { %v10018_v30 = vpop.xlane.xlu1 %1305  ;;  %v10020_v19 = vpop.xlane.xlu0 %1303  ;;  %v1215_v25 = vmul.f32 %v15486_v4, %v1081_v23  ;;  %v1217_v33 = vmul.f32 %v15486_v4, %v1083_v46  ;;  %v959_v23 = vadd.f32 %v10008_v48, %v741_v44  ;;  %v746_v46 = vld [vmem:[#allocation9 + $0x3d8] sm:$0xff]  ;;  %v745_v44 = vld [vmem:[#allocation9 + $0x3d0] sm:$0xff] }
 0x25a   : > { %v1085_v11 = vmax.f32 %v957_v45, 0.0  ;;  %v961_v45 = vadd.f32 %v10008_v48, %v743_v7  ;;  %v963_v24 = vadd.f32 %v10008_v48, %v745_v44  ;;  %v747_v7 = vld [vmem:[#allocation9 + $0x3e0] sm:$0xff]  ;;  %v749_v44 = vld [vmem:[#allocation9 + $0x3f0] sm:$0xff] }
 0x25c   : > { %1449 = vadd.xlane.f32.xlu1 %v1212_v36  ;;  %1447 = vadd.xlane.f32.xlu0 %v1211_v63 }
 0x25d   : > { %v10026_v47 = vpop.xlane.xlu1 %1309  ;;  %v10028_v51 = vpop.xlane.xlu0 %1307 }
 0x260   : > { %1453 = vadd.xlane.f32.xlu1 %v1214_v22  ;;  %1451 = vadd.xlane.f32.xlu0 %v1213_v58 }
 0x261   : > { %v10034_v36 = vpop.xlane.xlu1 %1313  ;;  %v10036_v63 = vpop.xlane.xlu0 %1311 }
 0x262   : > { %15492 = vst [vmem:[#allocation37_spill] sm:$0xff] %v10034_v36  ;;  %15493 = vst [vmem:[#allocation38_spill] sm:$0xff] %v10036_v63  ;;  %v1086_v36 = vmax.f32 %v958_v26, 0.0  ;;  %v960_v63 = vadd.f32 %v10008_v48, %v742_v1  ;;  %v1219_v1 = vmul.f32 %v15486_v4, %v1085_v11  ;;  %v1090_v11 = vmax.f32 %v962_v61, 0.0 }
 0x263   : > { %v965_v61 = vadd.f32 %v10008_v48, %v747_v7 }
 0x264   : > { %1457 = vadd.xlane.f32.xlu1 %v1216_v62  ;;  %1455 = vadd.xlane.f32.xlu0 %v1215_v25  ;;  %v1088_v26 = vmax.f32 %v960_v63, 0.0 }
 0x265   : > { %v10042_v22 = vpop.xlane.xlu1 %1317  ;;  %v10044_v58 = vpop.xlane.xlu0 %1315 }
 0x266   : > { %15494 = vst [vmem:[#allocation39_spill] sm:$0xff] %v10042_v22  ;;  %15495 = vst [vmem:[#allocation40_spill] sm:$0xff] %v10044_v58  ;;  %v1220_v22 = vmul.f32 %v15486_v4, %v1086_v36  ;;  %v1087_v58 = vmax.f32 %v959_v23, 0.0  ;;  %v964_v36 = vadd.f32 %v10008_v48, %v746_v46  ;;  %v1089_v23 = vmax.f32 %v961_v45, 0.0  ;;  %v750_v45 = vld [vmem:[#allocation9 + $0x3f8] sm:$0xff] }
 0x268   : > { %1461 = vadd.xlane.f32.xlu1 %v1218_v29  ;;  %1459 = vadd.xlane.f32.xlu0 %v1217_v33  ;;  %v1221_v63 = vmul.f32 %v15486_v4, %v1087_v58  ;;  %v1223_v46 = vmul.f32 %v15486_v4, %v1089_v23  ;;  %v1091_v58 = vmax.f32 %v963_v24, 0.0  ;;  %v967_v23 = vadd.f32 %v10008_v48, %v749_v44 }
 0x269   : > { %v10050_v62 = vpop.xlane.xlu1 %1321  ;;  %v10052_v25 = vpop.xlane.xlu0 %1319 }
 0x26a   : > { %15496 = vst [vmem:[#allocation41_spill] sm:$0xff] %v10050_v62  ;;  %15497 = vst [vmem:[#allocation42_spill] sm:$0xff] %v10052_v25  ;;  %v1222_v62 = vmul.f32 %v15486_v4, %v1088_v26  ;;  %v748_v25 = vld [vmem:[#allocation9 + $0x3e8] sm:$0xff]  ;;  %v1224_v26 = vmul.f32 %v15486_v4, %v1090_v11  ;;  %v1225_v11 = vmul.f32 %v15486_v4, %v1091_v58 }
 0x26c   : > { %1465 = vadd.xlane.f32.xlu1 %v1220_v22  ;;  %1463 = vadd.xlane.f32.xlu0 %v1219_v1 }
 0x26d   : > { %v10058_v29 = vpop.xlane.xlu1 %1325  ;;  %v10060_v33 = vpop.xlane.xlu0 %1323 }
 0x26e   : > { %15498 = vst [vmem:[#allocation43_spill] sm:$0xff] %v10058_v29  ;;  %15499 = vst [vmem:[#allocation44_spill] sm:$0xff] %v10060_v33  ;;  %v1092_v29 = vmax.f32 %v964_v36, 0.0  ;;  %v966_v33 = vadd.f32 %v10008_v48, %v748_v25  ;;  %v968_v36 = vadd.f32 %v10008_v48, %v750_v45 }
 0x270   : > { %1469 = vadd.xlane.f32.xlu1 %v1222_v62  ;;  %1467 = vadd.xlane.f32.xlu0 %v1221_v63  ;;  %v1226_v25 = vmul.f32 %v15486_v4, %v1092_v29 }
 0x271   : > { %v10066_v22 = vpop.xlane.xlu1 %1361  ;;  %v10068_v1 = vpop.xlane.xlu0 %1359 }
 0x272   : > { %15500 = vst [vmem:[#allocation45_spill] sm:$0xff] %v10066_v22  ;;  %15501 = vst [vmem:[#allocation46_spill] sm:$0xff] %v10068_v1  ;;  %v1094_v22 = vmax.f32 %v966_v33, 0.0  ;;  %v1093_v1 = vmax.f32 %v965_v61, 0.0  ;;  %v1096_v33 = vmax.f32 %v968_v36, 0.0 }
 0x274   : > { %1473 = vadd.xlane.f32.xlu1 %v1224_v26  ;;  %1471 = vadd.xlane.f32.xlu0 %v1223_v46  ;;  %v1228_v26 = vmul.f32 %v15486_v4, %v1094_v22  ;;  %v1227_v46 = vmul.f32 %v15486_v4, %v1093_v1  ;;  %v1230_v48 = vmul.f32 %v15486_v4, %v1096_v33 }
 0x275   : > { %v10074_v62 = vpop.xlane.xlu1 %1365  ;;  %v10076_v63 = vpop.xlane.xlu0 %1363 }
 0x276   : > { %15502 = vst [vmem:[#allocation47_spill] sm:$0xff] %v10074_v62  ;;  %15503 = vst [vmem:[#allocation48_spill] sm:$0xff] %v10076_v63  ;;  %v1095_v62 = vmax.f32 %v967_v23, 0.0 }
 0x278   : > { %1477 = vadd.xlane.f32.xlu1 %v1226_v25  ;;  %1475 = vadd.xlane.f32.xlu0 %v1225_v11  ;;  %v1229_v61 = vmul.f32 %v15486_v4, %v1095_v62 }
 0x279   : > { %v10082_v24 = vpop.xlane.xlu1 %1369  ;;  %v10084_v7 = vpop.xlane.xlu0 %1367 }
 0x27a   : > { %15504 = vst [vmem:[#allocation49_spill] sm:$0xff] %v10082_v24  ;;  %15505 = vst [vmem:[#allocation50_spill] sm:$0xff] %v10084_v7  ;;  %v10167_v7 = vadd.f32 %v9852_v34, %v9860_v49 }
 0x27c   : > { %1481 = vadd.xlane.f32.xlu1 %v1228_v26  ;;  %1479 = vadd.xlane.f32.xlu0 %v1227_v46  ;;  %15521 = vst [vmem:[#allocation66_spill] sm:$0xff] %v10167_v7 }
 0x27d   : > { %v10088_v29 = vpop.xlane.xlu1 %1373  ;;  %v10090_v58 = vpop.xlane.xlu0 %1371 }
 0x27e   : > { %15506 = vst [vmem:[#allocation51_spill] sm:$0xff] %v10088_v29  ;;  %15507 = vst [vmem:[#allocation52_spill] sm:$0xff] %v10090_v58  ;;  %v10157_v29 = vadd.f32 %v9854_v35, %v9862_v50 }
 0x280   : > { %1485 = vadd.xlane.f32.xlu1 %v1230_v48  ;;  %1483 = vadd.xlane.f32.xlu0 %v1229_v61  ;;  %15518 = vst [vmem:[#allocation63_spill] sm:$0xff] %v10157_v29 }
 0x281   : > { %v10094_v45 = vpop.xlane.xlu1 %1377  ;;  %v10096_v44 = vpop.xlane.xlu0 %1375 }
 0x282   : > { %15508 = vst [vmem:[#allocation53_spill] sm:$0xff] %v10094_v45  ;;  %15509 = vst [vmem:[#allocation54_spill] sm:$0xff] %v10096_v44  ;;  %v10153_v44 = vadd.f32 %v9846_v20, %v9874_v60 }
 0x284   : > { %15517 = vst [vmem:[#allocation62_spill] sm:$0xff] %v10153_v44 }
 0x285   : > { %v10098_v22 = vpop.xlane.xlu1 %1381  ;;  %v10100_v1 = vpop.xlane.xlu0 %1379 }
 0x286   : > { %15510 = vst [vmem:[#allocation55_spill] sm:$0xff] %v10098_v22  ;;  %15511 = vst [vmem:[#allocation56_spill] sm:$0xff] %v10100_v1 }
 0x289   : > { %v10102_v36 = vpop.xlane.xlu1 %1385  ;;  %v10104_v25 = vpop.xlane.xlu0 %1383 }
 0x28a   : > { %15512 = vst [vmem:[#allocation57_spill] sm:$0xff] %v10102_v36  ;;  %15513 = vst [vmem:[#allocation58_spill] sm:$0xff] %v10104_v25 }
 0x28d   : > { %v10106_v11 = vpop.xlane.xlu1 %1389  ;;  %v10108_v23 = vpop.xlane.xlu0 %1387 }
 0x28e   : > { %15514 = vst [vmem:[#allocation59_spill] sm:$0xff] %v10106_v11  ;;  %15515 = vst [vmem:[#allocation60_spill] sm:$0xff] %v10108_v23 }
 0x291   : > { %v10110_v26 = vpop.xlane.xlu1 %1329  ;;  %v10112_v62 = vpop.xlane.xlu0 %1327  ;;  %1501 = vbcast.lane.b32.xlu1 %v15485_v3, 280 }
 0x295   : > { %v10115_v46 = vpop.xlane.xlu1 %1333  ;;  %v10117_v33 = vpop.xlane.xlu0 %1331  ;;  %1509 = vbcast.lane.b32.xlu1 %v15485_v3, 296 }
 0x296   : > { %1505 = vbcast.lane.b32.xlu0 %v15485_v3, 288 }
 0x299   : > { %v10121_v48 = vpop.xlane.xlu1 %1337  ;;  %v10123_v61 = vpop.xlane.xlu0 %1335  ;;  %1517 = vbcast.lane.b32.xlu1 %v15485_v3, 312 }
 0x29a   : > { %1513 = vbcast.lane.b32.xlu0 %v15485_v3, 304 }
 0x29d   : > { %v10127_v4 = vpop.xlane.xlu1 %1341  ;;  %v10129_v11 = vpop.xlane.xlu0 %1339  ;;  %1525 = vbcast.lane.b32.xlu1 %v15485_v3, 328 }
 0x29e   : > { %1521 = vbcast.lane.b32.xlu0 %v15485_v3, 320 }
 0x2a1   : > { %v10133_v23 = vpop.xlane.xlu1 %1345  ;;  %v10135_v36 = vpop.xlane.xlu0 %1343  ;;  %1533 = vbcast.lane.b32.xlu1 %v15485_v3, 344 }
 0x2a2   : > { %1529 = vbcast.lane.b32.xlu0 %v15485_v3, 336 }
 0x2a5   : > { %v10139_v25 = vpop.xlane.xlu1 %1349  ;;  %v10141_v22 = vpop.xlane.xlu0 %1347  ;;  %1541 = vbcast.lane.b32.xlu1 %v15485_v3, 360 }
 0x2a6   : > { %1537 = vbcast.lane.b32.xlu0 %v15485_v3, 352 }
 0x2a9   : > { %v10145_v1 = vpop.xlane.xlu1 %1353  ;;  %v10147_v45 = vpop.xlane.xlu0 %1351  ;;  %1549 = vbcast.lane.b32.xlu1 %v15485_v3, 376 }
 0x2aa   : > { %15516 = vst [vmem:[#allocation61_spill] sm:$0xff] %v10145_v1  ;;  %1545 = vbcast.lane.b32.xlu0 %v15485_v3, 368 }
 0x2ad   : > { %v10159_v58 = vpop.xlane.xlu1 %1357  ;;  %v10161_v24 = vpop.xlane.xlu0 %1355  ;;  %1827 = vperm.xlu1 %8759, %v10153_v44  }
 0x2ae   : > { %15519 = vst [vmem:[#allocation64_spill] sm:$0xff] %v10159_v58  ;;  %15520 = vst [vmem:[#allocation65_spill] sm:$0xff] %v10161_v24  ;;  %1824 = vperm.xlu0 %8758, %v10157_v29  }
 0x2b1   : > { %v10169_v3 = vpop.xlane.xlu1 %1393  ;;  %v10171_v60 = vpop.xlane.xlu0 %1391  ;;  %1830 = vperm.xlu1 %8759, %v10167_v7  }
 0x2b2   : > { %15522 = vst [vmem:[#allocation67_spill] sm:$0xff] %v10169_v3  ;;  %15523 = vst [vmem:[#allocation68_spill] sm:$0xff] %v10171_v60 }
 0x2b5   : > { %v10174_v50 = vpop.xlane.xlu1 %1397  ;;  %v10176_v63 = vpop.xlane.xlu0 %1395 }
 0x2b6   : > { %15524 = vst [vmem:[#allocation69_spill] sm:$0xff] %v10174_v50  ;;  %15525 = vst [vmem:[#allocation70_spill] sm:$0xff] %v10176_v63 }
 0x2b9   : > { %v10178_v58 = vpop.xlane.xlu1 %1401  ;;  %v10180_v24 = vpop.xlane.xlu0 %1399 }
 0x2ba   : > { %15526 = vst [vmem:[#allocation71_spill] sm:$0xff] %v10178_v58  ;;  %15527 = vst [vmem:[#allocation72_spill] sm:$0xff] %v10180_v24 }
 0x2bd   : > { %v10182_v44 = vpop.xlane.xlu1 %1405  ;;  %v10184_v29 = vpop.xlane.xlu0 %1403 }
 0x2be   : > { %15528 = vst [vmem:[#allocation73_spill] sm:$0xff] %v10182_v44  ;;  %15529 = vst [vmem:[#allocation74_spill] sm:$0xff] %v10184_v29 }
 0x2c1   : > { %v10186_v49 = vpop.xlane.xlu1 %1409  ;;  %v10188_v1 = vpop.xlane.xlu0 %1407 }
 0x2c2   : > { %15530 = vst [vmem:[#allocation75_spill] sm:$0xff] %v10186_v49  ;;  %15531 = vst [vmem:[#allocation76_spill] sm:$0xff] %v10188_v1 }
 0x2c5   : > { %v10190_v3 = vpop.xlane.xlu1 %1413  ;;  %v10192_v60 = vpop.xlane.xlu0 %1411 }
 0x2c6   : > { %15532 = vst [vmem:[#allocation77_spill] sm:$0xff] %v10190_v3  ;;  %15533 = vst [vmem:[#allocation78_spill] sm:$0xff] %v10192_v60 }
 0x2c9   : > { %v10194_v7 = vpop.xlane.xlu1 %1417  ;;  %v10196_v50 = vpop.xlane.xlu0 %1415 }
 0x2ca   : > { %15534 = vst [vmem:[#allocation79_spill] sm:$0xff] %v10194_v7  ;;  %15535 = vst [vmem:[#allocation80_spill] sm:$0xff] %v10196_v50 }
 0x2cd   : > { %v10198_v63 = vpop.xlane.xlu1 %1421  ;;  %v10200_v58 = vpop.xlane.xlu0 %1419 }
 0x2ce   : > { %15536 = vst [vmem:[#allocation81_spill] sm:$0xff] %v10198_v63  ;;  %15537 = vst [vmem:[#allocation82_spill] sm:$0xff] %v10200_v58 }
 0x2d1   : > { %v10202_v24 = vpop.xlane.xlu1 %1425  ;;  %v10204_v44 = vpop.xlane.xlu0 %1423 }
 0x2d2   : > { %15538 = vst [vmem:[#allocation83_spill] sm:$0xff] %v10202_v24  ;;  %15539 = vst [vmem:[#allocation84_spill] sm:$0xff] %v10204_v44 }
 0x2d5   : > { %v10206_v29 = vpop.xlane.xlu1 %1429  ;;  %v10208_v49 = vpop.xlane.xlu0 %1427 }
 0x2d6   : > { %15540 = vst [vmem:[#allocation85_spill] sm:$0xff] %v10206_v29  ;;  %15541 = vst [vmem:[#allocation86_spill] sm:$0xff] %v10208_v49 }
 0x2d9   : > { %v10210_v1 = vpop.xlane.xlu1 %1433  ;;  %v10212_v3 = vpop.xlane.xlu0 %1431 }
 0x2da   : > { %15542 = vst [vmem:[#allocation87_spill] sm:$0xff] %v10210_v1  ;;  %15543 = vst [vmem:[#allocation88_spill] sm:$0xff] %v10212_v3 }
 0x2dd   : > { %v10214_v60 = vpop.xlane.xlu1 %1437  ;;  %v10216_v7 = vpop.xlane.xlu0 %1435 }
 0x2de   : > { %15544 = vst [vmem:[#allocation89_spill] sm:$0xff] %v10214_v60  ;;  %15545 = vst [vmem:[#allocation90_spill] sm:$0xff] %v10216_v7 }
 0x2e1   : > { %v10218_v50 = vpop.xlane.xlu1 %1441  ;;  %v10220_v63 = vpop.xlane.xlu0 %1439 }
 0x2e2   : > { %15546 = vst [vmem:[#allocation91_spill] sm:$0xff] %v10218_v50  ;;  %15547 = vst [vmem:[#allocation92_spill] sm:$0xff] %v10220_v63 }
 0x2e5   : > { %v10222_v58 = vpop.xlane.xlu1 %1445  ;;  %v10224_v24 = vpop.xlane.xlu0 %1443 }
 0x2e6   : > { %15548 = vst [vmem:[#allocation93_spill] sm:$0xff] %v10222_v58  ;;  %15549 = vst [vmem:[#allocation94_spill] sm:$0xff] %v10224_v24 }
 0x2e9   : > { %v10226_v44 = vpop.xlane.xlu1 %1449  ;;  %v10228_v29 = vpop.xlane.xlu0 %1447 }
 0x2ea   : > { %15550 = vst [vmem:[#allocation95_spill] sm:$0xff] %v10226_v44  ;;  %15551 = vst [vmem:[#allocation96_spill] sm:$0xff] %v10228_v29 }
 0x2ed   : > { %v10230_v49 = vpop.xlane.xlu1 %1453  ;;  %v10232_v1 = vpop.xlane.xlu0 %1451 }
 0x2ee   : > { %15552 = vst [vmem:[#allocation97_spill] sm:$0xff] %v10230_v49  ;;  %15553 = vst [vmem:[#allocation98_spill] sm:$0xff] %v10232_v1 }
 0x2f1   : > { %v10234_v3 = vpop.xlane.xlu1 %1457  ;;  %v10236_v60 = vpop.xlane.xlu0 %1455 }
 0x2f2   : > { %15554 = vst [vmem:[#allocation99_spill] sm:$0xff] %v10234_v3  ;;  %15555 = vst [vmem:[#allocation100_spill] sm:$0xff] %v10236_v60 }
 0x2f5   : > { %v10238_v7 = vpop.xlane.xlu1 %1461  ;;  %v10240_v50 = vpop.xlane.xlu0 %1459 }
 0x2f6   : > { %15556 = vst [vmem:[#allocation101_spill] sm:$0xff] %v10238_v7  ;;  %15557 = vst [vmem:[#allocation102_spill] sm:$0xff] %v10240_v50 }
 0x2f9   : > { %v10242_v63 = vpop.xlane.xlu1 %1465  ;;  %v10244_v58 = vpop.xlane.xlu0 %1463 }
 0x2fa   : > { %15558 = vst [vmem:[#allocation103_spill] sm:$0xff] %v10242_v63  ;;  %15559 = vst [vmem:[#allocation104_spill] sm:$0xff] %v10244_v58 }
 0x2fd   : > { %v10246_v24 = vpop.xlane.xlu1 %1469  ;;  %v10248_v44 = vpop.xlane.xlu0 %1467 }
 0x2fe   : > { %15560 = vst [vmem:[#allocation105_spill] sm:$0xff] %v10246_v24 }
 0x301   : > { %v10250_v29 = vpop.xlane.xlu1 %1473  ;;  %v10252_v49 = vpop.xlane.xlu0 %1471 }
 0x302   : > { %15561 = vst [vmem:[#allocation106_spill] sm:$0xff] %v10250_v29 }
 0x305   : > { %v10254_v1 = vpop.xlane.xlu1 %1477  ;;  %v10256_v3 = vpop.xlane.xlu0 %1475 }
 0x306   : > { %15562 = vst [vmem:[#allocation107_spill] sm:$0xff] %v10254_v1 }
 0x309   : > { %v10258_v60 = vpop.xlane.xlu1 %1481  ;;  %v10260_v7 = vpop.xlane.xlu0 %1479 }
 0x30a   : > { %15563 = vst [vmem:[#allocation108_spill] sm:$0xff] %v10258_v60 }
 0x30d   : > { %v10262_v50 = vpop.xlane.xlu1 %1485  ;;  %v10264_v63 = vpop.xlane.xlu0 %1483 }
 0x30e   : > { %15564 = vst [vmem:[#allocation109_spill] sm:$0xff] %v10262_v50  ;;  %15565 = vst [vmem:[#allocation110_spill] sm:$0xff] %v10264_v63 }
 0x311   : > { %v10266_v58 = vpop.permute.xlu1 %1501  ;;  %v10268_v24 = vpop.permute.xlu0 %1505 }
 0x312   : > { %v10272_v29 = vadd.f32 %v10266_v58, %v9872_v59  ;;  %v10276_v1 = vadd.f32 %v10268_v24, %v9882_v10 }
 0x314   : > { %15566 = vst [vmem:[#allocation111_spill] sm:$0xff] %v10272_v29  ;;  %15567 = vst [vmem:[#allocation112_spill] sm:$0xff] %v10276_v1  ;;  %1833 = vperm.xlu0 %8758, %v10272_v29   ;;  %1836 = vperm.xlu1 %8759, %v10276_v1  }
 0x315   : > { %v10280_v60 = vpop.permute.xlu1 %1509  ;;  %v10282_v50 = vpop.permute.xlu0 %1513 }
 0x316   : > { %v10286_v63 = vadd.f32 %v10280_v60, %v9880_v9  ;;  %v10290_v59 = vadd.f32 %v10282_v50, %v9890_v21 }
 0x318   : > { %15568 = vst [vmem:[#allocation113_spill] sm:$0xff] %v10286_v63  ;;  %15569 = vst [vmem:[#allocation114_spill] sm:$0xff] %v10290_v59  ;;  %1839 = vperm.xlu0 %8758, %v10286_v63   ;;  %1842 = vperm.xlu1 %8759, %v10290_v59  }
 0x319   : > { %v10294_v10 = vpop.permute.xlu1 %1517  ;;  %v10296_v29 = vpop.permute.xlu0 %1521 }
 0x31a   : > { %v10300_v1 = vadd.f32 %v10294_v10, %v9888_v18  ;;  %v10304_v9 = vadd.f32 %v10296_v29, %v9898_v37 }
 0x31c   : > { %15570 = vst [vmem:[#allocation115_spill] sm:$0xff] %v10300_v1  ;;  %15571 = vst [vmem:[#allocation116_spill] sm:$0xff] %v10304_v9  ;;  %1845 = vperm.xlu0 %8758, %v10300_v1   ;;  %1848 = vperm.xlu1 %8759, %v10304_v9  }
 0x31d   : > { %v10308_v21 = vpop.permute.xlu1 %1525  ;;  %v10310_v63 = vpop.permute.xlu0 %1529 }
 0x31e   : > { %v10314_v59 = vadd.f32 %v10308_v21, %v9896_v32  ;;  %v10318_v18 = vadd.f32 %v10310_v63, %v9906_v53 }
 0x320   : > { %15572 = vst [vmem:[#allocation117_spill] sm:$0xff] %v10314_v59  ;;  %15573 = vst [vmem:[#allocation118_spill] sm:$0xff] %v10318_v18  ;;  %1851 = vperm.xlu0 %8758, %v10314_v59   ;;  %1854 = vperm.xlu1 %8759, %v10318_v18  }
 0x321   : > { %v10322_v37 = vpop.permute.xlu1 %1533  ;;  %v10324_v1 = vpop.permute.xlu0 %1537 }
 0x322   : > { %v10328_v9 = vadd.f32 %v10322_v37, %v9904_v52  ;;  %v10332_v32 = vadd.f32 %v10324_v1, %v9914_v5 }
 0x324   : > { %15574 = vst [vmem:[#allocation119_spill] sm:$0xff] %v10328_v9  ;;  %15575 = vst [vmem:[#allocation120_spill] sm:$0xff] %v10332_v32  ;;  %1857 = vperm.xlu0 %8758, %v10328_v9   ;;  %1860 = vperm.xlu1 %8759, %v10332_v32   ;;  %v10354_v32 = vadd.f32 %v9854_v35, %v9932_v38  ;;  %v10378_v38 = vadd.f32 %v10268_v24, %v9951_v13 }
 0x325   : > { %v10336_v53 = vpop.permute.xlu1 %1541  ;;  %v10338_v59 = vpop.permute.xlu0 %1545  ;;  %v10398_v13 = vadd.f32 %v10296_v29, %v9967_v55  ;;  %v10418_v55 = vadd.f32 %v10324_v1, %v9983_v41 }
 0x326   : > { %v10342_v18 = vadd.f32 %v10336_v53, %v9912_v2  ;;  %v10346_v52 = vadd.f32 %v10338_v59, %v9922_v17  ;;  %15578 = vst [vmem:[#allocation123_spill] sm:$0xff] %v10354_v32  ;;  %v10364_v2 = vadd.f32 %v9846_v20, %v9930_v39  ;;  %v10368_v17 = vadd.f32 %v9852_v34, %v9943_v57 }
 0x327   : > { %15583 = vst [vmem:[#allocation128_spill] sm:$0xff] %v10378_v38  ;;  %v10384_v39 = vadd.f32 %v10280_v60, %v9949_v12  ;;  %v10388_v57 = vadd.f32 %v10282_v50, %v9959_v28  ;;  %15587 = vst [vmem:[#allocation132_spill] sm:$0xff] %v10398_v13  ;;  %v10404_v12 = vadd.f32 %v10308_v21, %v9965_v54 }
 0x328   : > { %15576 = vst [vmem:[#allocation121_spill] sm:$0xff] %v10342_v18  ;;  %15577 = vst [vmem:[#allocation122_spill] sm:$0xff] %v10346_v52  ;;  %1863 = vperm.xlu0 %8758, %v10342_v18   ;;  %1866 = vperm.xlu1 %8759, %v10346_v52   ;;  %v10408_v28 = vadd.f32 %v10310_v63, %v9975_v15  ;;  %v10424_v54 = vadd.f32 %v10336_v53, %v9981_v6  ;;  %v15688_v52 = vld [vmem:[#allocation73_spill] sm:$0xff]  ;;  %v15692_v18 = vld [vmem:[#allocation75_spill] sm:$0xff] }
 0x329   : > { %v10350_v5 = vpop.permute.xlu1 %1549  ;;  %15580 = vst [vmem:[#allocation125_spill] sm:$0xff] %v10364_v2  ;;  %15581 = vst [vmem:[#allocation126_spill] sm:$0xff] %v10368_v17  ;;  %v10428_v15 = vadd.f32 %v10338_v59, %v9991_v42  ;;  %v10444_v6 = vadd.f32 %v9846_v20, %v9999_v31  ;;  %v10448_v42 = vadd.f32 %v9852_v34, %v10012_v0 }
 0x32a   : > { %v10358_v9 = vadd.f32 %v10350_v5, %v9920_v16  ;;  %v10374_v16 = vadd.f32 %v10266_v58, %v9941_v56  ;;  %15584 = vst [vmem:[#allocation129_spill] sm:$0xff] %v10384_v39  ;;  %15585 = vst [vmem:[#allocation130_spill] sm:$0xff] %v10388_v57  ;;  %v10394_v56 = vadd.f32 %v10294_v10, %v9957_v27 }
 0x32b   : > { %15588 = vst [vmem:[#allocation133_spill] sm:$0xff] %v10404_v12  ;;  %15589 = vst [vmem:[#allocation134_spill] sm:$0xff] %v10408_v28  ;;  %v10414_v27 = vadd.f32 %v10322_v37, %v9973_v14  ;;  %v10434_v14 = vadd.f32 %v9854_v35, %v10001_v43  ;;  %v10438_v41 = vadd.f32 %v10350_v5, %v9989_v8 }
 0x32c   : > { %15579 = vst [vmem:[#allocation124_spill] sm:$0xff] %v10358_v9  ;;  %1869 = vperm.xlu0 %8758, %v10358_v9   ;;  %1872 = vperm.xlu1 %8759, %v10354_v32   ;;  %15582 = vst [vmem:[#allocation127_spill] sm:$0xff] %v10374_v16  ;;  %v10454_v8 = vadd.f32 %v10266_v58, %v10010_v40  ;;  %v10458_v43 = vadd.f32 %v10268_v24, %v10020_v19  ;;  %v15603_v19 = vld [vmem:[#allocation38_spill] sm:$0xff]  ;;  %v15684_v32 = vld [vmem:[#allocation71_spill] sm:$0xff] }
 0x32d   : > { %15586 = vst [vmem:[#allocation131_spill] sm:$0xff] %v10394_v56  ;;  %15590 = vst [vmem:[#allocation135_spill] sm:$0xff] %v10414_v27  ;;  %v10464_v0 = vadd.f32 %v10280_v60, %v10018_v30  ;;  %v10468_v31 = vadd.f32 %v10282_v50, %v10028_v51  ;;  %v10474_v40 = vadd.f32 %v10294_v10, %v10026_v47  ;;  %v15605_v30 = vld [vmem:[#allocation37_spill] sm:$0xff]  ;;  %v15609_v47 = vld [vmem:[#allocation39_spill] sm:$0xff] }
 0x32e   : > { %15591 = vst [vmem:[#allocation136_spill] sm:$0xff] %v10418_v55  ;;  %15592 = vst [vmem:[#allocation137_spill] sm:$0xff] %v10424_v54  ;;  %v10484_v51 = vadd.f32 %v10308_v21, %v15605_v30  ;;  %v15613_v30 = vld [vmem:[#allocation41_spill] sm:$0xff]  ;;  %v15720_v9 = vld [vmem:[#allocation90_spill] sm:$0xff] }
 0x32f   : > { %15593 = vst [vmem:[#allocation138_spill] sm:$0xff] %v10428_v15  ;;  %15594 = vst [vmem:[#allocation139_spill] sm:$0xff] %v10434_v14 }
 0x330   : > { %1875 = vperm.xlu0 %8758, %v10364_v2   ;;  %1878 = vperm.xlu1 %8759, %v10368_v17   ;;  %15595 = vst [vmem:[#allocation140_spill] sm:$0xff] %v10438_v41  ;;  %15596 = vst [vmem:[#allocation141_spill] sm:$0xff] %v10444_v6  ;;  %v15680_v17 = vld [vmem:[#allocation69_spill] sm:$0xff] }
 0x331   : > { %15597 = vst [vmem:[#allocation142_spill] sm:$0xff] %v10448_v42  ;;  %15598 = vst [vmem:[#allocation143_spill] sm:$0xff] %v10454_v8 }
 0x332   : > { %15599 = vst [vmem:[#allocation144_spill] sm:$0xff] %v10458_v43  ;;  %15600 = vst [vmem:[#allocation145_spill] sm:$0xff] %v10464_v0 }
 0x333   : > { %15601 = vst [vmem:[#allocation146_spill] sm:$0xff] %v10468_v31  ;;  %15602 = vst [vmem:[#allocation147_spill] sm:$0xff] %v10474_v40 }
 0x334   : > { %1881 = vperm.xlu0 %8758, %v10374_v16   ;;  %1884 = vperm.xlu1 %8759, %v10378_v38   ;;  %15606 = vst [vmem:[#allocation37_spill] sm:$0xff] %v10484_v51  ;;  %v15676_v38 = vld [vmem:[#allocation67_spill] sm:$0xff]  ;;  %v15716_v16 = vld [vmem:[#allocation88_spill] sm:$0xff] }
 0x338   : > { %1887 = vperm.xlu0 %8758, %v10384_v39   ;;  %1890 = vperm.xlu1 %8759, %v10388_v57   ;;  %v15671_v57 = vld [vmem:[#allocation68_spill] sm:$0xff] }
 0x33c   : > { %1893 = vperm.xlu0 %8758, %v10394_v56   ;;  %1896 = vperm.xlu1 %8759, %v10398_v13   ;;  %v15665_v13 = vld [vmem:[#allocation57_spill] sm:$0xff]  ;;  %v15712_v56 = vld [vmem:[#allocation83_spill] sm:$0xff] }
 0x340   : > { %1899 = vperm.xlu0 %8758, %v10404_v12   ;;  %1902 = vperm.xlu1 %8759, %v10408_v28   ;;  %v15660_v28 = vld [vmem:[#allocation55_spill] sm:$0xff] }
 0x344   : > { %1905 = vperm.xlu0 %8758, %v10414_v27   ;;  %1908 = vperm.xlu1 %8759, %v10418_v55   ;;  %v15707_v27 = vld [vmem:[#allocation84_spill] sm:$0xff] }
 0x348   : > { %1911 = vperm.xlu0 %8758, %v10424_v54   ;;  %1914 = vperm.xlu1 %8759, %v10428_v15  }
 0x34c   : > { %1917 = vperm.xlu0 %8758, %v10438_v41   ;;  %1920 = vperm.xlu1 %8759, %v10434_v14   ;;  %v15701_v41 = vld [vmem:[#allocation79_spill] sm:$0xff] }
 0x350   : > { %1923 = vperm.xlu0 %8758, %v10444_v6   ;;  %1926 = vperm.xlu1 %8759, %v10448_v42   ;;  %v10478_v42 = vadd.f32 %v10296_v29, %v15603_v19  ;;  %v10494_v19 = vadd.f32 %v10322_v37, %v15609_v47  ;;  %v15618_v47 = vld [vmem:[#allocation43_spill] sm:$0xff] }
 0x352   : > { %15604 = vst [vmem:[#allocation38_spill] sm:$0xff] %v10478_v42  ;;  %15610 = vst [vmem:[#allocation39_spill] sm:$0xff] %v10494_v19 }
 0x354   : > { %1929 = vperm.xlu0 %8758, %v10454_v8   ;;  %1932 = vperm.xlu1 %8759, %v10458_v43   ;;  %v15607_v43 = vld [vmem:[#allocation40_spill] sm:$0xff]  ;;  %v15696_v8 = vld [vmem:[#allocation77_spill] sm:$0xff] }
 0x355   : > { %v10488_v14 = vadd.f32 %v10310_v63, %v15607_v43  ;;  %v10504_v43 = vadd.f32 %v10336_v53, %v15613_v30  ;;  %v10528_v30 = vadd.f32 %v9852_v34, %v10117_v33  ;;  %v10548_v33 = vadd.f32 %v10282_v50, %v10129_v11 }
 0x356   : > { %v10564_v11 = vadd.f32 %v10308_v21, %v10133_v23  ;;  %v15632_v23 = vld [vmem:[#allocation61_spill] sm:$0xff] }
 0x357   : > { %15608 = vst [vmem:[#allocation40_spill] sm:$0xff] %v10488_v14  ;;  %15614 = vst [vmem:[#allocation41_spill] sm:$0xff] %v10504_v43 }
 0x358   : > { %1935 = vperm.xlu0 %8758, %v10464_v0   ;;  %1938 = vperm.xlu1 %8759, %v10468_v31   ;;  %v15611_v31 = vld [vmem:[#allocation42_spill] sm:$0xff]  ;;  %15621 = vst [vmem:[#allocation150_spill] sm:$0xff] %v10528_v30  ;;  %15625 = vst [vmem:[#allocation154_spill] sm:$0xff] %v10548_v33 }
 0x359   : > { %v10498_v15 = vadd.f32 %v10324_v1, %v15611_v31  ;;  %v10514_v31 = vadd.f32 %v9854_v35, %v10112_v62  ;;  %v10534_v62 = vadd.f32 %v10266_v58, %v10115_v46  ;;  %v10554_v46 = vadd.f32 %v10294_v10, %v10127_v4  ;;  %15628 = vst [vmem:[#allocation157_spill] sm:$0xff] %v10564_v11 }
 0x35a   : > { %v10574_v4 = vadd.f32 %v10322_v37, %v10139_v25  ;;  %v10592_v25 = vpop.permute.xlu1 %1827 }
 0x35b   : > { %15612 = vst [vmem:[#allocation42_spill] sm:$0xff] %v10498_v15  ;;  %15617 = vst [vmem:[#allocation148_spill] sm:$0xff] %v10514_v31 }
 0x35c   : > { %1941 = vperm.xlu0 %8758, %v10474_v40   ;;  %1944 = vperm.xlu1 %8759, %v10478_v42   ;;  %v15615_v42 = vld [vmem:[#allocation44_spill] sm:$0xff]  ;;  %15622 = vst [vmem:[#allocation151_spill] sm:$0xff] %v10534_v62  ;;  %15626 = vst [vmem:[#allocation155_spill] sm:$0xff] %v10554_v46 }
 0x35d   : > { %v10508_v55 = vadd.f32 %v10338_v59, %v15615_v42  ;;  %v10524_v42 = vadd.f32 %v9846_v20, %v10110_v26  ;;  %v10544_v26 = vadd.f32 %v10280_v60, %v10121_v48  ;;  %v10568_v48 = vadd.f32 %v10310_v63, %v10141_v22  ;;  %15630 = vst [vmem:[#allocation159_spill] sm:$0xff] %v10574_v4 }
 0x35e   : > { %v10584_v22 = vadd.f32 %v10336_v53, %v15632_v23 }
 0x35f   : > { %15616 = vst [vmem:[#allocation44_spill] sm:$0xff] %v10508_v55  ;;  %15620 = vst [vmem:[#allocation149_spill] sm:$0xff] %v10524_v42 }
 0x360   : > { %1947 = vperm.xlu0 %8758, %v10484_v51   ;;  %1950 = vperm.xlu1 %8759, %v10488_v14   ;;  %v10518_v14 = vadd.f32 %v10350_v5, %v15618_v47  ;;  %v10538_v47 = vadd.f32 %v10268_v24, %v10123_v61  ;;  %15624 = vst [vmem:[#allocation153_spill] sm:$0xff] %v10544_v26  ;;  %15629 = vst [vmem:[#allocation158_spill] sm:$0xff] %v10568_v48 }
 0x361   : > { %v10558_v61 = vadd.f32 %v10296_v29, %v10135_v36  ;;  %v10578_v36 = vadd.f32 %v10324_v1, %v10147_v45  ;;  %15633 = vst [vmem:[#allocation61_spill] sm:$0xff] %v10584_v22  ;;  %v15636_v45 = vld [vmem:[#allocation46_spill] sm:$0xff] }
 0x362   : > { %15619 = vst [vmem:[#allocation43_spill] sm:$0xff] %v10518_v14  ;;  %15623 = vst [vmem:[#allocation152_spill] sm:$0xff] %v10538_v47 }
 0x363   : > { %15627 = vst [vmem:[#allocation156_spill] sm:$0xff] %v10558_v61  ;;  %15631 = vst [vmem:[#allocation160_spill] sm:$0xff] %v10578_v36 }
 0x364   : > { %1953 = vperm.xlu0 %8758, %v10494_v19   ;;  %1956 = vperm.xlu1 %8759, %v10498_v15  }
 0x368   : > { %1959 = vperm.xlu0 %8758, %v10504_v43   ;;  %1962 = vperm.xlu1 %8759, %v10508_v55  }
 0x36c   : > { %1965 = vperm.xlu0 %8758, %v10518_v14   ;;  %1968 = vperm.xlu1 %8759, %v10514_v31   ;;  %v10612_v31 = vpop.permute.xlu0 %1824 }
 0x370   : > { %1971 = vperm.xlu0 %8758, %v10524_v42   ;;  %1974 = vperm.xlu1 %8759, %v10528_v30   ;;  %v15642_v30 = vld [vmem:[#allocation48_spill] sm:$0xff] }
 0x374   : > { %1977 = vperm.xlu0 %8758, %v10534_v62   ;;  %1980 = vperm.xlu1 %8759, %v10538_v47   ;;  %v15638_v47 = vld [vmem:[#allocation64_spill] sm:$0xff] }
 0x378   : > { %1983 = vperm.xlu0 %8758, %v10544_v26   ;;  %1986 = vperm.xlu1 %8759, %v10548_v33  }
 0x37c   : > { %1989 = vperm.xlu0 %8758, %v10554_v46   ;;  %1992 = vperm.xlu1 %8759, %v10558_v61   ;;  %v15634_v61 = vld [vmem:[#allocation65_spill] sm:$0xff] }
 0x37d   : > { %v10588_v33 = vadd.f32 %v10338_v59, %v15634_v61  ;;  %v15640_v61 = vld [vmem:[#allocation45_spill] sm:$0xff] }
 0x37e   : > { %v10606_v23 = vadd.f32 %v9846_v20, %v15640_v61  ;;  %v15656_v46 = vld [vmem:[#allocation53_spill] sm:$0xff] }
 0x37f   : > { %15635 = vst [vmem:[#allocation65_spill] sm:$0xff] %v10588_v33 }
 0x380   : > { %1995 = vperm.xlu0 %8758, %v10564_v11   ;;  %1998 = vperm.xlu1 %8759, %v10568_v48   ;;  %v10596_v48 = vadd.f32 %v9854_v35, %v15636_v45  ;;  %15641 = vst [vmem:[#allocation45_spill] sm:$0xff] %v10606_v23  ;;  %v10614_v45 = vpop.permute.xlu1 %1830 }
 0x382   : > { %15637 = vst [vmem:[#allocation46_spill] sm:$0xff] %v10596_v48 }
 0x384   : > { %2001 = vperm.xlu0 %8758, %v10574_v4   ;;  %2004 = vperm.xlu1 %8759, %v10578_v36   ;;  %v10600_v36 = vadd.f32 %v10350_v5, %v15638_v47  ;;  %v15644_v47 = vld [vmem:[#allocation47_spill] sm:$0xff] }
 0x385   : > { %v10620_v55 = vadd.f32 %v10266_v58, %v15644_v47  ;;  %v15652_v4 = vld [vmem:[#allocation51_spill] sm:$0xff] }
 0x386   : > { %15639 = vst [vmem:[#allocation64_spill] sm:$0xff] %v10600_v36 }
 0x387   : > { %15645 = vst [vmem:[#allocation47_spill] sm:$0xff] %v10620_v55 }
 0x388   : > { %2007 = vperm.xlu0 %8758, %v10584_v22   ;;  %2010 = vperm.xlu1 %8759, %v10588_v33   ;;  %v10610_v33 = vadd.f32 %v9852_v34, %v15642_v30 }
 0x38a   : > { %15643 = vst [vmem:[#allocation48_spill] sm:$0xff] %v10610_v33 }
 0x38c   : > { %2013 = vperm.xlu0 %8758, %v10600_v36   ;;  %2016 = vperm.xlu1 %8759, %v10596_v48   ;;  %v15646_v48 = vld [vmem:[#allocation50_spill] sm:$0xff]  ;;  %v15648_v36 = vld [vmem:[#allocation49_spill] sm:$0xff] }
 0x38d   : > { %v10624_v61 = vadd.f32 %v10268_v24, %v15646_v48 }
 0x38f   : > { %15647 = vst [vmem:[#allocation50_spill] sm:$0xff] %v10624_v61 }
 0x390   : > { %2019 = vperm.xlu0 %8758, %v10606_v23   ;;  %2022 = vperm.xlu1 %8759, %v10610_v33   ;;  %v10634_v23 = vadd.f32 %v10280_v60, %v15648_v36  ;;  %v15650_v33 = vld [vmem:[#allocation52_spill] sm:$0xff] }
 0x391   : > { %v10638_v47 = vadd.f32 %v10282_v50, %v15650_v33 }
 0x392   : > { %15649 = vst [vmem:[#allocation49_spill] sm:$0xff] %v10634_v23 }
 0x393   : > { %v10626_v15 = vpop.permute.xlu1 %1836  ;;  %v10628_v30 = vpop.permute.xlu0 %1833  ;;  %15651 = vst [vmem:[#allocation52_spill] sm:$0xff] %v10638_v47 }
 0x394   : > { %2025 = vperm.xlu0 %8758, %v10620_v55   ;;  %2028 = vperm.xlu1 %8759, %v10624_v61   ;;  %v10648_v55 = vadd.f32 %v10294_v10, %v15652_v4  ;;  %v15654_v61 = vld [vmem:[#allocation54_spill] sm:$0xff] }
 0x395   : > { %v10652_v36 = vadd.f32 %v10296_v29, %v15654_v61 }
 0x396   : > { %15653 = vst [vmem:[#allocation51_spill] sm:$0xff] %v10648_v55 }
 0x397   : > { %v10640_v22 = vpop.permute.xlu1 %1842  ;;  %v10642_v48 = vpop.permute.xlu0 %1839  ;;  %15655 = vst [vmem:[#allocation54_spill] sm:$0xff] %v10652_v36 }
 0x398   : > { %2031 = vperm.xlu0 %8758, %v10634_v23   ;;  %2034 = vperm.xlu1 %8759, %v10638_v47   ;;  %v10662_v23 = vadd.f32 %v10308_v21, %v15656_v46  ;;  %v15658_v47 = vld [vmem:[#allocation56_spill] sm:$0xff] }
 0x399   : > { %v10666_v4 = vadd.f32 %v10310_v63, %v15658_v47 }
 0x39a   : > { %15657 = vst [vmem:[#allocation53_spill] sm:$0xff] %v10662_v23 }
 0x39b   : > { %v10654_v11 = vpop.permute.xlu1 %1848  ;;  %v10656_v33 = vpop.permute.xlu0 %1845  ;;  %15659 = vst [vmem:[#allocation56_spill] sm:$0xff] %v10666_v4 }
 0x39c   : > { %2037 = vperm.xlu0 %8758, %v10648_v55   ;;  %2040 = vperm.xlu1 %8759, %v10652_v36   ;;  %v10676_v55 = vadd.f32 %v10322_v37, %v15660_v28  ;;  %v15662_v36 = vld [vmem:[#allocation58_spill] sm:$0xff] }
 0x39d   : > { %v10680_v46 = vadd.f32 %v10324_v1, %v15662_v36 }
 0x39e   : > { %15661 = vst [vmem:[#allocation55_spill] sm:$0xff] %v10676_v55 }
 0x39f   : > { %v10668_v26 = vpop.permute.xlu1 %1854  ;;  %v10670_v61 = vpop.permute.xlu0 %1851  ;;  %15663 = vst [vmem:[#allocation58_spill] sm:$0xff] %v10680_v46 }
 0x3a0   : > { %2043 = vperm.xlu0 %8758, %v10662_v23   ;;  %2046 = vperm.xlu1 %8759, %v10666_v4   ;;  %v10690_v23 = vadd.f32 %v10336_v53, %v15665_v13  ;;  %v15667_v4 = vld [vmem:[#allocation60_spill] sm:$0xff] }
 0x3a1   : > { %v10694_v28 = vadd.f32 %v10338_v59, %v15667_v4 }
 0x3a2   : > { %15666 = vst [vmem:[#allocation57_spill] sm:$0xff] %v10690_v23 }
 0x3a3   : > { %v10682_v62 = vpop.permute.xlu1 %1860  ;;  %v10684_v47 = vpop.permute.xlu0 %1857  ;;  %15668 = vst [vmem:[#allocation60_spill] sm:$0xff] %v10694_v28 }
 0x3a4   : > { %15664 = vst [vmem:[#allocation161_spill] sm:$0xff] %v10682_v62  ;;  %2049 = vperm.xlu0 %8758, %v10676_v55   ;;  %2052 = vperm.xlu1 %8759, %v10680_v46   ;;  %v10704_v55 = vadd.f32 %v9854_v35, %v15671_v57  ;;  %v15673_v46 = vld [vmem:[#allocation59_spill] sm:$0xff] }
 0x3a5   : > { %v10708_v13 = vadd.f32 %v10350_v5, %v15673_v46 }
 0x3a6   : > { %15672 = vst [vmem:[#allocation68_spill] sm:$0xff] %v10704_v55 }
 0x3a7   : > { %v10696_v42 = vpop.permute.xlu1 %1866  ;;  %v10698_v36 = vpop.permute.xlu0 %1863  ;;  %15674 = vst [vmem:[#allocation59_spill] sm:$0xff] %v10708_v13 }
 0x3a8   : > { %15669 = vst [vmem:[#allocation162_spill] sm:$0xff] %v10696_v42  ;;  %15670 = vst [vmem:[#allocation163_spill] sm:$0xff] %v10698_v36  ;;  %2055 = vperm.xlu0 %8758, %v10690_v23   ;;  %2058 = vperm.xlu1 %8759, %v10694_v28   ;;  %v10718_v23 = vadd.f32 %v9846_v20, %v15676_v38  ;;  %v15678_v28 = vld [vmem:[#allocation70_spill] sm:$0xff] }
 0x3a9   : > { %v10722_v57 = vadd.f32 %v9852_v34, %v15678_v28  ;;  %v15728_v42 = vld [vmem:[#allocation94_spill] sm:$0xff] }
 0x3aa   : > { %15677 = vst [vmem:[#allocation67_spill] sm:$0xff] %v10718_v23 }
 0x3ab   : > { %v10710_v14 = vpop.permute.xlu1 %1872  ;;  %v10712_v4 = vpop.permute.xlu0 %1869  ;;  %15679 = vst [vmem:[#allocation70_spill] sm:$0xff] %v10722_v57 }
 0x3ac   : > { %15675 = vst [vmem:[#allocation164_spill] sm:$0xff] %v10712_v4  ;;  %2061 = vperm.xlu0 %8758, %v10708_v13   ;;  %2064 = vperm.xlu1 %8759, %v10704_v55   ;;  %v10732_v13 = vadd.f32 %v10266_v58, %v15680_v17  ;;  %v15682_v55 = vld [vmem:[#allocation72_spill] sm:$0xff] }
 0x3ad   : > { %v10736_v38 = vadd.f32 %v10268_v24, %v15682_v55 }
 0x3ae   : > { %15681 = vst [vmem:[#allocation69_spill] sm:$0xff] %v10732_v13 }
 0x3af   : > { %v10724_v43 = vpop.permute.xlu1 %1878  ;;  %v10726_v46 = vpop.permute.xlu0 %1875  ;;  %15683 = vst [vmem:[#allocation72_spill] sm:$0xff] %v10736_v38 }
 0x3b0   : > { %2067 = vperm.xlu0 %8758, %v10718_v23   ;;  %2070 = vperm.xlu1 %8759, %v10722_v57   ;;  %v10746_v23 = vadd.f32 %v10280_v60, %v15684_v32  ;;  %v15686_v57 = vld [vmem:[#allocation74_spill] sm:$0xff] }
 0x3b1   : > { %v10750_v17 = vadd.f32 %v10282_v50, %v15686_v57 }
 0x3b2   : > { %15685 = vst [vmem:[#allocation71_spill] sm:$0xff] %v10746_v23 }
 0x3b3   : > { %v10738_v19 = vpop.permute.xlu1 %1884  ;;  %v10740_v28 = vpop.permute.xlu0 %1881  ;;  %15687 = vst [vmem:[#allocation74_spill] sm:$0xff] %v10750_v17 }
 0x3b4   : > { %2073 = vperm.xlu0 %8758, %v10732_v13   ;;  %2076 = vperm.xlu1 %8759, %v10736_v38   ;;  %v10760_v13 = vadd.f32 %v10294_v10, %v15688_v52  ;;  %v15690_v38 = vld [vmem:[#allocation76_spill] sm:$0xff] }
 0x3b5   : > { %v10764_v32 = vadd.f32 %v10296_v29, %v15690_v38 }
 0x3b6   : > { %15689 = vst [vmem:[#allocation73_spill] sm:$0xff] %v10760_v13 }
 0x3b7   : > { %v10752_v51 = vpop.permute.xlu1 %1890  ;;  %v10754_v55 = vpop.permute.xlu0 %1887  ;;  %15691 = vst [vmem:[#allocation76_spill] sm:$0xff] %v10764_v32 }
 0x3b8   : > { %2079 = vperm.xlu0 %8758, %v10746_v23   ;;  %2082 = vperm.xlu1 %8759, %v10750_v17   ;;  %v10774_v23 = vadd.f32 %v10308_v21, %v15692_v18  ;;  %v15694_v17 = vld [vmem:[#allocation78_spill] sm:$0xff] }
 0x3b9   : > { %v10778_v52 = vadd.f32 %v10310_v63, %v15694_v17 }
 0x3ba   : > { %15693 = vst [vmem:[#allocation75_spill] sm:$0xff] %v10774_v23 }
 0x3bb   : > { %v10766_v40 = vpop.permute.xlu1 %1896  ;;  %v10768_v57 = vpop.permute.xlu0 %1893  ;;  %15695 = vst [vmem:[#allocation78_spill] sm:$0xff] %v10778_v52 }
 0x3bc   : > { %2085 = vperm.xlu0 %8758, %v10760_v13   ;;  %2088 = vperm.xlu1 %8759, %v10764_v32   ;;  %v10788_v13 = vadd.f32 %v10322_v37, %v15696_v8  ;;  %v15698_v32 = vld [vmem:[#allocation80_spill] sm:$0xff] }
 0x3bd   : > { %v10792_v18 = vadd.f32 %v10324_v1, %v15698_v32 }
 0x3be   : > { %15697 = vst [vmem:[#allocation77_spill] sm:$0xff] %v10788_v13 }
 0x3bf   : > { %v10780_v0 = vpop.permute.xlu1 %1902  ;;  %v10782_v38 = vpop.permute.xlu0 %1899  ;;  %15699 = vst [vmem:[#allocation80_spill] sm:$0xff] %v10792_v18 }
 0x3c0   : > { %2091 = vperm.xlu0 %8758, %v10774_v23   ;;  %2094 = vperm.xlu1 %8759, %v10778_v52   ;;  %v10802_v23 = vadd.f32 %v10336_v53, %v15701_v41  ;;  %v15703_v52 = vld [vmem:[#allocation82_spill] sm:$0xff] }
 0x3c1   : > { %v10806_v8 = vadd.f32 %v10338_v59, %v15703_v52 }
 0x3c2   : > { %15702 = vst [vmem:[#allocation79_spill] sm:$0xff] %v10802_v23 }
 0x3c3   : > { %v10794_v6 = vpop.permute.xlu1 %1908  ;;  %v10796_v17 = vpop.permute.xlu0 %1905  ;;  %15704 = vst [vmem:[#allocation82_spill] sm:$0xff] %v10806_v8 }
 0x3c4   : > { %15700 = vst [vmem:[#allocation165_spill] sm:$0xff] %v10794_v6  ;;  %2097 = vperm.xlu0 %8758, %v10788_v13   ;;  %2100 = vperm.xlu1 %8759, %v10792_v18   ;;  %v10816_v13 = vadd.f32 %v9854_v35, %v15707_v27  ;;  %v15709_v18 = vld [vmem:[#allocation81_spill] sm:$0xff]  ;;  %v15733_v6 = vld [vmem:[#allocation96_spill] sm:$0xff] }
 0x3c5   : > { %v10820_v41 = vadd.f32 %v10350_v5, %v15709_v18 }
 0x3c6   : > { %15708 = vst [vmem:[#allocation84_spill] sm:$0xff] %v10816_v13 }
 0x3c7   : > { %v10808_v54 = vpop.permute.xlu1 %1914  ;;  %v10810_v32 = vpop.permute.xlu0 %1911  ;;  %15710 = vst [vmem:[#allocation81_spill] sm:$0xff] %v10820_v41 }
 0x3c8   : > { %15705 = vst [vmem:[#allocation166_spill] sm:$0xff] %v10808_v54  ;;  %15706 = vst [vmem:[#allocation167_spill] sm:$0xff] %v10810_v32  ;;  %2103 = vperm.xlu0 %8758, %v10802_v23   ;;  %2106 = vperm.xlu1 %8759, %v10806_v8   ;;  %v10830_v23 = vadd.f32 %v9846_v20, %v15712_v56  ;;  %v15714_v8 = vld [vmem:[#allocation86_spill] sm:$0xff]  ;;  %v15724_v54 = vld [vmem:[#allocation92_spill] sm:$0xff] }
 0x3c9   : > { %v10834_v27 = vadd.f32 %v9852_v34, %v15714_v8 }
 0x3ca   : > { %15713 = vst [vmem:[#allocation83_spill] sm:$0xff] %v10830_v23 }
 0x3cb   : > { %v10822_v12 = vpop.permute.xlu1 %1920  ;;  %v10824_v52 = vpop.permute.xlu0 %1917  ;;  %15715 = vst [vmem:[#allocation86_spill] sm:$0xff] %v10834_v27 }
 0x3cc   : > { %15711 = vst [vmem:[#allocation168_spill] sm:$0xff] %v10824_v52  ;;  %2109 = vperm.xlu0 %8758, %v10820_v41   ;;  %2112 = vperm.xlu1 %8759, %v10816_v13   ;;  %v10844_v41 = vadd.f32 %v10268_v24, %v15716_v16  ;;  %v15718_v13 = vld [vmem:[#allocation85_spill] sm:$0xff] }
 0x3cd   : > { %v10848_v56 = vadd.f32 %v10266_v58, %v15718_v13 }
 0x3ce   : > { %15717 = vst [vmem:[#allocation88_spill] sm:$0xff] %v10844_v41 }
 0x3cf   : > { %v10836_v39 = vpop.permute.xlu1 %1926  ;;  %v10838_v18 = vpop.permute.xlu0 %1923  ;;  %15719 = vst [vmem:[#allocation85_spill] sm:$0xff] %v10848_v56 }
 0x3d0   : > { %2118 = vperm.xlu1 %8759, %v10834_v27   ;;  %2115 = vperm.xlu0 %8758, %v10830_v23   ;;  %v10858_v27 = vadd.f32 %v10282_v50, %v15720_v9  ;;  %v15722_v23 = vld [vmem:[#allocation87_spill] sm:$0xff] }
 0x3d1   : > { %v10862_v16 = vadd.f32 %v10280_v60, %v15722_v23 }
 0x3d2   : > { %15721 = vst [vmem:[#allocation90_spill] sm:$0xff] %v10858_v27 }
 0x3d3   : > { %v10850_v2 = vpop.permute.xlu1 %1932  ;;  %v10852_v8 = vpop.permute.xlu0 %1929  ;;  %15723 = vst [vmem:[#allocation87_spill] sm:$0xff] %v10862_v16 }
 0x3d4   : > { %2124 = vperm.xlu1 %8759, %v10844_v41   ;;  %2121 = vperm.xlu0 %8758, %v10848_v56   ;;  %v10872_v41 = vadd.f32 %v10296_v29, %v15724_v54  ;;  %v15726_v56 = vld [vmem:[#allocation89_spill] sm:$0xff] }
 0x3d5   : > { %v10876_v9 = vadd.f32 %v10294_v10, %v15726_v56 }
 0x3d6   : > { %15725 = vst [vmem:[#allocation92_spill] sm:$0xff] %v10872_v41 }
 0x3d7   : > { %v10864_v52 = vpop.permute.xlu1 %1938  ;;  %v10866_v13 = vpop.permute.xlu0 %1935  ;;  %15727 = vst [vmem:[#allocation89_spill] sm:$0xff] %v10876_v9 }
 0x3d8   : > { %2130 = vperm.xlu1 %8759, %v10858_v27   ;;  %2127 = vperm.xlu0 %8758, %v10862_v16   ;;  %v10886_v27 = vadd.f32 %v10310_v63, %v15728_v42  ;;  %v15730_v16 = vld [vmem:[#allocation91_spill] sm:$0xff] }
 0x3d9   : > { %v10890_v54 = vadd.f32 %v10308_v21, %v15730_v16 }
 0x3da   : > { %15729 = vst [vmem:[#allocation94_spill] sm:$0xff] %v10886_v27 }
 0x3db   : > { %v10878_v4 = vpop.permute.xlu1 %1944  ;;  %v10880_v23 = vpop.permute.xlu0 %1941  ;;  %15731 = vst [vmem:[#allocation91_spill] sm:$0xff] %v10890_v54 }
 0x3dc   : > { %2136 = vperm.xlu1 %8759, %v10872_v41   ;;  %2133 = vperm.xlu0 %8758, %v10876_v9   ;;  %v10900_v41 = vadd.f32 %v10324_v1, %v15733_v6  ;;  %v15735_v9 = vld [vmem:[#allocation93_spill] sm:$0xff] }
 0x3dd   : > { %v10904_v42 = vadd.f32 %v10322_v37, %v15735_v9 }
 0x3de   : > { %15734 = vst [vmem:[#allocation96_spill] sm:$0xff] %v10900_v41 }
 0x3df   : > { %v10892_v32 = vpop.permute.xlu1 %1950  ;;  %v10894_v56 = vpop.permute.xlu0 %1947  ;;  %15736 = vst [vmem:[#allocation93_spill] sm:$0xff] %v10904_v42 }
 0x3e0   : > { %15732 = vst [vmem:[#allocation169_spill] sm:$0xff] %v10892_v32  ;;  %2142 = vperm.xlu1 %8759, %v10886_v27   ;;  %2139 = vperm.xlu0 %8758, %v10890_v54   ;;  %v15739_v32 = vld [vmem:[#allocation98_spill] sm:$0xff]  ;;  %v15741_v54 = vld [vmem:[#allocation95_spill] sm:$0xff] }
 0x3e1   : > { %v10914_v27 = vadd.f32 %v10338_v59, %v15739_v32  ;;  %v10918_v6 = vadd.f32 %v10336_v53, %v15741_v54 }
 0x3e3   : > { %v10906_v36 = vpop.permute.xlu1 %1956  ;;  %v10908_v16 = vpop.permute.xlu0 %1953  ;;  %15740 = vst [vmem:[#allocation98_spill] sm:$0xff] %v10914_v27  ;;  %15742 = vst [vmem:[#allocation95_spill] sm:$0xff] %v10918_v6 }
 0x3e4   : > { %15737 = vst [vmem:[#allocation170_spill] sm:$0xff] %v10906_v36  ;;  %15738 = vst [vmem:[#allocation171_spill] sm:$0xff] %v10908_v16  ;;  %2148 = vperm.xlu1 %8759, %v10900_v41   ;;  %2145 = vperm.xlu0 %8758, %v10904_v42   ;;  %v15745_v36 = vld [vmem:[#allocation100_spill] sm:$0xff]  ;;  %v15747_v42 = vld [vmem:[#allocation97_spill] sm:$0xff] }
 0x3e5   : > { %v10928_v41 = vadd.f32 %v9854_v35, %v15745_v36  ;;  %v10932_v32 = vadd.f32 %v10350_v5, %v15747_v42 }
 0x3e7   : > { %v10920_v62 = vpop.permute.xlu1 %1962  ;;  %v10922_v9 = vpop.permute.xlu0 %1959  ;;  %15746 = vst [vmem:[#allocation100_spill] sm:$0xff] %v10928_v41  ;;  %15748 = vst [vmem:[#allocation97_spill] sm:$0xff] %v10932_v32 }
 0x3e8   : > { %15743 = vst [vmem:[#allocation172_spill] sm:$0xff] %v10920_v62  ;;  %15744 = vst [vmem:[#allocation173_spill] sm:$0xff] %v10922_v9  ;;  %2154 = vperm.xlu1 %8759, %v10914_v27   ;;  %2151 = vperm.xlu0 %8758, %v10918_v6   ;;  %v15750_v62 = vld [vmem:[#allocation99_spill] sm:$0xff]  ;;  %v15752_v6 = vld [vmem:[#allocation102_spill] sm:$0xff] }
 0x3e9   : > { %v10942_v27 = vadd.f32 %v9846_v20, %v15750_v62  ;;  %v10946_v35 = vadd.f32 %v9852_v34, %v15752_v6  ;;  %v10970_v6 = vadd.f32 %v10282_v50, %v10248_v44 }
 0x3eb   : > { %v10934_v16 = vpop.permute.xlu1 %1968  ;;  %v10936_v54 = vpop.permute.xlu0 %1965  ;;  %15751 = vst [vmem:[#allocation99_spill] sm:$0xff] %v10942_v27  ;;  %15753 = vst [vmem:[#allocation102_spill] sm:$0xff] %v10946_v35 }
 0x3ec   : > { %15749 = vst [vmem:[#allocation174_spill] sm:$0xff] %v10936_v54  ;;  %2160 = vperm.xlu1 %8759, %v10928_v41   ;;  %2157 = vperm.xlu0 %8758, %v10932_v32   ;;  %v15754_v54 = vld [vmem:[#allocation104_spill] sm:$0xff]  ;;  %v15756_v32 = vld [vmem:[#allocation101_spill] sm:$0xff]  ;;  %15758 = vst [vmem:[#allocation175_spill] sm:$0xff] %v10970_v6 }
 0x3ed   : > { %v10956_v41 = vadd.f32 %v10268_v24, %v15754_v54  ;;  %v10960_v20 = vadd.f32 %v10266_v58, %v15756_v32  ;;  %v10984_v32 = vadd.f32 %v10296_v29, %v10252_v49 }
 0x3ef   : > { %v10948_v36 = vpop.permute.xlu1 %1974  ;;  %v10950_v42 = vpop.permute.xlu0 %1971  ;;  %15755 = vst [vmem:[#allocation104_spill] sm:$0xff] %v10956_v41  ;;  %15757 = vst [vmem:[#allocation101_spill] sm:$0xff] %v10960_v20 }
 0x3f0   : > { %2166 = vperm.xlu1 %8759, %v10946_v35   ;;  %2163 = vperm.xlu0 %8758, %v10942_v27   ;;  %v15759_v35 = vld [vmem:[#allocation103_spill] sm:$0xff]  ;;  %15761 = vst [vmem:[#allocation176_spill] sm:$0xff] %v10984_v32 }
 0x3f1   : > { %v10974_v24 = vadd.f32 %v10280_v60, %v15759_v35  ;;  %v10998_v35 = vadd.f32 %v10310_v63, %v10256_v3 }
 0x3f3   : > { %v10962_v62 = vpop.permute.xlu1 %1980  ;;  %v10964_v34 = vpop.permute.xlu0 %1977  ;;  %15760 = vst [vmem:[#allocation103_spill] sm:$0xff] %v10974_v24  ;;  %15764 = vst [vmem:[#allocation177_spill] sm:$0xff] %v10998_v35 }
 0x3f4   : > { %2172 = vperm.xlu1 %8759, %v10956_v41   ;;  %2169 = vperm.xlu0 %8758, %v10960_v20   ;;  %v15762_v41 = vld [vmem:[#allocation105_spill] sm:$0xff] }
 0x3f5   : > { %v10988_v44 = vadd.f32 %v10294_v10, %v15762_v41  ;;  %v11012_v41 = vadd.f32 %v10324_v1, %v10260_v7 }
 0x3f7   : > { %v10976_v54 = vpop.permute.xlu1 %1986  ;;  %v10978_v58 = vpop.permute.xlu0 %1983  ;;  %15763 = vst [vmem:[#allocation105_spill] sm:$0xff] %v10988_v44  ;;  %15769 = vst [vmem:[#allocation180_spill] sm:$0xff] %v11012_v41 }
 0x3f8   : > { %2178 = vperm.xlu1 %8759, %v10970_v6   ;;  %2175 = vperm.xlu0 %8758, %v10974_v24   ;;  %v15765_v6 = vld [vmem:[#allocation106_spill] sm:$0xff] }
 0x3f9   : > { %v11002_v29 = vadd.f32 %v10308_v21, %v15765_v6  ;;  %v15774_v6 = vld [vmem:[#allocation110_spill] sm:$0xff] }
 0x3fb   : > { %v10990_v50 = vpop.permute.xlu1 %1992  ;;  %v10992_v60 = vpop.permute.xlu0 %1989  ;;  %15766 = vst [vmem:[#allocation106_spill] sm:$0xff] %v11002_v29 }
 0x3fc   : > { %2184 = vperm.xlu1 %8759, %v10984_v32   ;;  %2181 = vperm.xlu0 %8758, %v10988_v44   ;;  %v15770_v32 = vld [vmem:[#allocation107_spill] sm:$0xff] }
 0x3fd   : > { %v11016_v3 = vadd.f32 %v10322_v37, %v15770_v32  ;;  %v15780_v32 = vld [vmem:[#allocation109_spill] sm:$0xff] }
 0x3ff   : > { %v11004_v49 = vpop.permute.xlu1 %1998  ;;  %v11006_v10 = vpop.permute.xlu0 %1995  ;;  %15771 = vst [vmem:[#allocation107_spill] sm:$0xff] %v11016_v3 }
 0x400   : > { %15767 = vst [vmem:[#allocation178_spill] sm:$0xff] %v11004_v49  ;;  %15768 = vst [vmem:[#allocation179_spill] sm:$0xff] %v11006_v10  ;;  %2190 = vperm.xlu1 %8759, %v10998_v35   ;;  %2187 = vperm.xlu0 %8758, %v11002_v29   ;;  %v11026_v35 = vadd.f32 %v10338_v59, %v15774_v6  ;;  %v15776_v29 = vld [vmem:[#allocation108_spill] sm:$0xff] }
 0x401   : > { %v11030_v7 = vadd.f32 %v10336_v53, %v15776_v29 }
 0x402   : > { %15775 = vst [vmem:[#allocation110_spill] sm:$0xff] %v11026_v35 }
 0x403   : > { %v11018_v63 = vpop.permute.xlu1 %2004  ;;  %v11020_v21 = vpop.permute.xlu0 %2001  ;;  %15777 = vst [vmem:[#allocation108_spill] sm:$0xff] %v11030_v7 }
 0x404   : > { %15772 = vst [vmem:[#allocation181_spill] sm:$0xff] %v11018_v63  ;;  %15773 = vst [vmem:[#allocation182_spill] sm:$0xff] %v11020_v21  ;;  %2196 = vperm.xlu1 %8759, %v11012_v41   ;;  %2193 = vperm.xlu0 %8758, %v11016_v3   ;;  %v11040_v41 = vadd.f32 %v10350_v5, %v15780_v32 }
 0x406   : > { %15781 = vst [vmem:[#allocation109_spill] sm:$0xff] %v11040_v41 }
 0x407   : > { %v11032_v1 = vpop.permute.xlu1 %2010  ;;  %v11034_v37 = vpop.permute.xlu0 %2007 }
 0x408   : > { %15778 = vst [vmem:[#allocation183_spill] sm:$0xff] %v11032_v1  ;;  %15779 = vst [vmem:[#allocation184_spill] sm:$0xff] %v11034_v37  ;;  %2202 = vperm.xlu1 %8759, %v11026_v35   ;;  %2199 = vperm.xlu0 %8758, %v11030_v7  }
 0x40b   : > { %v11042_v3 = vpop.permute.xlu1 %2016  ;;  %v11044_v59 = vpop.permute.xlu0 %2013 }
 0x40c   : > { %15782 = vst [vmem:[#allocation185_spill] sm:$0xff] %v11042_v3  ;;  %15783 = vst [vmem:[#allocation186_spill] sm:$0xff] %v11044_v59  ;;  %2205 = vperm.xlu0 %8758, %v11040_v41  }
 0x40f   : > { %v11047_v53 = vpop.permute.xlu1 %2022  ;;  %v11049_v29 = vpop.permute.xlu0 %2019 }
 0x410   : > { %15784 = vst [vmem:[#allocation187_spill] sm:$0xff] %v11047_v53 }
 0x413   : > { %v11051_v6 = vpop.permute.xlu1 %2028  ;;  %v11053_v44 = vpop.permute.xlu0 %2025 }
 0x414   : > { %15785 = vst [vmem:[#allocation188_spill] sm:$0xff] %v11051_v6  ;;  %15786 = vst [vmem:[#allocation189_spill] sm:$0xff] %v11053_v44  ;;  %v15810_v6 = vld [vmem:[#allocation34_spill] sm:$0xff] }
 0x417   : > { %v11055_v35 = vpop.permute.xlu1 %2034  ;;  %v11057_v7 = vpop.permute.xlu0 %2031 }
 0x418   : > { %15787 = vst [vmem:[#allocation190_spill] sm:$0xff] %v11055_v35  ;;  %15788 = vst [vmem:[#allocation191_spill] sm:$0xff] %v11057_v7 }
 0x41b   : > { %v11059_v5 = vpop.permute.xlu1 %2040  ;;  %v11061_v32 = vpop.permute.xlu0 %2037 }
 0x41c   : > { %15789 = vst [vmem:[#allocation192_spill] sm:$0xff] %v11059_v5  ;;  %15790 = vst [vmem:[#allocation193_spill] sm:$0xff] %v11061_v32 }
 0x41f   : > { %v11063_v24 = vpop.permute.xlu1 %2046  ;;  %v11065_v20 = vpop.permute.xlu0 %2043 }
 0x420   : > { %15791 = vst [vmem:[#allocation194_spill] sm:$0xff] %v11063_v24  ;;  %15792 = vst [vmem:[#allocation195_spill] sm:$0xff] %v11065_v20 }
 0x423   : > { %v11067_v41 = vpop.permute.xlu1 %2052  ;;  %v11069_v27 = vpop.permute.xlu0 %2049 }
 0x424   : > { %15793 = vst [vmem:[#allocation196_spill] sm:$0xff] %v11067_v41  ;;  %15794 = vst [vmem:[#allocation197_spill] sm:$0xff] %v11069_v27 }
 0x427   : > { %v11071_v59 = vpop.permute.xlu1 %2058  ;;  %v11073_v37 = vpop.permute.xlu0 %2055 }
 0x428   : > { %15795 = vst [vmem:[#allocation198_spill] sm:$0xff] %v11071_v59  ;;  %15796 = vst [vmem:[#allocation199_spill] sm:$0xff] %v11073_v37  ;;  %v15807_v37 = vld [vmem:[#allocation30_spill] sm:$0xff] }
 0x429   : > { %v2246_v21 = vadd.s32 4294967248, %v15807_v37  ;;  %v2253_v49 = vadd.s32 4294967240, %v15807_v37 }
 0x42b   : > { %v11075_v1 = vpop.permute.xlu1 %2064  ;;  %v11077_v35 = vpop.permute.xlu0 %2061  ;;  %v11145_v3 = vsub.s32 %v2246_v21, %v15810_v6  ;;  %v11160_v21 = vsub.s32 %v2253_v49, %v15810_v6 }
 0x42c   : > { %15797 = vst [vmem:[#allocation200_spill] sm:$0xff] %v11075_v1  ;;  %15798 = vst [vmem:[#allocation201_spill] sm:$0xff] %v11077_v35  ;;  %v2211_v1 = vadd.s32 4294967288, %v15807_v37 }
 0x42f   : > { %v11079_v63 = vpop.permute.xlu1 %2070  ;;  %v11081_v5 = vpop.permute.xlu0 %2067 }
 0x430   : > { %15799 = vst [vmem:[#allocation202_spill] sm:$0xff] %v11079_v63  ;;  %15800 = vst [vmem:[#allocation203_spill] sm:$0xff] %v11081_v5  ;;  %v2218_v63 = vadd.s32 4294967280, %v15807_v37  ;;  %v2239_v5 = vadd.s32 4294967256, %v15807_v37 }
 0x433   : > { %v11083_v32 = vpop.permute.xlu1 %2076  ;;  %v11085_v24 = vpop.permute.xlu0 %2073 }
 0x434   : > { %15801 = vst [vmem:[#allocation204_spill] sm:$0xff] %v11083_v32  ;;  %15802 = vst [vmem:[#allocation205_spill] sm:$0xff] %v11085_v24  ;;  %v2225_v32 = vadd.s32 4294967272, %v15807_v37  ;;  %v2232_v24 = vadd.s32 4294967264, %v15807_v37 }
 0x437   : > { %v11087_v20 = vpop.permute.xlu1 %2082  ;;  %v11089_v41 = vpop.permute.xlu0 %2079 }
 0x438   : > { %15803 = vst [vmem:[#allocation206_spill] sm:$0xff] %v11087_v20  ;;  %15804 = vst [vmem:[#allocation207_spill] sm:$0xff] %v11089_v41  ;;  %v11104_v20 = vsub.s32 %v2211_v1, %v15810_v6  ;;  %v11122_v1 = vsub.s32 %v2232_v24, %v15810_v6 }
 0x43a   : > { %v2236_v49 = vrot.slane %v10626_v15, %v11122_v1 }
 0x43b   : > { %v11091_v27 = vpop.permute.xlu1 %2088  ;;  %v11093_v59 = vpop.permute.xlu0 %2085 }
 0x43c   : > { %15805 = vst [vmem:[#allocation208_spill] sm:$0xff] %v11091_v27  ;;  %15806 = vst [vmem:[#allocation209_spill] sm:$0xff] %v11093_v59  ;;  %v11108_v27 = vsub.s32 %v15807_v37, %v15810_v6 }
 0x43f   : > { %v11096_v7 = vpop.permute.xlu1 %2094  ;;  %v11098_v35 = vpop.permute.xlu0 %2091 }
 0x440   : > { %15808 = vst [vmem:[#allocation210_spill] sm:$0xff] %v11096_v7  ;;  %15809 = vst [vmem:[#allocation211_spill] sm:$0xff] %v11098_v35  ;;  %v11115_v7 = vsub.s32 %v2218_v63, %v15810_v6  ;;  %v11118_v35 = vsub.s32 %v2225_v32, %v15810_v6  ;;  %v2215_v63 = vrot.slane %v10592_v25, %v11104_v20  ;;  %v2260_v32 = vadd.s32 4294967232, %v15807_v37 }
 0x441   : > { %v2319_v25 = vrot.slane %v10710_v14, %v11108_v27 }
 0x442   : > { %v2222_v53 = vrot.slane %v10614_v45, %v11115_v7  ;;  %v2333_v10 = vrot.slane %v10740_v28, %v11118_v35  ;;  %v2288_v28 = vadd.s32 4294967200, %v15807_v37 }
 0x443   : > { %v11110_v59 = vpop.permute.xlu1 %2100  ;;  %v11112_v41 = vpop.permute.xlu0 %2097 }
 0x444   : > { %15811 = vst [vmem:[#allocation212_spill] sm:$0xff] %v11110_v59  ;;  %15812 = vst [vmem:[#allocation213_spill] sm:$0xff] %v11112_v41  ;;  %v2323_v59 = vrot.slane %v10726_v46, %v11104_v20  ;;  %v2210_v41 = vrot.slane %v10612_v31, %v11108_v27  ;;  %v2274_v46 = vadd.s32 4294967216, %v15807_v37  ;;  %v2229_v31 = vrot.slane %v10628_v30, %v11118_v35 }
 0x445   : > { %v11157_v30 = vsub.s32 %v2260_v32, %v15810_v6  ;;  %v2338_v32 = vrot.slane %v10738_v19, %v11122_v1  ;;  %v2281_v19 = vadd.s32 4294967208, %v15807_v37 }
 0x446   : > { %v2324_v45 = vsel %vm2216_vm1, %v2323_v59, %v2319_v25  ;;  %v2217_v14 = vsel %vm2216_vm1, %v2215_v63, %v2210_v41  ;;  %v11169_v25 = vsub.s32 %v2274_v46, %v15810_v6  ;;  %v2402_v41 = vrot.slane %v10838_v18, %v11104_v20 }
 0x447   : > { %v11133_v44 = vpop.permute.xlu1 %2106  ;;  %v11135_v24 = vpop.permute.xlu0 %2103  ;;  %v2224_v59 = vsel %vm2223_vm2, %v2222_v53, %v2217_v14  ;;  %v2398_v18 = vrot.slane %v10822_v12, %v11108_v27  ;;  %v2295_v12 = vadd.s32 4294967192, %v15807_v37 }
 0x448   : > { %15813 = vst [vmem:[#allocation214_spill] sm:$0xff] %v11133_v44  ;;  %15814 = vst [vmem:[#allocation215_spill] sm:$0xff] %v11135_v24  ;;  %v2328_v44 = vrot.slane %v10724_v43, %v11115_v7  ;;  %v11150_v24 = vsub.s32 %v2239_v5, %v15810_v6  ;;  %v2267_v43 = vadd.s32 4294967224, %v15807_v37  ;;  %v2231_v63 = vsel %vm2230_vm3, %v2229_v31, %v2224_v59 }
 0x449   : > { %v2238_v59 = vsel %vm2237_vm4, %v2236_v49, %v2231_v63 }
 0x44a   : > { %v2243_v53 = vrot.slane %v10642_v48, %v11150_v24  ;;  %v2343_v14 = vrot.slane %v10754_v55, %v11150_v24  ;;  %v11188_v15 = vsub.s32 %v2267_v43, %v15810_v6  ;;  %v2407_v48 = vrot.slane %v10836_v39, %v11115_v7 }
 0x44b   : > { %v11163_v9 = vpop.permute.xlu1 %2112  ;;  %v11165_v5 = vpop.permute.xlu0 %2109  ;;  %v11199_v55 = vsub.s32 %v2288_v28, %v15810_v6  ;;  %v2412_v43 = vrot.slane %v10852_v8, %v11118_v35  ;;  %v2348_v39 = vrot.slane %v10752_v51, %v11145_v3  ;;  %v2353_v8 = vrot.slane %v10768_v57, %v11160_v21 }
 0x44c   : > { %15815 = vst [vmem:[#allocation216_spill] sm:$0xff] %v11163_v9  ;;  %15816 = vst [vmem:[#allocation217_spill] sm:$0xff] %v11165_v5  ;;  %v2329_v5 = vsel %vm2223_vm2, %v2328_v44, %v2324_v45  ;;  %v2302_v44 = vadd.s32 4294967184, %v15807_v37  ;;  %v2403_v45 = vsel %vm2216_vm1, %v2402_v41, %v2398_v18  ;;  %v2245_v28 = vsel %vm15357_vm5, %v2243_v53, %v2238_v59 }
 0x44d   : > { %v2334_v46 = vsel %vm2230_vm3, %v2333_v10, %v2329_v5  ;;  %v2250_v5 = vrot.slane %v10640_v22, %v11145_v3  ;;  %v2257_v9 = vrot.slane %v10656_v33, %v11160_v21  ;;  %v11218_v22 = vsub.s32 %v2281_v19, %v15810_v6 }
 0x44e   : > { %v11221_v49 = vsub.s32 %v2302_v44, %v15810_v6  ;;  %v2417_v51 = vrot.slane %v10850_v2, %v11122_v1  ;;  %v2408_v63 = vsel %vm2223_vm2, %v2407_v48, %v2403_v45  ;;  %v11231_v53 = vsub.s32 %v2295_v12, %v15810_v6 }
 0x44f   : > { %v11194_v31 = vpop.permute.xlu1 %2118  ;;  %v11196_v10 = vpop.permute.xlu0 %2115  ;;  %v2309_v57 = vadd.s32 4294967176, %v15807_v37  ;;  %v2264_v18 = vrot.slane %v10654_v11, %v11157_v30  ;;  %v2252_v2 = vsel %vm15195_vm6, %v2250_v5, %v2245_v28  ;;  %v2481_v44 = vrot.slane %v10950_v42, %v11104_v20 }
 0x450   : > { %15817 = vst [vmem:[#allocation218_spill] sm:$0xff] %v11194_v31  ;;  %v2339_v31 = vsel %vm2237_vm4, %v2338_v32, %v2334_v46  ;;  %15818 = vst [vmem:[#allocation219_spill] sm:$0xff] %v11221_v49  ;;  %v2413_v46 = vsel %vm2230_vm3, %v2412_v43, %v2408_v63  ;;  %v2259_v48 = vsel %vm2258_vm7, %v2257_v9, %v2252_v2 }
 0x451   : > { %v2344_v41 = vsel %vm15357_vm5, %v2343_v14, %v2339_v31  ;;  %v2422_v14 = vrot.slane %v10866_v13, %v11150_v24  ;;  %v2271_v31 = vrot.slane %v10670_v61, %v11188_v15  ;;  %v2358_v12 = vrot.slane %v10766_v40, %v11157_v30 }
 0x452   : > { %v2349_v19 = vsel %vm15195_vm6, %v2348_v39, %v2344_v41  ;;  %v2363_v11 = vrot.slane %v10782_v38, %v11188_v15  ;;  %v2427_v45 = vrot.slane %v10864_v52, %v11145_v3  ;;  %v2418_v42 = vsel %vm2237_vm4, %v2417_v51, %v2413_v46 }
 0x453   : > { %v11226_v32 = vpop.permute.xlu1 %2124  ;;  %v11228_v33 = vpop.permute.xlu0 %2121  ;;  %v2354_v13 = vsel %vm2258_vm7, %v2353_v8, %v2349_v19  ;;  %v2477_v9 = vrot.slane %v10934_v16, %v11108_v27  ;;  %v11261_v40 = vsub.s32 %v2309_v57, %v15810_v6  ;;  %v2423_v5 = vsel %vm15357_vm5, %v2422_v14, %v2418_v42 }
 0x454   : > { %v2432_v38 = vrot.slane %v10880_v23, %v11160_v21  ;;  %v2486_v52 = vrot.slane %v10948_v36, %v11115_v7  ;;  %v2278_v59 = vrot.slane %v10668_v26, %v11169_v25  ;;  %v2266_v16 = vsel %vm2265_vm8, %v2264_v18, %v2259_v48  ;;  %v15820_v18 = vld [vmem:[#allocation161_spill] sm:$0xff] }
 0x455   : > { %15819 = vst [vmem:[#allocation220_spill] sm:$0xff] %v11261_v40  ;;  %v2482_v39 = vsel %vm2216_vm1, %v2481_v44, %v2477_v9  ;;  %v2491_v28 = vrot.slane %v10964_v34, %v11118_v35  ;;  %v2273_v41 = vsel %vm15199_vm9, %v2271_v31, %v2266_v16  ;;  %v2285_v8 = vrot.slane %v10684_v47, %v11218_v22  ;;  %v15821_v31 = vld [vmem:[#allocation163_spill] sm:$0xff]  ;;  %v15824_v9 = vld [vmem:[#allocation169_spill] sm:$0xff] }
 0x456   : > { %v2368_v23 = vrot.slane %v10780_v0, %v11169_v25  ;;  %v2359_v36 = vsel %vm2265_vm8, %v2358_v12, %v2354_v13  ;;  %v2373_v26 = vrot.slane %v10796_v17, %v11218_v22  ;;  %v2437_v63 = vrot.slane %v10878_v4, %v11157_v30  ;;  %v15822_v12 = vld [vmem:[#allocation165_spill] sm:$0xff]  ;;  %v15825_v16 = vld [vmem:[#allocation171_spill] sm:$0xff] }
 0x457   : > { %v11256_v43 = vpop.permute.xlu1 %2130  ;;  %v11258_v61 = vpop.permute.xlu0 %2127  ;;  %v2364_v51 = vsel %vm15199_vm9, %v2363_v11, %v2359_v36  ;;  %v2428_v34 = vsel %vm15195_vm6, %v2427_v45, %v2423_v5  ;;  %v2442_v0 = vrot.slane %v10894_v56, %v11188_v15  ;;  %v2496_v14 = vrot.slane %v10962_v62, %v11122_v1  ;;  %v15823_v45 = vld [vmem:[#allocation167_spill] sm:$0xff] }
 0x458   : > { %v2433_v47 = vsel %vm2258_vm7, %v2432_v38, %v2428_v34  ;;  %v2487_v17 = vsel %vm2223_vm2, %v2486_v52, %v2482_v39  ;;  %v2292_v4 = vrot.slane %v15820_v18, %v11199_v55  ;;  %v2280_v2 = vsel %vm15198_vm10, %v2278_v59, %v2273_v41  ;;  %v15827_v34 = vld [vmem:[#allocation164_spill] sm:$0xff] }
 0x459   : > { %v2492_v19 = vsel %vm2230_vm3, %v2491_v28, %v2487_v17  ;;  %v2501_v44 = vrot.slane %v10978_v58, %v11150_v24  ;;  %v2287_v48 = vsel %vm15196_vm11, %v2285_v8, %v2280_v2  ;;  %v2299_v56 = vrot.slane %v15821_v31, %v11231_v53  ;;  %v15826_v8 = vld [vmem:[#allocation162_spill] sm:$0xff]  ;;  %v15829_v18 = vld [vmem:[#allocation168_spill] sm:$0xff] }
 0x45a   : > { %v2378_v62 = vrot.slane %v15822_v12, %v11199_v55  ;;  %v2369_v13 = vsel %vm15198_vm10, %v2368_v23, %v2364_v51  ;;  %v2383_v42 = vrot.slane %v15823_v45, %v11231_v53  ;;  %v2447_v5 = vrot.slane %v15824_v9, %v11169_v25  ;;  %v15833_v9 = vld [vmem:[#allocation185_spill] sm:$0xff] }
 0x45b   : > { %v11286_v57 = vpop.permute.xlu1 %2136  ;;  %v11288_v46 = vpop.permute.xlu0 %2133  ;;  %v2374_v11 = vsel %vm15196_vm11, %v2373_v26, %v2369_v13  ;;  %v2438_v58 = vsel %vm2265_vm8, %v2437_v63, %v2433_v47  ;;  %v2452_v39 = vrot.slane %v15825_v16, %v11218_v22  ;;  %v2506_v28 = vrot.slane %v10976_v54, %v11145_v3  ;;  %v15831_v13 = vld [vmem:[#allocation173_spill] sm:$0xff] }
 0x45c   : > { %v2443_v59 = vsel %vm15199_vm9, %v2442_v0, %v2438_v58  ;;  %v2497_v41 = vsel %vm2237_vm4, %v2496_v14, %v2492_v19  ;;  %v2306_v23 = vrot.slane %v15826_v8, %v11221_v49  ;;  %v2294_v36 = vsel %vm2293_vm12, %v2292_v4, %v2287_v48  ;;  %v15828_v0 = vld [vmem:[#allocation166_spill] sm:$0xff] }
 0x45d   : > { %v2502_v51 = vsel %vm15357_vm5, %v2501_v44, %v2497_v41  ;;  %v2511_v26 = vrot.slane %v10992_v60, %v11160_v21  ;;  %v2301_v63 = vsel %vm2300_vm13, %v2299_v56, %v2294_v36  ;;  %v2313_v47 = vrot.slane %v15827_v34, %v11261_v40  ;;  %v15830_v48 = vld [vmem:[#allocation170_spill] sm:$0xff]  ;;  %v15835_v41 = vld [vmem:[#allocation189_spill] sm:$0xff] }
 0x45e   : > { %v2388_v54 = vrot.slane %v15828_v0, %v11221_v49  ;;  %v2379_v14 = vsel %vm2293_vm12, %v2378_v62, %v2374_v11  ;;  %v2393_v4 = vrot.slane %v15829_v18, %v11261_v40  ;;  %v2448_v2 = vsel %vm15198_vm10, %v2447_v5, %v2443_v59  ;;  %v15834_v59 = vld [vmem:[#allocation187_spill] sm:$0xff] }
 0x45f   : > { %v11314_v38 = vpop.permute.xlu1 %2142  ;;  %v11316_v52 = vpop.permute.xlu0 %2139  ;;  %v2384_v17 = vsel %vm2300_vm13, %v2383_v42, %v2379_v14  ;;  %v2560_v60 = vrot.slane %v11049_v29, %v11104_v20  ;;  %v2457_v31 = vrot.slane %v15830_v48, %v11199_v55  ;;  %v2453_v56 = vsel %vm15196_vm11, %v2452_v39, %v2448_v2  ;;  %v15832_v29 = vld [vmem:[#allocation179_spill] sm:$0xff]  ;;  %v15839_v48 = vld [vmem:[#allocation182_spill] sm:$0xff] }
 0x460   : > { %v2516_v12 = vrot.slane %v10990_v50, %v11157_v30  ;;  %v2507_v62 = vsel %vm15195_vm6, %v2506_v28, %v2502_v51  ;;  %v2462_v11 = vrot.slane %v15831_v13, %v11231_v53  ;;  %v2521_v42 = vrot.slane %v15832_v29, %v11188_v15  ;;  %v15841_v13 = vld [vmem:[#allocation191_spill] sm:$0xff] }
 0x461   : > { %v2512_v45 = vsel %vm2258_vm7, %v2511_v26, %v2507_v62  ;;  %v2556_v5 = vrot.slane %v15833_v9, %v11108_v27  ;;  %v2389_v58 = vsel %vm2307_vm14, %v2388_v54, %v2384_v17  ;;  %v2565_v50 = vrot.slane %v15834_v59, %v11115_v7  ;;  %v15836_v26 = vld [vmem:[#allocation172_spill] sm:$0xff]  ;;  %v15837_v54 = vld [vmem:[#allocation178_spill] sm:$0xff] }
 0x462   : > { %v2308_v16 = vsel %vm2307_vm14, %v2306_v23, %v2301_v63  ;;  %v2394_v39 = vsel %vm2314_vm15, %v2393_v4, %v2389_v58  ;;  %v2570_v8 = vrot.slane %v15835_v41, %v11118_v35  ;;  %v2467_v34 = vrot.slane %v15836_v26, %v11221_v49  ;;  %v15838_v4 = vld [vmem:[#allocation203_spill] sm:$0xff]  ;;  %v15843_v59 = vld [vmem:[#allocation174_spill] sm:$0xff]  ;;  %v15845_v41 = vld [vmem:[#allocation181_spill] sm:$0xff] }
 0x463   : > { %v11342_v19 = vpop.permute.xlu1 %2148  ;;  %v11344_v44 = vpop.permute.xlu0 %2145  ;;  %v2561_v28 = vsel %vm2216_vm1, %v2560_v60, %v2556_v5  ;;  %v2458_v0 = vsel %vm2293_vm12, %v2457_v31, %v2453_v56  ;;  %v2526_v14 = vrot.slane %v15837_v54, %v11169_v25  ;;  %v2517_v23 = vsel %vm2265_vm8, %v2516_v12, %v2512_v45  ;;  %v15840_v56 = vld [vmem:[#allocation188_spill] sm:$0xff] }
 0x464   : > { %v2315_v63 = vsel %vm2314_vm15, %v2313_v47, %v2308_v16  ;;  %v2463_v17 = vsel %vm2300_vm13, %v2462_v11, %v2458_v0  ;;  %v2522_v18 = vsel %vm15199_vm9, %v2521_v42, %v2517_v23  ;;  %v2639_v2 = vrot.slane %v15838_v4, %v11104_v20  ;;  %v15842_v45 = vld [vmem:[#allocation200_spill] sm:$0xff] }
 0x465   : > { %v11383_v60 = vsel %vm15194_vm0, %v2394_v39, %v2315_v63  ;;  %v2531_v31 = vrot.slane %v15839_v48, %v11218_v22  ;;  %v2575_v62 = vrot.slane %v15840_v56, %v11122_v1  ;;  %v2566_v12 = vsel %vm2223_vm2, %v2565_v50, %v2561_v28  ;;  %v15844_v39 = vld [vmem:[#allocation202_spill] sm:$0xff]  ;;  %v15847_v54 = vld [vmem:[#allocation216_spill] sm:$0xff] }
 0x466   : > { %v2571_v47 = vsel %vm2230_vm3, %v2570_v8, %v2566_v12  ;;  %v2580_v11 = vrot.slane %v15841_v13, %v11150_v24  ;;  %v2635_v29 = vrot.slane %v15842_v45, %v11108_v27  ;;  %v2718_v42 = vrot.slane %v11196_v10, %v11104_v20  ;;  %v15846_v10 = vld [vmem:[#allocation205_spill] sm:$0xff]  ;;  %v15848_v63 = vld [vmem:[#allocation190_spill] sm:$0xff] }
 0x467   : > { %v11367_v36 = vpop.permute.xlu1 %2154  ;;  %v11369_v51 = vpop.permute.xlu0 %2151  ;;  %v2468_v58 = vsel %vm2307_vm14, %v2467_v34, %v2463_v17  ;;  %v2472_v16 = vrot.slane %v15843_v59, %v11261_v40  ;;  %v2527_v50 = vsel %vm15198_vm10, %v2526_v14, %v2522_v18  ;;  %v2644_v28 = vrot.slane %v15844_v39, %v11115_v7  ;;  %v15849_v18 = vld [vmem:[#allocation218_spill] sm:$0xff] }
 0x468   : > { %v2536_v8 = vrot.slane %v15845_v41, %v11199_v55  ;;  %v2640_v26 = vsel %vm2216_vm1, %v2639_v2, %v2635_v29  ;;  %v2649_v0 = vrot.slane %v15846_v10, %v11118_v35  ;;  %v2714_v23 = vrot.slane %v15847_v54, %v11108_v27  ;;  %v15850_v2 = vld [vmem:[#allocation193_spill] sm:$0xff]  ;;  %v15851_v29 = vld [vmem:[#allocation204_spill] sm:$0xff] }
 0x469   : > { %v2532_v34 = vsel %vm15196_vm11, %v2531_v31, %v2527_v50  ;;  %v2585_v17 = vrot.slane %v15848_v63, %v11145_v3  ;;  %v2576_v14 = vsel %vm2237_vm4, %v2575_v62, %v2571_v47  ;;  %v2723_v4 = vrot.slane %v15849_v18, %v11115_v7 }
 0x46a   : > { %v2581_v48 = vsel %vm15357_vm5, %v2580_v11, %v2576_v14  ;;  %v2590_v56 = vrot.slane %v15850_v2, %v11160_v21  ;;  %v2719_v12 = vsel %vm2216_vm1, %v2718_v42, %v2714_v23  ;;  %v2728_v13 = vrot.slane %v11228_v33, %v11118_v35  ;;  %v15852_v42 = vld [vmem:[#allocation207_spill] sm:$0xff] }
 0x46b   : > { %v2161_v9 = vpop.permute.xlu1 %2160  ;;  %v11397_v5 = vpop.permute.xlu0 %2157  ;;  %v2654_v59 = vrot.slane %v15851_v29, %v11122_v1  ;;  %v2645_v62 = vsel %vm2223_vm2, %v2644_v28, %v2640_v26  ;;  %v11430_v11 = vsel %vm2314_vm15, %v2472_v16, %v2468_v58  ;;  %v2659_v41 = vrot.slane %v15852_v42, %v11150_v24  ;;  %v15853_v26 = vld [vmem:[#allocation192_spill] sm:$0xff] }
 0x46c   : > { %v2793_v47 = vrot.slane %v2161_v9, %v11108_v27  ;;  %v2650_v39 = vsel %vm2230_vm3, %v2649_v0, %v2645_v62  ;;  %v2537_v10 = vsel %vm2293_vm12, %v2536_v8, %v2532_v34  ;;  %v2733_v54 = vrot.slane %v11226_v32, %v11122_v1  ;;  %v15854_v32 = vld [vmem:[#allocation206_spill] sm:$0xff] }
 0x46d   : > { %v2724_v28 = vsel %vm2223_vm2, %v2723_v4, %v2719_v12  ;;  %v2595_v58 = vrot.slane %v15853_v26, %v11157_v30  ;;  %v2586_v16 = vsel %vm15195_vm6, %v2585_v17, %v2581_v48  ;;  %v2738_v23 = vrot.slane %v11258_v61, %v11150_v24  ;;  %v15855_v17 = vld [vmem:[#allocation209_spill] sm:$0xff] }
 0x46e   : > { %v2729_v0 = vsel %vm2230_vm3, %v2728_v13, %v2724_v28  ;;  %v2591_v8 = vsel %vm2258_vm7, %v2590_v56, %v2586_v16  ;;  %v2664_v34 = vrot.slane %v15854_v32, %v11145_v3  ;;  %v2655_v18 = vsel %vm2237_vm4, %v2654_v59, %v2650_v39  ;;  %v15856_v13 = vld [vmem:[#allocation183_spill] sm:$0xff]  ;;  %v15857_v59 = vld [vmem:[#allocation184_spill] sm:$0xff] }
 0x46f   : > { %v2167_v45 = vpop.permute.xlu1 %2166  ;;  %v2164_v31 = vpop.permute.xlu0 %2163  ;;  %v2660_v2 = vsel %vm15357_vm5, %v2659_v41, %v2655_v18  ;;  %v2669_v48 = vrot.slane %v15855_v17, %v11160_v21  ;;  %v2743_v56 = vrot.slane %v11256_v43, %v11145_v3  ;;  %v2541_v62 = vrot.slane %v15857_v59, %v11231_v53  ;;  %v15859_v43 = vld [vmem:[#allocation208_spill] sm:$0xff] }
 0x470   : > { %v2797_v50 = vrot.slane %v2164_v31, %v11104_v20  ;;  %v2802_v33 = vrot.slane %v2167_v45, %v11115_v7  ;;  %v2546_v45 = vrot.slane %v15856_v13, %v11221_v49  ;;  %v2734_v31 = vsel %vm2237_vm4, %v2733_v54, %v2729_v0  ;;  %v15860_v0 = vld [vmem:[#allocation211_spill] sm:$0xff] }
 0x471   : > { %v2739_v39 = vsel %vm15357_vm5, %v2738_v23, %v2734_v31  ;;  %v2748_v42 = vrot.slane %v11288_v46, %v11160_v21  ;;  %v2596_v28 = vsel %vm2265_vm8, %v2595_v58, %v2591_v8  ;;  %v2674_v54 = vrot.slane %v15859_v43, %v11157_v30 }
 0x472   : > { %v2798_v9 = vsel %vm2216_vm1, %v2797_v50, %v2793_v47  ;;  %v15858_v47 = vld [vmem:[#allocation195_spill] sm:$0xff]  ;;  %v2753_v58 = vrot.slane %v11286_v57, %v11157_v30  ;;  %v2744_v8 = vsel %vm15195_vm6, %v2743_v56, %v2739_v39  ;;  %vm15197_vm0 = vcmask 1042434   ;;  %v15863_v57 = vld [vmem:[#allocation210_spill] sm:$0xff] }
 0x473   : > { %v2173_v63 = vpop.permute.xlu1 %2172  ;;  %v2170_v14 = vpop.permute.xlu0 %2169  ;;  %v2803_v61 = vsel %vm2223_vm2, %v2802_v33, %v2798_v9  ;;  %v2600_v50 = vrot.slane %v15858_v47, %v11188_v15  ;;  %v2665_v9 = vsel %vm15195_vm6, %v2664_v34, %v2660_v2  ;;  %v2749_v17 = vsel %vm2258_vm7, %v2748_v42, %v2744_v8  ;;  %v15868_v8 = vld [vmem:[#allocation215_spill] sm:$0xff] }
 0x474   : > { %v2807_v4 = vrot.slane %v2170_v14, %v11118_v35  ;;  %v2812_v12 = vrot.slane %v2173_v63, %v11122_v1  ;;  %v2670_v16 = vsel %vm2258_vm7, %v2669_v48, %v2665_v9  ;;  %v2679_v63 = vrot.slane %v15860_v0, %v11188_v15  ;;  %v15861_v14 = vld [vmem:[#allocation194_spill] sm:$0xff] }
 0x475   : > { %v2605_v32 = vrot.slane %v15861_v14, %v11169_v25  ;;  %v2601_v18 = vsel %vm15199_vm9, %v2600_v50, %v2596_v28  ;;  %v2758_v48 = vrot.slane %v11316_v52, %v11188_v15  ;;  %v2542_v31 = vsel %vm2300_vm13, %v2541_v62, %v2537_v10  ;;  %v15864_v50 = vld [vmem:[#allocation213_spill] sm:$0xff]  ;;  %v15865_v28 = vld [vmem:[#allocation196_spill] sm:$0xff] }
 0x476   : > { %v2808_v29 = vsel %vm2230_vm3, %v2807_v4, %v2803_v61  ;;  %v15862_v4 = vld [vmem:[#allocation197_spill] sm:$0xff]  ;;  %v2684_v56 = vrot.slane %v15863_v57, %v11169_v25  ;;  %v2689_v39 = vrot.slane %v15864_v50, %v11218_v22  ;;  %v2763_v10 = vrot.slane %v11314_v38, %v11169_v25 }
 0x477   : > { %v2179_v41 = vpop.permute.xlu1 %2178  ;;  %v2176_v33 = vpop.permute.xlu0 %2175  ;;  %v2813_v46 = vsel %vm2237_vm4, %v2812_v12, %v2808_v29  ;;  %v2610_v2 = vrot.slane %v15862_v4, %v11218_v22  ;;  %v2675_v29 = vsel %vm2265_vm8, %v2674_v54, %v2670_v16  ;;  %v2754_v62 = vsel %vm2265_vm8, %v2753_v58, %v2749_v17  ;;  %v15869_v4 = vld [vmem:[#allocation186_spill] sm:$0xff] }
 0x478   : > { %v2817_v26 = vrot.slane %v2176_v33, %v11150_v24  ;;  %v2822_v23 = vrot.slane %v2179_v41, %v11145_v3  ;;  %v2680_v47 = vsel %vm15199_vm9, %v2679_v63, %v2675_v29  ;;  %v2606_v41 = vsel %vm15198_vm10, %v2605_v32, %v2601_v18  ;;  %v15866_v63 = vld [vmem:[#allocation199_spill] sm:$0xff] }
 0x479   : > { %v2615_v43 = vrot.slane %v15865_v28, %v11199_v55  ;;  %v2611_v54 = vsel %vm15196_vm11, %v2610_v2, %v2606_v41  ;;  %v2759_v9 = vsel %vm15199_vm9, %v2758_v48, %v2754_v62  ;;  %v2620_v38 = vrot.slane %v15866_v63, %v11231_v53 }
 0x47a   : > { %v2818_v34 = vsel %vm15357_vm5, %v2817_v26, %v2813_v46  ;;  %v2768_v26 = vrot.slane %v11344_v44, %v11218_v22  ;;  %v2685_v14 = vsel %vm15198_vm10, %v2684_v56, %v2680_v47  ;;  %v2551_v2 = vrot.slane %v15869_v4, %v11261_v40 }
 0x47b   : > { %v2185_v12 = vpop.permute.xlu1 %2184  ;;  %v2182_v61 = vpop.permute.xlu0 %2181  ;;  %v2823_v52 = vsel %vm15195_vm6, %v2822_v23, %v2818_v34  ;;  %vm2873_vm6 = vcmask 1043459   ;;  %v15867_v23 = vld [vmem:[#allocation212_spill] sm:$0xff]  ;;  %v2690_v58 = vsel %vm15196_vm11, %v2689_v39, %v2685_v14  ;;  %v2699_v34 = vrot.slane %v15868_v8, %v11231_v53 }
 0x47c   : > { %v2827_v59 = vrot.slane %v2182_v61, %v11160_v21  ;;  %v2832_v42 = vrot.slane %v2185_v12, %v11157_v30  ;;  %v2694_v46 = vrot.slane %v15867_v23, %v11199_v55  ;;  %v2773_v17 = vrot.slane %v11342_v19, %v11199_v55  ;;  %v15870_v61 = vld [vmem:[#allocation198_spill] sm:$0xff]  ;;  %v15871_v19 = vld [vmem:[#allocation201_spill] sm:$0xff] }
 0x47d   : > { %v2764_v48 = vsel %vm15198_vm10, %v2763_v10, %v2759_v9  ;;  %v2625_v57 = vrot.slane %v15870_v61, %v11221_v49  ;;  %v2616_v56 = vsel %vm2293_vm12, %v2615_v43, %v2611_v54  ;;  %v15872_v10 = vld [vmem:[#allocation214_spill] sm:$0xff]  ;;  %v15873_v43 = vld [vmem:[#allocation217_spill] sm:$0xff]  ;;  %v2783_v9 = vrot.slane %v11367_v36, %v11221_v49 }
 0x47e   : > { %v2828_v33 = vsel %vm2258_vm7, %v2827_v59, %v2823_v52  ;;  %v2769_v29 = vsel %vm15196_vm11, %v2768_v26, %v2764_v48  ;;  %v2778_v59 = vrot.slane %v11369_v51, %v11231_v53  ;;  %v2621_v39 = vsel %vm2300_vm13, %v2620_v38, %v2616_v56 }
 0x47f   : > { %v2191_v16 = vpop.permute.xlu1 %2190  ;;  %v2188_v0 = vpop.permute.xlu0 %2187  ;;  %v2833_v18 = vsel %vm2265_vm8, %v2832_v42, %v2828_v33  ;;  %v2630_v42 = vrot.slane %v15871_v19, %v11261_v40  ;;  %v2695_v52 = vsel %vm2293_vm12, %v2694_v46, %v2690_v58  ;;  %v2704_v62 = vrot.slane %v15872_v10, %v11221_v49 }
 0x480   : > { %v2837_v32 = vrot.slane %v2188_v0, %v11188_v15  ;;  %v2842_v44 = vrot.slane %v2191_v16, %v11169_v25  ;;  %v2700_v33 = vsel %vm2300_vm13, %v2699_v34, %v2695_v52  ;;  %v2709_v54 = vrot.slane %v15873_v43, %v11261_v40 }
 0x481   : > { %v2774_v26 = vsel %vm2293_vm12, %v2773_v17, %v2769_v29  ;;  %v2872_v0 = vsel %vm15197_vm0, %v11430_v11, %v11383_v60  ;;  %v2547_v63 = vsel %vm2307_vm14, %v2546_v45, %v2542_v31  ;;  %v2788_v23 = vrot.slane %v11397_v5, %v11261_v40 }
 0x482   : > { %v2838_v12 = vsel %vm15199_vm9, %v2837_v32, %v2833_v18  ;;  %v2779_v38 = vsel %vm2300_vm13, %v2778_v59, %v2774_v26  ;;  %v2552_v14 = vsel %vm2314_vm15, %v2551_v2, %v2547_v63  ;;  %v2626_v32 = vsel %vm2307_vm14, %v2625_v57, %v2621_v39  ;;  %v15875_v59 = vld [vmem:[#allocation35_spill] sm:$0xff]  ;;  %v15876_v39 = vld [vmem:[#allocation117_spill] sm:$0xff] }
 0x483   : > { %v2197_v47 = vpop.permute.xlu1 %2196  ;;  %v2194_v50 = vpop.permute.xlu0 %2193  ;;  %v2843_v51 = vsel %vm15198_vm10, %v2842_v44, %v2838_v12  ;;  %v2631_v60 = vsel %vm2314_vm15, %v2630_v42, %v2626_v32  ;;  %v2705_v11 = vsel %vm2307_vm14, %v2704_v62, %v2700_v33  ;;  %v2784_v8 = vsel %vm2307_vm14, %v2783_v9, %v2779_v38  ;;  %v15877_v42 = vld [vmem:[#allocation63_spill] sm:$0xff]  ;;  %v15879_v62 = vld [vmem:[#allocation62_spill] sm:$0xff] }
 0x484   : > { %v2847_v41 = vrot.slane %v2194_v50, %v11218_v22  ;;  %v2852_v28 = vrot.slane %v2197_v47, %v11199_v55  ;;  %v2710_v31 = vsel %vm2314_vm15, %v2709_v54, %v2705_v11  ;;  %vm15355_vm0 = vcmask 1045509   ;;  %v15880_v54 = vld [vmem:[#allocation125_spill] sm:$0xff]  ;;  %v15882_v38 = vld [vmem:[#allocation127_spill] sm:$0xff] }
 0x485   : > { %v2874_v34 = vsel %vm2873_vm6, %v2552_v14, %v2872_v0  ;;  %v2789_v18 = vsel %vm2314_vm15, %v2788_v23, %v2784_v8  ;;  %vm15354_vm10 = vcmask 1046534   ;;  %vm15353_vm9 = vcmask 1047559  }
 0x486   : > { %v2848_v16 = vsel %vm15196_vm11, %v2847_v41, %v2843_v51  ;;  %vm15356_vm11 = vcmask 1044484   ;;  %v11584_v29 = vsub.s32 1, %v15810_v6  ;;  %v15878_v41 = vld [vmem:[#allocation124_spill] sm:$0xff] }
 0x487   : > { %v2203_v46 = vpop.permute.xlu1 %2202  ;;  %v2200_v36 = vpop.permute.xlu0 %2199  ;;  %v2853_v45 = vsel %vm2293_vm12, %v2852_v28, %v2848_v16  ;;  %v2876_v2 = vsel %vm15356_vm11, %v2631_v60, %v2874_v34  ;;  %v15881_v16 = vld [vmem:[#allocation66_spill] sm:$0xff]  ;;  %v15888_v34 = vld [vmem:[#allocation131_spill] sm:$0xff]  ;;  %vm16200_vm11 = vcmask 458112  }
 0x488   : > { %v2857_v58 = vrot.slane %v2200_v36, %v11231_v53  ;;  %v2862_v13 = vrot.slane %v2203_v46, %v11221_v49  ;;  %v2878_v48 = vsel %vm15355_vm0, %v2710_v31, %v2876_v2  ;;  %15874 = vst [vmem:[#allocation161_spill] sm:$0xff] %v11584_v29  ;;  %v15883_v36 = vld [vmem:[#allocation111_spill] sm:$0xff]  ;;  %vm16199_vm0 = vcmask 720512  }
 0x489   : > { %v2880_v61 = vsel %vm15354_vm10, %v2789_v18, %v2878_v48 }
 0x48a   : > { %v2858_v5 = vsel %vm2300_vm13, %v2857_v58, %v2853_v45  ;;  %v15884_v58 = vld [vmem:[#allocation129_spill] sm:$0xff] }
 0x48b   : > { %v2206_v44 = vpop.permute.xlu0 %2205  ;;  %v2863_v17 = vsel %vm2307_vm14, %v2862_v13, %v2858_v5  ;;  %v15885_v13 = vld [vmem:[#allocation112_spill] sm:$0xff] }
 0x48c   : > { %v2867_v4 = vrot.slane %v2206_v44, %v11261_v40 }
 0x48e   : > { %v2868_v12 = vsel %vm2314_vm15, %v2867_v4, %v2863_v17  ;;  %v15889_v4 = vld [vmem:[#allocation113_spill] sm:$0xff] }
 0x48f   : > { %v2882_v57 = vsel %vm15353_vm9, %v2868_v12, %v2880_v61  ;;  %v15892_v61 = vld [vmem:[#allocation133_spill] sm:$0xff]  ;;  %vm16194_vm9 = vcmask 458112  }
 0x490   : > { %2884 = vmax.xlane.f32.xlu1 %v2882_v57  ;;  %vm16195_vm10 = vmmov %vm16194_vm9 }
 0x51d   : > { %v11581_v56 = vpop.xlane.xlu1 %2884 }
 0x51e   : > { %v11588_v47 = vrot.slane %v11581_v56, %v15875_v59  ;;  %v11592_v50 = vrot.slane %v11581_v56, %v11584_v29 }
 0x520   : > { %v2936_v19 = vsub.f32 %v15876_v39, %v11588_v47  ;;  %v2927_v52 = vsub.f32 %v15877_v42, %v11588_v47  ;;  %v2942_v10 = vsub.f32 %v15878_v41, %v11588_v47  ;;  %v2928_v33 = vsub.f32 %v15879_v62, %v11588_v47  ;;  %v15896_v62 = vld [vmem:[#allocation135_spill] sm:$0xff] }
 0x521   : > { %v2944_v9 = vsub.f32 %v15880_v54, %v11592_v50  ;;  %v2929_v0 = vsub.f32 %v15881_v16, %v11588_v47  ;;  %v2946_v23 = vsub.f32 %v15882_v38, %v11592_v50  ;;  %v2930_v14 = vsub.f32 %v15883_v36, %v11588_v47 }
 0x522   : > { %v3073_v28 = vmul.f32 1.442695, %v2936_v19  ;;  %v3055_v51 = vmul.f32 1.442695, %v2927_v52  ;;  %v3085_v43 = vmul.f32 1.442695, %v2942_v10  ;;  %v2948_v60 = vsub.f32 %v15884_v58, %v11592_v50 }
 0x523   : > { %v3057_v26 = vmul.f32 1.442695, %v2928_v33  ;;  %v3089_v63 = vmul.f32 1.442695, %v2944_v9  ;;  %v3059_v46 = vmul.f32 1.442695, %v2929_v0  ;;  %v2931_v45 = vsub.f32 %v15885_v13, %v11588_v47 }
 0x524   : > { %8944 = vpow2.f32 %v3073_v28  ;;  %v3093_v32 = vmul.f32 1.442695, %v2946_v23  ;;  %v3061_v11 = vmul.f32 1.442695, %v2930_v14  ;;  %v3097_v8 = vmul.f32 1.442695, %v2948_v60 }
 0x525   : > { %8946 = vpow2.f32 %v3055_v51  ;;  %v2950_v44 = vsub.f32 %v15888_v34, %v11592_v50  ;;  %v3063_v18 = vmul.f32 1.442695, %v2931_v45  ;;  %v2932_v2 = vsub.f32 %v15889_v4, %v11588_v47  ;;  %v15893_v19 = vld [vmem:[#allocation114_spill] sm:$0xff]  ;;  %v15897_v51 = vld [vmem:[#allocation115_spill] sm:$0xff]  ;;  %v15901_v0 = vld [vmem:[#allocation137_spill] sm:$0xff] }
 0x526   : > { %8948 = vpow2.f32 %v3085_v43  ;;  %v2952_v57 = vsub.f32 %v15892_v61, %v11592_v50  ;;  %v2933_v42 = vsub.f32 %v15893_v19, %v11588_v47  ;;  %v2954_v33 = vsub.f32 %v15896_v62, %v11592_v50  ;;  %v15902_v23 = vld [vmem:[#allocation116_spill] sm:$0xff]  ;;  %v15906_v45 = vld [vmem:[#allocation118_spill] sm:$0xff]  ;;  %v15909_v4 = vld [vmem:[#allocation141_spill] sm:$0xff] }
 0x527   : > { %8950 = vpow2.f32 %v3057_v26  ;;  %v3101_v12 = vmul.f32 1.442695, %v2950_v44  ;;  %v3065_v39 = vmul.f32 1.442695, %v2932_v2  ;;  %v2934_v43 = vsub.f32 %v15897_v51, %v11588_v47  ;;  %v15905_v60 = vld [vmem:[#allocation140_spill] sm:$0xff]  ;;  %v15910_v61 = vld [vmem:[#allocation119_spill] sm:$0xff] }
 0x528   : > { %8952 = vpow2.f32 %v3089_v63  ;;  %v3105_v10 = vmul.f32 1.442695, %v2952_v57  ;;  %v3067_v28 = vmul.f32 1.442695, %v2933_v42  ;;  %v11650_v26 = vsub.s32 2, %v15810_v6 }
 0x529   : > { %8954 = vpow2.f32 %v3059_v46  ;;  %v3109_v16 = vmul.f32 1.442695, %v2954_v33  ;;  %v2956_v63 = vsub.f32 %v15901_v0, %v11592_v50  ;;  %v3069_v38 = vmul.f32 1.442695, %v2934_v43 }
 0x52a   : > { %8956 = vpow2.f32 %v3093_v32  ;;  %15900 = vst [vmem:[#allocation168_spill] sm:$0xff] %v11650_v26  ;;  %v2935_v46 = vsub.f32 %v15902_v23, %v11588_v47  ;;  %v11664_v32 = vrot.slane %v11581_v56, %v11650_v26  ;;  %v2938_v57 = vsub.f32 %v15910_v61, %v11588_v47 }
 0x52b   : > { %8958 = vpow2.f32 %v3061_v11  ;;  %v3113_v58 = vmul.f32 1.442695, %v2956_v63  ;;  %v2958_v11 = vsub.f32 %v15905_v60, %v11592_v50  ;;  %v15917_v63 = vld [vmem:[#allocation145_spill] sm:$0xff] }
 0x52c   : > { %8960 = vpow2.f32 %v3097_v8  ;;  %v3071_v13 = vmul.f32 1.442695, %v2935_v46  ;;  %v2937_v8 = vsub.f32 %v15906_v45, %v11588_v47  ;;  %v2960_v2 = vsub.f32 %v15909_v4, %v11664_v32  ;;  %v15918_v46 = vld [vmem:[#allocation121_spill] sm:$0xff]  ;;  %v15921_v45 = vld [vmem:[#allocation147_spill] sm:$0xff]  ;;  %v15922_v4 = vld [vmem:[#allocation122_spill] sm:$0xff] }
 0x52d   : > { %8962 = vpow2.f32 %v3063_v18  ;;  %v3117_v18 = vmul.f32 1.442695, %v2958_v11  ;;  %v3077_v33 = vmul.f32 1.442695, %v2938_v57 }
 0x52e   : > { %v11614_v31 = vpop.eup %8944  ;;  %8964 = vpow2.f32 %v3101_v12  ;;  %v3075_v12 = vmul.f32 1.442695, %v2937_v8  ;;  %v3121_v42 = vmul.f32 1.442695, %v2960_v2  ;;  %v2966_v8 = vsub.f32 %v15921_v45, %v11664_v32 }
 0x52f   : > { %15886 = vst [vmem:[#allocation163_spill] sm:$0xff] %v11614_v31  ;;  %v11616_v5 = vpop.eup %8946  ;;  %3467 = vperm.xlu1 %8759, %v11614_v31   ;;  %8966 = vpow2.f32 %v3065_v39  ;;  %v2941_v2 = vsub.f32 %v15922_v4, %v11588_v47  ;;  %v15934_v4 = vld [vmem:[#allocation41_spill] sm:$0xff] }
 0x530   : > { %15887 = vst [vmem:[#allocation165_spill] sm:$0xff] %v11616_v5  ;;  %3440 = vperm.xlu0 %8758, %v11616_v5   ;;  %v11624_v17 = vpop.eup %8948  ;;  %8968 = vpow2.f32 %v3105_v10  ;;  %v15913_v10 = vld [vmem:[#allocation143_spill] sm:$0xff]  ;;  %v3133_v57 = vmul.f32 1.442695, %v2966_v8  ;;  %v11737_v8 = vsub.s32 3, %v15810_v6 }
 0x531   : > { %15890 = vst [vmem:[#allocation167_spill] sm:$0xff] %v11624_v17  ;;  %v11626_v48 = vpop.eup %8950  ;;  %8970 = vpow2.f32 %v3067_v28  ;;  %v2962_v62 = vsub.f32 %v15913_v10, %v11664_v32  ;;  %v15914_v28 = vld [vmem:[#allocation120_spill] sm:$0xff] }
 0x532   : > { %15891 = vst [vmem:[#allocation169_spill] sm:$0xff] %v11626_v48  ;;  %v11634_v52 = vpop.eup %8952  ;;  %8972 = vpow2.f32 %v3109_v16  ;;  %v2939_v51 = vsub.f32 %v15914_v28, %v11588_v47  ;;  %15933 = vst [vmem:[#allocation205_spill] sm:$0xff] %v11737_v8 }
 0x533   : > { %3485 = vperm.xlu1 %8759, %v11624_v17   ;;  %15894 = vst [vmem:[#allocation171_spill] sm:$0xff] %v11634_v52  ;;  %v11636_v41 = vpop.eup %8954  ;;  %8974 = vpow2.f32 %v3069_v38  ;;  %v3125_v0 = vmul.f32 1.442695, %v2962_v62  ;;  %v2964_v38 = vsub.f32 %v15917_v63, %v11664_v32  ;;  %v3083_v62 = vmul.f32 1.442695, %v2941_v2  ;;  %v15929_v63 = vld [vmem:[#allocation39_spill] sm:$0xff] }
 0x534   : > { %3443 = vperm.xlu0 %8758, %v11626_v48   ;;  %15895 = vst [vmem:[#allocation162_spill] sm:$0xff] %v11636_v41  ;;  %v11644_v54 = vpop.eup %8956  ;;  %8976 = vpow2.f32 %v3113_v58  ;;  %v3079_v23 = vmul.f32 1.442695, %v2939_v51  ;;  %v2940_v58 = vsub.f32 %v15918_v46, %v11588_v47  ;;  %v15930_v46 = vld [vmem:[#allocation126_spill] sm:$0xff]  ;;  %v2972_v2 = vsub.f32 %v15934_v4, %v11664_v32 }
 0x535   : > { %15898 = vst [vmem:[#allocation164_spill] sm:$0xff] %v11644_v54  ;;  %v11646_v9 = vpop.eup %8958  ;;  %8978 = vpow2.f32 %v3071_v13  ;;  %v3129_v13 = vmul.f32 1.442695, %v2964_v38  ;;  %v2970_v38 = vsub.f32 %v15929_v63, %v11664_v32  ;;  %v15938_v63 = vld [vmem:[#allocation43_spill] sm:$0xff] }
 0x536   : > { %15899 = vst [vmem:[#allocation166_spill] sm:$0xff] %v11646_v9  ;;  %v11657_v36 = vpop.eup %8960  ;;  %8980 = vpow2.f32 %v3117_v18  ;;  %v3081_v18 = vmul.f32 1.442695, %v2940_v58  ;;  %v2945_v58 = vsub.f32 %v15930_v46, %v11592_v50  ;;  %v15939_v46 = vld [vmem:[#allocation130_spill] sm:$0xff] }
 0x537   : > { %3491 = vperm.xlu1 %8759, %v11634_v52   ;;  %15903 = vst [vmem:[#allocation170_spill] sm:$0xff] %v11657_v36  ;;  %v11659_v14 = vpop.eup %8962  ;;  %8982 = vpow2.f32 %v3075_v12 }
 0x538   : > { %3446 = vperm.xlu0 %8758, %v11636_v41   ;;  %15904 = vst [vmem:[#allocation173_spill] sm:$0xff] %v11659_v14  ;;  %v11671_v34 = vpop.eup %8964  ;;  %8984 = vpow2.f32 %v3121_v42  ;;  %v15925_v42 = vld [vmem:[#allocation37_spill] sm:$0xff] }
 0x539   : > { %15907 = vst [vmem:[#allocation179_spill] sm:$0xff] %v11671_v34  ;;  %v11673_v44 = vpop.eup %8966  ;;  %8986 = vpow2.f32 %v3077_v33  ;;  %v2968_v10 = vsub.f32 %v15925_v42, %v11664_v32  ;;  %v15926_v33 = vld [vmem:[#allocation123_spill] sm:$0xff]  ;;  %v15935_v42 = vld [vmem:[#allocation128_spill] sm:$0xff] }
 0x53a   : > { %15908 = vst [vmem:[#allocation185_spill] sm:$0xff] %v11673_v44  ;;  %v11681_v39 = vpop.eup %8968  ;;  %8988 = vpow2.f32 %v3125_v0  ;;  %v2943_v28 = vsub.f32 %v15926_v33, %v11592_v50 }
 0x53b   : > { %3497 = vperm.xlu1 %8759, %v11644_v54   ;;  %15911 = vst [vmem:[#allocation187_spill] sm:$0xff] %v11681_v39  ;;  %v11683_v19 = vpop.eup %8970  ;;  %8990 = vpow2.f32 %v3079_v23  ;;  %v3137_v0 = vmul.f32 1.442695, %v2968_v10  ;;  %v2947_v10 = vsub.f32 %v15935_v42, %v11592_v50 }
 0x53c   : > { %3449 = vperm.xlu0 %8758, %v11646_v9   ;;  %15912 = vst [vmem:[#allocation189_spill] sm:$0xff] %v11683_v19  ;;  %v11691_v43 = vpop.eup %8972  ;;  %8992 = vpow2.f32 %v3129_v13  ;;  %v3087_v23 = vmul.f32 1.442695, %v2943_v28  ;;  %v11751_v28 = vrot.slane %v11581_v56, %v11737_v8 }
 0x53d   : > { %15915 = vst [vmem:[#allocation172_spill] sm:$0xff] %v11691_v43  ;;  %v11693_v16 = vpop.eup %8974  ;;  %8994 = vpow2.f32 %v3081_v18  ;;  %v3141_v18 = vmul.f32 1.442695, %v2970_v38  ;;  %v2974_v38 = vsub.f32 %v15938_v63, %v11664_v32 }
 0x53e   : > { %15916 = vst [vmem:[#allocation178_spill] sm:$0xff] %v11693_v16  ;;  %v11701_v60 = vpop.eup %8976  ;;  %8996 = vpow2.f32 %v3133_v57  ;;  %v3091_v57 = vmul.f32 1.442695, %v2945_v58  ;;  %v2949_v58 = vsub.f32 %v15939_v46, %v11592_v50 }
 0x53f   : > { %3503 = vperm.xlu1 %8759, %v11657_v36   ;;  %15919 = vst [vmem:[#allocation203_spill] sm:$0xff] %v11701_v60  ;;  %v11703_v11 = vpop.eup %8978  ;;  %8998 = vpow2.f32 %v3083_v62  ;;  %v3149_v37 = vmul.f32 1.442695, %v2974_v38 }
 0x540   : > { %3452 = vperm.xlu0 %8758, %v11659_v14   ;;  %15920 = vst [vmem:[#allocation182_spill] sm:$0xff] %v11703_v11  ;;  %v11711_v12 = vpop.eup %8980  ;;  %9000 = vpow2.f32 %v3137_v0  ;;  %v3145_v0 = vmul.f32 1.442695, %v2972_v2  ;;  %v3099_v63 = vmul.f32 1.442695, %v2949_v58 }
 0x541   : > { %15923 = vst [vmem:[#allocation188_spill] sm:$0xff] %v11711_v12  ;;  %v11713_v61 = vpop.eup %8982  ;;  %9002 = vpow2.f32 %v3087_v23  ;;  %v3095_v23 = vmul.f32 1.442695, %v2947_v10 }
 0x542   : > { %15924 = vst [vmem:[#allocation191_spill] sm:$0xff] %v11713_v61  ;;  %v11721_v51 = vpop.eup %8984  ;;  %9004 = vpow2.f32 %v3141_v18  ;;  %v15942_v18 = vld [vmem:[#allocation149_spill] sm:$0xff] }
 0x543   : > { %3509 = vperm.xlu1 %8759, %v11671_v34   ;;  %15927 = vst [vmem:[#allocation200_spill] sm:$0xff] %v11721_v51  ;;  %v11723_v47 = vpop.eup %8986  ;;  %9006 = vpow2.f32 %v3091_v57  ;;  %v2976_v2 = vsub.f32 %v15942_v18, %v11751_v28  ;;  %v15943_v57 = vld [vmem:[#allocation132_spill] sm:$0xff] }
 0x544   : > { %3455 = vperm.xlu0 %8758, %v11673_v44   ;;  %15928 = vst [vmem:[#allocation174_spill] sm:$0xff] %v11723_v47  ;;  %v11731_v13 = vpop.eup %8988  ;;  %9008 = vpow2.f32 %v3145_v0  ;;  %v2951_v10 = vsub.f32 %v15943_v57, %v11592_v50  ;;  %v15946_v0 = vld [vmem:[#allocation151_spill] sm:$0xff] }
 0x545   : > { %15931 = vst [vmem:[#allocation202_spill] sm:$0xff] %v11731_v13  ;;  %v11733_v45 = vpop.eup %8990  ;;  %9010 = vpow2.f32 %v3095_v23  ;;  %v2978_v38 = vsub.f32 %v15946_v0, %v11751_v28  ;;  %v15947_v23 = vld [vmem:[#allocation134_spill] sm:$0xff] }
 0x546   : > { %15932 = vst [vmem:[#allocation181_spill] sm:$0xff] %v11733_v45  ;;  %v11744_v62 = vpop.eup %8992  ;;  %9012 = vpow2.f32 %v3149_v37  ;;  %v3103_v18 = vmul.f32 1.442695, %v2951_v10  ;;  %v2953_v58 = vsub.f32 %v15947_v23, %v11592_v50  ;;  %v15950_v37 = vld [vmem:[#allocation153_spill] sm:$0xff] }
 0x547   : > { %3515 = vperm.xlu1 %8759, %v11681_v39   ;;  %15936 = vst [vmem:[#allocation216_spill] sm:$0xff] %v11744_v62  ;;  %v11746_v33 = vpop.eup %8994  ;;  %9014 = vpow2.f32 %v3099_v63  ;;  %v15951_v63 = vld [vmem:[#allocation136_spill] sm:$0xff] }
 0x548   : > { %3458 = vperm.xlu0 %8758, %v11683_v19   ;;  %15937 = vst [vmem:[#allocation190_spill] sm:$0xff] %v11746_v33  ;;  %v11758_v4 = vpop.eup %8996  ;;  %v3107_v0 = vmul.f32 1.442695, %v2953_v58  ;;  %v2955_v10 = vsub.f32 %v15951_v63, %v11592_v50 }
 0x549   : > { %15940 = vst [vmem:[#allocation218_spill] sm:$0xff] %v11758_v4  ;;  %v11760_v42 = vpop.eup %8998 }
 0x54a   : > { %15941 = vst [vmem:[#allocation193_spill] sm:$0xff] %v11760_v42  ;;  %v11768_v8 = vpop.eup %9000 }
 0x54b   : > { %3521 = vperm.xlu1 %8759, %v11691_v43   ;;  %15944 = vst [vmem:[#allocation204_spill] sm:$0xff] %v11768_v8  ;;  %v11770_v46 = vpop.eup %9002 }
 0x54c   : > { %3461 = vperm.xlu0 %8758, %v11693_v16   ;;  %15945 = vst [vmem:[#allocation207_spill] sm:$0xff] %v11770_v46 }
 0x54f   : > { %3527 = vperm.xlu1 %8759, %v11701_v60  }
 0x550   : > { %3464 = vperm.xlu0 %8758, %v11703_v11  }
 0x553   : > { %3533 = vperm.xlu1 %8759, %v11711_v12  }
 0x554   : > { %3470 = vperm.xlu0 %8758, %v11713_v61  }
 0x557   : > { %3539 = vperm.xlu1 %8759, %v11721_v51  }
 0x558   : > { %3473 = vperm.xlu0 %8758, %v11723_v47  }
 0x55b   : > { %3545 = vperm.xlu1 %8759, %v11731_v13  }
 0x55c   : > { %3476 = vperm.xlu0 %8758, %v11733_v45  }
 0x55f   : > { %3551 = vperm.xlu1 %8759, %v11744_v62   ;;  %v11778_v62 = vpop.eup %9004 }
 0x560   : > { %3479 = vperm.xlu0 %8758, %v11746_v33   ;;  %15948 = vst [vmem:[#allocation192_spill] sm:$0xff] %v11778_v62  ;;  %v11780_v57 = vpop.eup %9006 }
 0x561   : > { %15949 = vst [vmem:[#allocation206_spill] sm:$0xff] %v11780_v57  ;;  %v11788_v33 = vpop.eup %9008 }
 0x562   : > { %15952 = vst [vmem:[#allocation209_spill] sm:$0xff] %v11788_v33  ;;  %v11790_v23 = vpop.eup %9010 }
 0x563   : > { %3557 = vperm.xlu1 %8759, %v11758_v4   ;;  %v3153_v4 = vmul.f32 1.442695, %v2976_v2  ;;  %v2980_v2 = vsub.f32 %v15950_v37, %v11751_v28  ;;  %15953 = vst [vmem:[#allocation183_spill] sm:$0xff] %v11790_v23  ;;  %v3111_v37 = vmul.f32 1.442695, %v2955_v10  ;;  %v11798_v45 = vpop.eup %9012 }
 0x564   : > { %3482 = vperm.xlu0 %8758, %v11760_v42   ;;  %15956 = vst [vmem:[#allocation184_spill] sm:$0xff] %v11798_v45  ;;  %v11800_v63 = vpop.eup %9014 }
 0x565   : > { %9016 = vpow2.f32 %v3153_v4  ;;  %v15954_v4 = vld [vmem:[#allocation155_spill] sm:$0xff]  ;;  %15957 = vst [vmem:[#allocation195_spill] sm:$0xff] %v11800_v63 }
 0x566   : > { %9018 = vpow2.f32 %v3103_v18  ;;  %v15955_v18 = vld [vmem:[#allocation138_spill] sm:$0xff] }
 0x567   : > { %3563 = vperm.xlu1 %8759, %v11768_v8   ;;  %v3157_v8 = vmul.f32 1.442695, %v2978_v38  ;;  %v2982_v38 = vsub.f32 %v15954_v4, %v11751_v28  ;;  %v2957_v58 = vsub.f32 %v15955_v18, %v11592_v50 }
 0x568   : > { %3488 = vperm.xlu0 %8758, %v11770_v46  }
 0x569   : > { %9020 = vpow2.f32 %v3157_v8  ;;  %v15958_v8 = vld [vmem:[#allocation157_spill] sm:$0xff]  ;;  %v3115_v4 = vmul.f32 1.442695, %v2957_v58 }
 0x56a   : > { %9022 = vpow2.f32 %v3107_v0  ;;  %v15959_v0 = vld [vmem:[#allocation139_spill] sm:$0xff] }
 0x56b   : > { %3569 = vperm.xlu1 %8759, %v11778_v62   ;;  %v3161_v62 = vmul.f32 1.442695, %v2980_v2  ;;  %v2984_v2 = vsub.f32 %v15958_v8, %v11751_v28  ;;  %v2959_v10 = vsub.f32 %v15959_v0, %v11664_v32 }
 0x56c   : > { %3494 = vperm.xlu0 %8758, %v11780_v57  }
 0x56d   : > { %9024 = vpow2.f32 %v3161_v62  ;;  %v3169_v18 = vmul.f32 1.442695, %v2984_v2  ;;  %v15962_v62 = vld [vmem:[#allocation159_spill] sm:$0xff]  ;;  %v3119_v8 = vmul.f32 1.442695, %v2959_v10  ;;  %v15967_v2 = vld [vmem:[#allocation61_spill] sm:$0xff] }
 0x56e   : > { %9026 = vpow2.f32 %v3111_v37  ;;  %v15963_v37 = vld [vmem:[#allocation142_spill] sm:$0xff] }
 0x56f   : > { %3575 = vperm.xlu1 %8759, %v11788_v33   ;;  %v3165_v33 = vmul.f32 1.442695, %v2982_v38  ;;  %v11808_v13 = vpop.eup %9016  ;;  %v2986_v38 = vsub.f32 %v15962_v62, %v11751_v28  ;;  %v2961_v58 = vsub.f32 %v15963_v37, %v11664_v32  ;;  %v15968_v62 = vld [vmem:[#allocation144_spill] sm:$0xff] }
 0x570   : > { %3500 = vperm.xlu0 %8758, %v11790_v23   ;;  %15960 = vst [vmem:[#allocation208_spill] sm:$0xff] %v11808_v13  ;;  %v11810_v50 = vpop.eup %9018  ;;  %v2963_v37 = vsub.f32 %v15968_v62, %v11664_v32 }
 0x571   : > { %15961 = vst [vmem:[#allocation211_spill] sm:$0xff] %v11810_v50  ;;  %9028 = vpow2.f32 %v3165_v33  ;;  %v3173_v33 = vmul.f32 1.442695, %v2986_v38  ;;  %v3123_v10 = vmul.f32 1.442695, %v2961_v58  ;;  %v15971_v38 = vld [vmem:[#allocation64_spill] sm:$0xff] }
 0x572   : > { %9030 = vpow2.f32 %v3115_v4  ;;  %v2988_v4 = vsub.f32 %v15967_v2, %v11751_v28  ;;  %v3127_v58 = vmul.f32 1.442695, %v2963_v37  ;;  %v15972_v2 = vld [vmem:[#allocation146_spill] sm:$0xff] }
 0x573   : > { %3581 = vperm.xlu1 %8759, %v11798_v45   ;;  %v11818_v45 = vpop.eup %9020  ;;  %9032 = vpow2.f32 %v3169_v18  ;;  %v2965_v62 = vsub.f32 %v15972_v2, %v11664_v32 }
 0x574   : > { %3506 = vperm.xlu0 %8758, %v11800_v63   ;;  %15964 = vst [vmem:[#allocation194_spill] sm:$0xff] %v11818_v45  ;;  %v11820_v0 = vpop.eup %9022  ;;  %9034 = vpow2.f32 %v3119_v8  ;;  %v3177_v18 = vmul.f32 1.442695, %v2988_v4  ;;  %v2990_v8 = vsub.f32 %v15971_v38, %v11751_v28 }
 0x575   : > { %15965 = vst [vmem:[#allocation197_spill] sm:$0xff] %v11820_v0  ;;  %9036 = vpow2.f32 %v3173_v33  ;;  %v15975_v33 = vld [vmem:[#allocation45_spill] sm:$0xff]  ;;  %v3131_v38 = vmul.f32 1.442695, %v2965_v62 }
 0x576   : > { %9038 = vpow2.f32 %v3123_v10  ;;  %v15976_v10 = vld [vmem:[#allocation38_spill] sm:$0xff] }
 0x577   : > { %3587 = vperm.xlu1 %8759, %v11808_v13   ;;  %v11824_v13 = vsub.s32 4, %v15810_v6  ;;  %v11831_v51 = vpop.eup %9024  ;;  %9040 = vpow2.f32 %v3177_v18  ;;  %v2967_v37 = vsub.f32 %v15976_v10, %v11664_v32  ;;  %v15979_v18 = vld [vmem:[#allocation47_spill] sm:$0xff] }
 0x578   : > { %3512 = vperm.xlu0 %8758, %v11810_v50   ;;  %15969 = vst [vmem:[#allocation213_spill] sm:$0xff] %v11831_v51  ;;  %v11833_v47 = vpop.eup %9026  ;;  %9042 = vpow2.f32 %v3127_v58  ;;  %v15980_v58 = vld [vmem:[#allocation40_spill] sm:$0xff] }
 0x579   : > { %15966 = vst [vmem:[#allocation210_spill] sm:$0xff] %v11824_v13  ;;  %15970 = vst [vmem:[#allocation196_spill] sm:$0xff] %v11833_v47  ;;  %v2969_v62 = vsub.f32 %v15980_v58, %v11664_v32 }
 0x57b   : > { %3593 = vperm.xlu1 %8759, %v11818_v45   ;;  %v11838_v45 = vrot.slane %v11581_v56, %v11824_v13  ;;  %v11845_v61 = vpop.eup %9028  ;;  %v3181_v13 = vmul.f32 1.442695, %v2990_v8 }
 0x57c   : > { %3518 = vperm.xlu0 %8758, %v11820_v0   ;;  %15973 = vst [vmem:[#allocation199_spill] sm:$0xff] %v11845_v61  ;;  %v11847_v26 = vpop.eup %9030 }
 0x57d   : > { %15974 = vst [vmem:[#allocation212_spill] sm:$0xff] %v11847_v26  ;;  %v2992_v4 = vsub.f32 %v15975_v33, %v11838_v45  ;;  %9044 = vpow2.f32 %v3181_v13  ;;  %v2994_v8 = vsub.f32 %v15979_v18, %v11838_v45  ;;  %v3135_v33 = vmul.f32 1.442695, %v2967_v37  ;;  %v15983_v13 = vld [vmem:[#allocation49_spill] sm:$0xff] }
 0x57e   : > { %9046 = vpow2.f32 %v3131_v38  ;;  %v3139_v18 = vmul.f32 1.442695, %v2969_v62  ;;  %v15984_v38 = vld [vmem:[#allocation42_spill] sm:$0xff] }
 0x57f   : > { %3599 = vperm.xlu1 %8759, %v11831_v51   ;;  %v11855_v51 = vpop.eup %9032  ;;  %v2971_v37 = vsub.f32 %v15984_v38, %v11664_v32 }
 0x580   : > { %3524 = vperm.xlu0 %8758, %v11833_v47   ;;  %15977 = vst [vmem:[#allocation215_spill] sm:$0xff] %v11855_v51  ;;  %v11857_v2 = vpop.eup %9034 }
 0x581   : > { %15978 = vst [vmem:[#allocation186_spill] sm:$0xff] %v11857_v2  ;;  %v11865_v12 = vpop.eup %9036 }
 0x582   : > { %15981 = vst [vmem:[#allocation198_spill] sm:$0xff] %v11865_v12  ;;  %v11867_v10 = vpop.eup %9038 }
 0x583   : > { %3605 = vperm.xlu1 %8759, %v11845_v61   ;;  %v3185_v61 = vmul.f32 1.442695, %v2992_v4  ;;  %15982 = vst [vmem:[#allocation201_spill] sm:$0xff] %v11867_v10  ;;  %v2996_v4 = vsub.f32 %v15983_v13, %v11838_v45  ;;  %v3143_v13 = vmul.f32 1.442695, %v2971_v37 }
 0x584   : > { %3530 = vperm.xlu0 %8758, %v11847_v26  }
 0x585   : > { %9048 = vpow2.f32 %v3185_v61  ;;  %v15987_v61 = vld [vmem:[#allocation51_spill] sm:$0xff] }
 0x586   : > { %9050 = vpow2.f32 %v3135_v33  ;;  %v15988_v33 = vld [vmem:[#allocation44_spill] sm:$0xff] }
 0x587   : > { %3611 = vperm.xlu1 %8759, %v11855_v51   ;;  %v3189_v51 = vmul.f32 1.442695, %v2994_v8  ;;  %v2998_v8 = vsub.f32 %v15987_v61, %v11838_v45  ;;  %v2973_v62 = vsub.f32 %v15988_v33, %v11664_v32 }
 0x588   : > { %3536 = vperm.xlu0 %8758, %v11857_v2   ;;  %v11875_v2 = vpop.eup %9040 }
 0x589   : > { %15985 = vst [vmem:[#allocation214_spill] sm:$0xff] %v11875_v2  ;;  %v11877_v58 = vpop.eup %9042  ;;  %9052 = vpow2.f32 %v3189_v51  ;;  %v15991_v51 = vld [vmem:[#allocation53_spill] sm:$0xff]  ;;  %v3147_v61 = vmul.f32 1.442695, %v2973_v62 }
 0x58a   : > { %15986 = vst [vmem:[#allocation217_spill] sm:$0xff] %v11877_v58  ;;  %9054 = vpow2.f32 %v3139_v18  ;;  %v15992_v18 = vld [vmem:[#allocation148_spill] sm:$0xff] }
 0x58b   : > { %3617 = vperm.xlu1 %8759, %v11865_v12   ;;  %v3193_v12 = vmul.f32 1.442695, %v2996_v4  ;;  %v3000_v4 = vsub.f32 %v15991_v51, %v11838_v45  ;;  %v2975_v37 = vsub.f32 %v15992_v18, %v11751_v28 }
 0x58c   : > { %3542 = vperm.xlu0 %8758, %v11867_v10   ;;  %v11885_v10 = vpop.eup %9044 }
 0x58d   : > { %15989 = vst [vmem:[#allocation117_spill] sm:$0xff] %v11885_v10  ;;  %v11887_v38 = vpop.eup %9046  ;;  %9056 = vpow2.f32 %v3193_v12  ;;  %v3201_v33 = vmul.f32 1.442695, %v3000_v4  ;;  %v15995_v12 = vld [vmem:[#allocation55_spill] sm:$0xff]  ;;  %v3151_v51 = vmul.f32 1.442695, %v2975_v37 }
 0x58e   : > { %15990 = vst [vmem:[#allocation63_spill] sm:$0xff] %v11887_v38  ;;  %9058 = vpow2.f32 %v3143_v13  ;;  %v15996_v13 = vld [vmem:[#allocation150_spill] sm:$0xff]  ;;  %v16000_v4 = vld [vmem:[#allocation57_spill] sm:$0xff] }
 0x58f   : > { %3623 = vperm.xlu1 %8759, %v11875_v2   ;;  %v3197_v2 = vmul.f32 1.442695, %v2998_v8  ;;  %v3002_v8 = vsub.f32 %v15995_v12, %v11838_v45  ;;  %v2977_v62 = vsub.f32 %v15996_v13, %v11751_v28  ;;  %v16001_v12 = vld [vmem:[#allocation152_spill] sm:$0xff] }
 0x590   : > { %3548 = vperm.xlu0 %8758, %v11877_v58   ;;  %v11895_v58 = vpop.eup %9048  ;;  %v2979_v13 = vsub.f32 %v16001_v12, %v11751_v28 }
 0x591   : > { %15993 = vst [vmem:[#allocation124_spill] sm:$0xff] %v11895_v58  ;;  %v11897_v32 = vpop.eup %9050  ;;  %9060 = vpow2.f32 %v3197_v2  ;;  %v3205_v2 = vmul.f32 1.442695, %v3002_v8  ;;  %v3155_v37 = vmul.f32 1.442695, %v2977_v62  ;;  %v16004_v8 = vld [vmem:[#allocation59_spill] sm:$0xff] }
 0x592   : > { %15994 = vst [vmem:[#allocation62_spill] sm:$0xff] %v11897_v32  ;;  %9062 = vpow2.f32 %v3147_v61  ;;  %v3004_v61 = vsub.f32 %v16000_v4, %v11838_v45  ;;  %v3159_v62 = vmul.f32 1.442695, %v2979_v13  ;;  %v16005_v4 = vld [vmem:[#allocation154_spill] sm:$0xff] }
 0x593   : > { %3629 = vperm.xlu1 %8759, %v11885_v10   ;;  %v11905_v10 = vpop.eup %9052  ;;  %9064 = vpow2.f32 %v3201_v33  ;;  %v2981_v12 = vsub.f32 %v16005_v4, %v11751_v28 }
 0x594   : > { %3554 = vperm.xlu0 %8758, %v11887_v38   ;;  %15997 = vst [vmem:[#allocation125_spill] sm:$0xff] %v11905_v10  ;;  %v11907_v18 = vpop.eup %9054  ;;  %9066 = vpow2.f32 %v3151_v51  ;;  %v3209_v33 = vmul.f32 1.442695, %v3004_v61  ;;  %v3006_v51 = vsub.f32 %v16004_v8, %v11838_v45 }
 0x595   : > { %15998 = vst [vmem:[#allocation66_spill] sm:$0xff] %v11907_v18  ;;  %9068 = vpow2.f32 %v3205_v2  ;;  %v16008_v2 = vld [vmem:[#allocation67_spill] sm:$0xff]  ;;  %v3163_v8 = vmul.f32 1.442695, %v2981_v12 }
 0x596   : > { %9070 = vpow2.f32 %v3155_v37  ;;  %v16009_v37 = vld [vmem:[#allocation156_spill] sm:$0xff] }
 0x597   : > { %3635 = vperm.xlu1 %8759, %v11895_v58   ;;  %v11911_v58 = vsub.s32 5, %v15810_v6  ;;  %9072 = vpow2.f32 %v3209_v33  ;;  %v2983_v13 = vsub.f32 %v16009_v37, %v11751_v28  ;;  %v16012_v33 = vld [vmem:[#allocation69_spill] sm:$0xff] }
 0x598   : > { %3560 = vperm.xlu0 %8758, %v11897_v32   ;;  %v11918_v32 = vpop.eup %9056  ;;  %9074 = vpow2.f32 %v3159_v62  ;;  %v16013_v62 = vld [vmem:[#allocation158_spill] sm:$0xff] }
 0x599   : > { %15999 = vst [vmem:[#allocation127_spill] sm:$0xff] %v11911_v58  ;;  %16002 = vst [vmem:[#allocation111_spill] sm:$0xff] %v11918_v32  ;;  %v11920_v38 = vpop.eup %9058  ;;  %v2985_v12 = vsub.f32 %v16013_v62, %v11751_v28 }
 0x59a   : > { %16003 = vst [vmem:[#allocation129_spill] sm:$0xff] %v11920_v38 }
 0x59b   : > { %3641 = vperm.xlu1 %8759, %v11905_v10   ;;  %v11925_v10 = vrot.slane %v11581_v56, %v11911_v58  ;;  %v3213_v58 = vmul.f32 1.442695, %v3006_v51 }
 0x59c   : > { %3566 = vperm.xlu0 %8758, %v11907_v18   ;;  %v11932_v18 = vpop.eup %9060 }
 0x59d   : > { %16006 = vst [vmem:[#allocation112_spill] sm:$0xff] %v11932_v18  ;;  %v11934_v26 = vpop.eup %9062  ;;  %v3008_v61 = vsub.f32 %v16008_v2, %v11925_v10  ;;  %9076 = vpow2.f32 %v3213_v58  ;;  %v3010_v51 = vsub.f32 %v16012_v33, %v11925_v10  ;;  %v3167_v2 = vmul.f32 1.442695, %v2983_v13  ;;  %v16016_v58 = vld [vmem:[#allocation71_spill] sm:$0xff] }
 0x59e   : > { %16007 = vst [vmem:[#allocation131_spill] sm:$0xff] %v11934_v26  ;;  %9078 = vpow2.f32 %v3163_v8  ;;  %v3171_v33 = vmul.f32 1.442695, %v2985_v12  ;;  %v16017_v8 = vld [vmem:[#allocation160_spill] sm:$0xff] }
 0x59f   : > { %3647 = vperm.xlu1 %8759, %v11918_v32   ;;  %v11942_v32 = vpop.eup %9064  ;;  %v2987_v13 = vsub.f32 %v16017_v8, %v11751_v28 }
 0x5a0   : > { %3572 = vperm.xlu0 %8758, %v11920_v38   ;;  %16010 = vst [vmem:[#allocation113_spill] sm:$0xff] %v11942_v32  ;;  %v11944_v4 = vpop.eup %9066 }
 0x5a1   : > { %16011 = vst [vmem:[#allocation133_spill] sm:$0xff] %v11944_v4  ;;  %v3175_v12 = vmul.f32 1.442695, %v2987_v13 }
 0x5a3   : > { %3653 = vperm.xlu1 %8759, %v11932_v18   ;;  %v3217_v18 = vmul.f32 1.442695, %v3008_v61  ;;  %v3012_v61 = vsub.f32 %v16016_v58, %v11925_v10  ;;  %v16021_v58 = vld [vmem:[#allocation65_spill] sm:$0xff] }
 0x5a4   : > { %3578 = vperm.xlu0 %8758, %v11934_v26   ;;  %v11952_v26 = vpop.eup %9068  ;;  %v2989_v8 = vsub.f32 %v16021_v58, %v11751_v28  ;;  %v16026_v28 = vld [vmem:[#allocation46_spill] sm:$0xff] }
 0x5a5   : > { %16014 = vst [vmem:[#allocation114_spill] sm:$0xff] %v11952_v26  ;;  %v11954_v37 = vpop.eup %9070  ;;  %9080 = vpow2.f32 %v3217_v18  ;;  %v3225_v18 = vmul.f32 1.442695, %v3012_v61  ;;  %v16025_v61 = vld [vmem:[#allocation75_spill] sm:$0xff] }
 0x5a6   : > { %16015 = vst [vmem:[#allocation135_spill] sm:$0xff] %v11954_v37  ;;  %9082 = vpow2.f32 %v3167_v2  ;;  %v3179_v13 = vmul.f32 1.442695, %v2989_v8 }
 0x5a7   : > { %3659 = vperm.xlu1 %8759, %v11942_v32   ;;  %v3221_v32 = vmul.f32 1.442695, %v3010_v51  ;;  %v16020_v51 = vld [vmem:[#allocation73_spill] sm:$0xff] }
 0x5a8   : > { %3584 = vperm.xlu0 %8758, %v11944_v4   ;;  %v11962_v4 = vpop.eup %9072  ;;  %v3014_v2 = vsub.f32 %v16020_v51, %v11925_v10  ;;  %v2991_v51 = vsub.f32 %v16026_v28, %v11838_v45 }
 0x5a9   : > { %16018 = vst [vmem:[#allocation115_spill] sm:$0xff] %v11962_v4  ;;  %v11966_v38 = vpop.eup %9074  ;;  %9084 = vpow2.f32 %v3221_v32 }
 0x5aa   : > { %16019 = vst [vmem:[#allocation137_spill] sm:$0xff] %v11966_v38  ;;  %9086 = vpow2.f32 %v3171_v33  ;;  %v3229_v32 = vmul.f32 1.442695, %v3014_v2  ;;  %v3016_v33 = vsub.f32 %v16025_v61, %v11925_v10  ;;  %v16029_v2 = vld [vmem:[#allocation77_spill] sm:$0xff]  ;;  %v3183_v8 = vmul.f32 1.442695, %v2991_v51 }
 0x5ab   : > { %3665 = vperm.xlu1 %8759, %v11952_v26   ;;  %v11976_v26 = vpop.eup %9076  ;;  %9088 = vpow2.f32 %v3225_v18  ;;  %v16030_v61 = vld [vmem:[#allocation48_spill] sm:$0xff] }
 0x5ac   : > { %3590 = vperm.xlu0 %8758, %v11954_v37   ;;  %16022 = vst [vmem:[#allocation116_spill] sm:$0xff] %v11976_v26  ;;  %v11980_v47 = vpop.eup %9078  ;;  %9090 = vpow2.f32 %v3175_v12  ;;  %v3233_v18 = vmul.f32 1.442695, %v3016_v33  ;;  %v3018_v12 = vsub.f32 %v16029_v2, %v11925_v10  ;;  %v2993_v28 = vsub.f32 %v16030_v61, %v11838_v45  ;;  %v16034_v61 = vld [vmem:[#allocation50_spill] sm:$0xff] }
 0x5ad   : > { %16024 = vst [vmem:[#allocation118_spill] sm:$0xff] %v11980_v47  ;;  %9092 = vpow2.f32 %v3229_v32  ;;  %v15266_v32 = vsub.s32 6, %v15810_v6 }
 0x5ae   : > { %v11964_v62 = vpop.permute.xlu1 %3467  ;;  %9094 = vpow2.f32 %v3179_v13  ;;  %v3237_v33 = vmul.f32 1.442695, %v3018_v12  ;;  %v16033_v13 = vld [vmem:[#allocation79_spill] sm:$0xff]  ;;  %v3187_v2 = vmul.f32 1.442695, %v2993_v28 }
 0x5af   : > { %v11968_v60 = vpop.permute.xlu0 %3440  ;;  %3671 = vperm.xlu1 %8759, %v11962_v4   ;;  %v11990_v58 = vpop.eup %9080  ;;  %9096 = vpow2.f32 %v3233_v18  ;;  %v3020_v51 = vsub.f32 %v16033_v13, %v11925_v10  ;;  %v12031_v18 = vrot.slane %v11581_v56, %v15266_v32 }
 0x5b0   : > { %3596 = vperm.xlu0 %8758, %v11966_v38   ;;  %16027 = vst [vmem:[#allocation141_spill] sm:$0xff] %v11990_v58  ;;  %v11994_v38 = vpop.eup %9082  ;;  %9098 = vpow2.f32 %v3183_v8  ;;  %v16037_v8 = vld [vmem:[#allocation81_spill] sm:$0xff] }
 0x5b1   : > { %16028 = vst [vmem:[#allocation119_spill] sm:$0xff] %v11994_v38  ;;  %9100 = vpow2.f32 %v3237_v33  ;;  %v3241_v12 = vmul.f32 1.442695, %v3020_v51  ;;  %v3022_v28 = vsub.f32 %v16037_v8, %v11925_v10  ;;  %v16041_v51 = vld [vmem:[#allocation83_spill] sm:$0xff]  ;;  %v16042_v8 = vld [vmem:[#allocation54_spill] sm:$0xff] }
 0x5b2   : > { %v11978_v37 = vpop.permute.xlu1 %3485  ;;  %9102 = vpow2.f32 %v3187_v2 }
 0x5b3   : > { %16023 = vst [vmem:[#allocation140_spill] sm:$0xff] %v11978_v37  ;;  %v11982_v43 = vpop.permute.xlu0 %3443  ;;  %3677 = vperm.xlu1 %8759, %v11976_v26   ;;  %v12004_v26 = vpop.eup %9084  ;;  %9104 = vpow2.f32 %v3241_v12  ;;  %v3245_v33 = vmul.f32 1.442695, %v3022_v28  ;;  %v16045_v28 = vld [vmem:[#allocation85_spill] sm:$0xff] }
 0x5b4   : > { %3602 = vperm.xlu0 %8758, %v11980_v47   ;;  %16031 = vst [vmem:[#allocation143_spill] sm:$0xff] %v12004_v26  ;;  %v12008_v16 = vpop.eup %9086 }
 0x5b5   : > { %16032 = vst [vmem:[#allocation120_spill] sm:$0xff] %v12008_v16 }
 0x5b6   : > { %v11992_v4 = vpop.permute.xlu1 %3491 }
 0x5b7   : > { %v11996_v0 = vpop.permute.xlu0 %3446  ;;  %3683 = vperm.xlu1 %8759, %v11990_v58   ;;  %v2995_v58 = vsub.f32 %v16034_v61, %v11838_v45  ;;  %v16038_v61 = vld [vmem:[#allocation52_spill] sm:$0xff] }
 0x5b8   : > { %3608 = vperm.xlu0 %8758, %v11994_v38   ;;  %v12019_v38 = vpop.eup %9088 }
 0x5b9   : > { %16035 = vst [vmem:[#allocation145_spill] sm:$0xff] %v12019_v38  ;;  %v12023_v50 = vpop.eup %9090  ;;  %v3191_v13 = vmul.f32 1.442695, %v2995_v58  ;;  %v3024_v58 = vsub.f32 %v16041_v51, %v12031_v18  ;;  %v16046_v51 = vld [vmem:[#allocation56_spill] sm:$0xff] }
 0x5ba   : > { %v12006_v47 = vpop.permute.xlu1 %3497  ;;  %16036 = vst [vmem:[#allocation121_spill] sm:$0xff] %v12023_v50  ;;  %v12038_v34 = vpop.eup %9092 }
 0x5bb   : > { %v12010_v19 = vpop.permute.xlu0 %3449  ;;  %3689 = vperm.xlu1 %8759, %v12004_v26   ;;  %16039 = vst [vmem:[#allocation147_spill] sm:$0xff] %v12038_v34  ;;  %v12042_v63 = vpop.eup %9094  ;;  %9106 = vpow2.f32 %v3191_v13  ;;  %v3249_v12 = vmul.f32 1.442695, %v3024_v58  ;;  %v16049_v58 = vld [vmem:[#allocation87_spill] sm:$0xff] }
 0x5bc   : > { %3614 = vperm.xlu0 %8758, %v12008_v16   ;;  %v2997_v16 = vsub.f32 %v16038_v61, %v11838_v45  ;;  %16040 = vst [vmem:[#allocation122_spill] sm:$0xff] %v12042_v63  ;;  %v2999_v61 = vsub.f32 %v16042_v8, %v11838_v45  ;;  %9108 = vpow2.f32 %v3245_v33  ;;  %v3001_v8 = vsub.f32 %v16046_v51, %v11838_v45 }
 0x5be   : > { %v12021_v39 = vpop.permute.xlu1 %3503  ;;  %v3195_v2 = vmul.f32 1.442695, %v2997_v16  ;;  %v3026_v16 = vsub.f32 %v16045_v28, %v12031_v18  ;;  %v3199_v13 = vmul.f32 1.442695, %v2999_v61  ;;  %v3203_v61 = vmul.f32 1.442695, %v3001_v8 }
 0x5bf   : > { %v12025_v26 = vpop.permute.xlu0 %3452  ;;  %3695 = vperm.xlu1 %8759, %v12019_v38   ;;  %v16050_v28 = vld [vmem:[#allocation58_spill] sm:$0xff] }
 0x5c0   : > { %3620 = vperm.xlu0 %8758, %v12023_v50   ;;  %v12052_v50 = vpop.eup %9096  ;;  %9110 = vpow2.f32 %v3195_v2  ;;  %v3253_v33 = vmul.f32 1.442695, %v3026_v16  ;;  %v3028_v2 = vsub.f32 %v16049_v58, %v12031_v18  ;;  %v3003_v51 = vsub.f32 %v16050_v28, %v11838_v45  ;;  %v16054_v16 = vld [vmem:[#allocation89_spill] sm:$0xff]  ;;  %v16055_v58 = vld [vmem:[#allocation60_spill] sm:$0xff] }
 0x5c1   : > { %16043 = vst [vmem:[#allocation37_spill] sm:$0xff] %v12052_v50  ;;  %v12056_v14 = vpop.eup %9098  ;;  %9112 = vpow2.f32 %v3249_v12  ;;  %v3005_v28 = vsub.f32 %v16055_v58, %v11838_v45  ;;  %v16060_v45 = vld [vmem:[#allocation68_spill] sm:$0xff] }
 0x5c2   : > { %v12040_v38 = vpop.permute.xlu1 %3509  ;;  %16044 = vst [vmem:[#allocation123_spill] sm:$0xff] %v12056_v14  ;;  %9114 = vpow2.f32 %v3199_v13  ;;  %v3257_v12 = vmul.f32 1.442695, %v3028_v2  ;;  %v3030_v13 = vsub.f32 %v16054_v16, %v12031_v18  ;;  %v3207_v8 = vmul.f32 1.442695, %v3003_v51  ;;  %v16059_v2 = vld [vmem:[#allocation91_spill] sm:$0xff] }
 0x5c3   : > { %v12044_v32 = vpop.permute.xlu0 %3455  ;;  %3701 = vperm.xlu1 %8759, %v12038_v34   ;;  %v12066_v34 = vpop.eup %9100  ;;  %9116 = vpow2.f32 %v3253_v33  ;;  %v3211_v51 = vmul.f32 1.442695, %v3005_v28  ;;  %v3007_v16 = vsub.f32 %v16060_v45, %v11925_v10 }
 0x5c4   : > { %3626 = vperm.xlu0 %8758, %v12042_v63   ;;  %16047 = vst [vmem:[#allocation39_spill] sm:$0xff] %v12066_v34  ;;  %v12070_v23 = vpop.eup %9102  ;;  %9118 = vpow2.f32 %v3203_v61  ;;  %v3261_v33 = vmul.f32 1.442695, %v3030_v13  ;;  %v3032_v61 = vsub.f32 %v16059_v2, %v12031_v18  ;;  %v16063_v13 = vld [vmem:[#allocation93_spill] sm:$0xff]  ;;  %v16064_v2 = vld [vmem:[#allocation70_spill] sm:$0xff] }
 0x5c5   : > { %16048 = vst [vmem:[#allocation126_spill] sm:$0xff] %v12070_v23  ;;  %9120 = vpow2.f32 %v3257_v12  ;;  %v3215_v28 = vmul.f32 1.442695, %v3007_v16  ;;  %v3009_v45 = vsub.f32 %v16064_v2, %v11925_v10  ;;  %v16068_v2 = vld [vmem:[#allocation72_spill] sm:$0xff] }
 0x5c6   : > { %v12054_v44 = vpop.permute.xlu1 %3515  ;;  %9122 = vpow2.f32 %v3207_v8  ;;  %v3265_v12 = vmul.f32 1.442695, %v3032_v61  ;;  %v3034_v8 = vsub.f32 %v16063_v13, %v12031_v18 }
 0x5c7   : > { %v12058_v36 = vpop.permute.xlu0 %3458  ;;  %3707 = vperm.xlu1 %8759, %v12052_v50   ;;  %v12080_v50 = vpop.eup %9104  ;;  %9124 = vpow2.f32 %v3261_v33  ;;  %v15299_v33 = vsub.s32 7, %v15810_v6  ;;  %v3219_v13 = vmul.f32 1.442695, %v3009_v45 }
 0x5c8   : > { %3632 = vperm.xlu0 %8758, %v12056_v14   ;;  %16051 = vst [vmem:[#allocation41_spill] sm:$0xff] %v12080_v50  ;;  %v12084_v57 = vpop.eup %9106  ;;  %9126 = vpow2.f32 %v3211_v51  ;;  %v3269_v61 = vmul.f32 1.442695, %v3034_v8  ;;  %v16067_v51 = vld [vmem:[#allocation95_spill] sm:$0xff] }
 0x5c9   : > { %16053 = vst [vmem:[#allocation43_spill] sm:$0xff] %v12084_v57  ;;  %9128 = vpow2.f32 %v3265_v12  ;;  %v3036_v16 = vsub.f32 %v16067_v51, %v12031_v18  ;;  %v12149_v12 = vrot.slane %v11581_v56, %v15299_v33 }
 0x5ca   : > { %v12068_v63 = vpop.permute.xlu1 %3521  ;;  %9130 = vpow2.f32 %v3215_v28  ;;  %v16071_v28 = vld [vmem:[#allocation97_spill] sm:$0xff] }
 0x5cb   : > { %v12072_v54 = vpop.permute.xlu0 %3461  ;;  %3713 = vperm.xlu1 %8759, %v12066_v34   ;;  %v12094_v34 = vpop.eup %9108  ;;  %9132 = vpow2.f32 %v3269_v61  ;;  %v3273_v8 = vmul.f32 1.442695, %v3036_v16  ;;  %v3038_v45 = vsub.f32 %v16071_v28, %v12031_v18  ;;  %v16076_v16 = vld [vmem:[#allocation99_spill] sm:$0xff]  ;;  %v16077_v28 = vld [vmem:[#allocation76_spill] sm:$0xff] }
 0x5cc   : > { %3638 = vperm.xlu0 %8758, %v12070_v23   ;;  %16056 = vst [vmem:[#allocation130_spill] sm:$0xff] %v12094_v34  ;;  %v12098_v41 = vpop.eup %9110  ;;  %9134 = vpow2.f32 %v3219_v13 }
 0x5cd   : > { %16058 = vst [vmem:[#allocation132_spill] sm:$0xff] %v12098_v41  ;;  %v12108_v58 = vpop.eup %9112  ;;  %9136 = vpow2.f32 %v3273_v8  ;;  %v3277_v61 = vmul.f32 1.442695, %v3038_v45  ;;  %v16081_v45 = vld [vmem:[#allocation101_spill] sm:$0xff] }
 0x5ce   : > { %v12082_v14 = vpop.permute.xlu1 %3527  ;;  %16061 = vst [vmem:[#allocation151_spill] sm:$0xff] %v12108_v58 }
 0x5cf   : > { %16052 = vst [vmem:[#allocation128_spill] sm:$0xff] %v12082_v14  ;;  %v12086_v9 = vpop.permute.xlu0 %3464  ;;  %3719 = vperm.xlu1 %8759, %v12080_v50  }
 0x5d0   : > { %3644 = vperm.xlu0 %8758, %v12084_v57   ;;  %v12112_v57 = vpop.eup %9114 }
 0x5d1   : > { %16062 = vst [vmem:[#allocation134_spill] sm:$0xff] %v12112_v57 }
 0x5d2   : > { %v12096_v23 = vpop.permute.xlu1 %3533 }
 0x5d3   : > { %16057 = vst [vmem:[#allocation149_spill] sm:$0xff] %v12096_v23  ;;  %v12100_v52 = vpop.permute.xlu0 %3470  ;;  %3725 = vperm.xlu1 %8759, %v12094_v34   ;;  %v12122_v34 = vpop.eup %9116 }
 0x5d4   : > { %3650 = vperm.xlu0 %8758, %v12098_v41   ;;  %16065 = vst [vmem:[#allocation153_spill] sm:$0xff] %v12122_v34  ;;  %v12126_v17 = vpop.eup %9118 }
 0x5d5   : > { %16066 = vst [vmem:[#allocation136_spill] sm:$0xff] %v12126_v17 }
 0x5d6   : > { %v12110_v50 = vpop.permute.xlu1 %3539 }
 0x5d7   : > { %v12114_v46 = vpop.permute.xlu0 %3473  ;;  %3731 = vperm.xlu1 %8759, %v12108_v58   ;;  %v3011_v58 = vsub.f32 %v16068_v2, %v11925_v10  ;;  %v16072_v2 = vld [vmem:[#allocation74_spill] sm:$0xff] }
 0x5d8   : > { %3656 = vperm.xlu0 %8758, %v12112_v57   ;;  %v12137_v57 = vpop.eup %9120 }
 0x5d9   : > { %16069 = vst [vmem:[#allocation155_spill] sm:$0xff] %v12137_v57  ;;  %v12141_v5 = vpop.eup %9122  ;;  %v3223_v51 = vmul.f32 1.442695, %v3011_v58  ;;  %v3040_v58 = vsub.f32 %v16076_v16, %v12149_v12  ;;  %v16082_v16 = vld [vmem:[#allocation78_spill] sm:$0xff] }
 0x5da   : > { %v12124_v41 = vpop.permute.xlu1 %3545  ;;  %16070 = vst [vmem:[#allocation138_spill] sm:$0xff] %v12141_v5  ;;  %v12156_v31 = vpop.eup %9124 }
 0x5db   : > { %v12128_v42 = vpop.permute.xlu0 %3476  ;;  %3737 = vperm.xlu1 %8759, %v12122_v34   ;;  %16073 = vst [vmem:[#allocation157_spill] sm:$0xff] %v12156_v31  ;;  %v12160_v6 = vpop.eup %9126  ;;  %9138 = vpow2.f32 %v3223_v51  ;;  %v3281_v8 = vmul.f32 1.442695, %v3040_v58  ;;  %v16086_v58 = vld [vmem:[#allocation103_spill] sm:$0xff] }
 0x5dc   : > { %3662 = vperm.xlu0 %8758, %v12126_v17   ;;  %v3013_v17 = vsub.f32 %v16072_v2, %v11925_v10  ;;  %16074 = vst [vmem:[#allocation139_spill] sm:$0xff] %v12160_v6  ;;  %v3015_v2 = vsub.f32 %v16077_v28, %v11925_v10  ;;  %v12170_v33 = vpop.eup %9128  ;;  %9140 = vpow2.f32 %v3277_v61  ;;  %v3017_v28 = vsub.f32 %v16082_v16, %v11925_v10 }
 0x5dd   : > { %16078 = vst [vmem:[#allocation142_spill] sm:$0xff] %v12170_v33  ;;  %v12174_v11 = vpop.eup %9130 }
 0x5de   : > { %v12139_v48 = vpop.permute.xlu1 %3551  ;;  %v3227_v13 = vmul.f32 1.442695, %v3013_v17  ;;  %16080 = vst [vmem:[#allocation144_spill] sm:$0xff] %v12174_v11  ;;  %v3042_v17 = vsub.f32 %v16081_v45, %v12149_v12  ;;  %v3231_v51 = vmul.f32 1.442695, %v3015_v2  ;;  %v16087_v45 = vld [vmem:[#allocation80_spill] sm:$0xff] }
 0x5df   : > { %v12143_v34 = vpop.permute.xlu0 %3479  ;;  %3743 = vperm.xlu1 %8759, %v12137_v57   ;;  %v3235_v2 = vmul.f32 1.442695, %v3017_v28  ;;  %v3019_v16 = vsub.f32 %v16087_v45, %v11925_v10 }
 0x5e0   : > { %3668 = vperm.xlu0 %8758, %v12141_v5   ;;  %9142 = vpow2.f32 %v3227_v13  ;;  %v3285_v61 = vmul.f32 1.442695, %v3042_v17  ;;  %v3044_v13 = vsub.f32 %v16086_v58, %v12149_v12  ;;  %v16091_v17 = vld [vmem:[#allocation105_spill] sm:$0xff]  ;;  %v16092_v58 = vld [vmem:[#allocation82_spill] sm:$0xff] }
 0x5e1   : > { %9144 = vpow2.f32 %v3281_v8  ;;  %v3239_v28 = vmul.f32 1.442695, %v3019_v16  ;;  %v3021_v45 = vsub.f32 %v16092_v58, %v11925_v10  ;;  %v16097_v10 = vld [vmem:[#allocation84_spill] sm:$0xff] }
 0x5e2   : > { %v12158_v57 = vpop.permute.xlu1 %3557  ;;  %9146 = vpow2.f32 %v3231_v51  ;;  %v3289_v8 = vmul.f32 1.442695, %v3044_v13  ;;  %v3046_v51 = vsub.f32 %v16091_v17, %v12149_v12  ;;  %v16096_v13 = vld [vmem:[#allocation106_spill] sm:$0xff]  ;;  %v3023_v17 = vsub.f32 %v16097_v10, %v12031_v18 }
 0x5e3   : > { %v12162_v56 = vpop.permute.xlu0 %3482  ;;  %3749 = vperm.xlu1 %8759, %v12156_v31   ;;  %v12184_v31 = vpop.eup %9132  ;;  %9148 = vpow2.f32 %v3285_v61  ;;  %v3243_v16 = vmul.f32 1.442695, %v3021_v45 }
 0x5e4   : > { %16075 = vst [vmem:[#allocation159_spill] sm:$0xff] %v12162_v56  ;;  %3674 = vperm.xlu0 %8758, %v12160_v6   ;;  %16083 = vst [vmem:[#allocation64_spill] sm:$0xff] %v12184_v31  ;;  %v12188_v59 = vpop.eup %9134  ;;  %9150 = vpow2.f32 %v3235_v2  ;;  %v3293_v61 = vmul.f32 1.442695, %v3046_v51  ;;  %v3048_v2 = vsub.f32 %v16096_v13, %v12149_v12  ;;  %v16101_v51 = vld [vmem:[#allocation107_spill] sm:$0xff]  ;;  %v16102_v13 = vld [vmem:[#allocation86_spill] sm:$0xff] }
 0x5e5   : > { %16085 = vst [vmem:[#allocation45_spill] sm:$0xff] %v12188_v59  ;;  %9152 = vpow2.f32 %v3289_v8  ;;  %v3247_v45 = vmul.f32 1.442695, %v3023_v17  ;;  %v3025_v10 = vsub.f32 %v16102_v13, %v12031_v18 }
 0x5e6   : > { %v12172_v5 = vpop.permute.xlu1 %3563  ;;  %9154 = vpow2.f32 %v3239_v28  ;;  %v3297_v8 = vmul.f32 1.442695, %v3048_v2  ;;  %v3050_v28 = vsub.f32 %v16101_v51, %v12149_v12  ;;  %v16106_v2 = vld [vmem:[#allocation108_spill] sm:$0xff] }
 0x5e7   : > { %16079 = vst [vmem:[#allocation61_spill] sm:$0xff] %v12172_v5  ;;  %v12176_v29 = vpop.permute.xlu0 %3488  ;;  %3755 = vperm.xlu1 %8759, %v12170_v33   ;;  %v12198_v33 = vpop.eup %9136  ;;  %9156 = vpow2.f32 %v3293_v61  ;;  %v3251_v17 = vmul.f32 1.442695, %v3025_v10  ;;  %v16107_v51 = vld [vmem:[#allocation88_spill] sm:$0xff] }
 0x5e8   : > { %3680 = vperm.xlu0 %8758, %v12174_v11   ;;  %16088 = vst [vmem:[#allocation38_spill] sm:$0xff] %v12198_v33  ;;  %9158 = vpow2.f32 %v3243_v16  ;;  %v3301_v61 = vmul.f32 1.442695, %v3050_v28  ;;  %v3052_v16 = vsub.f32 %v16106_v2, %v12149_v12  ;;  %v3027_v13 = vsub.f32 %v16107_v51, %v12031_v18  ;;  %v16111_v28 = vld [vmem:[#allocation109_spill] sm:$0xff]  ;;  %v16112_v2 = vld [vmem:[#allocation90_spill] sm:$0xff] }
 0x5e9   : > { %9160 = vpow2.f32 %v3297_v8  ;;  %v3029_v51 = vsub.f32 %v16112_v2, %v12031_v18 }
 0x5ea   : > { %v12186_v6 = vpop.permute.xlu1 %3569  ;;  %9162 = vpow2.f32 %v3247_v45  ;;  %v3305_v8 = vmul.f32 1.442695, %v3052_v16  ;;  %v3054_v45 = vsub.f32 %v16111_v28, %v12149_v12  ;;  %v3255_v10 = vmul.f32 1.442695, %v3027_v13 }
 0x5eb   : > { %16084 = vst [vmem:[#allocation146_spill] sm:$0xff] %v12186_v6  ;;  %v12190_v23 = vpop.permute.xlu0 %3494  ;;  %3761 = vperm.xlu1 %8759, %v12184_v31   ;;  %v12202_v6 = vpop.eup %9138  ;;  %9164 = vpow2.f32 %v3301_v61  ;;  %v3259_v16 = vmul.f32 1.442695, %v3029_v51 }
 0x5ec   : > { %3686 = vperm.xlu0 %8758, %v12188_v59   ;;  %16090 = vst [vmem:[#allocation40_spill] sm:$0xff] %v12202_v6  ;;  %v12212_v31 = vpop.eup %9140  ;;  %9166 = vpow2.f32 %v3251_v17  ;;  %v3309_v61 = vmul.f32 1.442695, %v3054_v45  ;;  %v16117_v17 = vld [vmem:[#allocation92_spill] sm:$0xff]  ;;  %v16121_v45 = vld [vmem:[#allocation94_spill] sm:$0xff] }
 0x5ed   : > { %16093 = vst [vmem:[#allocation49_spill] sm:$0xff] %v12212_v31  ;;  %9168 = vpow2.f32 %v3305_v8  ;;  %v3031_v13 = vsub.f32 %v16117_v17, %v12031_v18 }
 0x5ee   : > { %v12200_v11 = vpop.permute.xlu1 %3575  ;;  %9170 = vpow2.f32 %v3255_v10  ;;  %v3033_v10 = vsub.f32 %v16121_v45, %v12031_v18 }
 0x5ef   : > { %16089 = vst [vmem:[#allocation47_spill] sm:$0xff] %v12200_v11  ;;  %v12204_v37 = vpop.permute.xlu0 %3500  ;;  %3767 = vperm.xlu1 %8759, %v12198_v33   ;;  %v12216_v11 = vpop.eup %9142  ;;  %9172 = vpow2.f32 %v3309_v61  ;;  %v3263_v8 = vmul.f32 1.442695, %v3031_v13  ;;  %v16125_v61 = vld [vmem:[#allocation96_spill] sm:$0xff] }
 0x5f0   : > { %3692 = vperm.xlu0 %8758, %v12202_v6   ;;  %16095 = vst [vmem:[#allocation51_spill] sm:$0xff] %v12216_v11  ;;  %v12226_v58 = vpop.eup %9144  ;;  %9174 = vpow2.f32 %v3259_v16  ;;  %v3035_v16 = vsub.f32 %v16125_v61, %v12031_v18 }
 0x5f1   : > { %16098 = vst [vmem:[#allocation44_spill] sm:$0xff] %v12226_v58  ;;  %v12230_v6 = vpop.eup %9146  ;;  %9176 = vpow2.f32 %v3263_v8  ;;  %v16129_v8 = vld [vmem:[#allocation98_spill] sm:$0xff] }
 0x5f2   : > { %v12214_v59 = vpop.permute.xlu1 %3581  ;;  %16100 = vst [vmem:[#allocation148_spill] sm:$0xff] %v12230_v6 }
 0x5f3   : > { %16094 = vst [vmem:[#allocation42_spill] sm:$0xff] %v12214_v59  ;;  %v12218_v40 = vpop.permute.xlu0 %3506  ;;  %3773 = vperm.xlu1 %8759, %v12212_v31   ;;  %v12240_v31 = vpop.eup %9148 }
 0x5f4   : > { %3698 = vperm.xlu0 %8758, %v12216_v11   ;;  %16103 = vst [vmem:[#allocation55_spill] sm:$0xff] %v12240_v31  ;;  %v12244_v5 = vpop.eup %9150 }
 0x5f5   : > { %16105 = vst [vmem:[#allocation57_spill] sm:$0xff] %v12244_v5 }
 0x5f6   : > { %v12228_v33 = vpop.permute.xlu1 %3587 }
 0x5f7   : > { %16099 = vst [vmem:[#allocation53_spill] sm:$0xff] %v12228_v33  ;;  %v12232_v59 = vpop.permute.xlu0 %3512  ;;  %3779 = vperm.xlu1 %8759, %v12226_v58   ;;  %v12254_v58 = vpop.eup %9152 }
 0x5f8   : > { %3704 = vperm.xlu0 %8758, %v12230_v6   ;;  %16108 = vst [vmem:[#allocation152_spill] sm:$0xff] %v12254_v58 }
 0x5fa   : > { %v12242_v11 = vpop.permute.xlu1 %3593 }
 0x5fb   : > { %16104 = vst [vmem:[#allocation150_spill] sm:$0xff] %v12242_v11  ;;  %v12246_v14 = vpop.permute.xlu0 %3518  ;;  %3785 = vperm.xlu1 %8759, %v12240_v31   ;;  %v12258_v11 = vpop.eup %9154 }
 0x5fc   : > { %3710 = vperm.xlu0 %8758, %v12244_v5   ;;  %16110 = vst [vmem:[#allocation154_spill] sm:$0xff] %v12258_v11  ;;  %v12268_v31 = vpop.eup %9156 }
 0x5fd   : > { %16113 = vst [vmem:[#allocation67_spill] sm:$0xff] %v12268_v31 }
 0x5fe   : > { %v12256_v6 = vpop.permute.xlu1 %3599 }
 0x5ff   : > { %16109 = vst [vmem:[#allocation59_spill] sm:$0xff] %v12256_v6  ;;  %v12260_v33 = vpop.permute.xlu0 %3524  ;;  %3791 = vperm.xlu1 %8759, %v12254_v58   ;;  %v12272_v6 = vpop.eup %9158 }
 0x600   : > { %3716 = vperm.xlu0 %8758, %v12258_v11   ;;  %16115 = vst [vmem:[#allocation69_spill] sm:$0xff] %v12272_v6  ;;  %v12280_v28 = vpop.eup %9160 }
 0x601   : > { %16118 = vst [vmem:[#allocation71_spill] sm:$0xff] %v12280_v28  ;;  %v12284_v58 = vpop.eup %9162 }
 0x602   : > { %v12270_v5 = vpop.permute.xlu1 %3605  ;;  %16120 = vst [vmem:[#allocation73_spill] sm:$0xff] %v12284_v58  ;;  %v12292_v51 = vpop.eup %9164 }
 0x603   : > { %16114 = vst [vmem:[#allocation156_spill] sm:$0xff] %v12270_v5  ;;  %v12274_v56 = vpop.permute.xlu0 %3530  ;;  %3797 = vperm.xlu1 %8759, %v12268_v31   ;;  %16122 = vst [vmem:[#allocation65_spill] sm:$0xff] %v12292_v51  ;;  %v12296_v31 = vpop.eup %9166  ;;  %v16136_v5 = vld [vmem:[#allocation102_spill] sm:$0xff] }
 0x604   : > { %16116 = vst [vmem:[#allocation158_spill] sm:$0xff] %v12274_v56  ;;  %3722 = vperm.xlu0 %8758, %v12272_v6   ;;  %16124 = vst [vmem:[#allocation46_spill] sm:$0xff] %v12296_v31  ;;  %v12304_v13 = vpop.eup %9168 }
 0x605   : > { %16126 = vst [vmem:[#allocation77_spill] sm:$0xff] %v12304_v13 }
 0x606   : > { %v12282_v2 = vpop.permute.xlu1 %3611 }
 0x607   : > { %16119 = vst [vmem:[#allocation160_spill] sm:$0xff] %v12282_v2  ;;  %v12286_v11 = vpop.permute.xlu0 %3536  ;;  %3803 = vperm.xlu1 %8759, %v12280_v28   ;;  %v3267_v28 = vmul.f32 1.442695, %v3033_v10  ;;  %v3037_v10 = vsub.f32 %v16129_v8, %v12031_v18 }
 0x608   : > { %3728 = vperm.xlu0 %8758, %v12284_v58   ;;  %v12308_v58 = vpop.eup %9170 }
 0x609   : > { %16128 = vst [vmem:[#allocation79_spill] sm:$0xff] %v12308_v58  ;;  %9178 = vpow2.f32 %v3267_v28  ;;  %v16133_v28 = vld [vmem:[#allocation100_spill] sm:$0xff] }
 0x60a   : > { %v12294_v17 = vpop.permute.xlu1 %3617 }
 0x60b   : > { %16123 = vst [vmem:[#allocation75_spill] sm:$0xff] %v12294_v17  ;;  %v12298_v6 = vpop.permute.xlu0 %3542  ;;  %3809 = vperm.xlu1 %8759, %v12292_v51   ;;  %v3271_v51 = vmul.f32 1.442695, %v3035_v16  ;;  %v3039_v16 = vsub.f32 %v16133_v28, %v12149_v12 }
 0x60c   : > { %3734 = vperm.xlu0 %8758, %v12296_v31   ;;  %v12316_v31 = vpop.eup %9172 }
 0x60d   : > { %16130 = vst [vmem:[#allocation50_spill] sm:$0xff] %v12316_v31  ;;  %v12320_v2 = vpop.eup %9174  ;;  %9180 = vpow2.f32 %v3271_v51 }
 0x60e   : > { %v12306_v45 = vpop.permute.xlu1 %3623  ;;  %16132 = vst [vmem:[#allocation52_spill] sm:$0xff] %v12320_v2  ;;  %v12330_v18 = vpop.eup %9176 }
 0x60f   : > { %16127 = vst [vmem:[#allocation48_spill] sm:$0xff] %v12306_v45  ;;  %v12310_v17 = vpop.permute.xlu0 %3548  ;;  %3815 = vperm.xlu1 %8759, %v12304_v13   ;;  %v3275_v13 = vmul.f32 1.442695, %v3037_v10  ;;  %16135 = vst [vmem:[#allocation54_spill] sm:$0xff] %v12330_v18 }
 0x610   : > { %3740 = vperm.xlu0 %8758, %v12308_v58  }
 0x611   : > { %9182 = vpow2.f32 %v3275_v13 }
 0x612   : > { %v12318_v61 = vpop.permute.xlu1 %3629 }
 0x613   : > { %16131 = vst [vmem:[#allocation81_spill] sm:$0xff] %v12318_v61  ;;  %v12322_v45 = vpop.permute.xlu0 %3554  ;;  %3821 = vperm.xlu1 %8759, %v12316_v31   ;;  %v3279_v61 = vmul.f32 1.442695, %v3039_v16  ;;  %v3041_v31 = vsub.f32 %v16136_v5, %v12149_v12  ;;  %v12339_v51 = vpop.eup %9178 }
 0x614   : > { %3746 = vperm.xlu0 %8758, %v12320_v2   ;;  %16138 = vst [vmem:[#allocation56_spill] sm:$0xff] %v12339_v51  ;;  %v16140_v2 = vld [vmem:[#allocation104_spill] sm:$0xff] }
 0x615   : > { %9184 = vpow2.f32 %v3279_v61  ;;  %v3283_v28 = vmul.f32 1.442695, %v3041_v31 }
 0x616   : > { %v12328_v58 = vpop.permute.xlu1 %3635 }
 0x617   : > { %16134 = vst [vmem:[#allocation83_spill] sm:$0xff] %v12328_v58  ;;  %v12332_v8 = vpop.permute.xlu0 %3560  ;;  %v3043_v58 = vsub.f32 %v16140_v2, %v12149_v12  ;;  %v12348_v13 = vpop.eup %9180  ;;  %9186 = vpow2.f32 %v3283_v28 }
 0x618   : > { %3752 = vperm.xlu0 %8758, %v12330_v18   ;;  %16142 = vst [vmem:[#allocation89_spill] sm:$0xff] %v12348_v13  ;;  %v16144_v18 = vld [vmem:[#allocation175_spill] sm:$0xff] }
 0x619   : > { %v3287_v5 = vmul.f32 1.442695, %v3043_v58 }
 0x61a   : > { %v12337_v56 = vpop.permute.xlu1 %3641 }
 0x61b   : > { %16137 = vst [vmem:[#allocation85_spill] sm:$0xff] %v12337_v56  ;;  %v12341_v10 = vpop.permute.xlu0 %3566  ;;  %v3045_v56 = vsub.f32 %v16144_v18, %v12149_v12  ;;  %v12357_v61 = vpop.eup %9182  ;;  %9188 = vpow2.f32 %v3287_v5 }
 0x61c   : > { %16139 = vst [vmem:[#allocation87_spill] sm:$0xff] %v12341_v10  ;;  %3758 = vperm.xlu0 %8758, %v12339_v51   ;;  %16146 = vst [vmem:[#allocation68_spill] sm:$0xff] %v12357_v61  ;;  %v16148_v51 = vld [vmem:[#allocation176_spill] sm:$0xff] }
 0x61d   : > { %v3291_v2 = vmul.f32 1.442695, %v3045_v56 }
 0x61e   : > { %v12346_v49 = vpop.permute.xlu1 %3647 }
 0x61f   : > { %16141 = vst [vmem:[#allocation58_spill] sm:$0xff] %v12346_v49  ;;  %v12350_v16 = vpop.permute.xlu0 %3572  ;;  %v3047_v49 = vsub.f32 %v16148_v51, %v12149_v12  ;;  %v12366_v28 = vpop.eup %9184  ;;  %9190 = vpow2.f32 %v3291_v2 }
 0x620   : > { %16143 = vst [vmem:[#allocation60_spill] sm:$0xff] %v12350_v16  ;;  %3764 = vperm.xlu0 %8758, %v12348_v13   ;;  %16150 = vst [vmem:[#allocation95_spill] sm:$0xff] %v12366_v28  ;;  %v16152_v13 = vld [vmem:[#allocation177_spill] sm:$0xff] }
 0x621   : > { %v3295_v18 = vmul.f32 1.442695, %v3047_v49  ;;  %v12375_v5 = vpop.eup %9186 }
 0x622   : > { %v12355_v10 = vpop.permute.xlu1 %3653  ;;  %16154 = vst [vmem:[#allocation74_spill] sm:$0xff] %v12375_v5 }
 0x623   : > { %16145 = vst [vmem:[#allocation91_spill] sm:$0xff] %v12355_v10  ;;  %v12359_v31 = vpop.permute.xlu0 %3578  ;;  %v3049_v10 = vsub.f32 %v16152_v13, %v12149_v12  ;;  %9192 = vpow2.f32 %v3295_v18 }
 0x624   : > { %16147 = vst [vmem:[#allocation93_spill] sm:$0xff] %v12359_v31  ;;  %3770 = vperm.xlu0 %8758, %v12357_v61   ;;  %v16156_v61 = vld [vmem:[#allocation180_spill] sm:$0xff] }
 0x625   : > { %v3299_v51 = vmul.f32 1.442695, %v3049_v10  ;;  %v12384_v2 = vpop.eup %9188 }
 0x626   : > { %v12364_v16 = vpop.permute.xlu1 %3659  ;;  %16158 = vst [vmem:[#allocation101_spill] sm:$0xff] %v12384_v2 }
 0x627   : > { %16149 = vst [vmem:[#allocation70_spill] sm:$0xff] %v12364_v16  ;;  %v12368_v58 = vpop.permute.xlu0 %3584  ;;  %v3051_v16 = vsub.f32 %v16156_v61, %v12149_v12  ;;  %9194 = vpow2.f32 %v3299_v51 }
 0x628   : > { %16151 = vst [vmem:[#allocation72_spill] sm:$0xff] %v12368_v58  ;;  %3776 = vperm.xlu0 %8758, %v12366_v28   ;;  %v16159_v28 = vld [vmem:[#allocation110_spill] sm:$0xff] }
 0x629   : > { %v3303_v13 = vmul.f32 1.442695, %v3051_v16  ;;  %v12393_v18 = vpop.eup %9190 }
 0x62a   : > { %v12373_v31 = vpop.permute.xlu1 %3665  ;;  %16161 = vst [vmem:[#allocation103_spill] sm:$0xff] %v12393_v18 }
 0x62b   : > { %16153 = vst [vmem:[#allocation97_spill] sm:$0xff] %v12373_v31  ;;  %v12377_v56 = vpop.permute.xlu0 %3590  ;;  %v3053_v31 = vsub.f32 %v16159_v28, %v12149_v12  ;;  %9196 = vpow2.f32 %v3303_v13 }
 0x62c   : > { %16155 = vst [vmem:[#allocation99_spill] sm:$0xff] %v12377_v56  ;;  %3782 = vperm.xlu0 %8758, %v12375_v5  }
 0x62d   : > { %v3307_v61 = vmul.f32 1.442695, %v3053_v31  ;;  %v12398_v5 = vpop.eup %9192 }
 0x62e   : > { %v12382_v58 = vpop.permute.xlu1 %3671  ;;  %16162 = vst [vmem:[#allocation80_spill] sm:$0xff] %v12398_v5 }
 0x62f   : > { %16157 = vst [vmem:[#allocation76_spill] sm:$0xff] %v12382_v58  ;;  %v12386_v49 = vpop.permute.xlu0 %3596  ;;  %9198 = vpow2.f32 %v3307_v61 }
 0x630   : > { %3788 = vperm.xlu0 %8758, %v12384_v2  }
 0x631   : > { %v12405_v12 = vpop.eup %9194 }
 0x632   : > { %v12391_v56 = vpop.permute.xlu1 %3677  ;;  %16164 = vst [vmem:[#allocation82_spill] sm:$0xff] %v12405_v12 }
 0x633   : > { %16160 = vst [vmem:[#allocation78_spill] sm:$0xff] %v12391_v56  ;;  %v12395_v10 = vpop.permute.xlu0 %3602 }
 0x634   : > { %3794 = vperm.xlu0 %8758, %v12393_v18  }
 0x635   : > { %v12412_v51 = vpop.eup %9196 }
 0x636   : > { %v12402_v2 = vpop.permute.xlu1 %3683  ;;  %16167 = vst [vmem:[#allocation107_spill] sm:$0xff] %v12412_v51 }
 0x637   : > { %v12400_v58 = vpop.permute.xlu0 %3608  ;;  %16163 = vst [vmem:[#allocation105_spill] sm:$0xff] %v12402_v2 }
 0x638   : > { %3800 = vperm.xlu0 %8758, %v12398_v5  }
 0x639   : > { %v12417_v13 = vpop.eup %9198 }
 0x63a   : > { %v12410_v28 = vpop.permute.xlu1 %3689  ;;  %16169 = vst [vmem:[#allocation108_spill] sm:$0xff] %v12417_v13 }
 0x63b   : > { %v12407_v16 = vpop.permute.xlu0 %3614  ;;  %16166 = vst [vmem:[#allocation84_spill] sm:$0xff] %v12410_v28 }
 0x63c   : > { %16165 = vst [vmem:[#allocation106_spill] sm:$0xff] %v12407_v16  ;;  %3806 = vperm.xlu0 %8758, %v12405_v12  }
 0x63e   : > { %v12421_v5 = vpop.permute.xlu1 %3695 }
 0x63f   : > { %v12414_v31 = vpop.permute.xlu0 %3620  ;;  %16171 = vst [vmem:[#allocation109_spill] sm:$0xff] %v12421_v5 }
 0x640   : > { %16168 = vst [vmem:[#allocation86_spill] sm:$0xff] %v12414_v31  ;;  %3812 = vperm.xlu0 %8758, %v12412_v51  }
 0x642   : > { %v12426_v56 = vpop.permute.xlu1 %3701 }
 0x643   : > { %v12419_v18 = vpop.permute.xlu0 %3626  ;;  %16173 = vst [vmem:[#allocation92_spill] sm:$0xff] %v12426_v56 }
 0x644   : > { %16170 = vst [vmem:[#allocation88_spill] sm:$0xff] %v12419_v18  ;;  %3818 = vperm.xlu0 %8758, %v12417_v13  }
 0x646   : > { %v12432_v16 = vpop.permute.xlu1 %3707 }
 0x647   : > { %v12424_v61 = vpop.permute.xlu0 %3632  ;;  %16176 = vst [vmem:[#allocation98_spill] sm:$0xff] %v12432_v16 }
 0x648   : > { %16172 = vst [vmem:[#allocation90_spill] sm:$0xff] %v12424_v61 }
 0x64a   : > { %v12436_v51 = vpop.permute.xlu1 %3713 }
 0x64b   : > { %v12428_v12 = vpop.permute.xlu0 %3638  ;;  %16178 = vst [vmem:[#allocation102_spill] sm:$0xff] %v12436_v51 }
 0x64c   : > { %16174 = vst [vmem:[#allocation94_spill] sm:$0xff] %v12428_v12 }
 0x64e   : > { %v12442_v5 = vpop.permute.xlu1 %3719 }
 0x64f   : > { %v12430_v28 = vpop.permute.xlu0 %3644  ;;  %16181 = vst [vmem:[#allocation176_spill] sm:$0xff] %v12442_v5 }
 0x650   : > { %16175 = vst [vmem:[#allocation96_spill] sm:$0xff] %v12430_v28 }
 0x652   : > { %v12446_v61 = vpop.permute.xlu1 %3725 }
 0x653   : > { %v12434_v31 = vpop.permute.xlu0 %3650  ;;  %16183 = vst [vmem:[#allocation180_spill] sm:$0xff] %v12446_v61 }
 0x654   : > { %16177 = vst [vmem:[#allocation100_spill] sm:$0xff] %v12434_v31 }
 0x656   : > { %v12452_v28 = vpop.permute.xlu1 %3731 }
 0x657   : > { %v12438_v2 = vpop.permute.xlu0 %3656  ;;  %16185 = vst [vmem:[#allocation221_spill] sm:$0xff] %v12452_v28 }
 0x658   : > { %16179 = vst [vmem:[#allocation104_spill] sm:$0xff] %v12438_v2 }
 0x65a   : > { %v12456_v31 = vpop.permute.xlu1 %3737 }
 0x65b   : > { %v12440_v18 = vpop.permute.xlu0 %3662  ;;  %16187 = vst [vmem:[#allocation223_spill] sm:$0xff] %v12456_v31  ;;  %v3914_v31 = vrot.slane %v12190_v23, %v11115_v7  ;;  %v3924_v23 = vrot.slane %v12204_v37, %v11122_v1 }
 0x65c   : > { %16180 = vst [vmem:[#allocation175_spill] sm:$0xff] %v12440_v18 }
 0x65e   : > { %v12462_v18 = vpop.permute.xlu1 %3743 }
 0x65f   : > { %v12444_v13 = vpop.permute.xlu0 %3668  ;;  %16189 = vst [vmem:[#allocation225_spill] sm:$0xff] %v12462_v18 }
 0x660   : > { %16182 = vst [vmem:[#allocation177_spill] sm:$0xff] %v12444_v13 }
 0x662   : > { %v12466_v13 = vpop.permute.xlu1 %3749 }
 0x663   : > { %v12448_v56 = vpop.permute.xlu0 %3674  ;;  %16191 = vst [vmem:[#allocation227_spill] sm:$0xff] %v12466_v13 }
 0x664   : > { %16184 = vst [vmem:[#allocation110_spill] sm:$0xff] %v12448_v56  ;;  %v3905_v56 = vrot.slane %v12176_v29, %v11108_v27  ;;  %v3835_v29 = vrot.slane %v11996_v0, %v11115_v7 }
 0x667   : > { %v12450_v12 = vpop.permute.xlu0 %3680 }
 0x66b   : > { %v12454_v16 = vpop.permute.xlu0 %3686 }
 0x66c   : > { %16186 = vst [vmem:[#allocation222_spill] sm:$0xff] %v12454_v16  ;;  %v12476_v16 = vpop.permute.xlu1 %3755 }
 0x66d   : > { %16193 = vst [vmem:[#allocation229_spill] sm:$0xff] %v12476_v16  ;;  %v3826_v16 = vrot.slane %v11968_v60, %v11108_v27  ;;  %v3984_v60 = vrot.slane %v12286_v11, %v11108_v27  ;;  %v3855_v11 = vrot.slane %v12058_v36, %v11145_v3 }
 0x66f   : > { %v12458_v51 = vpop.permute.xlu0 %3692 }
 0x673   : > { %v12460_v2 = vpop.permute.xlu0 %3698 }
 0x674   : > { %16188 = vst [vmem:[#allocation224_spill] sm:$0xff] %v12460_v2  ;;  %v3909_v2 = vrot.slane %v11992_v4, %v11104_v20  ;;  %v3919_v4 = vrot.slane %v12006_v47, %v11118_v35 }
 0x676   : > { %v3910_v13 = vsel %vm2216_vm1, %v3909_v2, %v3905_v56  ;;  %v3845_v56 = vrot.slane %v12025_v26, %v11122_v1  ;;  %v12498_v2 = vpop.permute.xlu1 %3761  ;;  %v3934_v26 = vrot.slane %v12218_v40, %v11145_v3 }
 0x677   : > { %v12464_v5 = vpop.permute.xlu0 %3704 }
 0x678   : > { %16190 = vst [vmem:[#allocation226_spill] sm:$0xff] %v12464_v5  ;;  %v3830_v5 = vrot.slane %v11982_v43, %v11104_v20  ;;  %v3840_v43 = vrot.slane %v12010_v19, %v11118_v35 }
 0x67a   : > { %v3831_v0 = vsel %vm2216_vm1, %v3830_v5, %v3826_v16  ;;  %v3993_v5 = vrot.slane %v12298_v6, %v11115_v7  ;;  %v3865_v6 = vrot.slane %v12086_v9, %v11157_v30  ;;  %v3939_v9 = vrot.slane %v12040_v38, %v11160_v21 }
 0x67b   : > { %v12468_v61 = vpop.permute.xlu0 %3710  ;;  %v3836_v47 = vsel %vm2223_vm2, %v3835_v29, %v3831_v0  ;;  %v12537_v0 = vpop.permute.xlu1 %3767  ;;  %v3954_v38 = vrot.slane %v12246_v14, %v11169_v25  ;;  %v3959_v14 = vrot.slane %v12068_v63, %v11218_v22  ;;  %v3964_v63 = vrot.slane %v12260_v33, %v11199_v55  ;;  %v16205_v33 = vld [vmem:[#allocation159_spill] sm:$0xff] }
 0x67c   : > { %v3841_v16 = vsel %vm2230_vm3, %v3840_v43, %v3836_v47 }
 0x67d   : > { %v3846_v29 = vsel %vm2237_vm4, %v3845_v56, %v3841_v16  ;;  %v3870_v16 = vrot.slane %v11964_v62, %v11188_v15  ;;  %v3885_v62 = vrot.slane %v12128_v42, %v11199_v55  ;;  %v3890_v42 = vrot.slane %v12143_v34, %v11231_v53 }
 0x67f   : > { %v12472_v28 = vpop.permute.xlu0 %3716 }
 0x680   : > { %16192 = vst [vmem:[#allocation228_spill] sm:$0xff] %v12472_v28  ;;  %v3915_v28 = vsel %vm2223_vm2, %v3914_v31, %v3910_v13  ;;  %v3850_v31 = vrot.slane %v12044_v32, %v11150_v24  ;;  %v3929_v32 = vrot.slane %v12021_v39, %v11150_v24 }
 0x681   : > { %v3920_v37 = vsel %vm2230_vm3, %v3919_v4, %v3915_v28  ;;  %v3988_v28 = vrot.slane %v12110_v50, %v11104_v20  ;;  %v3944_v50 = vrot.slane %v12232_v59, %v11157_v30 }
 0x682   : > { %v3925_v19 = vsel %vm2237_vm4, %v3924_v23, %v3920_v37  ;;  %v3860_v23 = vrot.slane %v12072_v54, %v11160_v21  ;;  %v3851_v40 = vsel %vm15357_vm5, %v3850_v31, %v3846_v29  ;;  %v4003_v54 = vrot.slane %v12310_v17, %v11122_v1 }
 0x683   : > { %v12483_v18 = vpop.permute.xlu0 %3722  ;;  %v3930_v4 = vsel %vm15357_vm5, %v3929_v32, %v3925_v19  ;;  %v3989_v39 = vsel %vm2216_vm1, %v3988_v28, %v3984_v60  ;;  %v3856_v31 = vsel %vm16195_vm10, %v3855_v11, %v3851_v40  ;;  %v3998_v37 = vrot.slane %v12124_v41, %v11118_v35 }
 0x684   : > { %v3935_v36 = vsel %vm16194_vm9, %v3934_v26, %v3930_v4  ;;  %v3994_v56 = vsel %vm2223_vm2, %v3993_v5, %v3989_v39  ;;  %v3861_v60 = vsel %vm2258_vm7, %v3860_v23, %v3856_v31  ;;  %v4013_v41 = vrot.slane %v12322_v45, %v11145_v3  ;;  %v12568_v23 = vpop.permute.xlu1 %3773  ;;  %v16206_v31 = vld [vmem:[#allocation99_spill] sm:$0xff] }
 0x685   : > { %v3866_v47 = vsel %vm2265_vm8, %v3865_v6, %v3861_v60  ;;  %v3940_v59 = vsel %vm2258_vm7, %v3939_v9, %v3935_v36  ;;  %v3999_v19 = vsel %vm2230_vm3, %v3998_v37, %v3994_v56  ;;  %v3949_v32 = vrot.slane %v12054_v44, %v11188_v15  ;;  %16196 = vst [vmem:[#allocation230_spill] sm:$0xff] %v12568_v23  ;;  %v16202_v36 = vld [vmem:[#allocation72_spill] sm:$0xff]  ;;  %v16207_v60 = vld [vmem:[#allocation53_spill] sm:$0xff] }
 0x686   : > { %v3945_v17 = vsel %vm2265_vm8, %v3944_v50, %v3940_v59  ;;  %v4004_v5 = vsel %vm2237_vm4, %v4003_v54, %v3999_v19  ;;  %v3875_v11 = vrot.slane %v12100_v52, %v11169_v25  ;;  %v4008_v28 = vrot.slane %v12139_v48, %v11150_v24  ;;  %v16204_v54 = vld [vmem:[#allocation219_spill] sm:$0xff] }
 0x687   : > { %v12506_v13 = vpop.permute.xlu0 %3728  ;;  %v3880_v29 = vrot.slane %v12114_v46, %v11218_v22  ;;  %vm16197_vm9 = vcmask 654912   ;;  %v4023_v6 = vrot.slane %v12332_v8, %v11157_v30  ;;  %v4018_v39 = vrot.slane %v12158_v57, %v11160_v21 }
 0x688   : > { %v3871_v45 = vsel %vm16197_vm9, %v3870_v16, %v3866_v47  ;;  %vm16198_vm10 = vmmov %vm16197_vm9  ;;  %v4009_v52 = vsel %vm15357_vm5, %v4008_v28, %v4004_v5  ;;  %v4063_v50 = vrot.slane %v16202_v36, %v11108_v27  ;;  %v3895_v9 = vrot.slane %v16205_v33, %v16204_v54 }
 0x689   : > { %v3950_v44 = vsel %vm16198_vm10, %v3949_v32, %v3945_v17  ;;  %v4014_v46 = vsel %vm16200_vm11, %v4013_v41, %v4009_v52  ;;  %vm16201_vm9 = vmmov %vm16199_vm0  ;;  %v4072_v37 = vrot.slane %v16206_v31, %v11115_v7  ;;  %v4067_v47 = vrot.slane %v16207_v60, %v11104_v20  ;;  %v16209_v17 = vld [vmem:[#allocation158_spill] sm:$0xff]  ;;  %v16210_v41 = vld [vmem:[#allocation87_spill] sm:$0xff]  ;;  %v12608_v32 = vpop.permute.xlu1 %3779 }
 0x68a   : > { %v3955_v48 = vsel %vm16199_vm0, %v3954_v38, %v3950_v44  ;;  %v3876_v4 = vsel %vm16201_vm9, %v3875_v11, %v3871_v45  ;;  %vm16203_vm0 = vcmask 786112   ;;  %v4019_v57 = vsel %vm2258_vm7, %v4018_v39, %v4014_v46  ;;  %v16211_v11 = vld [vmem:[#allocation128_spill] sm:$0xff]  ;;  %v16219_v60 = vld [vmem:[#allocation146_spill] sm:$0xff] }
 0x68b   : > { %v12529_v43 = vpop.permute.xlu0 %3734  ;;  %v3881_v56 = vsel %vm16203_vm0, %v3880_v29, %v3876_v4  ;;  %vm16208_vm11 = vmmov %vm16203_vm0  ;;  %v3974_v38 = vrot.slane %v16209_v17, %v16204_v54  ;;  %v4024_v5 = vsel %vm2265_vm8, %v4023_v6, %v4019_v57  ;;  %v4033_v16 = vrot.slane %v16210_v41, %v11169_v25  ;;  %v16212_v29 = vld [vmem:[#allocation61_spill] sm:$0xff]  ;;  %v16214_v46 = vld [vmem:[#allocation140_spill] sm:$0xff] }
 0x68c   : > { %v3886_v8 = vsel %vm2293_vm12, %v3885_v62, %v3881_v56  ;;  %v3960_v34 = vsel %vm16208_vm11, %v3959_v14, %v3955_v48  ;;  %v3969_v28 = vrot.slane %v16211_v11, %v11231_v53  ;;  %v4028_v45 = vrot.slane %v16212_v29, %v11188_v15  ;;  %v16215_v4 = vld [vmem:[#allocation150_spill] sm:$0xff] }
 0x68d   : > { %v3965_v19 = vsel %vm2293_vm12, %v3964_v63, %v3960_v34  ;;  %v3891_v14 = vsel %vm2300_vm13, %v3890_v42, %v3886_v8  ;;  %v4068_v62 = vsel %vm2216_vm1, %v4067_v47, %v4063_v50  ;;  %v4082_v48 = vrot.slane %v12386_v49, %v11122_v1  ;;  %v16213_v63 = vld [vmem:[#allocation220_spill] sm:$0xff]  ;;  %v16216_v50 = vld [vmem:[#allocation149_spill] sm:$0xff]  ;;  %v16220_v34 = vld [vmem:[#allocation47_spill] sm:$0xff] }
 0x68e   : > { %v3896_v44 = vsel %vm2307_vm14, %v3895_v9, %v3891_v14  ;;  %v4073_v52 = vsel %vm2223_vm2, %v4072_v37, %v4068_v62  ;;  %v3900_v6 = vrot.slane %v16214_v46, %v16213_v63  ;;  %v4077_v39 = vrot.slane %v16215_v4, %v11118_v35  ;;  %v16217_v49 = vld [vmem:[#allocation60_spill] sm:$0xff]  ;;  %v16221_v17 = vld [vmem:[#allocation42_spill] sm:$0xff] }
 0x68f   : > { %v12548_v26 = vpop.permute.xlu0 %3740  ;;  %v3970_v42 = vsel %vm2300_vm13, %v3969_v28, %v3965_v19  ;;  %v4029_v36 = vsel %vm16198_vm10, %v4028_v45, %v4024_v5  ;;  %v3979_v33 = vrot.slane %v16216_v50, %v16213_v63  ;;  %v4043_v37 = vrot.slane %v16217_v49, %v11199_v55  ;;  %v12649_v28 = vpop.permute.xlu1 %3785  ;;  %v16223_v14 = vld [vmem:[#allocation156_spill] sm:$0xff]  ;;  %v16229_v50 = vld [vmem:[#allocation81_spill] sm:$0xff] }
 0x690   : > { %v3975_v9 = vsel %vm2307_vm14, %v3974_v38, %v3970_v42  ;;  %v4034_v31 = vsel %vm16201_vm9, %v4033_v16, %v4029_v36  ;;  %v12635_v8 = vsel %vm2314_vm15, %v3900_v6, %v3896_v44  ;;  %v4038_v47 = vrot.slane %v16219_v60, %v11218_v22  ;;  %v16222_v38 = vld [vmem:[#allocation59_spill] sm:$0xff]  ;;  %v16225_v62 = vld [vmem:[#allocation160_spill] sm:$0xff]  ;;  %v16228_v42 = vld [vmem:[#allocation93_spill] sm:$0xff] }
 0x691   : > { %16218 = vst [vmem:[#allocation72_spill] sm:$0xff] %v12635_v8  ;;  %v4048_v57 = vrot.slane %v16220_v34, %v11231_v53  ;;  %v4078_v19 = vsel %vm2230_vm3, %v4077_v39, %v4073_v52  ;;  %v4087_v41 = vrot.slane %v16222_v38, %v11150_v24  ;;  %v4092_v11 = vrot.slane %v12395_v10, %v11145_v3  ;;  %v16227_v10 = vld [vmem:[#allocation48_spill] sm:$0xff]  ;;  %v16232_v34 = vld [vmem:[#allocation58_spill] sm:$0xff] }
 0x692   : > { %v4083_v16 = vsel %vm2237_vm4, %v4082_v48, %v4078_v19  ;;  %v4097_v29 = vrot.slane %v16223_v14, %v11160_v21  ;;  %v12654_v45 = vsel %vm2314_vm15, %v3979_v33, %v3975_v9  ;;  %v4107_v44 = vrot.slane %v16225_v62, %v11188_v15  ;;  %v16226_v48 = vld [vmem:[#allocation75_spill] sm:$0xff]  ;;  %v16234_v14 = vld [vmem:[#allocation90_spill] sm:$0xff] }
 0x693   : > { %v12575_v40 = vpop.permute.xlu0 %3746  ;;  %16224 = vst [vmem:[#allocation219_spill] sm:$0xff] %v12654_v45  ;;  %v4039_v52 = vsel %vm16203_vm0, %v4038_v47, %v4034_v31  ;;  %v4117_v6 = vrot.slane %v16226_v48, %v11218_v22  ;;  %v4053_v36 = vrot.slane %v16228_v42, %v16204_v54  ;;  %v16230_v9 = vld [vmem:[#allocation83_spill] sm:$0xff]  ;;  %v16231_v31 = vld [vmem:[#allocation85_spill] sm:$0xff]  ;;  %v4088_v47 = vsel %vm15357_vm5, %v4087_v41, %v4083_v16  ;;  %v12698_v33 = vpop.permute.xlu1 %3791 }
 0x694   : > { %v4044_v39 = vsel %vm2293_vm12, %v4043_v37, %v4039_v52  ;;  %v4146_v49 = vrot.slane %v16230_v9, %v11104_v20  ;;  %v4156_v60 = vrot.slane %v16231_v31, %v11118_v35  ;;  %v4166_v19 = vrot.slane %v16232_v34, %v11150_v24  ;;  %v16235_v52 = vld [vmem:[#allocation91_spill] sm:$0xff]  ;;  %v16236_v9 = vld [vmem:[#allocation94_spill] sm:$0xff] }
 0x695   : > { %vm16233_vm11 = vcmask 458112   ;;  %v4102_v37 = vrot.slane %v12400_v58, %v11157_v30  ;;  %v4142_v62 = vrot.slane %v16234_v14, %v11108_v27  ;;  %v4049_v42 = vsel %vm2300_vm13, %v4048_v57, %v4044_v39  ;;  %v16237_v58 = vld [vmem:[#allocation70_spill] sm:$0xff]  ;;  %v16239_v39 = vld [vmem:[#allocation97_spill] sm:$0xff] }
 0x696   : > { %v4093_v38 = vsel %vm16233_vm11, %v4092_v11, %v4088_v47  ;;  %v4151_v31 = vrot.slane %v16236_v9, %v11115_v7  ;;  %v4221_v41 = vrot.slane %v12450_v12, %v11108_v27  ;;  %v12692_v11 = vsel %vm2307_vm14, %v4053_v36, %v4049_v42  ;;  %v16238_v34 = vld [vmem:[#allocation222_spill] sm:$0xff]  ;;  %v16240_v12 = vld [vmem:[#allocation105_spill] sm:$0xff]  ;;  %v16243_v9 = vld [vmem:[#allocation76_spill] sm:$0xff] }
 0x697   : > { %v12600_v59 = vpop.permute.xlu0 %3752  ;;  %v4230_v14 = vrot.slane %v16238_v34, %v11115_v7  ;;  %v4300_v57 = vrot.slane %v12506_v13, %v11108_v27  ;;  %v4225_v5 = vrot.slane %v16240_v12, %v11104_v20  ;;  %v4098_v36 = vsel %vm2258_vm7, %v4097_v29, %v4093_v38  ;;  %v16241_v34 = vld [vmem:[#allocation106_spill] sm:$0xff]  ;;  %v16242_v13 = vld [vmem:[#allocation221_spill] sm:$0xff]  ;;  %v16244_v29 = vld [vmem:[#allocation96_spill] sm:$0xff] }
 0x698   : > { %v4309_v42 = vrot.slane %v12529_v43, %v11115_v7  ;;  %v4103_v47 = vsel %vm2265_vm8, %v4102_v37, %v4098_v36  ;;  %v4112_v4 = vrot.slane %v16241_v34, %v11169_v25  ;;  %v4147_v48 = vsel %vm2216_vm1, %v4146_v49, %v4142_v62  ;;  %v16245_v37 = vld [vmem:[#allocation84_spill] sm:$0xff] }
 0x699   : > { %v4304_v23 = vrot.slane %v16242_v13, %v11104_v20  ;;  %v4206_v45 = vrot.slane %v16243_v9, %v11231_v53  ;;  %v4152_v12 = vsel %vm2223_vm2, %v4151_v31, %v4147_v48  ;;  %v4161_v38 = vrot.slane %v16244_v29, %v11122_v1  ;;  %v16246_v29 = vld [vmem:[#allocation109_spill] sm:$0xff] }
 0x69a   : > { %v4226_v43 = vsel %vm2216_vm1, %v4225_v5, %v4221_v41  ;;  %v4235_v36 = vrot.slane %v16245_v37, %v11118_v35  ;;  %v4240_v49 = vrot.slane %v12458_v51, %v11122_v1  ;;  %v4108_v13 = vsel %vm16198_vm10, %v4107_v44, %v4103_v47  ;;  %v16247_v51 = vld [vmem:[#allocation223_spill] sm:$0xff]  ;;  %v16248_v47 = vld [vmem:[#allocation100_spill] sm:$0xff]  ;;  %vm16253_vm10 = vmmov %vm16233_vm11 }
 0x69b   : > { %v12626_v56 = vpop.permute.xlu0 %3758  ;;  %v4231_v34 = vsel %vm2223_vm2, %v4230_v14, %v4226_v43  ;;  %v4305_v62 = vsel %vm2216_vm1, %v4304_v23, %v4300_v57  ;;  %v4319_v31 = vrot.slane %v12548_v26, %v11122_v1  ;;  %v4113_v41 = vsel %vm16201_vm9, %v4112_v4, %v4108_v13  ;;  %v12738_v23 = vpop.permute.xlu1 %3797  ;;  %vm16256_vm9 = vmmov %vm16253_vm10 }
 0x69c   : > { %v4310_v48 = vsel %vm2223_vm2, %v4309_v42, %v4305_v62  ;;  %v4245_v37 = vrot.slane %v16246_v29, %v11150_v24  ;;  %v4157_v14 = vsel %vm2230_vm3, %v4156_v60, %v4152_v12  ;;  %v4314_v43 = vrot.slane %v16247_v51, %v11118_v35  ;;  %v16249_v60 = vld [vmem:[#allocation224_spill] sm:$0xff]  ;;  %v16251_v51 = vld [vmem:[#allocation225_spill] sm:$0xff] }
 0x69d   : > { %v4162_v44 = vsel %vm2237_vm4, %v4161_v38, %v4157_v14  ;;  %v4171_v57 = vrot.slane %v16248_v47, %v11145_v3  ;;  %v4236_v26 = vsel %vm2230_vm3, %v4235_v36, %v4231_v34  ;;  %v4250_v12 = vrot.slane %v16249_v60, %v11145_v3 }
 0x69e   : > { %v4241_v42 = vsel %vm2237_vm4, %v4240_v49, %v4236_v26  ;;  %v4315_v62 = vsel %vm2230_vm3, %v4314_v43, %v4310_v48  ;;  %v4118_v38 = vsel %vm16203_vm0, %v4117_v6, %v4113_v41  ;;  %v4329_v36 = vrot.slane %v12575_v40, %v11145_v3  ;;  %v16252_v6 = vld [vmem:[#allocation104_spill] sm:$0xff] }
 0x69f   : > { %v12659_v46 = vpop.permute.xlu0 %3764  ;;  %v4320_v29 = vsel %vm2237_vm4, %v4319_v31, %v4315_v62  ;;  %v4167_v49 = vsel %vm15357_vm5, %v4166_v19, %v4162_v44  ;;  %v4324_v47 = vrot.slane %v16251_v51, %v11150_v24  ;;  %v4181_v31 = vrot.slane %v16252_v6, %v11157_v30  ;;  %v16254_v19 = vld [vmem:[#allocation226_spill] sm:$0xff] }
 0x6a0   : > { %v4172_v43 = vsel %vm16233_vm11, %v4171_v57, %v4167_v49  ;;  %v4246_v41 = vsel %vm15357_vm5, %v4245_v37, %v4241_v42  ;;  %v4393_v40 = vrot.slane %v12649_v28, %v11118_v35  ;;  %v4260_v44 = vrot.slane %v16254_v19, %v11157_v30  ;;  %v16255_v57 = vld [vmem:[#allocation92_spill] sm:$0xff]  ;;  %vm16265_vm11 = vmmov %vm16256_vm9 }
 0x6a1   : > { %v4251_v26 = vsel %vm16253_vm10, %v4250_v12, %v4246_v41  ;;  %v4255_v62 = vrot.slane %v16255_v57, %v11160_v21  ;;  %v4339_v37 = vrot.slane %v12600_v59, %v11157_v30  ;;  %v16257_v12 = vrot.slane %v16235_v52, %v11160_v21 }
 0x6a2   : > { %vm16263_vm0 = vcmask 654912   ;;  %vm16266_vm10 = vcmask 720512  }
 0x6a3   : > { %v12689_v16 = vpop.permute.xlu0 %3770  ;;  %v4256_v59 = vsel %vm2258_vm7, %v4255_v62, %v4251_v26  ;;  %v16261_v26 = vrot.slane %v16227_v10, %v11231_v53 }
 0x6a4   : > { %v4261_v52 = vsel %vm2265_vm8, %v4260_v44, %v4256_v59  ;;  %v16273_v59 = vld [vmem:[#allocation88_spill] sm:$0xff] }
 0x6a7   : > { %v3777_v8 = vpop.permute.xlu0 %3776 }
 0x6a8   : > { %v4379_v5 = vrot.slane %v3777_v8, %v11108_v27  ;;  %v4383_v8 = vrot.slane %v12608_v32, %v11104_v20  ;;  %v16250_v32 = vld [vmem:[#allocation86_spill] sm:$0xff] }
 0x6a9   : > { %v4122_v14 = vrot.slane %v16250_v32, %v11199_v55 }
 0x6aa   : > { %v4384_v34 = vsel %vm2216_vm1, %v4383_v8, %v4379_v5  ;;  %v3804_v8 = vpop.permute.xlu1 %3803 }
 0x6ab   : > { %v3783_v4 = vpop.permute.xlu0 %3782  ;;  %v4123_v42 = vsel %vm2293_vm12, %v4122_v14, %v4118_v38  ;;  %v4403_v38 = vrot.slane %v12698_v33, %v11150_v24 }
 0x6ac   : > { %v4388_v13 = vrot.slane %v3783_v4, %v11115_v7  ;;  %v4325_v4 = vsel %vm15357_vm5, %v4324_v47, %v4320_v29  ;;  %v16258_v29 = vld [vmem:[#allocation227_spill] sm:$0xff]  ;;  %v4128_v19 = vsel %vm2300_vm13, %v16261_v26, %v4123_v42 }
 0x6ad   : > { %v4334_v32 = vrot.slane %v16258_v29, %v11160_v21 }
 0x6ae   : > { %v4389_v48 = vsel %vm2223_vm2, %v4388_v13, %v4384_v34  ;;  %v4330_v13 = vsel %vm16256_vm9, %v4329_v36, %v4325_v4  ;;  %v4177_v34 = vsel %vm2258_vm7, %v16257_v12, %v4172_v43  ;;  %v16259_v36 = vld [vmem:[#allocation175_spill] sm:$0xff]  ;;  %v16264_v4 = vld [vmem:[#allocation229_spill] sm:$0xff]  ;;  %v3810_v57 = vpop.permute.xlu1 %3809  ;;  %vm16268_vm9 = vmmov %vm16263_vm0 }
 0x6af   : > { %v3789_v5 = vpop.permute.xlu0 %3788  ;;  %v4394_v28 = vsel %vm2230_vm3, %v4393_v40, %v4389_v48  ;;  %v4182_v51 = vsel %vm2265_vm8, %v4181_v31, %v4177_v34  ;;  %v4191_v47 = vrot.slane %v16259_v36, %v11169_v25  ;;  %v4270_v48 = vrot.slane %v12468_v61, %v11169_v25  ;;  %v16260_v31 = vld [vmem:[#allocation98_spill] sm:$0xff]  ;;  %v16270_v12 = vld [vmem:[#allocation228_spill] sm:$0xff] }
 0x6b0   : > { %v4398_v60 = vrot.slane %v3789_v5, %v11122_v1  ;;  %v4335_v43 = vsel %vm2258_vm7, %v4334_v32, %v4330_v13  ;;  %v4265_v41 = vrot.slane %v16260_v31, %v11188_v15  ;;  %v4349_v5 = vrot.slane %v12626_v56, %v11169_v25  ;;  %v16267_v13 = vld [vmem:[#allocation177_spill] sm:$0xff]  ;;  %v16276_v31 = vld [vmem:[#allocation110_spill] sm:$0xff] }
 0x6b1   : > { %v4340_v40 = vsel %vm2265_vm8, %v4339_v37, %v4335_v43  ;;  %v16262_v61 = vrot.slane %v16237_v58, %v11188_v15  ;;  %v4201_v37 = vrot.slane %v16267_v13, %v11199_v55  ;;  %v4280_v34 = vrot.slane %v16270_v12, %v11199_v55 }
 0x6b2   : > { %v4399_v49 = vsel %vm2237_vm4, %v4398_v60, %v4394_v28  ;;  %v4344_v60 = vrot.slane %v16264_v4, %v11188_v15  ;;  %v4266_v10 = vsel %vm16268_vm9, %v4265_v41, %v4261_v52  ;;  %v4413_v28 = vrot.slane %v12738_v23, %v11160_v21  ;;  %v3816_v26 = vpop.permute.xlu1 %3815 }
 0x6b3   : > { %v3795_v14 = vpop.permute.xlu0 %3794  ;;  %v4404_v33 = vsel %vm15357_vm5, %v4403_v38, %v4399_v49  ;;  %v4187_v44 = vsel %vm16263_vm0, %v16262_v61, %v4182_v51  ;;  %vm16269_vm5 = vmmov %vm16266_vm10  ;;  %v16271_v49 = vld [vmem:[#allocation102_spill] sm:$0xff]  ;;  %v4132_v38 = vrot.slane %v16273_v59, %v16204_v54  ;;  %v4364_v13 = vrot.slane %v12537_v0, %v11231_v53 }
 0x6b4   : > { %v4408_v6 = vrot.slane %v3795_v14, %v11145_v3  ;;  %v4192_v56 = vsel %vm16266_vm10, %v4191_v47, %v4187_v44  ;;  %v4271_v58 = vsel %vm16269_vm5, %v4270_v48, %v4266_v10  ;;  %v4345_v29 = vsel %vm16263_vm0, %v4344_v60, %v4340_v40  ;;  %v16279_v44 = vld [vmem:[#allocation176_spill] sm:$0xff]  ;;  %v16287_v59 = vld [vmem:[#allocation230_spill] sm:$0xff] }
 0x6b5   : > { %v4275_v51 = vrot.slane %v16271_v49, %v11218_v22  ;;  %v4359_v47 = vrot.slane %v12659_v46, %v11199_v55  ;;  %v16274_v14 = vrot.slane %v16239_v39, %v11218_v22  ;;  %v4354_v48 = vrot.slane %v12498_v2, %v11218_v22 }
 0x6b6   : > { %v4409_v62 = vsel %vm16265_vm11, %v4408_v6, %v4404_v33  ;;  %vm16272_vm11 = vmmov %vm16269_vm5  ;;  %vm16275_vm5 = vcmask 786112   ;;  %v4211_v46 = vrot.slane %v16276_v31, %v16204_v54  ;;  %v4423_v40 = vrot.slane %v3804_v8, %v11188_v15 }
 0x6b7   : > { %v3801_v42 = vpop.permute.xlu0 %3800  ;;  %v4350_v36 = vsel %vm16272_vm11, %v4349_v5, %v4345_v29  ;;  %v4414_v23 = vsel %vm2258_vm7, %v4413_v28, %v4409_v62  ;;  %v4197_v52 = vsel %vm16275_vm5, %v16274_v14, %v4192_v56  ;;  %vm16277_vm10 = vmmov %vm16275_vm5  ;;  %v4290_v39 = vrot.slane %v12483_v18, %v16204_v54  ;;  %v16283_v29 = vld [vmem:[#allocation180_spill] sm:$0xff]  ;;  %v3822_v14 = vpop.permute.xlu1 %3821 }
 0x6b8   : > { %v4418_v32 = vrot.slane %v3801_v42, %v11157_v30  ;;  %v4202_v6 = vsel %vm2293_vm12, %v4201_v37, %v4197_v52  ;;  %v4276_v41 = vsel %vm16277_vm10, %v4275_v51, %v4271_v58  ;;  %vm16278_vm9 = vmmov %vm16275_vm5  ;;  %v4285_v4 = vrot.slane %v16279_v44, %v11231_v53  ;;  %v16284_v51 = vld [vmem:[#allocation72_spill] sm:$0xff] }
 0x6b9   : > { %v4281_v33 = vsel %vm2293_vm12, %v4280_v34, %v4276_v41  ;;  %v4355_v2 = vsel %vm16278_vm9, %v4354_v48, %v4350_v36  ;;  %v4369_v62 = vrot.slane %v12689_v16, %v16204_v54  ;;  %v4133_v56 = vsel %vm2307_vm14, %v4132_v38, %v4128_v19  ;;  %v16285_v36 = vld [vmem:[#allocation219_spill] sm:$0xff] }
 0x6ba   : > { %v4419_v43 = vsel %vm2265_vm8, %v4418_v32, %v4414_v23  ;;  %v4360_v60 = vsel %vm2293_vm12, %v4359_v47, %v4355_v2  ;;  %v4207_v18 = vsel %vm2300_vm13, %v4206_v45, %v4202_v6  ;;  %v16280_v10 = vrot.slane %v16221_v17, %v16213_v63  ;;  %v16281_v45 = vld [vmem:[#allocation78_spill] sm:$0xff] }
 0x6bb   : > { %v3807_v5 = vpop.permute.xlu0 %3806  ;;  %v4424_v8 = vsel %vm16263_vm0, %v4423_v40, %v4419_v43  ;;  %v4212_v28 = vsel %vm2307_vm14, %v4211_v46, %v4207_v18  ;;  %v4286_v19 = vsel %vm2300_vm13, %v4285_v4, %v4281_v33  ;;  %v4433_v42 = vrot.slane %v3810_v57, %v11218_v22  ;;  %v8786_v18 = vld [vmem:[#allocation12 + $0x8] ss:$24 sps:$4 sm:$0xff]  }
 0x6bc   : > { %v4428_v61 = vrot.slane %v3807_v5, %v11169_v25  ;;  %v4059_v16 = vsel %vm2314_vm15, %v16280_v10, %v12692_v11  ;;  %v4216_v58 = vrot.slane %v16281_v45, %v16213_v63  ;;  %v4291_v0 = vsel %vm2307_vm14, %v4290_v39, %v4286_v19  ;;  %v16295_v10 = vld [vmem:[#allocation182_spill] sm:$0xff]  ;;  %v16301_v45 = vld [vmem:[#allocation169_spill] sm:$0xff] }
 0x6bd   : > { %v4365_v12 = vsel %vm2300_vm13, %v4364_v13, %v4360_v60  ;;  %v16282_v17 = vrot.slane %v16229_v50, %v16213_v63  ;;  %v4295_v32 = vrot.slane %v16283_v29, %v16213_v63  ;;  %vm16286_vm10 = vcmask 1041409   ;;  %v16294_v13 = vld [vmem:[#allocation161_spill] sm:$0xff] }
 0x6be   : > { %v4429_v37 = vsel %vm16272_vm11, %v4428_v61, %v4424_v8  ;;  %v4370_v57 = vsel %vm2307_vm14, %v4369_v62, %v4365_v12  ;;  %v4455_v47 = vsel %vm16286_vm10, %v16285_v36, %v16284_v51  ;;  %v4217_v23 = vsel %vm2314_vm15, %v4216_v58, %v4212_v28  ;;  %v16293_v62 = vld [vmem:[#allocation35_spill] sm:$0xff] }
 0x6bf   : > { %v3813_v9 = vpop.permute.xlu0 %3812  ;;  %v4138_v11 = vsel %vm2314_vm15, %v16282_v17, %v4133_v56  ;;  %v4434_v49 = vsel %vm16275_vm5, %v4433_v42, %v4429_v37  ;;  %v4374_v38 = vrot.slane %v16287_v59, %v16213_v63  ;;  %vm16288_vm9 = vcmask 1042434   ;;  %v8784_v56 = vld [vmem:[#allocation12 + $0xc] ss:$24 sps:$4 sm:$0xff]   ;;  %v16297_v28 = vld [vmem:[#allocation163_spill] sm:$0xff] }
 0x6c0   : > { %v4438_v34 = vrot.slane %v3813_v9, %v11199_v55  ;;  %v4456_v52 = vsel %vm16288_vm9, %v4059_v16, %v4455_v47  ;;  %v4443_v48 = vrot.slane %v3816_v26, %v11231_v53  ;;  %v4296_v6 = vsel %vm2314_vm15, %v4295_v32, %v4291_v0  ;;  %v16299_v42 = vld [vmem:[#allocation165_spill] sm:$0xff]  ;;  %535 = vmatprep.subr.bf16.mxu1 %v8784_v56  ;;  %v8787_v32 = vld [vmem:[#allocation12 + $0x3c] ss:$24 sps:$4 sm:$0xff]  }
 0x6c1   : > { %v4375_v46 = vsel %vm2314_vm15, %v4374_v38, %v4370_v57  ;;  %v4457_v41 = vsel %vm2873_vm6, %v4138_v11, %v4456_v52  ;;  %v4453_v40 = vrot.slane %v3822_v14, %v16213_v63  ;;  %vm16289_vm0 = vcmask 1044484   ;;  %v16303_v0 = vld [vmem:[#allocation193_spill] sm:$0xff]  ;;  %536 = vmatpush1.bf16.msra.mxu1 %v8786_v18  ;;  %v8789_v57 = vld [vmem:[#allocation12 + $0x38] ss:$24 sps:$4 sm:$0xff]  }
 0x6c2   : > { %v4439_v50 = vsel %vm2293_vm12, %v4438_v34, %v4434_v49  ;;  %v4458_v33 = vsel %vm16289_vm0, %v4217_v23, %v4457_v41  ;;  %vm16290_vm11 = vcmask 1045509   ;;  %vm16291_vm5 = vcmask 1046534   ;;  %v16305_v34 = vld [vmem:[#allocation167_spill] sm:$0xff]  ;;  %v16311_v23 = vld [vmem:[#allocation162_spill] sm:$0xff]  ;;  %537 = vmatprep.subr.bf16.mxu1 %v8787_v32 }
 0x6c3   : > { %v3819_v43 = vpop.permute.xlu0 %3818  ;;  %v4444_v5 = vsel %vm2300_vm13, %v4443_v48, %v4439_v50  ;;  %v4459_v2 = vsel %vm16290_vm11, %v4296_v6, %v4458_v33  ;;  %vm16292_vm10 = vcmask 1047559   ;;  %v16307_v49 = vld [vmem:[#allocation207_spill] sm:$0xff]  ;;  %v16313_v52 = vld [vmem:[#allocation166_spill] sm:$0xff]  ;;  %v8792_v6 = vld [vmem:[#allocation12 + $0x68] ss:$24 sps:$4 sm:$0xff]   ;;  %vm9466_vm9 = vmmov 0  }
 0x6c4   : > { %v4448_v31 = vrot.slane %v3819_v43, %v16204_v54  ;;  %v4460_v61 = vsel %vm16291_vm5, %v4375_v46, %v4459_v2  ;;  %v16309_v36 = vld [vmem:[#allocation171_spill] sm:$0xff]  ;;  %v8790_v43 = vld [vmem:[#allocation12 + $0x6c] ss:$24 sps:$4 sm:$0xff]   ;;  %v16315_v46 = vld [vmem:[#allocation206_spill] sm:$0xff]  ;;  %vm16512_vm0 = vcmask 392512   ;;  %vm16513_vm11 = vcmask 458112  }
 0x6c5   : > { %538 = vmatpush1.bf16.msra.mxu1 %v8789_v57  ;;  %v16321_v56 = vld [vmem:[#allocation170_spill] sm:$0xff]  ;;  %vm16517_vm5 = vcmask 654912  }
 0x6c6   : > { %v4449_v39 = vsel %vm2307_vm14, %v4448_v31, %v4444_v5  ;;  %539 = vmatprep.subr.bf16.mxu1 %v8790_v43  ;;  %v8798_v43 = vld [vmem:[#allocation12 + $0xc8] ss:$24 sps:$4 sm:$0xff]  }
 0x6c7   : > { %v4454_v26 = vsel %vm2314_vm15, %v4453_v40, %v4449_v39  ;;  %v16317_v40 = vld [vmem:[#allocation164_spill] sm:$0xff] }
 0x6c8   : > { %v4461_v44 = vsel %vm16292_vm10, %v4454_v26, %v4460_v61  ;;  %vm16520_vm10 = vcmask 720512  }
 0x6c9   : > { %4463 = vadd.xlane.f32.xlu0 %v4461_v44  ;;  %540 = vmatpush1.bf16.msra.mxu1 %v8792_v6  ;;  %v16319_v44 = vld [vmem:[#allocation183_spill] sm:$0xff] }
 0x6ca   : > { %v16331_v6 = vld [vmem:[#allocation211_spill] sm:$0xff] }
 0x756   : > { %v4464_v4 = vpop.xlane.xlu0 %4463 }
 0x757   : > { %9200 = vrcp.f32 %v4464_v4 }
 0x761   : > { %v12907_v60 = vpop.eup %9200 }
 0x762   : > { %v12911_v8 = vrot.slane %v12907_v60, %v16293_v62  ;;  %v12915_v37 = vrot.slane %v12907_v60, %v16294_v13  ;;  %v16349_v13 = vld [vmem:[#allocation188_spill] sm:$0xff] }
 0x764   : > { %v12919_v16 = vmul.f32 %v16295_v10, %v12911_v8  ;;  %v12923_v19 = vmul.f32 %v16297_v28, %v12911_v8  ;;  %v12927_v9 = vmul.f32 %v16299_v42, %v12911_v8  ;;  %v12931_v58 = vmul.f32 %v16301_v45, %v12911_v8  ;;  %v16323_v10 = vld [vmem:[#allocation173_spill] sm:$0xff] }
 0x765   : > { %v12935_v12 = vmul.f32 %v16303_v0, %v12911_v8  ;;  %v12939_v17 = vmul.f32 %v16305_v34, %v12911_v8  ;;  %v12949_v51 = vmul.f32 %v16307_v49, %v12915_v37  ;;  %v12953_v47 = vmul.f32 %v16309_v36, %v12915_v37  ;;  %v16325_v42 = vld [vmem:[#allocation185_spill] sm:$0xff]  ;;  %v8793_v0 = vld [vmem:[#allocation12 + $0x9c] ss:$24 sps:$4 sm:$0xff]   ;;  %v8795_v34 = vld [vmem:[#allocation12 + $0x98] ss:$24 sps:$4 sm:$0xff]  }
 0x766   : > { %16296 = vst [vmem:[#allocation159_spill] sm:$0xff] %v12919_v16  ;;  %16298 = vst [vmem:[#allocation99_spill] sm:$0xff] %v12923_v19  ;;  %v12943_v11 = vpack.c.bf16 %v12923_v19, %v12919_v16  ;;  %v4635_v29 = vpack.c.bf16 %v12931_v58, %v12927_v9  ;;  %v12957_v59 = vmul.f32 %v16311_v23, %v12911_v8  ;;  %541 = vmatprep.subr.bf16.mxu1 %v8793_v0  ;;  %v16327_v36 = vld [vmem:[#allocation195_spill] sm:$0xff]  ;;  %v8816_v16 = vld [vmem:[#allocation12 + $0x70] ss:$24 sps:$4 sm:$0xff]  }
 0x767   : > { %16300 = vst [vmem:[#allocation53_spill] sm:$0xff] %v12927_v9  ;;  %16302 = vst [vmem:[#allocation158_spill] sm:$0xff] %v12931_v58  ;;  %v12962_v50 = vpack.c.bf16 %v12939_v17, %v12935_v12  ;;  %v12966_v48 = vmul.f32 %v16313_v52, %v12911_v8  ;;  %v12970_v31 = vpack.c.bf16 %v12953_v47, %v12949_v51  ;;  %542 = vmatpush1.bf16.msra.mxu1 %v8795_v34  ;;  %v8796_v52 = vld [vmem:[#allocation12 + $0xcc] ss:$24 sps:$4 sm:$0xff]   ;;  %v8801_v0 = vld [vmem:[#allocation12 + $0xf8] ss:$24 sps:$4 sm:$0xff]  }
 0x768   : > { %16304 = vst [vmem:[#allocation87_spill] sm:$0xff] %v12935_v12  ;;  %16306 = vst [vmem:[#allocation128_spill] sm:$0xff] %v12939_v17  ;;  %v4843_v38 = vunpack.c.l.b16 %v12943_v11  ;;  %v4835_v14 = vunpack.c.l.b16 %v4635_v29  ;;  %v12974_v41 = vmul.f32 %v16315_v46, %v12915_v37  ;;  %v12978_v5 = vmul.f32 %v16317_v40, %v12915_v37  ;;  %v16333_v40 = vld [vmem:[#allocation187_spill] sm:$0xff]  ;;  %543 = vmatprep.subr.bf16.mxu1 %v8796_v52 }
 0x769   : > { %16308 = vst [vmem:[#allocation61_spill] sm:$0xff] %v12949_v51  ;;  %16310 = vst [vmem:[#allocation220_spill] sm:$0xff] %v12953_v47  ;;  %v4850_v33 = vunpack.c.h.b16 %v12962_v50  ;;  %v4836_v39 = vunpack.c.h.b16 %v4635_v29  ;;  %v4636_v2 = vpack.c.bf16 %v12966_v48, %v12957_v59  ;;  %v5077_v26 = vunpack.c.h.b16 %v12970_v31  ;;  %v16363_v51 = vld [vmem:[#allocation202_spill] sm:$0xff] }
 0x76a   : > { %16312 = vst [vmem:[#allocation140_spill] sm:$0xff] %v12957_v59  ;;  %16314 = vst [vmem:[#allocation150_spill] sm:$0xff] %v12966_v48  ;;  %4876 = vperm.xlu0 %8758, %v4843_v38   ;;  %4852 = vperm.xlu1 %8759, %v4835_v14   ;;  %v12986_v61 = vpack.c.bf16 %v12978_v5, %v12974_v41  ;;  %v12990_v4 = vmul.f32 %v16319_v44, %v12915_v37  ;;  %v16329_v38 = vld [vmem:[#allocation179_spill] sm:$0xff] }
 0x76b   : > { %16316 = vst [vmem:[#allocation149_spill] sm:$0xff] %v12974_v41  ;;  %16318 = vst [vmem:[#allocation60_spill] sm:$0xff] %v12978_v5  ;;  %v4837_v62 = vunpack.c.l.b16 %v4636_v2  ;;  %v12994_v18 = vmul.f32 %v16321_v56, %v12915_v37  ;;  %v12998_v28 = vmul.f32 %v16323_v10, %v12911_v8  ;;  %v13002_v45 = vmul.f32 %v16325_v42, %v12911_v8  ;;  %v16337_v56 = vld [vmem:[#allocation178_spill] sm:$0xff] }
 0x76c   : > { %16320 = vst [vmem:[#allocation146_spill] sm:$0xff] %v12990_v4  ;;  %v5079_v29 = vunpack.c.h.b16 %v12986_v61  ;;  %v4838_v32 = vunpack.c.h.b16 %v4636_v2  ;;  %v13013_v23 = vmul.f32 %v16327_v36, %v12915_v37  ;;  %v13017_v14 = vmul.f32 %v16329_v38, %v12915_v37  ;;  %544 = vmatpush1.bf16.msra.mxu1 %v8798_v43  ;;  %v8799_v42 = vld [vmem:[#allocation12 + $0xfc] ss:$24 sps:$4 sm:$0xff]   ;;  %v16341_v43 = vld [vmem:[#allocation172_spill] sm:$0xff] }
 0x76d   : > { %16322 = vst [vmem:[#allocation47_spill] sm:$0xff] %v12994_v18  ;;  %16324 = vst [vmem:[#allocation42_spill] sm:$0xff] %v12998_v28  ;;  %v13007_v57 = vpack.c.bf16 %v12994_v18, %v12990_v4  ;;  %v4637_v49 = vpack.c.bf16 %v13002_v45, %v12998_v28  ;;  %v13021_v46 = vmul.f32 %v16331_v6, %v12915_v37  ;;  %545 = vmatprep.subr.bf16.mxu1 %v8799_v42 }
 0x76e   : > { %4897 = vperm.xlu0 %8758, %v4850_v33   ;;  %4855 = vperm.xlu1 %8759, %v4836_v39   ;;  %16326 = vst [vmem:[#allocation59_spill] sm:$0xff] %v13002_v45  ;;  %16328 = vst [vmem:[#allocation156_spill] sm:$0xff] %v13013_v23  ;;  %v13025_v33 = vmul.f32 %v16333_v40, %v12915_v37  ;;  %v16335_v39 = vld [vmem:[#allocation189_spill] sm:$0xff]  ;;  %v13038_v10 = vmul.f32 %v16337_v56, %v12911_v8 }
 0x76f   : > { %16330 = vst [vmem:[#allocation160_spill] sm:$0xff] %v13017_v14  ;;  %16332 = vst [vmem:[#allocation75_spill] sm:$0xff] %v13021_v46  ;;  %v13029_v2 = vmul.f32 %v16335_v39, %v12911_v8  ;;  %v4839_v44 = vunpack.c.l.b16 %v4637_v49  ;;  %v4840_v38 = vunpack.c.h.b16 %v4637_v49  ;;  %v13053_v6 = vmul.f32 %v16341_v43, %v12915_v37  ;;  %v8802_v40 = vld [vmem:[#allocation12 + $0x12c] ss:$24 sps:$4 sm:$0xff]   ;;  %v8804_v39 = vld [vmem:[#allocation12 + $0x128] ss:$24 sps:$4 sm:$0xff]  }
 0x770   : > { %16334 = vst [vmem:[#allocation48_spill] sm:$0xff] %v13025_v33  ;;  %16338 = vst [vmem:[#allocation81_spill] sm:$0xff] %v13038_v10  ;;  %v13042_v34 = vpack.c.bf16 %v13025_v33, %v13021_v46  ;;  %546 = vmatpush1.bf16.msra.mxu1 %v8801_v0  ;;  %v8805_v0 = vld [vmem:[#allocation12 + $0x15c] ss:$24 sps:$4 sm:$0xff]   ;;  %v13074_v46 = vmul.f32 %v16349_v13, %v12915_v37  ;;  %v8808_v13 = vld [vmem:[#allocation12 + $0x10] ss:$24 sps:$4 sm:$0xff]  }
 0x771   : > { %16336 = vst [vmem:[#allocation93_spill] sm:$0xff] %v13029_v2  ;;  %v4638_v52 = vpack.c.bf16 %v13038_v10, %v13029_v2  ;;  %16342 = vst [vmem:[#allocation85_spill] sm:$0xff] %v13053_v6  ;;  %547 = vmatprep.subr.bf16.mxu1 %v8802_v40 }
 0x772   : > { %5096 = vperm.xlu0 %8758, %v5077_v26   ;;  %4858 = vperm.xlu1 %8759, %v4837_v62   ;;  %v5081_v26 = vunpack.c.h.b16 %v13007_v57  ;;  %v13034_v62 = vpack.c.bf16 %v13017_v14, %v13013_v23  ;;  %v5085_v56 = vunpack.c.h.b16 %v13042_v34  ;;  %16350 = vst [vmem:[#allocation94_spill] sm:$0xff] %v13074_v46 }
 0x773   : > { %v4841_v49 = vunpack.c.l.b16 %v4638_v52 }
 0x774   : > { %v5083_v36 = vunpack.c.h.b16 %v13034_v62  ;;  %548 = vmatpush1.bf16.msra.mxu1 %v8804_v39 }
 0x775   : > { %549 = vmatprep.subr.bf16.mxu1 %v8805_v0  ;;  %v4844_v0 = vunpack.c.h.b16 %v12943_v11  ;;  %v8812_v11 = vld [vmem:[#allocation12 + $0x40] ss:$24 sps:$4 sm:$0xff]  }
 0x776   : > { %5102 = vperm.xlu0 %8758, %v5079_v29   ;;  %4861 = vperm.xlu1 %8759, %v4838_v32   ;;  %v16339_v29 = vld [vmem:[#allocation197_spill] sm:$0xff] }
 0x777   : > { %v13046_v32 = vmul.f32 %v16339_v29, %v12915_v37  ;;  %v16345_v29 = vld [vmem:[#allocation203_spill] sm:$0xff] }
 0x778   : > { %v13066_v43 = vmul.f32 %v16345_v29, %v12915_v37  ;;  %v16354_v29 = vld [vmem:[#allocation174_spill] sm:$0xff] }
 0x779   : > { %16340 = vst [vmem:[#allocation83_spill] sm:$0xff] %v13046_v32  ;;  %v13062_v42 = vpack.c.bf16 %v13053_v6, %v13046_v32  ;;  %v16351_v32 = vld [vmem:[#allocation168_spill] sm:$0xff] }
 0x77a   : > { %5108 = vperm.xlu0 %8758, %v5081_v26   ;;  %4864 = vperm.xlu1 %8759, %v4839_v44   ;;  %v16343_v26 = vld [vmem:[#allocation196_spill] sm:$0xff]  ;;  %16346 = vst [vmem:[#allocation90_spill] sm:$0xff] %v13066_v43  ;;  %v13078_v23 = vrot.slane %v12907_v60, %v16351_v32 }
 0x77b   : > { %v13057_v44 = vmul.f32 %v16343_v26, %v12915_v37  ;;  %v16347_v26 = vld [vmem:[#allocation212_spill] sm:$0xff]  ;;  %v5087_v39 = vunpack.c.h.b16 %v13062_v42 }
 0x77c   : > { %v13070_v40 = vmul.f32 %v16347_v26, %v12915_v37  ;;  %v13091_v26 = vmul.f32 %v16354_v29, %v12911_v8  ;;  %v8810_v37 = vld [vmem:[#allocation12 + $0x14] ss:$24 sps:$4 sm:$0xff]   ;;  %v13116_v12 = vmul.f32 %v16363_v51, %v13078_v23 }
 0x77d   : > { %16344 = vst [vmem:[#allocation58_spill] sm:$0xff] %v13057_v44  ;;  %576 = vmatprep.subr.bf16.mxu0 %v8810_v37  ;;  %v16361_v37 = vld [vmem:[#allocation201_spill] sm:$0xff] }
 0x77e   : > { %5114 = vperm.xlu0 %8758, %v5083_v36   ;;  %4867 = vperm.xlu1 %8759, %v4840_v38   ;;  %v8807_v36 = vld [vmem:[#allocation12 + $0x158] ss:$24 sps:$4 sm:$0xff]   ;;  %v4842_v38 = vunpack.c.h.b16 %v4638_v52  ;;  %16348 = vst [vmem:[#allocation91_spill] sm:$0xff] %v13070_v40  ;;  %16355 = vst [vmem:[#allocation222_spill] sm:$0xff] %v13091_v26  ;;  %v13096_v32 = vpack.c.bf16 %v13074_v46, %v13070_v40  ;;  %v8814_v40 = vld [vmem:[#allocation12 + $0x44] ss:$24 sps:$4 sm:$0xff]   ;;  %v13112_v41 = vmul.f32 %v16361_v37, %v13078_v23 }
 0x77f   : > { %v16352_v52 = vld [vmem:[#allocation191_spill] sm:$0xff]  ;;  %550 = vmatpush1.bf16.msra.mxu1 %v8807_v36  ;;  %v16357_v36 = vld [vmem:[#allocation186_spill] sm:$0xff]  ;;  %577 = vmatpush1.bf16.msra.mxu0 %v8808_v13  ;;  %16364 = vst [vmem:[#allocation221_spill] sm:$0xff] %v13116_v12 }
 0x780   : > { %v13104_v4 = vmul.f32 %v16357_v36, %v13078_v23  ;;  %16362 = vst [vmem:[#allocation106_spill] sm:$0xff] %v13112_v41  ;;  %v16365_v36 = vld [vmem:[#allocation181_spill] sm:$0xff]  ;;  %578 = vmatprep.subr.bf16.mxu0 %v8814_v40 }
 0x781   : > { %v8818_v51 = vld [vmem:[#allocation12 + $0x74] ss:$24 sps:$4 sm:$0xff]  }
 0x782   : > { %5120 = vperm.xlu0 %8758, %v5085_v56   ;;  %4870 = vperm.xlu1 %8759, %v4841_v49   ;;  %v13083_v56 = vpack.c.bf16 %v13066_v43, %v13057_v44  ;;  %v13087_v49 = vmul.f32 %v16352_v52, %v12911_v8  ;;  %v16356_v44 = vld [vmem:[#allocation33_spill] sm:$0xff]  ;;  %16358 = vst [vmem:[#allocation97_spill] sm:$0xff] %v13104_v4 }
 0x783   : > { %568 = vmatmul.mubr.bf16.vlgmr.msra.gmra.mrb[0].mxu1 %v16356_v44  ;;  %579 = vmatpush1.bf16.msra.mxu0 %v8812_v11  ;;  %v16371_v11 = vld [vmem:[#allocation216_spill] sm:$0xff] }
 0x784   : > { %16353 = vst [vmem:[#allocation70_spill] sm:$0xff] %v13087_v49  ;;  %v5089_v52 = vunpack.c.h.b16 %v13083_v56  ;;  %v4640_v29 = vpack.c.bf16 %v13091_v26, %v13087_v49  ;;  %v13120_v49 = vmul.f32 %v16365_v36, %v12911_v8  ;;  %v16369_v36 = vld [vmem:[#allocation217_spill] sm:$0xff]  ;;  %580 = vmatprep.subr.bf16.mxu0 %v8818_v51 }
 0x785   : > { %v13133_v40 = vmul.f32 %v16369_v36, %v13078_v23 }
 0x786   : > { %5126 = vperm.xlu0 %8758, %v5087_v39   ;;  %4873 = vperm.xlu1 %8759, %v4842_v38   ;;  %v16359_v38 = vld [vmem:[#allocation200_spill] sm:$0xff]  ;;  %16366 = vst [vmem:[#allocation76_spill] sm:$0xff] %v13120_v49  ;;  %v4845_v13 = vunpack.c.l.b16 %v4640_v29  ;;  %v4846_v2 = vunpack.c.h.b16 %v4640_v29 }
 0x787   : > { %v13108_v39 = vmul.f32 %v16359_v38, %v13078_v23  ;;  %v5091_v38 = vunpack.c.h.b16 %v13096_v32  ;;  %16370 = vst [vmem:[#allocation84_spill] sm:$0xff] %v13133_v40  ;;  %581 = vmatpush1.bf16.msra.mxu0 %v8816_v16  ;;  %v8820_v29 = vld [vmem:[#allocation12 + $0xa0] ss:$24 sps:$4 sm:$0xff]   ;;  %v8824_v16 = vld [vmem:[#allocation12 + $0xd0] ss:$24 sps:$4 sm:$0xff]  }
 0x789   : > { %16360 = vst [vmem:[#allocation105_spill] sm:$0xff] %v13108_v39 }
 0x78a   : > { %5132 = vperm.xlu0 %8758, %v5089_v52   ;;  %4879 = vperm.xlu1 %8759, %v4844_v0   ;;  %v13125_v52 = vpack.c.bf16 %v13108_v39, %v13104_v4  ;;  %v16367_v0 = vld [vmem:[#allocation190_spill] sm:$0xff]  ;;  %v13138_v4 = vpack.c.bf16 %v13116_v12, %v13112_v41  ;;  %v8811_v39 = vld [vmem:[#allocation6] sm:$0xff]  }
 0x78b   : > { %v13129_v37 = vmul.f32 %v16367_v0, %v12911_v8  ;;  %v13144_v0 = vmul.f32 %v16371_v11, %v13078_v23  ;;  %v16375_v11 = vld [vmem:[#allocation218_spill] sm:$0xff] }
 0x78c   : > { %v5318_v46 = vunpack.c.h.b16 %v13125_v52  ;;  %v5320_v36 = vunpack.c.h.b16 %v13138_v4  ;;  %v13157_v12 = vmul.f32 %v16375_v11, %v13078_v23  ;;  %v16379_v11 = vld [vmem:[#allocation204_spill] sm:$0xff] }
 0x78d   : > { %16368 = vst [vmem:[#allocation96_spill] sm:$0xff] %v13129_v37  ;;  %v4641_v8 = vpack.c.bf16 %v13129_v37, %v13120_v49  ;;  %16372 = vst [vmem:[#allocation109_spill] sm:$0xff] %v13144_v0  ;;  %v13153_v49 = vpack.c.bf16 %v13144_v0, %v13133_v40  ;;  %v16383_v0 = vld [vmem:[#allocation192_spill] sm:$0xff] }
 0x78e   : > { %5138 = vperm.xlu0 %8758, %v5091_v38   ;;  %4882 = vperm.xlu1 %8759, %v4845_v13   ;;  %v8822_v38 = vld [vmem:[#allocation12 + $0xa4] ss:$24 sps:$4 sm:$0xff]   ;;  %16376 = vst [vmem:[#allocation100_spill] sm:$0xff] %v13157_v12 }
 0x78f   : > { %v16373_v13 = vld [vmem:[#allocation63_spill] sm:$0xff]  ;;  %582 = vmatprep.subr.bf16.mxu0 %v8822_v38  ;;  %v4847_v41 = vunpack.c.l.b16 %v4641_v8  ;;  %v5322_v28 = vunpack.c.h.b16 %v13153_v49 }
 0x790   : > { %v13148_v51 = vmul.f32 %v16373_v13, %v13078_v23  ;;  %583 = vmatpush1.bf16.msra.mxu0 %v8820_v29  ;;  %v16377_v13 = vld [vmem:[#allocation62_spill] sm:$0xff]  ;;  %v13170_v29 = vmul.f32 %v16379_v11, %v13078_v23 }
 0x791   : > { %v13161_v38 = vmul.f32 %v16377_v13, %v13078_v23  ;;  %v8815_v13 = vld [vmem:[#allocation6 + $0x8] sm:$0xff]  }
 0x792   : > { %5337 = vperm.xlu0 %8758, %v5318_v46   ;;  %4885 = vperm.xlu1 %8759, %v4846_v2   ;;  %16374 = vst [vmem:[#allocation223_spill] sm:$0xff] %v13148_v51  ;;  %v8826_v46 = vld [vmem:[#allocation12 + $0xd4] ss:$24 sps:$4 sm:$0xff]   ;;  %v4848_v2 = vunpack.c.h.b16 %v4641_v8  ;;  %v13166_v40 = vpack.c.bf16 %v13157_v12, %v13148_v51  ;;  %16380 = vst [vmem:[#allocation86_spill] sm:$0xff] %v13170_v29  ;;  %v15381_v8 = vmov 0.0  }
 0x793   : > { %16378 = vst [vmem:[#allocation224_spill] sm:$0xff] %v13161_v38  ;;  %584 = vmatprep.subr.bf16.mxu0 %v8826_v46  ;;  %8550 = vmatprep.subr.bf16.mxu1 %v15381_v8  ;;  %v4849_v46 = vunpack.c.l.b16 %v12962_v50  ;;  %v13177_v12 = vpack.c.bf16 %v13170_v29, %v13161_v38  ;;  %v13185_v8 = vmul.f32 %v16383_v0, %v13078_v23  ;;  %v8832_v50 = vld [vmem:[#allocation12 + $0x130] ss:$24 sps:$4 sm:$0xff]  }
 0x794   : > { %585 = vmatpush1.bf16.msra.mxu0 %v8824_v16  ;;  %8551 = vmatpush3.bf16.msra.mxu1 %v8811_v39  ;;  %v5324_v51 = vunpack.c.h.b16 %v13166_v40  ;;  %v16381_v16 = vld [vmem:[#allocation66_spill] sm:$0xff]  ;;  %v16386_v0 = vld [vmem:[#allocation129_spill] sm:$0xff] }
 0x795   : > { %v13181_v11 = vmul.f32 %v16381_v16, %v13078_v23  ;;  %16384 = vst [vmem:[#allocation104_spill] sm:$0xff] %v13185_v8  ;;  %v8834_v39 = vld [vmem:[#allocation12 + $0x134] ss:$24 sps:$4 sm:$0xff]   ;;  %v5326_v38 = vunpack.c.h.b16 %v13177_v12  ;;  %v13196_v29 = vmul.f32 %v16386_v0, %v13078_v23 }
 0x796   : > { %5343 = vperm.xlu0 %8758, %v5320_v36   ;;  %4888 = vperm.xlu1 %8759, %v4847_v41   ;;  %v8828_v36 = vld [vmem:[#allocation12 + $0x100] ss:$24 sps:$4 sm:$0xff]   ;;  %v8830_v41 = vld [vmem:[#allocation12 + $0x104] ss:$24 sps:$4 sm:$0xff]  }
 0x797   : > { %586 = vmatprep.subr.bf16.mxu0 %v8830_v41  ;;  %16382 = vst [vmem:[#allocation225_spill] sm:$0xff] %v13181_v11  ;;  %v8819_v41 = vld [vmem:[#allocation6 + $0x10] sm:$0xff]   ;;  %v13192_v16 = vpack.c.bf16 %v13185_v8, %v13181_v11  ;;  %16387 = vst [vmem:[#allocation226_spill] sm:$0xff] %v13196_v29 }
 0x798   : > { %587 = vmatpush1.bf16.msra.mxu0 %v8828_v36  ;;  %v16388_v36 = vld [vmem:[#allocation209_spill] sm:$0xff] }
 0x799   : > { %588 = vmatprep.subr.bf16.mxu0 %v8834_v39  ;;  %v13200_v43 = vmul.f32 %v16388_v36, %v13078_v23  ;;  %v16392_v11 = vld [vmem:[#allocation205_spill] sm:$0xff]  ;;  %v8823_v36 = vld [vmem:[#allocation6 + $0x18] sm:$0xff]   ;;  %v5328_v8 = vunpack.c.h.b16 %v13192_v16 }
 0x79a   : > { %5349 = vperm.xlu0 %8758, %v5322_v28   ;;  %4891 = vperm.xlu1 %8759, %v4848_v2   ;;  %v16385_v28 = vmov 0.0   ;;  %v5076_v2 = vunpack.c.l.b16 %v12970_v31  ;;  %v8836_v31 = vld [vmem:[#allocation12 + $0x160] ss:$24 sps:$4 sm:$0xff]   ;;  %v13210_v0 = vrot.slane %v12907_v60, %v16392_v11 }
 0x79b   : > { %8552 = vmatprep.subr.bf16.mxu1 %v16385_v28  ;;  %16389 = vst [vmem:[#allocation92_spill] sm:$0xff] %v13200_v43  ;;  %8566 = vmatprep.mubr.msk.bf16.mxu1 %vm9466_vm9, %v16385_v28  ;;  %v16397_v11 = vld [vmem:[#allocation208_spill] sm:$0xff] }
 0x79c   : > { %8553 = vmatpush3.bf16.msra.mxu1 %v8815_v13  ;;  %589 = vmatpush1.bf16.msra.mxu0 %v8832_v50  ;;  %v16390_v13 = vld [vmem:[#allocation131_spill] sm:$0xff]  ;;  %v13215_v50 = vpack.c.bf16 %v13200_v43, %v13196_v29 }
 0x79d   : > { %8554 = vmatprep.subr.bf16.mxu1 %v16385_v28  ;;  %v13206_v39 = vmul.f32 %v16390_v13, %v13078_v23  ;;  %v16395_v13 = vld [vmem:[#allocation133_spill] sm:$0xff] }
 0x79e   : > { %5355 = vperm.xlu0 %8758, %v5324_v51   ;;  %4894 = vperm.xlu1 %8759, %v4849_v46   ;;  %v8838_v51 = vld [vmem:[#allocation12 + $0x164] ss:$24 sps:$4 sm:$0xff]   ;;  %v5078_v46 = vunpack.c.l.b16 %v12986_v61 }
 0x79f   : > { %16391 = vst [vmem:[#allocation227_spill] sm:$0xff] %v13206_v39  ;;  %590 = vmatprep.subr.bf16.mxu0 %v8838_v51  ;;  %v8827_v51 = vld [vmem:[#allocation6 + $0x20] sm:$0xff]  }
 0x7a0   : > { %8555 = vmatpush3.bf16.msra.mxu1 %v8819_v41  ;;  %591 = vmatpush1.bf16.msra.mxu0 %v8836_v31  ;;  %v5080_v41 = vunpack.c.l.b16 %v13007_v57  ;;  %v8841_v57 = vld [vmem:[#allocation6 + $0x48] sm:$0xff]  }
 0x7a1   : > { %8556 = vmatprep.subr.bf16.mxu1 %v16385_v28  ;;  %8570 = vmatprep.subr.bf16.mxu0 %v16385_v28 }
 0x7a2   : > { %5361 = vperm.xlu0 %8758, %v5326_v38   ;;  %5093 = vperm.xlu1 %8759, %v5076_v2   ;;  %v16393_v38 = vld [vmem:[#allocation184_spill] sm:$0xff]  ;;  %v8840_v2 = vld [vmem:[#allocation6 + $0x40] sm:$0xff]  }
 0x7a3   : > { %v13219_v61 = vmul.f32 %v16393_v38, %v13078_v23  ;;  %609 = vmatmul.mubr.bf16.vlgmr.msra.gmra.mrb[4].mxu0 %v16356_v44  ;;  %v5330_v23 = vunpack.c.h.b16 %v13215_v50  ;;  %v13234_v38 = vmul.f32 %v16395_v13, %v13210_v0  ;;  %v5082_v44 = vunpack.c.l.b16 %v13034_v62  ;;  %v8842_v62 = vld [vmem:[#allocation6 + $0x50] sm:$0xff]  }
 0x7a4   : > { %8557 = vmatpush3.bf16.msra.mxu1 %v8823_v36  ;;  %8571 = vmatpush3.bf16.msra.mxu0 %v8840_v2  ;;  %v16399_v2 = vld [vmem:[#allocation135_spill] sm:$0xff] }
 0x7a5   : > { %16394 = vst [vmem:[#allocation175_spill] sm:$0xff] %v13219_v61  ;;  %v13230_v31 = vpack.c.bf16 %v13219_v61, %v13206_v39  ;;  %16396 = vst [vmem:[#allocation98_spill] sm:$0xff] %v13234_v38  ;;  %8558 = vmatprep.subr.bf16.mxu1 %v16385_v28  ;;  %8572 = vmatprep.subr.bf16.mxu0 %v16385_v28  ;;  %v13252_v13 = vmul.f32 %v16399_v2, %v13210_v0  ;;  %v16401_v39 = vld [vmem:[#allocation194_spill] sm:$0xff] }
 0x7a6   : > { %5367 = vperm.xlu0 %8758, %v5328_v8   ;;  %5099 = vperm.xlu1 %8759, %v5078_v46   ;;  %v13238_v8 = vmul.f32 %v16397_v11, %v13210_v0  ;;  %v8831_v46 = vld [vmem:[#allocation6 + $0x28] sm:$0xff]   ;;  %v13256_v29 = vmul.f32 %v16401_v39, %v13210_v0  ;;  %v16403_v39 = vld [vmem:[#allocation137_spill] sm:$0xff] }
 0x7a7   : > { %8586 = vmatprep.mubr.msk.bf16.mxu0 %vm9466_vm9, %v16385_v28  ;;  %v5332_v36 = vunpack.c.h.b16 %v13230_v31  ;;  %16400 = vst [vmem:[#allocation177_spill] sm:$0xff] %v13252_v13 }
 0x7a8   : > { %16398 = vst [vmem:[#allocation229_spill] sm:$0xff] %v13238_v8  ;;  %8559 = vmatpush3.bf16.msra.mxu1 %v8827_v51  ;;  %v13248_v11 = vpack.c.bf16 %v13238_v8, %v13234_v38  ;;  %16402 = vst [vmem:[#allocation228_spill] sm:$0xff] %v13256_v29  ;;  %8573 = vmatpush3.bf16.msra.mxu0 %v8841_v57  ;;  %v8835_v51 = vld [vmem:[#allocation6 + $0x30] sm:$0xff]   ;;  %v13264_v2 = vpack.c.bf16 %v13256_v29, %v13252_v13 }
 0x7a9   : > { %8560 = vmatprep.subr.bf16.mxu1 %v16385_v28  ;;  %8574 = vmatprep.subr.bf16.mxu0 %v16385_v28  ;;  %v13268_v38 = vmul.f32 %v16403_v39, %v13210_v0  ;;  %v16405_v57 = vld [vmem:[#allocation213_spill] sm:$0xff] }
 0x7aa   : > { %5373 = vperm.xlu0 %8758, %v5330_v23   ;;  %5105 = vperm.xlu1 %8759, %v5080_v41   ;;  %v5084_v41 = vunpack.c.l.b16 %v13042_v34  ;;  %v5559_v23 = vunpack.c.h.b16 %v13248_v11  ;;  %v13272_v8 = vmul.f32 %v16405_v57, %v13210_v0  ;;  %v8843_v34 = vld [vmem:[#allocation6 + $0x58] sm:$0xff]  }
 0x7ab   : > { %16404 = vst [vmem:[#allocation102_spill] sm:$0xff] %v13268_v38  ;;  %v16407_v57 = vld [vmem:[#allocation118_spill] sm:$0xff] }
 0x7ac   : > { %8561 = vmatpush3.bf16.msra.mxu1 %v8831_v46  ;;  %16406 = vst [vmem:[#allocation88_spill] sm:$0xff] %v13272_v8  ;;  %8575 = vmatpush3.bf16.msra.mxu0 %v8842_v62  ;;  %v8839_v46 = vld [vmem:[#allocation6 + $0x38] sm:$0xff]   ;;  %v13280_v39 = vpack.c.bf16 %v13272_v8, %v13268_v38  ;;  %v13284_v13 = vmul.f32 %v16407_v57, %v13210_v0  ;;  %v16409_v62 = vld [vmem:[#allocation199_spill] sm:$0xff] }
 0x7ad   : > { %8562 = vmatprep.subr.bf16.mxu1 %v16385_v28  ;;  %8576 = vmatprep.subr.bf16.mxu0 %v16385_v28  ;;  %v13288_v29 = vmul.f32 %v16409_v62, %v13210_v0  ;;  %v16411_v57 = vld [vmem:[#allocation119_spill] sm:$0xff] }
 0x7ae   : > { %5379 = vperm.xlu0 %8758, %v5332_v36   ;;  %5111 = vperm.xlu1 %8759, %v5082_v44   ;;  %v5086_v44 = vunpack.c.l.b16 %v13062_v42  ;;  %v5561_v36 = vunpack.c.h.b16 %v13264_v2  ;;  %16408 = vst [vmem:[#allocation110_spill] sm:$0xff] %v13284_v13  ;;  %v8844_v42 = vld [vmem:[#allocation6 + $0x60] sm:$0xff]   ;;  %v13300_v62 = vmul.f32 %v16411_v57, %v13210_v0  ;;  %v16415_v57 = vld [vmem:[#allocation120_spill] sm:$0xff] }
 0x7af   : > { %16410 = vst [vmem:[#allocation176_spill] sm:$0xff] %v13288_v29 }
 0x7b0   : > { %8563 = vmatpush3.bf16.msra.mxu1 %v8835_v51  ;;  %8577 = vmatpush3.bf16.msra.mxu0 %v8843_v34  ;;  %v5563_v51 = vunpack.c.h.b16 %v13280_v39  ;;  %16412 = vst [vmem:[#allocation78_spill] sm:$0xff] %v13300_v62  ;;  %v16413_v34 = vld [vmem:[#allocation215_spill] sm:$0xff] }
 0x7b1   : > { %8564 = vmatprep.subr.bf16.mxu1 %v16385_v28  ;;  %8578 = vmatprep.subr.bf16.mxu0 %v16385_v28  ;;  %v13304_v38 = vmul.f32 %v16413_v34, %v13210_v0  ;;  %v13316_v34 = vmul.f32 %v16415_v57, %v13210_v0  ;;  %v16419_v57 = vld [vmem:[#allocation121_spill] sm:$0xff] }
 0x7b2   : > { %5578 = vperm.xlu0 %8758, %v5559_v23   ;;  %5117 = vperm.xlu1 %8759, %v5084_v41   ;;  %v5088_v41 = vunpack.c.l.b16 %v13083_v56  ;;  %v13296_v23 = vpack.c.bf16 %v13288_v29, %v13284_v13  ;;  %v5090_v56 = vunpack.c.l.b16 %v13096_v32  ;;  %v8846_v29 = vld [vmem:[#allocation6 + $0x70] sm:$0xff]   ;;  %v5317_v32 = vunpack.c.l.b16 %v13125_v52 }
 0x7b3   : > { %16414 = vst [vmem:[#allocation180_spill] sm:$0xff] %v13304_v38  ;;  %16416 = vst [vmem:[#allocation72_spill] sm:$0xff] %v13316_v34  ;;  %v5319_v52 = vunpack.c.l.b16 %v13138_v4  ;;  %v5321_v4 = vunpack.c.l.b16 %v13153_v49 }
 0x7b4   : > { %8565 = vmatpush3.bf16.msra.mxu1 %v8839_v46  ;;  %8579 = vmatpush3.bf16.msra.mxu0 %v8844_v42  ;;  %v13312_v46 = vpack.c.bf16 %v13304_v38, %v13300_v62  ;;  %v16417_v42 = vld [vmem:[#allocation198_spill] sm:$0xff]  ;;  %v13331_v62 = vmul.f32 %v16419_v57, %v13210_v0 }
 0x7b5   : > { %8590 = vmatprep.subr.bf16.mxu1 %v16385_v28  ;;  %8580 = vmatprep.subr.bf16.mxu0 %v16385_v28  ;;  %v13320_v13 = vmul.f32 %v16417_v42, %v13210_v0  ;;  %v16421_v42 = vld [vmem:[#allocation214_spill] sm:$0xff] }
 0x7b6   : > { %5584 = vperm.xlu0 %8758, %v5561_v36   ;;  %5123 = vperm.xlu1 %8759, %v5086_v44   ;;  %v8845_v36 = vld [vmem:[#allocation6 + $0x68] sm:$0xff]   ;;  %v5565_v44 = vunpack.c.h.b16 %v13296_v23  ;;  %16420 = vst [vmem:[#allocation230_spill] sm:$0xff] %v13331_v62  ;;  %v8847_v38 = vld [vmem:[#allocation6 + $0x78] sm:$0xff]  }
 0x7b7   : > { %16418 = vst [vmem:[#allocation219_spill] sm:$0xff] %v13320_v13 }
 0x7b8   : > { %8581 = vmatpush3.bf16.msra.mxu0 %v8845_v36  ;;  %v13335_v36 = vmul.f32 %v16421_v42, %v13210_v0  ;;  %v16424_v42 = vld [vmem:[#allocation122_spill] sm:$0xff] }
 0x7b9   : > { %8582 = vmatprep.subr.bf16.mxu0 %v16385_v28 }
 0x7ba   : > { %5590 = vperm.xlu0 %8758, %v5563_v51   ;;  %5129 = vperm.xlu1 %8759, %v5088_v41   ;;  %v5567_v41 = vunpack.c.h.b16 %v13312_v46  ;;  %v13327_v51 = vpack.c.bf16 %v13320_v13, %v13316_v34  ;;  %16422 = vst [vmem:[#allocation35_spill] sm:$0xff] %v13335_v36  ;;  %v13346_v57 = vpack.c.bf16 %v13335_v36, %v13331_v62  ;;  %v16426_v13 = vld [vmem:[#allocation117_spill] sm:$0xff] }
 0x7bc   : > { %8583 = vmatpush3.bf16.msra.mxu0 %v8846_v29  ;;  %v5569_v34 = vunpack.c.h.b16 %v13327_v51  ;;  %v13350_v29 = vmul.f32 %v16424_v42, %v13210_v0  ;;  %v16428_v42 = vld [vmem:[#allocation123_spill] sm:$0xff] }
 0x7bd   : > { %8584 = vmatprep.subr.bf16.mxu0 %v16385_v28 }
 0x7be   : > { %5596 = vperm.xlu0 %8758, %v5565_v44   ;;  %5135 = vperm.xlu1 %8759, %v5090_v56   ;;  %v16423_v56 = vld [vmem:[#allocation210_spill] sm:$0xff]  ;;  %16425 = vst [vmem:[#allocation182_spill] sm:$0xff] %v13350_v29 }
 0x7bf   : > { %v13341_v44 = vrot.slane %v12907_v60, %v16423_v56 }
 0x7c0   : > { %8585 = vmatpush3.bf16.msra.mxu0 %v8847_v38  ;;  %v5323_v38 = vunpack.c.l.b16 %v13166_v40 }
 0x7c1   : > { %8610 = vmatprep.subr.bf16.mxu0 %v16385_v28  ;;  %v13365_v62 = vmul.f32 %v16428_v42, %v13341_v44  ;;  %v16434_v42 = vld [vmem:[#allocation125_spill] sm:$0xff] }
 0x7c2   : > { %5602 = vperm.xlu0 %8758, %v5567_v41   ;;  %5334 = vperm.xlu1 %8759, %v5317_v32   ;;  %v13354_v41 = vmul.f32 %v16426_v13, %v13210_v0  ;;  %v5571_v32 = vunpack.c.h.b16 %v13346_v57  ;;  %v16430_v0 = vld [vmem:[#allocation124_spill] sm:$0xff] }
 0x7c3   : > { %16429 = vst [vmem:[#allocation165_spill] sm:$0xff] %v13365_v62  ;;  %v13369_v13 = vmul.f32 %v16430_v0, %v13341_v44  ;;  %v16436_v0 = vld [vmem:[#allocation43_spill] sm:$0xff] }
 0x7c4   : > { %16427 = vst [vmem:[#allocation163_spill] sm:$0xff] %v13354_v41  ;;  %v13361_v56 = vpack.c.bf16 %v13354_v41, %v13350_v29  ;;  %v13383_v41 = vmul.f32 %v16434_v42, %v13341_v44  ;;  %v16440_v42 = vld [vmem:[#allocation132_spill] sm:$0xff] }
 0x7c5   : > { %16431 = vst [vmem:[#allocation169_spill] sm:$0xff] %v13369_v13 }
 0x7c6   : > { %5608 = vperm.xlu0 %8758, %v5569_v34   ;;  %5340 = vperm.xlu1 %8759, %v5319_v52   ;;  %v5573_v49 = vunpack.c.h.b16 %v13361_v56  ;;  %v13375_v34 = vpack.c.bf16 %v13369_v13, %v13365_v62  ;;  %v16432_v52 = vld [vmem:[#allocation126_spill] sm:$0xff]  ;;  %16435 = vst [vmem:[#allocation167_spill] sm:$0xff] %v13383_v41  ;;  %v13393_v62 = vmul.f32 %v16436_v0, %v13341_v44  ;;  %v16442_v0 = vld [vmem:[#allocation112_spill] sm:$0xff] }
 0x7c7   : > { %v13379_v29 = vmul.f32 %v16432_v52, %v13341_v44  ;;  %v16438_v52 = vld [vmem:[#allocation111_spill] sm:$0xff] }
 0x7c8   : > { %v5800_v40 = vunpack.c.h.b16 %v13375_v34  ;;  %16437 = vst [vmem:[#allocation207_spill] sm:$0xff] %v13393_v62  ;;  %v13397_v13 = vmul.f32 %v16438_v52, %v13341_v44  ;;  %v16444_v52 = vld [vmem:[#allocation134_spill] sm:$0xff] }
 0x7c9   : > { %16433 = vst [vmem:[#allocation193_spill] sm:$0xff] %v13379_v29 }
 0x7ca   : > { %5614 = vperm.xlu0 %8758, %v5571_v32   ;;  %5346 = vperm.xlu1 %8759, %v5321_v4   ;;  %v5325_v4 = vunpack.c.l.b16 %v13177_v12  ;;  %v13389_v32 = vpack.c.bf16 %v13383_v41, %v13379_v29  ;;  %16439 = vst [vmem:[#allocation171_spill] sm:$0xff] %v13397_v13  ;;  %v13407_v29 = vmul.f32 %v16440_v42, %v13341_v44  ;;  %v16446_v42 = vld [vmem:[#allocation113_spill] sm:$0xff] }
 0x7cb   : > { %v13411_v41 = vmul.f32 %v16442_v0, %v13341_v44  ;;  %v16448_v0 = vld [vmem:[#allocation136_spill] sm:$0xff] }
 0x7cc   : > { %v5802_v12 = vunpack.c.h.b16 %v13389_v32  ;;  %16441 = vst [vmem:[#allocation162_spill] sm:$0xff] %v13407_v29 }
 0x7cd   : > { %16443 = vst [vmem:[#allocation166_spill] sm:$0xff] %v13411_v41 }
 0x7ce   : > { %5620 = vperm.xlu0 %8758, %v5573_v49   ;;  %5352 = vperm.xlu1 %8759, %v5323_v38   ;;  %v5327_v38 = vunpack.c.l.b16 %v13192_v16  ;;  %v13403_v49 = vpack.c.bf16 %v13397_v13, %v13393_v62  ;;  %v13421_v62 = vmul.f32 %v16444_v52, %v13341_v44  ;;  %v13425_v13 = vmul.f32 %v16446_v42, %v13341_v44  ;;  %v16450_v52 = vld [vmem:[#allocation114_spill] sm:$0xff] }
 0x7cf   : > { %v16452_v42 = vld [vmem:[#allocation138_spill] sm:$0xff] }
 0x7d0   : > { %v5804_v16 = vunpack.c.h.b16 %v13403_v49  ;;  %16445 = vst [vmem:[#allocation206_spill] sm:$0xff] %v13421_v62  ;;  %16447 = vst [vmem:[#allocation164_spill] sm:$0xff] %v13425_v13 }
 0x7d2   : > { %5819 = vperm.xlu0 %8758, %v5800_v40   ;;  %5358 = vperm.xlu1 %8759, %v5325_v4   ;;  %v5329_v4 = vunpack.c.l.b16 %v13215_v50  ;;  %v13417_v40 = vpack.c.bf16 %v13411_v41, %v13407_v29  ;;  %v13435_v29 = vmul.f32 %v16448_v0, %v13341_v44  ;;  %v13439_v41 = vmul.f32 %v16450_v52, %v13341_v44  ;;  %v16454_v0 = vld [vmem:[#allocation115_spill] sm:$0xff] }
 0x7d4   : > { %v5806_v50 = vunpack.c.h.b16 %v13417_v40  ;;  %16449 = vst [vmem:[#allocation183_spill] sm:$0xff] %v13435_v29  ;;  %16451 = vst [vmem:[#allocation170_spill] sm:$0xff] %v13439_v41 }
 0x7d6   : > { %5825 = vperm.xlu0 %8758, %v5802_v12   ;;  %5364 = vperm.xlu1 %8759, %v5327_v38   ;;  %v5331_v38 = vunpack.c.l.b16 %v13230_v31  ;;  %v13431_v12 = vpack.c.bf16 %v13425_v13, %v13421_v62  ;;  %v13449_v62 = vmul.f32 %v16452_v42, %v13341_v44  ;;  %v13453_v13 = vmul.f32 %v16454_v0, %v13341_v44  ;;  %v16457_v42 = vld [vmem:[#allocation139_spill] sm:$0xff]  ;;  %v16459_v0 = vld [vmem:[#allocation116_spill] sm:$0xff] }
 0x7d8   : > { %v5808_v31 = vunpack.c.h.b16 %v13431_v12  ;;  %16453 = vst [vmem:[#allocation173_spill] sm:$0xff] %v13449_v62  ;;  %16455 = vst [vmem:[#allocation185_spill] sm:$0xff] %v13453_v13 }
 0x7da   : > { %5831 = vperm.xlu0 %8758, %v5804_v16   ;;  %5370 = vperm.xlu1 %8759, %v5329_v4   ;;  %v5558_v4 = vunpack.c.l.b16 %v13248_v11  ;;  %v13445_v16 = vpack.c.bf16 %v13439_v41, %v13435_v29  ;;  %v13463_v29 = vpack.c.bf16 %v13453_v13, %v13449_v62  ;;  %v13467_v41 = vmul.f32 %v16457_v42, %v13341_v44  ;;  %v16461_v62 = vld [vmem:[#allocation144_spill] sm:$0xff]  ;;  %v16463_v42 = vld [vmem:[#allocation141_spill] sm:$0xff] }
 0x7dc   : > { %v5810_v52 = vunpack.c.h.b16 %v13445_v16  ;;  %16458 = vst [vmem:[#allocation195_spill] sm:$0xff] %v13467_v41 }
 0x7de   : > { %5837 = vperm.xlu0 %8758, %v5806_v50   ;;  %5376 = vperm.xlu1 %8759, %v5331_v38   ;;  %v5560_v38 = vunpack.c.l.b16 %v13264_v2  ;;  %v16456_v50 = vld [vmem:[#allocation127_spill] sm:$0xff]  ;;  %v5562_v2 = vunpack.c.l.b16 %v13280_v39  ;;  %v5564_v39 = vunpack.c.l.b16 %v13296_v23  ;;  %v5566_v23 = vunpack.c.l.b16 %v13312_v46 }
 0x7df   : > { %v13458_v11 = vrot.slane %v12907_v60, %v16456_v50  ;;  %v5568_v46 = vunpack.c.l.b16 %v13327_v51  ;;  %v5570_v51 = vunpack.c.l.b16 %v13346_v57  ;;  %v5572_v57 = vunpack.c.l.b16 %v13361_v56 }
 0x7e0   : > { %v5799_v56 = vunpack.c.l.b16 %v13375_v34  ;;  %v5801_v34 = vunpack.c.l.b16 %v13389_v32 }
 0x7e1   : > { %v13481_v13 = vmul.f32 %v16461_v62, %v13458_v11  ;;  %v13485_v36 = vmul.f32 %v16463_v42, %v13458_v11  ;;  %v16465_v62 = vld [vmem:[#allocation45_spill] sm:$0xff]  ;;  %v16467_v42 = vld [vmem:[#allocation143_spill] sm:$0xff] }
 0x7e2   : > { %5843 = vperm.xlu0 %8758, %v5808_v31   ;;  %5575 = vperm.xlu1 %8759, %v5558_v4   ;;  %v13471_v31 = vmul.f32 %v16459_v0, %v13341_v44  ;;  %v5812_v4 = vunpack.c.h.b16 %v13463_v29 }
 0x7e3   : > { %16462 = vst [vmem:[#allocation211_spill] sm:$0xff] %v13481_v13  ;;  %16464 = vst [vmem:[#allocation187_spill] sm:$0xff] %v13485_v36  ;;  %v13495_v0 = vpack.c.bf16 %v13485_v36, %v13481_v13 }
 0x7e4   : > { %16460 = vst [vmem:[#allocation179_spill] sm:$0xff] %v13471_v31  ;;  %v13477_v50 = vpack.c.bf16 %v13471_v31, %v13467_v41  ;;  %v13499_v41 = vmul.f32 %v16465_v62, %v13458_v11  ;;  %v13503_v31 = vmul.f32 %v16467_v42, %v13458_v11  ;;  %v16469_v62 = vld [vmem:[#allocation40_spill] sm:$0xff]  ;;  %v16471_v42 = vld [vmem:[#allocation145_spill] sm:$0xff] }
 0x7e5   : > { %v13517_v36 = vmul.f32 %v16469_v62, %v13458_v11  ;;  %v13521_v61 = vmul.f32 %v16471_v42, %v13458_v11  ;;  %v16473_v62 = vld [vmem:[#allocation51_spill] sm:$0xff] }
 0x7e6   : > { %5849 = vperm.xlu0 %8758, %v5810_v52   ;;  %5581 = vperm.xlu1 %8759, %v5560_v38   ;;  %v5814_v38 = vunpack.c.h.b16 %v13477_v50  ;;  %16466 = vst [vmem:[#allocation189_spill] sm:$0xff] %v13499_v41  ;;  %16468 = vst [vmem:[#allocation178_spill] sm:$0xff] %v13503_v31  ;;  %v13513_v13 = vpack.c.bf16 %v13503_v31, %v13499_v41  ;;  %v13535_v31 = vmul.f32 %v16473_v62, %v13458_v11  ;;  %v16475_v42 = vld [vmem:[#allocation147_spill] sm:$0xff]  ;;  %v16477_v62 = vld [vmem:[#allocation148_spill] sm:$0xff] }
 0x7e7   : > { %16470 = vst [vmem:[#allocation197_spill] sm:$0xff] %v13517_v36  ;;  %16472 = vst [vmem:[#allocation172_spill] sm:$0xff] %v13521_v61  ;;  %v13531_v41 = vpack.c.bf16 %v13521_v61, %v13517_v36  ;;  %v13539_v59 = vmul.f32 %v16475_v42, %v13458_v11  ;;  %v13553_v61 = vmul.f32 %v16477_v62, %v13458_v11  ;;  %v16479_v42 = vld [vmem:[#allocation37_spill] sm:$0xff] }
 0x7e8   : > { %16474 = vst [vmem:[#allocation196_spill] sm:$0xff] %v13535_v31  ;;  %v13557_v9 = vmul.f32 %v16479_v42, %v13458_v11  ;;  %v16481_v62 = vld [vmem:[#allocation57_spill] sm:$0xff]  ;;  %v16483_v42 = vld [vmem:[#allocation39_spill] sm:$0xff] }
 0x7e9   : > { %v13487_v44 = vpop.permute.xlu0 %4876  ;;  %v13489_v52 = vpop.permute.xlu1 %4852  ;;  %16476 = vst [vmem:[#allocation203_spill] sm:$0xff] %v13539_v59  ;;  %v13549_v36 = vpack.c.bf16 %v13539_v59, %v13535_v31  ;;  %16478 = vst [vmem:[#allocation212_spill] sm:$0xff] %v13553_v61  ;;  %v13571_v59 = vmul.f32 %v16481_v62, %v13458_v11  ;;  %v13575_v14 = vmul.f32 %v16483_v42, %v13458_v11  ;;  %v16485_v62 = vld [vmem:[#allocation154_spill] sm:$0xff]  ;;  %v16487_v42 = vld [vmem:[#allocation41_spill] sm:$0xff] }
 0x7ea   : > { %5855 = vperm.xlu0 %8758, %v5812_v4   ;;  %5587 = vperm.xlu1 %8759, %v5562_v2   ;;  %v6041_v2 = vunpack.c.h.b16 %v13495_v0  ;;  %16480 = vst [vmem:[#allocation188_spill] sm:$0xff] %v13557_v9  ;;  %v13567_v31 = vpack.c.bf16 %v13557_v9, %v13553_v61  ;;  %v13589_v9 = vmul.f32 %v16485_v62, %v13458_v11 }
 0x7eb   : > { %16482 = vst [vmem:[#allocation191_spill] sm:$0xff] %v13571_v59  ;;  %16484 = vst [vmem:[#allocation174_spill] sm:$0xff] %v13575_v14  ;;  %v13585_v61 = vpack.c.bf16 %v13575_v14, %v13571_v59  ;;  %v13593_v5 = vmul.f32 %v16487_v42, %v13458_v11  ;;  %v16491_v42 = vld [vmem:[#allocation69_spill] sm:$0xff] }
 0x7ec   : > { %16486 = vst [vmem:[#allocation33_spill] sm:$0xff] %v13589_v9  ;;  %v13610_v37 = vmul.f32 %v16491_v42, %v13458_v11  ;;  %v16495_v42 = vld [vmem:[#allocation73_spill] sm:$0xff] }
 0x7ed   : > { %v13505_v8 = vpop.permute.xlu0 %4897  ;;  %v13507_v4 = vpop.permute.xlu1 %4855  ;;  %16488 = vst [vmem:[#allocation186_spill] sm:$0xff] %v13593_v5  ;;  %v6051_v14 = vunpack.c.h.b16 %v13585_v61  ;;  %v13606_v62 = vpack.c.bf16 %v13593_v5, %v13589_v9 }
 0x7ee   : > { %5861 = vperm.xlu0 %8758, %v5814_v38   ;;  %5593 = vperm.xlu1 %8759, %v5564_v39   ;;  %v6043_v39 = vunpack.c.h.b16 %v13513_v13  ;;  %16492 = vst [vmem:[#allocation200_spill] sm:$0xff] %v13610_v37 }
 0x7ef   : > { %v6053_v19 = vunpack.c.h.b16 %v13606_v62 }
 0x7f1   : > { %v13523_v43 = vpop.permute.xlu0 %5096  ;;  %v13525_v38 = vpop.permute.xlu1 %4858 }
 0x7f2   : > { %6060 = vperm.xlu0 %8758, %v6041_v2   ;;  %5599 = vperm.xlu1 %8759, %v5566_v23   ;;  %v6045_v23 = vunpack.c.h.b16 %v13531_v41  ;;  %v4911_v48 = vrot.slane %v13525_v38, %v11115_v7 }
 0x7f5   : > { %v13541_v6 = vpop.permute.xlu0 %5102  ;;  %v13543_v2 = vpop.permute.xlu1 %4861 }
 0x7f6   : > { %6066 = vperm.xlu0 %8758, %v6043_v39   ;;  %5605 = vperm.xlu1 %8759, %v5568_v46   ;;  %v6047_v46 = vunpack.c.h.b16 %v13549_v36 }
 0x7f9   : > { %v13559_v33 = vpop.permute.xlu0 %5108  ;;  %v13561_v39 = vpop.permute.xlu1 %4864 }
 0x7fa   : > { %6072 = vperm.xlu0 %8758, %v6045_v23   ;;  %5611 = vperm.xlu1 %8759, %v5570_v51   ;;  %v6049_v51 = vunpack.c.h.b16 %v13567_v31 }
 0x7fd   : > { %v13577_v18 = vpop.permute.xlu0 %5114  ;;  %v13579_v23 = vpop.permute.xlu1 %4867 }
 0x7fe   : > { %6078 = vperm.xlu0 %8758, %v6047_v46   ;;  %5617 = vperm.xlu1 %8759, %v5572_v57   ;;  %v16489_v57 = vld [vmem:[#allocation34_spill] sm:$0xff] }
 0x7ff   : > { %v16490_v17 = vsub.s32 6, %v16489_v57 }
 0x801   : > { %v13595_v47 = vpop.permute.xlu0 %5120  ;;  %v4871_v46 = vpop.permute.xlu1 %4870  ;;  %v13601_v59 = vrot.slane %v12907_v60, %v16490_v17  ;;  %v5803_v17 = vunpack.c.l.b16 %v13403_v49  ;;  %v5805_v49 = vunpack.c.l.b16 %v13417_v40 }
 0x802   : > { %6084 = vperm.xlu0 %8758, %v6049_v51   ;;  %5816 = vperm.xlu1 %8759, %v5799_v56   ;;  %v16493_v51 = vld [vmem:[#allocation130_spill] sm:$0xff] }
 0x803   : > { %v13614_v56 = vmul.f32 %v16493_v51, %v13458_v11  ;;  %v13626_v5 = vmul.f32 %v16495_v42, %v13601_v59  ;;  %v16497_v11 = vld [vmem:[#allocation151_spill] sm:$0xff]  ;;  %v16500_v42 = vld [vmem:[#allocation46_spill] sm:$0xff] }
 0x804   : > { %v13630_v51 = vmul.f32 %v16497_v11, %v13601_v59  ;;  %v16502_v11 = vld [vmem:[#allocation153_spill] sm:$0xff] }
 0x805   : > { %16494 = vst [vmem:[#allocation201_spill] sm:$0xff] %v13614_v56  ;;  %v13616_v32 = vpop.permute.xlu0 %5126  ;;  %v4874_v26 = vpop.permute.xlu1 %4873  ;;  %v13622_v9 = vpack.c.bf16 %v13614_v56, %v13610_v37  ;;  %16496 = vst [vmem:[#allocation202_spill] sm:$0xff] %v13626_v5  ;;  %v13642_v56 = vmul.f32 %v16500_v42, %v13601_v59  ;;  %v13646_v45 = vmul.f32 %v16502_v11, %v13601_v59  ;;  %v5807_v11 = vunpack.c.l.b16 %v13431_v12 }
 0x806   : > { %6090 = vperm.xlu0 %8758, %v6051_v14   ;;  %5822 = vperm.xlu1 %8759, %v5801_v34   ;;  %16498 = vst [vmem:[#allocation181_spill] sm:$0xff] %v13630_v51  ;;  %v13638_v37 = vpack.c.bf16 %v13630_v51, %v13626_v5  ;;  %v4902_v5 = vrot.slane %v13489_v52, %v11108_v27  ;;  %v16505_v51 = vld [vmem:[#allocation79_spill] sm:$0xff] }
 0x807   : > { %v6055_v34 = vunpack.c.h.b16 %v13622_v9  ;;  %16501 = vst [vmem:[#allocation217_spill] sm:$0xff] %v13642_v56  ;;  %16503 = vst [vmem:[#allocation216_spill] sm:$0xff] %v13646_v45  ;;  %v4916_v42 = vrot.slane %v13543_v2, %v11118_v35  ;;  %v13661_v58 = vmul.f32 %v16505_v51, %v13601_v59  ;;  %v13668_v38 = vpack.c.bf16 %v13646_v45, %v13642_v56  ;;  %v16507_v52 = vld [vmem:[#allocation155_spill] sm:$0xff] }
 0x808   : > { %16499 = vst [vmem:[#allocation190_spill] sm:$0xff] %v13638_v37  ;;  %v4926_v12 = vrot.slane %v13579_v23, %v11150_v24  ;;  %v4936_v45 = vrot.slane %v4874_v26, %v11160_v21 }
 0x809   : > { %v13632_v10 = vpop.permute.xlu0 %5132  ;;  %v4880_v14 = vpop.permute.xlu1 %4879  ;;  %16506 = vst [vmem:[#allocation218_spill] sm:$0xff] %v13661_v58 }
 0x80a   : > { %6096 = vperm.xlu0 %8758, %v6053_v19   ;;  %5828 = vperm.xlu1 %8759, %v5803_v17   ;;  %v4906_v19 = vrot.slane %v13507_v4, %v11104_v20  ;;  %v4921_v4 = vrot.slane %v13561_v39, %v11122_v1 }
 0x80c   : > { %v4907_v2 = vsel %vm2216_vm1, %v4906_v19, %v4902_v5  ;;  %v16509_v5 = vld [vmem:[#allocation52_spill] sm:$0xff] }
 0x80d   : > { %v13650_v17 = vpop.permute.xlu0 %5138  ;;  %v4883_v40 = vpop.permute.xlu1 %4882  ;;  %v4912_v39 = vsel %vm2223_vm2, %v4911_v48, %v4907_v2  ;;  %v13686_v19 = vmul.f32 %v16509_v5, %v13601_v59  ;;  %v4946_v2 = vrot.slane %v4880_v14, %v11188_v15 }
 0x80e   : > { %16504 = vst [vmem:[#allocation63_spill] sm:$0xff] %v13650_v17  ;;  %6102 = vperm.xlu0 %8758, %v6055_v34   ;;  %5834 = vperm.xlu1 %8759, %v5805_v49   ;;  %v6282_v17 = vunpack.c.h.b16 %v13638_v37  ;;  %v13672_v49 = vmul.f32 %v16507_v52, %v13601_v59  ;;  %v4931_v37 = vrot.slane %v4871_v46, %v11145_v3  ;;  %v5809_v52 = vunpack.c.l.b16 %v13445_v16  ;;  %v16511_v46 = vld [vmem:[#allocation157_spill] sm:$0xff] }
 0x80f   : > { %v4917_v56 = vsel %vm2230_vm3, %v4916_v42, %v4912_v39  ;;  %16510 = vst [vmem:[#allocation204_spill] sm:$0xff] %v13686_v19  ;;  %v16514_v39 = vld [vmem:[#allocation54_spill] sm:$0xff] }
 0x810   : > { %v4922_v23 = vsel %vm2237_vm4, %v4921_v4, %v4917_v56  ;;  %v13692_v48 = vpack.c.bf16 %v13672_v49, %v13661_v58  ;;  %v5811_v56 = vunpack.c.l.b16 %v13463_v29  ;;  %v13707_v5 = vmul.f32 %v16514_v39, %v13601_v59 }
 0x811   : > { %v13677_v51 = vpop.permute.xlu0 %5337  ;;  %v4886_v34 = vpop.permute.xlu1 %4885  ;;  %v4927_v26 = vsel %vm16512_vm0, %v4926_v12, %v4922_v23  ;;  %v4941_v23 = vrot.slane %v13487_v44, %v11157_v30  ;;  %v5813_v39 = vunpack.c.l.b16 %v13477_v50  ;;  %vm16522_vm0 = vcmask 786112  }
 0x812   : > { %16508 = vst [vmem:[#allocation62_spill] sm:$0xff] %v13677_v51  ;;  %6301 = vperm.xlu0 %8758, %v6282_v17   ;;  %5840 = vperm.xlu1 %8759, %v5807_v11   ;;  %v6284_v51 = vunpack.c.h.b16 %v13668_v38  ;;  %v13696_v17 = vmul.f32 %v16511_v46, %v13601_v59  ;;  %v4932_v11 = vsel %vm16513_vm11, %v4931_v37, %v4927_v26  ;;  %16515 = vst [vmem:[#allocation66_spill] sm:$0xff] %v13707_v5  ;;  %v16516_v46 = vld [vmem:[#allocation142_spill] sm:$0xff]  ;;  %vm16539_vm11 = vcmask 392512  }
 0x813   : > { %v4937_v4 = vsel %vm2258_vm7, %v4936_v45, %v4932_v11  ;;  %v13711_v12 = vmul.f32 %v16516_v46, %v13601_v59  ;;  %v4951_v37 = vrot.slane %v4883_v40, %v11169_v25  ;;  %v4956_v29 = vrot.slane %v4886_v34, %v11218_v22  ;;  %v16518_v46 = vld [vmem:[#allocation56_spill] sm:$0xff] }
 0x814   : > { %v13719_v45 = vpack.c.bf16 %v13696_v17, %v13686_v19  ;;  %v4942_v26 = vsel %vm2265_vm8, %v4941_v23, %v4937_v4  ;;  %v13731_v19 = vmul.f32 %v16518_v46, %v13601_v59  ;;  %v16523_v46 = vld [vmem:[#allocation89_spill] sm:$0xff] }
 0x815   : > { %v13699_v42 = vpop.permute.xlu0 %5343  ;;  %v4889_v16 = vpop.permute.xlu1 %4888  ;;  %v4947_v44 = vsel %vm16517_vm5, %v4946_v2, %v4942_v26  ;;  %v13737_v4 = vpack.c.bf16 %v13711_v12, %v13707_v5  ;;  %v16535_v5 = vld [vmem:[#allocation74_spill] sm:$0xff]  ;;  %vm16542_vm5 = vcmask 458112  }
 0x816   : > { %6307 = vperm.xlu0 %8758, %v6284_v51   ;;  %5846 = vperm.xlu1 %8759, %v5809_v52   ;;  %v6286_v51 = vunpack.c.h.b16 %v13692_v48  ;;  %v4961_v11 = vrot.slane %v4889_v16, %v11199_v55  ;;  %16519 = vst [vmem:[#allocation192_spill] sm:$0xff] %v13731_v19  ;;  %v4952_v34 = vsel %vm16520_vm10, %v4951_v37, %v4947_v44  ;;  %v6288_v58 = vunpack.c.h.b16 %v13719_v45  ;;  %v16521_v16 = vld [vmem:[#allocation64_spill] sm:$0xff] }
 0x817   : > { %v4957_v2 = vsel %vm16522_vm0, %v4956_v29, %v4952_v34  ;;  %v4976_v37 = vrot.slane %v13505_v8, %v16213_v63  ;;  %v6040_v44 = vunpack.c.l.b16 %v13495_v0  ;;  %v6290_v34 = vunpack.c.h.b16 %v13737_v4 }
 0x818   : > { %vm16549_vm10 = vcmask 654912   ;;  %vm16552_vm0 = vcmask 720512  }
 0x819   : > { %v13722_v14 = vpop.permute.xlu0 %5349  ;;  %v4892_v52 = vpop.permute.xlu1 %4891 }
 0x81a   : > { %6313 = vperm.xlu0 %8758, %v6286_v51   ;;  %5852 = vperm.xlu1 %8759, %v5811_v56   ;;  %v4966_v40 = vrot.slane %v4892_v52, %v11231_v53  ;;  %v13741_v56 = vmul.f32 %v16521_v16, %v13601_v59  ;;  %v4962_v51 = vsel %vm2293_vm12, %v4961_v11, %v4957_v2  ;;  %v8848_v2 = vld [vmem:[#allocation6 + $0x80] sm:$0xff]  }
 0x81b   : > { %v13754_v16 = vmul.f32 %v16523_v46, %v13601_v59 }
 0x81c   : > { %v4967_v26 = vsel %vm2300_vm13, %v4966_v40, %v4962_v51  ;;  %v13760_v11 = vpack.c.bf16 %v13741_v56, %v13731_v19 }
 0x81d   : > { %v13744_v23 = vpop.permute.xlu0 %5355  ;;  %v4895_v50 = vpop.permute.xlu1 %4894  ;;  %16524 = vst [vmem:[#allocation129_spill] sm:$0xff] %v13754_v16 }
 0x81e   : > { %v4971_v52 = vrot.slane %v4895_v50, %v16204_v54  ;;  %6319 = vperm.xlu0 %8758, %v6288_v58   ;;  %5858 = vperm.xlu1 %8759, %v5813_v39   ;;  %v16525_v58 = vld [vmem:[#allocation38_spill] sm:$0xff] }
 0x81f   : > { %v13764_v39 = vmul.f32 %v16525_v58, %v13601_v59  ;;  %v6292_v58 = vunpack.c.h.b16 %v13760_v11 }
 0x820   : > { %v4972_v29 = vsel %vm2307_vm14, %v4971_v52, %v4967_v26  ;;  %v6042_v52 = vunpack.c.l.b16 %v13513_v13  ;;  %v16527_v26 = vsub.s32 7, %v16489_v57  ;;  %v5147_v13 = vrot.slane %v13523_v43, %v11104_v20 }
 0x821   : > { %16526 = vst [vmem:[#allocation209_spill] sm:$0xff] %v13764_v39  ;;  %v13766_v8 = vpop.permute.xlu0 %5361  ;;  %v5094_v40 = vpop.permute.xlu1 %5093  ;;  %v4977_v0 = vsel %vm2314_vm15, %v4976_v37, %v4972_v29  ;;  %v13779_v19 = vpack.c.bf16 %v13764_v39, %v13754_v16  ;;  %v16528_v37 = vld [vmem:[#allocation68_spill] sm:$0xff]  ;;  %v16530_v29 = vld [vmem:[#allocation49_spill] sm:$0xff] }
 0x822   : > { %6325 = vperm.xlu0 %8758, %v6290_v34   ;;  %6057 = vperm.xlu1 %8759, %v6040_v44   ;;  %v4978_v50 = vpack.c.b16 %v4977_v0, %v4977_v0  ;;  %v5143_v51 = vrot.slane %v5094_v40, %v11108_v27  ;;  %v13774_v46 = vrot.slane %v12907_v60, %v16527_v26  ;;  %v8849_v40 = vld [vmem:[#allocation6 + $0x88] sm:$0xff]   ;;  %v16532_v26 = vld [vmem:[#allocation95_spill] sm:$0xff] }
 0x823   : > { %v13783_v44 = vmul.f32 %v16528_v37, %v13601_v59  ;;  %v13787_v34 = vmul.f32 %v16530_v29, %v13601_v59  ;;  %v6044_v59 = vunpack.c.l.b16 %v13531_v41  ;;  %v5157_v41 = vrot.slane %v13541_v6, %v11118_v35 }
 0x824   : > { %8567 = vmatmul.mubr.bf16.vlgmr.msra.gmra.mrb[4].mxu1 %v4978_v50  ;;  %v5148_v50 = vsel %vm2216_vm1, %v5147_v13, %v5143_v51  ;;  %v13800_v37 = vmul.f32 %v16532_v26, %v13774_v46  ;;  %v6046_v26 = vunpack.c.l.b16 %v13549_v36  ;;  %v5167_v36 = vrot.slane %v13559_v33, %v11150_v24 }
 0x825   : > { %16529 = vst [vmem:[#allocation131_spill] sm:$0xff] %v13783_v44  ;;  %16531 = vst [vmem:[#allocation184_spill] sm:$0xff] %v13787_v34  ;;  %v13791_v60 = vpop.permute.xlu0 %5367  ;;  %v5100_v57 = vpop.permute.xlu1 %5099  ;;  %8591 = vmatpush3.bf16.msra.mxu1 %v8848_v2  ;;  %8606 = vmatprep.mubr.msk.bf16.mxu1 %vm9466_vm9, %v16385_v28  ;;  %v6294_v2 = vunpack.c.h.b16 %v13779_v19  ;;  %v13807_v29 = vpack.c.bf16 %v13787_v34, %v13783_v44 }
 0x826   : > { %v5152_v0 = vrot.slane %v5100_v57, %v11115_v7  ;;  %6331 = vperm.xlu0 %8758, %v6292_v58   ;;  %6063 = vperm.xlu1 %8759, %v6042_v52   ;;  %16533 = vst [vmem:[#allocation133_spill] sm:$0xff] %v13800_v37  ;;  %v16534_v52 = vld [vmem:[#allocation44_spill] sm:$0xff]  ;;  %v8850_v57 = vld [vmem:[#allocation6 + $0x90] sm:$0xff]  }
 0x827   : > { %8592 = vmatprep.subr.bf16.mxu1 %v16385_v28  ;;  %v13811_v58 = vmul.f32 %v16534_v52, %v13774_v46  ;;  %v13822_v52 = vmul.f32 %v16535_v5, %v13774_v46  ;;  %v6296_v34 = vunpack.c.h.b16 %v13807_v29 }
 0x828   : > { %v5153_v43 = vsel %vm2223_vm2, %v5152_v0, %v5148_v50 }
 0x829   : > { %v13815_v51 = vpop.permute.xlu0 %5373  ;;  %v5106_v13 = vpop.permute.xlu1 %5105  ;;  %8593 = vmatpush3.bf16.msra.mxu1 %v8849_v40  ;;  %v5158_v50 = vsel %vm2230_vm3, %v5157_v41, %v5153_v43  ;;  %16536 = vst [vmem:[#allocation208_spill] sm:$0xff] %v13822_v52  ;;  %v13829_v40 = vpack.c.bf16 %v13811_v58, %v13800_v37  ;;  %v8851_v41 = vld [vmem:[#allocation6 + $0x98] sm:$0xff]   ;;  %v16540_v37 = vld [vmem:[#allocation101_spill] sm:$0xff] }
 0x82a   : > { %v5162_v0 = vrot.slane %v5106_v13, %v11122_v1  ;;  %6337 = vperm.xlu0 %8758, %v6294_v2   ;;  %6069 = vperm.xlu1 %8759, %v6044_v59   ;;  %v16537_v59 = vld [vmem:[#allocation55_spill] sm:$0xff] }
 0x82b   : > { %8594 = vmatprep.subr.bf16.mxu1 %v16385_v28  ;;  %v13833_v2 = vmul.f32 %v16537_v59, %v13774_v46  ;;  %v13844_v59 = vmul.f32 %v16540_v37, %v13774_v46  ;;  %v6523_v44 = vunpack.c.h.b16 %v13829_v40 }
 0x82c   : > { %v5163_v6 = vsel %vm2237_vm4, %v5162_v0, %v5158_v50  ;;  %v6048_v50 = vunpack.c.l.b16 %v13567_v31  ;;  %v5177_v31 = vrot.slane %v13577_v18, %v11160_v21 }
 0x82d   : > { %16538 = vst [vmem:[#allocation135_spill] sm:$0xff] %v13833_v2  ;;  %v13837_v43 = vpop.permute.xlu0 %5379  ;;  %v5112_v5 = vpop.permute.xlu1 %5111  ;;  %8595 = vmatpush3.bf16.msra.mxu1 %v8850_v57  ;;  %v5168_v0 = vsel %vm16539_vm11, %v5167_v36, %v5163_v6  ;;  %16541 = vst [vmem:[#allocation194_spill] sm:$0xff] %v13844_v59  ;;  %v13851_v57 = vpack.c.bf16 %v13833_v2, %v13822_v52  ;;  %v8852_v36 = vld [vmem:[#allocation6 + $0xa0] sm:$0xff]   ;;  %vm16555_vm11 = vcmask 786112  }
 0x82e   : > { %v5172_v13 = vrot.slane %v5112_v5, %v11145_v3  ;;  %6343 = vperm.xlu0 %8758, %v6296_v34   ;;  %6075 = vperm.xlu1 %8759, %v6046_v26   ;;  %v16543_v34 = vld [vmem:[#allocation152_spill] sm:$0xff]  ;;  %v16545_v52 = vld [vmem:[#allocation103_spill] sm:$0xff] }
 0x82f   : > { %8596 = vmatprep.subr.bf16.mxu1 %v16385_v28  ;;  %v13855_v26 = vmul.f32 %v16543_v34, %v13774_v46  ;;  %v13866_v34 = vmul.f32 %v16545_v52, %v13774_v46  ;;  %v6525_v39 = vunpack.c.h.b16 %v13851_v57 }
 0x830   : > { %v5173_v33 = vsel %vm16542_vm5, %v5172_v13, %v5168_v0  ;;  %v6050_v0 = vunpack.c.l.b16 %v13585_v61  ;;  %v5187_v61 = vrot.slane %v13595_v47, %v11188_v15  ;;  %vm16569_vm5 = vcmask 392512  }
 0x831   : > { %16544 = vst [vmem:[#allocation137_spill] sm:$0xff] %v13855_v26  ;;  %v13859_v6 = vpop.permute.xlu0 %5578  ;;  %v5118_v37 = vpop.permute.xlu1 %5117  ;;  %8597 = vmatpush3.bf16.msra.mxu1 %v8851_v41  ;;  %v5178_v13 = vsel %vm2258_vm7, %v5177_v31, %v5173_v33  ;;  %16546 = vst [vmem:[#allocation213_spill] sm:$0xff] %v13866_v34  ;;  %v13873_v41 = vpack.c.bf16 %v13855_v26, %v13844_v59  ;;  %v8853_v31 = vld [vmem:[#allocation6 + $0xa8] sm:$0xff]   ;;  %v16561_v26 = vld [vmem:[#allocation107_spill] sm:$0xff] }
 0x832   : > { %v5182_v5 = vrot.slane %v5118_v37, %v11157_v30  ;;  %6542 = vperm.xlu0 %8758, %v6523_v44   ;;  %6081 = vperm.xlu1 %8759, %v6048_v50   ;;  %v16547_v44 = vld [vmem:[#allocation67_spill] sm:$0xff]  ;;  %v16550_v59 = vld [vmem:[#allocation80_spill] sm:$0xff]  ;;  %v13934_v2 = vmul.f32 %v16561_v26, %v13774_v46 }
 0x833   : > { %8598 = vmatprep.subr.bf16.mxu1 %v16385_v28  ;;  %v13877_v50 = vmul.f32 %v16547_v44, %v13774_v46  ;;  %v13888_v44 = vmul.f32 %v16550_v59, %v13774_v46  ;;  %v6527_v16 = vunpack.c.h.b16 %v13873_v41 }
 0x834   : > { %v5183_v18 = vsel %vm2265_vm8, %v5182_v5, %v5178_v13  ;;  %v6052_v13 = vunpack.c.l.b16 %v13606_v62  ;;  %v5197_v62 = vrot.slane %v13616_v32, %v11218_v22  ;;  %16562 = vst [vmem:[#allocation120_spill] sm:$0xff] %v13934_v2 }
 0x835   : > { %16548 = vst [vmem:[#allocation118_spill] sm:$0xff] %v13877_v50  ;;  %v13881_v33 = vpop.permute.xlu0 %5584  ;;  %v5124_v52 = vpop.permute.xlu1 %5123  ;;  %8599 = vmatpush3.bf16.msra.mxu1 %v8852_v36  ;;  %v5188_v5 = vsel %vm16549_vm10, %v5187_v61, %v5183_v18  ;;  %16551 = vst [vmem:[#allocation199_spill] sm:$0xff] %v13888_v44  ;;  %v13895_v36 = vpack.c.bf16 %v13877_v50, %v13866_v34  ;;  %v8854_v61 = vld [vmem:[#allocation6 + $0xb0] sm:$0xff]   ;;  %v16556_v34 = vld [vmem:[#allocation82_spill] sm:$0xff]  ;;  %vm16570_vm10 = vcmask 458112  }
 0x836   : > { %v5192_v37 = vrot.slane %v5124_v52, %v11169_v25  ;;  %6548 = vperm.xlu0 %8758, %v6525_v39   ;;  %6087 = vperm.xlu1 %8759, %v6050_v0   ;;  %v16553_v39 = vld [vmem:[#allocation71_spill] sm:$0xff] }
 0x837   : > { %8600 = vmatprep.subr.bf16.mxu1 %v16385_v28  ;;  %v13899_v0 = vmul.f32 %v16553_v39, %v13774_v46  ;;  %v13910_v39 = vmul.f32 %v16556_v34, %v13774_v46  ;;  %v6529_v50 = vunpack.c.h.b16 %v13895_v36 }
 0x838   : > { %v5193_v47 = vsel %vm16552_vm0, %v5192_v37, %v5188_v5  ;;  %v6054_v5 = vunpack.c.l.b16 %v13622_v9  ;;  %v5207_v9 = vrot.slane %v13632_v10, %v11231_v53  ;;  %vm16573_vm0 = vcmask 654912  }
 0x839   : > { %16554 = vst [vmem:[#allocation119_spill] sm:$0xff] %v13899_v0  ;;  %v13903_v18 = vpop.permute.xlu0 %5590  ;;  %v5130_v59 = vpop.permute.xlu1 %5129  ;;  %8601 = vmatpush3.bf16.msra.mxu1 %v8853_v31  ;;  %v5198_v37 = vsel %vm16555_vm11, %v5197_v62, %v5193_v47  ;;  %v13917_v31 = vpack.c.bf16 %v13899_v0, %v13888_v44  ;;  %v8855_v62 = vld [vmem:[#allocation6 + $0xb8] sm:$0xff]   ;;  %vm16574_vm11 = vcmask 720512  }
 0x83a   : > { %v5202_v52 = vrot.slane %v5130_v59, %v11199_v55  ;;  %6554 = vperm.xlu0 %8758, %v6527_v16   ;;  %6093 = vperm.xlu1 %8759, %v6052_v13   ;;  %v16557_v16 = vld [vmem:[#allocation65_spill] sm:$0xff]  ;;  %v16560_v0 = vld [vmem:[#allocation190_spill] sm:$0xff] }
 0x83b   : > { %8602 = vmatprep.subr.bf16.mxu1 %v16385_v28  ;;  %v13921_v13 = vmul.f32 %v16557_v16, %v13774_v46  ;;  %v6281_v16 = vunpack.c.l.b16 %v16560_v0 }
 0x83c   : > { %v5203_v32 = vsel %vm2293_vm12, %v5202_v52, %v5198_v37  ;;  %v16559_v52 = vld [vmem:[#allocation63_spill] sm:$0xff] }
 0x83d   : > { %16558 = vst [vmem:[#allocation215_spill] sm:$0xff] %v13921_v13  ;;  %v13925_v47 = vpop.permute.xlu0 %5596  ;;  %v5136_v34 = vpop.permute.xlu1 %5135  ;;  %8603 = vmatpush3.bf16.msra.mxu1 %v8854_v61  ;;  %v5217_v37 = vrot.slane %v16559_v52, %v16213_v63  ;;  %v5208_v44 = vsel %vm2300_vm13, %v5207_v9, %v5203_v32  ;;  %v6531_v61 = vunpack.c.h.b16 %v13917_v31  ;;  %v8856_v9 = vld [vmem:[#allocation6 + $0xc0] sm:$0xff]   ;;  %v6283_v52 = vunpack.c.l.b16 %v13668_v38 }
 0x83e   : > { %v5212_v59 = vrot.slane %v5136_v34, %v16204_v54  ;;  %6560 = vperm.xlu0 %8758, %v6529_v50   ;;  %6099 = vperm.xlu1 %8759, %v6054_v5   ;;  %v13941_v50 = vpack.c.bf16 %v13921_v13, %v13910_v39  ;;  %v16563_v5 = vld [vmem:[#allocation77_spill] sm:$0xff] }
 0x83f   : > { %8604 = vmatprep.subr.bf16.mxu1 %v16385_v28  ;;  %v13945_v34 = vmul.f32 %v16563_v5, %v13774_v46 }
 0x840   : > { %v5213_v10 = vsel %vm2307_vm14, %v5212_v59, %v5208_v44  ;;  %v6533_v5 = vunpack.c.h.b16 %v13941_v50 }
 0x841   : > { %16564 = vst [vmem:[#allocation198_spill] sm:$0xff] %v13945_v34  ;;  %v13947_v32 = vpop.permute.xlu0 %5602  ;;  %v5335_v0 = vpop.permute.xlu1 %5334  ;;  %v5218_v26 = vsel %vm2314_vm15, %v5217_v37, %v5213_v10  ;;  %8605 = vmatpush3.bf16.msra.mxu1 %v8855_v62  ;;  %v13956_v13 = vpack.c.bf16 %v13945_v34, %v13934_v2  ;;  %v16565_v37 = vld [vmem:[#allocation108_spill] sm:$0xff]  ;;  %v5398_v2 = vrot.slane %v13699_v42, %v11118_v35 }
 0x842   : > { %6566 = vperm.xlu0 %8758, %v6531_v61   ;;  %6298 = vperm.xlu1 %8759, %v6281_v16   ;;  %v5219_v44 = vpack.c.b16 %v5218_v26, %v5218_v26  ;;  %v5384_v59 = vrot.slane %v5335_v0, %v11108_v27  ;;  %v13960_v62 = vmul.f32 %v16565_v37, %v13774_v46  ;;  %v16567_v16 = vld [vmem:[#allocation50_spill] sm:$0xff] }
 0x843   : > { %8630 = vmatprep.subr.bf16.mxu1 %v16385_v28  ;;  %v13964_v10 = vmul.f32 %v16567_v16, %v13774_v46  ;;  %v16568_v61 = vld [vmem:[#allocation62_spill] sm:$0xff]  ;;  %v6535_v16 = vunpack.c.h.b16 %v13956_v13  ;;  %v5408_v42 = vrot.slane %v13722_v14, %v11150_v24  ;;  %v5418_v14 = vrot.slane %v13744_v23, %v11160_v21 }
 0x844   : > { %8587 = vmatmul.mubr.bf16.vlgmr.msra.gmra.mrb[8].mxu0 %v5219_v44  ;;  %16566 = vst [vmem:[#allocation121_spill] sm:$0xff] %v13960_v62  ;;  %v5388_v38 = vrot.slane %v16568_v61, %v11104_v20  ;;  %v8857_v44 = vld [vmem:[#allocation6 + $0xc8] sm:$0xff]   ;;  %v6285_v61 = vunpack.c.l.b16 %v13692_v48  ;;  %v5428_v23 = vrot.slane %v13766_v8, %v11188_v15  ;;  %v5438_v8 = vrot.slane %v13791_v60, %v11218_v22 }
 0x845   : > { %v13968_v0 = vpop.permute.xlu0 %5608  ;;  %v5341_v26 = vpop.permute.xlu1 %5340  ;;  %8611 = vmatpush3.bf16.msra.mxu0 %v8856_v9  ;;  %8626 = vmatprep.mubr.msk.bf16.mxu0 %vm9466_vm9, %v16385_v28  ;;  %v13980_v9 = vpack.c.bf16 %v13964_v10, %v13960_v62  ;;  %v5448_v60 = vrot.slane %v13815_v51, %v11231_v53  ;;  %v6522_v51 = vunpack.c.l.b16 %v13829_v40  ;;  %v5629_v40 = vrot.slane %v13859_v6, %v11104_v20 }
 0x846   : > { %v5393_v34 = vrot.slane %v5341_v26, %v11115_v7  ;;  %6572 = vperm.xlu0 %8758, %v6533_v5   ;;  %6304 = vperm.xlu1 %8759, %v6283_v52   ;;  %v5389_v37 = vsel %vm2216_vm1, %v5388_v38, %v5384_v59  ;;  %v8858_v59 = vld [vmem:[#allocation6 + $0xd0] sm:$0xff]   ;;  %v6526_v6 = vunpack.c.l.b16 %v13873_v41  ;;  %v6528_v41 = vunpack.c.l.b16 %v13895_v36 }
 0x847   : > { %8612 = vmatprep.subr.bf16.mxu0 %v16385_v28  ;;  %v6537_v38 = vunpack.c.h.b16 %v13980_v9  ;;  %v6530_v36 = vunpack.c.l.b16 %v13917_v31  ;;  %v6532_v31 = vunpack.c.l.b16 %v13941_v50  ;;  %v6534_v50 = vunpack.c.l.b16 %v13956_v13 }
 0x848   : > { %v5394_v46 = vsel %vm2223_vm2, %v5393_v34, %v5389_v37  ;;  %v6287_v37 = vunpack.c.l.b16 %v13719_v45  ;;  %v6289_v45 = vunpack.c.l.b16 %v13737_v4  ;;  %v6291_v4 = vunpack.c.l.b16 %v13760_v11 }
 0x849   : > { %v13984_v26 = vpop.permute.xlu0 %5614  ;;  %v5347_v52 = vpop.permute.xlu1 %5346  ;;  %8613 = vmatpush3.bf16.msra.mxu0 %v8857_v44  ;;  %v5399_v34 = vsel %vm2230_vm3, %v5398_v2, %v5394_v46  ;;  %v6293_v11 = vunpack.c.l.b16 %v13779_v19  ;;  %v6295_v19 = vunpack.c.l.b16 %v13807_v29  ;;  %v6536_v13 = vunpack.c.l.b16 %v13980_v9 }
 0x84a   : > { %v5403_v5 = vrot.slane %v5347_v52, %v11122_v1  ;;  %6578 = vperm.xlu0 %8758, %v6535_v16   ;;  %6310 = vperm.xlu1 %8759, %v6285_v61   ;;  %v8859_v52 = vld [vmem:[#allocation6 + $0xd8] sm:$0xff]  }
 0x84b   : > { %8614 = vmatprep.subr.bf16.mxu0 %v16385_v28 }
 0x84c   : > { %v5404_v48 = vsel %vm2237_vm4, %v5403_v5, %v5399_v34 }
 0x84d   : > { %v13994_v62 = vpop.permute.xlu0 %5620  ;;  %v5353_v44 = vpop.permute.xlu1 %5352  ;;  %8615 = vmatpush3.bf16.msra.mxu0 %v8858_v59  ;;  %v5409_v2 = vsel %vm16569_vm5, %v5408_v42, %v5404_v48  ;;  %v8860_v59 = vld [vmem:[#allocation6 + $0xe0] sm:$0xff]   ;;  %vm16576_vm5 = vcmask 786112  }
 0x84e   : > { %v5413_v16 = vrot.slane %v5353_v44, %v11145_v3  ;;  %6584 = vperm.xlu0 %8758, %v6537_v38   ;;  %6316 = vperm.xlu1 %8759, %v6287_v37   ;;  %v16571_v38 = vld [vmem:[#allocation158_spill] sm:$0xff] }
 0x84f   : > { %8616 = vmatprep.subr.bf16.mxu0 %v16385_v28 }
 0x850   : > { %v5414_v46 = vsel %vm16570_vm10, %v5413_v16, %v5409_v2  ;;  %v16572_v2 = vld [vmem:[#allocation150_spill] sm:$0xff]  ;;  %vm16582_vm10 = vcmask 392512  }
 0x851   : > { %v14003_v61 = vpop.permute.xlu0 %5819  ;;  %v5359_v5 = vpop.permute.xlu1 %5358  ;;  %8617 = vmatpush3.bf16.msra.mxu0 %v8859_v52  ;;  %v5419_v48 = vsel %vm2258_vm7, %v5418_v14, %v5414_v46  ;;  %v8861_v52 = vld [vmem:[#allocation6 + $0xe8] sm:$0xff]  }
 0x852   : > { %v5423_v34 = vrot.slane %v5359_v5, %v11157_v30  ;;  %7227 = vperm.xlu0 %8758, %v16571_v38   ;;  %6322 = vperm.xlu1 %8759, %v6289_v45   ;;  %v16575_v38 = vld [vmem:[#allocation59_spill] sm:$0xff] }
 0x853   : > { %8618 = vmatprep.subr.bf16.mxu0 %v16385_v28 }
 0x854   : > { %v5424_v37 = vsel %vm2265_vm8, %v5423_v34, %v5419_v48 }
 0x855   : > { %v14013_v42 = vpop.permute.xlu0 %5825  ;;  %v5365_v44 = vpop.permute.xlu1 %5364  ;;  %8619 = vmatpush3.bf16.msra.mxu0 %v8860_v59  ;;  %v5429_v46 = vsel %vm16573_vm0, %v5428_v23, %v5424_v37  ;;  %v8862_v59 = vld [vmem:[#allocation6 + $0xf0] sm:$0xff]   ;;  %vm16583_vm0 = vcmask 458112  }
 0x856   : > { %v5433_v16 = vrot.slane %v5365_v44, %v11169_v25  ;;  %7233 = vperm.xlu0 %8758, %v16572_v2   ;;  %6328 = vperm.xlu1 %8759, %v6291_v4   ;;  %v8863_v44 = vld [vmem:[#allocation6 + $0xf8] sm:$0xff]   ;;  %v5458_v2 = vrot.slane %v13837_v43, %v16213_v63 }
 0x857   : > { %8620 = vmatprep.subr.bf16.mxu0 %v16385_v28 }
 0x858   : > { %v5434_v45 = vsel %vm16574_vm11, %v5433_v16, %v5429_v46  ;;  %v16577_v16 = vld [vmem:[#allocation81_spill] sm:$0xff]  ;;  %vm16586_vm11 = vcmask 654912  }
 0x859   : > { %v14023_v14 = vpop.permute.xlu0 %5831  ;;  %v5371_v5 = vpop.permute.xlu1 %5370  ;;  %8621 = vmatpush3.bf16.msra.mxu0 %v8861_v52  ;;  %v5439_v48 = vsel %vm16576_vm5, %v5438_v8, %v5434_v45  ;;  %vm16587_vm5 = vcmask 720512  }
 0x85a   : > { %v5443_v34 = vrot.slane %v5371_v5, %v11199_v55  ;;  %7239 = vperm.xlu0 %8758, %v16575_v38   ;;  %6334 = vperm.xlu1 %8759, %v6293_v11   ;;  %v8864_v5 = vld [vmem:[#allocation6 + $0x100] sm:$0xff]   ;;  %v6524_v38 = vunpack.c.l.b16 %v13851_v57 }
 0x85b   : > { %8622 = vmatprep.subr.bf16.mxu0 %v16385_v28 }
 0x85c   : > { %v5444_v37 = vsel %vm2293_vm12, %v5443_v34, %v5439_v48 }
 0x85d   : > { %v14033_v4 = vpop.permute.xlu0 %5837  ;;  %v5377_v23 = vpop.permute.xlu1 %5376  ;;  %8623 = vmatpush3.bf16.msra.mxu0 %v8862_v59  ;;  %v5449_v46 = vsel %vm2300_vm13, %v5448_v60, %v5444_v37  ;;  %v16578_v59 = vld [vmem:[#allocation99_spill] sm:$0xff] }
 0x85e   : > { %v5453_v52 = vrot.slane %v5377_v23, %v16204_v54  ;;  %7245 = vperm.xlu0 %8758, %v16577_v16   ;;  %6340 = vperm.xlu1 %8759, %v6295_v19   ;;  %v8865_v19 = vld [vmem:[#allocation6 + $0x108] sm:$0xff]   ;;  %v16579_v23 = vld [vmem:[#allocation222_spill] sm:$0xff] }
 0x85f   : > { %8624 = vmatprep.subr.bf16.mxu0 %v16385_v28 }
 0x860   : > { %v5454_v29 = vsel %vm2307_vm14, %v5453_v52, %v5449_v46  ;;  %v5639_v52 = vrot.slane %v13881_v33, %v11118_v35  ;;  %v8866_v46 = vld [vmem:[#allocation6 + $0x110] sm:$0xff]   ;;  %v5649_v33 = vrot.slane %v13903_v18, %v11150_v24  ;;  %v5659_v18 = vrot.slane %v13925_v47, %v11160_v21 }
 0x861   : > { %v14043_v45 = vpop.permute.xlu0 %5843  ;;  %v5576_v11 = vpop.permute.xlu1 %5575  ;;  %v5459_v8 = vsel %vm2314_vm15, %v5458_v2, %v5454_v29  ;;  %8625 = vmatpush3.bf16.msra.mxu0 %v8863_v44  ;;  %v5669_v47 = vrot.slane %v13947_v32, %v11188_v15  ;;  %v5679_v32 = vrot.slane %v13968_v0, %v11218_v22  ;;  %v5689_v0 = vrot.slane %v13984_v26, %v11231_v53 }
 0x862   : > { %7251 = vperm.xlu0 %8758, %v16578_v59   ;;  %6539 = vperm.xlu1 %8759, %v6522_v51   ;;  %v5460_v34 = vpack.c.b16 %v5459_v8, %v5459_v8  ;;  %v5625_v43 = vrot.slane %v5576_v11, %v11108_v27  ;;  %v16580_v51 = vld [vmem:[#allocation96_spill] sm:$0xff] }
 0x863   : > { %8650 = vmatprep.subr.bf16.mxu0 %v16385_v28 }
 0x864   : > { %8607 = vmatmul.mubr.bf16.vlgmr.msra.gmra.mrb[8].mxu1 %v5460_v34  ;;  %v5630_v44 = vsel %vm2216_vm1, %v5629_v40, %v5625_v43  ;;  %v8867_v34 = vld [vmem:[#allocation6 + $0x118] sm:$0xff]  }
 0x865   : > { %v14052_v48 = vpop.permute.xlu0 %5849  ;;  %v5582_v37 = vpop.permute.xlu1 %5581  ;;  %8631 = vmatpush3.bf16.msra.mxu1 %v8864_v5  ;;  %8646 = vmatprep.mubr.msk.bf16.mxu1 %vm9466_vm9, %v16385_v28 }
 0x866   : > { %v5634_v60 = vrot.slane %v5582_v37, %v11115_v7  ;;  %7257 = vperm.xlu0 %8758, %v16579_v23   ;;  %6545 = vperm.xlu1 %8759, %v6524_v38   ;;  %v16581_v38 = vld [vmem:[#allocation128_spill] sm:$0xff]  ;;  %v8868_v23 = vld [vmem:[#allocation6 + $0x120] sm:$0xff]  }
 0x867   : > { %8632 = vmatprep.subr.bf16.mxu1 %v16385_v28 }
 0x868   : > { %v5635_v57 = vsel %vm2223_vm2, %v5634_v60, %v5630_v44 }
 0x869   : > { %v14064_v16 = vpop.permute.xlu0 %5855  ;;  %v5588_v2 = vpop.permute.xlu1 %5587  ;;  %8633 = vmatpush3.bf16.msra.mxu1 %v8865_v19  ;;  %v5640_v11 = vsel %vm2230_vm3, %v5639_v52, %v5635_v57  ;;  %v16584_v57 = vld [vmem:[#allocation220_spill] sm:$0xff] }
 0x86a   : > { %v5644_v29 = vrot.slane %v5588_v2, %v11122_v1  ;;  %7263 = vperm.xlu0 %8758, %v16580_v51   ;;  %6551 = vperm.xlu1 %8759, %v6526_v6  }
 0x86b   : > { %8634 = vmatprep.subr.bf16.mxu1 %v16385_v28 }
 0x86c   : > { %v5645_v8 = vsel %vm2237_vm4, %v5644_v29, %v5640_v11  ;;  %v8869_v29 = vld [vmem:[#allocation6 + $0x128] sm:$0xff]  }
 0x86d   : > { %v14074_v5 = vpop.permute.xlu0 %5861  ;;  %v5594_v59 = vpop.permute.xlu1 %5593  ;;  %8635 = vmatpush3.bf16.msra.mxu1 %v8866_v46  ;;  %v5650_v40 = vsel %vm16582_vm10, %v5649_v33, %v5645_v8  ;;  %v16585_v11 = vld [vmem:[#allocation60_spill] sm:$0xff]  ;;  %vm16589_vm10 = vcmask 786112  }
 0x86e   : > { %v5654_v43 = vrot.slane %v5594_v59, %v11145_v3  ;;  %7269 = vperm.xlu0 %8758, %v16581_v38   ;;  %6557 = vperm.xlu1 %8759, %v6528_v41   ;;  %v16588_v38 = vld [vmem:[#allocation47_spill] sm:$0xff] }
 0x86f   : > { %8636 = vmatprep.subr.bf16.mxu1 %v16385_v28 }
 0x870   : > { %v5655_v37 = vsel %vm16583_vm0, %v5654_v43, %v5650_v40  ;;  %vm16599_vm0 = vcmask 392512  }
 0x871   : > { %v14084_v19 = vpop.permute.xlu0 %6060  ;;  %v5600_v60 = vpop.permute.xlu1 %5599  ;;  %8637 = vmatpush3.bf16.msra.mxu1 %v8867_v34  ;;  %v5660_v6 = vsel %vm2258_vm7, %v5659_v18, %v5655_v37  ;;  %v8870_v34 = vld [vmem:[#allocation6 + $0x130] sm:$0xff]  }
 0x872   : > { %v5664_v44 = vrot.slane %v5600_v60, %v11157_v30  ;;  %7275 = vperm.xlu0 %8758, %v16584_v57   ;;  %6563 = vperm.xlu1 %8759, %v6530_v36   ;;  %v8871_v60 = vld [vmem:[#allocation6 + $0x138] sm:$0xff]   ;;  %v5699_v57 = vrot.slane %v13994_v62, %v16213_v63 }
 0x873   : > { %8638 = vmatprep.subr.bf16.mxu1 %v16385_v28 }
 0x874   : > { %v5665_v52 = vsel %vm2265_vm8, %v5664_v44, %v5660_v6  ;;  %v16590_v44 = vld [vmem:[#allocation160_spill] sm:$0xff] }
 0x875   : > { %v14094_v2 = vpop.permute.xlu0 %6066  ;;  %v5606_v46 = vpop.permute.xlu1 %5605  ;;  %8639 = vmatpush3.bf16.msra.mxu1 %v8868_v23  ;;  %v5670_v8 = vsel %vm16586_vm11, %v5669_v47, %v5665_v52  ;;  %v8872_v47 = vld [vmem:[#allocation6 + $0x140] sm:$0xff]   ;;  %vm16600_vm11 = vcmask 458112  }
 0x876   : > { %v5674_v51 = vrot.slane %v5606_v46, %v11169_v25  ;;  %7281 = vperm.xlu0 %8758, %v16585_v11   ;;  %6569 = vperm.xlu1 %8759, %v6532_v31   ;;  %v16591_v46 = vld [vmem:[#allocation48_spill] sm:$0xff]  ;;  %v5870_v11 = vrot.slane %v14003_v61, %v11104_v20 }
 0x877   : > { %8640 = vmatprep.subr.bf16.mxu1 %v16385_v28 }
 0x878   : > { %v5675_v41 = vsel %vm16587_vm5, %v5674_v51, %v5670_v8  ;;  %vm16605_vm5 = vcmask 654912  }
 0x879   : > { %v14104_v33 = vpop.permute.xlu0 %6072  ;;  %v5612_v59 = vpop.permute.xlu1 %5611  ;;  %8641 = vmatpush3.bf16.msra.mxu1 %v8869_v29  ;;  %v5680_v40 = vsel %vm16589_vm10, %v5679_v32, %v5675_v41  ;;  %v16592_v29 = vld [vmem:[#allocation53_spill] sm:$0xff]  ;;  %vm16606_vm10 = vcmask 720512  }
 0x87a   : > { %v5684_v43 = vrot.slane %v5612_v59, %v11199_v55  ;;  %7287 = vperm.xlu0 %8758, %v16588_v38   ;;  %6575 = vperm.xlu1 %8759, %v6534_v50   ;;  %v8873_v50 = vld [vmem:[#allocation6 + $0x148] sm:$0xff]   ;;  %v16593_v59 = vld [vmem:[#allocation85_spill] sm:$0xff]  ;;  %v5880_v38 = vrot.slane %v14013_v42, %v11118_v35  ;;  %v5890_v42 = vrot.slane %v14023_v14, %v11150_v24 }
 0x87b   : > { %8642 = vmatprep.subr.bf16.mxu1 %v16385_v28  ;;  %v5900_v14 = vrot.slane %v14033_v4, %v11160_v21  ;;  %v5910_v4 = vrot.slane %v14043_v45, %v11188_v15  ;;  %v5920_v45 = vrot.slane %v14052_v48, %v11218_v22  ;;  %v5930_v48 = vrot.slane %v14064_v16, %v11231_v53 }
 0x87c   : > { %v5685_v37 = vsel %vm2293_vm12, %v5684_v43, %v5680_v40 }
 0x87d   : > { %v14114_v36 = vpop.permute.xlu0 %6078  ;;  %v5618_v18 = vpop.permute.xlu1 %5617  ;;  %8643 = vmatpush3.bf16.msra.mxu1 %v8870_v34  ;;  %v5690_v6 = vsel %vm2300_vm13, %v5689_v0, %v5685_v37  ;;  %v16594_v34 = vld [vmem:[#allocation140_spill] sm:$0xff] }
 0x87e   : > { %v5694_v23 = vrot.slane %v5618_v18, %v16204_v54  ;;  %7293 = vperm.xlu0 %8758, %v16590_v44   ;;  %6581 = vperm.xlu1 %8759, %v6536_v13   ;;  %v8874_v13 = vld [vmem:[#allocation6 + $0x150] sm:$0xff]   ;;  %v16595_v18 = vld [vmem:[#allocation90_spill] sm:$0xff] }
 0x87f   : > { %8644 = vmatprep.subr.bf16.mxu1 %v16385_v28 }
 0x880   : > { %v5695_v9 = vsel %vm2307_vm14, %v5694_v23, %v5690_v6 }
 0x881   : > { %v14123_v26 = vpop.permute.xlu0 %6084  ;;  %v5817_v52 = vpop.permute.xlu1 %5816  ;;  %v5700_v31 = vsel %vm2314_vm15, %v5699_v57, %v5695_v9  ;;  %8645 = vmatpush3.bf16.msra.mxu1 %v8871_v60  ;;  %v16596_v60 = vld [vmem:[#allocation42_spill] sm:$0xff] }
 0x882   : > { %7299 = vperm.xlu0 %8758, %v16591_v46   ;;  %7224 = vperm.xlu1 %8759, %v16592_v29   ;;  %v5701_v51 = vpack.c.b16 %v5700_v31, %v5700_v31  ;;  %v5866_v62 = vrot.slane %v5817_v52, %v11108_v27  ;;  %v8875_v9 = vld [vmem:[#allocation6 + $0x158] sm:$0xff]  }
 0x883   : > { %8670 = vmatprep.subr.bf16.mxu1 %v16385_v28  ;;  %v16597_v31 = vld [vmem:[#allocation94_spill] sm:$0xff] }
 0x884   : > { %8627 = vmatmul.mubr.bf16.vlgmr.msra.gmra.mrb[12].mxu0 %v5701_v51  ;;  %v5871_v43 = vsel %vm2216_vm1, %v5870_v11, %v5866_v62  ;;  %v8876_v11 = vld [vmem:[#allocation6 + $0x160] sm:$0xff]  }
 0x885   : > { %v14132_v8 = vpop.permute.xlu0 %6090  ;;  %v5823_v41 = vpop.permute.xlu1 %5822  ;;  %8651 = vmatpush3.bf16.msra.mxu0 %v8872_v47  ;;  %8666 = vmatprep.mubr.msk.bf16.mxu0 %vm9466_vm9, %v16385_v28  ;;  %v16598_v47 = vld [vmem:[#allocation93_spill] sm:$0xff] }
 0x886   : > { %v5875_v32 = vrot.slane %v5823_v41, %v11115_v7  ;;  %7305 = vperm.xlu0 %8758, %v16593_v59   ;;  %7230 = vperm.xlu1 %8759, %v16594_v34  }
 0x887   : > { %8652 = vmatprep.subr.bf16.mxu0 %v16385_v28 }
 0x888   : > { %v5876_v61 = vsel %vm2223_vm2, %v5875_v32, %v5871_v43  ;;  %v16602_v32 = vld [vmem:[#allocation159_spill] sm:$0xff] }
 0x889   : > { %v14144_v40 = vpop.permute.xlu0 %6096  ;;  %v5829_v37 = vpop.permute.xlu1 %5828  ;;  %8653 = vmatpush3.bf16.msra.mxu0 %v8873_v50  ;;  %v5881_v23 = vsel %vm2230_vm3, %v5880_v38, %v5876_v61  ;;  %v16601_v50 = vld [vmem:[#allocation105_spill] sm:$0xff]  ;;  %v8877_v38 = vld [vmem:[#allocation6 + $0x168] sm:$0xff]  }
 0x88a   : > { %v5885_v0 = vrot.slane %v5829_v37, %v11122_v1  ;;  %7311 = vperm.xlu0 %8758, %v16595_v18   ;;  %7236 = vperm.xlu1 %8759, %v16596_v60  }
 0x88b   : > { %8654 = vmatprep.subr.bf16.mxu0 %v16385_v28 }
 0x88c   : > { %v5886_v44 = vsel %vm2237_vm4, %v5885_v0, %v5881_v23  ;;  %v16604_v0 = vld [vmem:[#allocation70_spill] sm:$0xff] }
 0x88d   : > { %v14154_v57 = vpop.permute.xlu0 %6102  ;;  %v5835_v6 = vpop.permute.xlu1 %5834  ;;  %8655 = vmatpush3.bf16.msra.mxu0 %v8874_v13  ;;  %v5891_v46 = vsel %vm16599_vm0, %v5890_v42, %v5886_v44  ;;  %v16603_v13 = vld [vmem:[#allocation221_spill] sm:$0xff]  ;;  %vm16609_vm0 = vcmask 786112  }
 0x88e   : > { %v5895_v52 = vrot.slane %v5835_v6, %v11145_v3  ;;  %7317 = vperm.xlu0 %8758, %v16597_v31   ;;  %7242 = vperm.xlu1 %8759, %v16598_v47   ;;  %v8878_v42 = vld [vmem:[#allocation6 + $0x170] sm:$0xff]  }
 0x88f   : > { %8656 = vmatprep.subr.bf16.mxu0 %v16385_v28 }
 0x890   : > { %v5896_v29 = vsel %vm16600_vm11, %v5895_v52, %v5891_v46  ;;  %v16608_v52 = vld [vmem:[#allocation76_spill] sm:$0xff]  ;;  %vm16620_vm11 = vcmask 392512  }
 0x891   : > { %v14164_v51 = vpop.permute.xlu0 %6301  ;;  %v5841_v62 = vpop.permute.xlu1 %5840  ;;  %8657 = vmatpush3.bf16.msra.mxu0 %v8875_v9  ;;  %v5901_v59 = vsel %vm2258_vm7, %v5900_v14, %v5896_v29  ;;  %v16607_v9 = vld [vmem:[#allocation109_spill] sm:$0xff]  ;;  %v8879_v14 = vld [vmem:[#allocation6 + $0x178] sm:$0xff]  }
 0x892   : > { %v5905_v41 = vrot.slane %v5841_v62, %v11157_v30  ;;  %7323 = vperm.xlu0 %8758, %v16601_v50   ;;  %7248 = vperm.xlu1 %8759, %v16602_v32   ;;  %v5940_v50 = vrot.slane %v14074_v5, %v16213_v63 }
 0x893   : > { %8658 = vmatprep.subr.bf16.mxu0 %v16385_v28 }
 0x894   : > { %v5906_v34 = vsel %vm2265_vm8, %v5905_v41, %v5901_v59  ;;  %v16611_v41 = vld [vmem:[#allocation87_spill] sm:$0xff] }
 0x895   : > { %v14174_v43 = vpop.permute.xlu0 %6307  ;;  %v5847_v61 = vpop.permute.xlu1 %5846  ;;  %8659 = vmatpush3.bf16.msra.mxu0 %v8876_v11  ;;  %v5911_v18 = vsel %vm16605_vm5, %v5910_v4, %v5906_v34  ;;  %v16610_v11 = vld [vmem:[#allocation100_spill] sm:$0xff]  ;;  %vm16621_vm5 = vcmask 458112  }
 0x896   : > { %v5915_v37 = vrot.slane %v5847_v61, %v11169_v25  ;;  %7329 = vperm.xlu0 %8758, %v16603_v13   ;;  %7254 = vperm.xlu1 %8759, %v16604_v0   ;;  %v8880_v61 = vld [vmem:[#allocation6 + $0x180] sm:$0xff]   ;;  %v6111_v0 = vrot.slane %v14084_v19, %v11104_v20 }
 0x897   : > { %8660 = vmatprep.subr.bf16.mxu0 %v16385_v28 }
 0x898   : > { %v5916_v60 = vsel %vm16606_vm10, %v5915_v37, %v5911_v18  ;;  %v16613_v37 = vld [vmem:[#allocation61_spill] sm:$0xff]  ;;  %vm16626_vm10 = vcmask 654912  }
 0x899   : > { %v14184_v23 = vpop.permute.xlu0 %6313  ;;  %v5853_v44 = vpop.permute.xlu1 %5852  ;;  %8661 = vmatpush3.bf16.msra.mxu0 %v8877_v38  ;;  %v5921_v31 = vsel %vm16609_vm0, %v5920_v45, %v5916_v60  ;;  %v16612_v38 = vld [vmem:[#allocation86_spill] sm:$0xff]  ;;  %v8881_v45 = vld [vmem:[#allocation6 + $0x188] sm:$0xff]   ;;  %vm16627_vm0 = vcmask 720512  }
 0x89a   : > { %v5925_v6 = vrot.slane %v5853_v44, %v11199_v55  ;;  %7335 = vperm.xlu0 %8758, %v16607_v9   ;;  %7260 = vperm.xlu1 %8759, %v16608_v52   ;;  %v6121_v52 = vrot.slane %v14094_v2, %v11118_v35  ;;  %v6131_v2 = vrot.slane %v14104_v33, %v11150_v24 }
 0x89b   : > { %8662 = vmatprep.subr.bf16.mxu0 %v16385_v28  ;;  %v6141_v33 = vrot.slane %v14114_v36, %v11160_v21  ;;  %v6151_v36 = vrot.slane %v14123_v26, %v11188_v15  ;;  %v6161_v26 = vrot.slane %v14132_v8, %v11218_v22  ;;  %v6171_v8 = vrot.slane %v14144_v40, %v11231_v53 }
 0x89c   : > { %v5926_v47 = vsel %vm2293_vm12, %v5925_v6, %v5921_v31  ;;  %v16615_v6 = vld [vmem:[#allocation149_spill] sm:$0xff] }
 0x89d   : > { %v14194_v46 = vpop.permute.xlu0 %6319  ;;  %v5859_v29 = vpop.permute.xlu1 %5858  ;;  %8663 = vmatpush3.bf16.msra.mxu0 %v8878_v42  ;;  %v5931_v32 = vsel %vm2300_vm13, %v5930_v48, %v5926_v47  ;;  %v16614_v42 = vld [vmem:[#allocation104_spill] sm:$0xff]  ;;  %v8882_v48 = vld [vmem:[#allocation6 + $0x190] sm:$0xff]  }
 0x89e   : > { %v5935_v62 = vrot.slane %v5859_v29, %v16204_v54  ;;  %7341 = vperm.xlu0 %8758, %v16610_v11   ;;  %7266 = vperm.xlu1 %8759, %v16611_v41  }
 0x89f   : > { %8664 = vmatprep.subr.bf16.mxu0 %v16385_v28 }
 0x8a0   : > { %v5936_v16 = vsel %vm2307_vm14, %v5935_v62, %v5931_v32  ;;  %v16617_v62 = vld [vmem:[#allocation146_spill] sm:$0xff] }
 0x8a1   : > { %v14204_v59 = vpop.permute.xlu0 %6325  ;;  %v6058_v34 = vpop.permute.xlu1 %6057  ;;  %v5941_v4 = vsel %vm2314_vm15, %v5940_v50, %v5936_v16  ;;  %8665 = vmatpush3.bf16.msra.mxu0 %v8879_v14  ;;  %v16616_v14 = vld [vmem:[#allocation92_spill] sm:$0xff]  ;;  %v8883_v16 = vld [vmem:[#allocation6 + $0x198] sm:$0xff]  }
 0x8a2   : > { %7347 = vperm.xlu0 %8758, %v16612_v38   ;;  %7272 = vperm.xlu1 %8759, %v16613_v37   ;;  %v5942_v13 = vpack.c.b16 %v5941_v4, %v5941_v4  ;;  %v6107_v5 = vrot.slane %v6058_v34, %v11108_v27  ;;  %v16618_v4 = vld [vmem:[#allocation175_spill] sm:$0xff] }
 0x8a3   : > { %8690 = vmatprep.subr.bf16.mxu0 %v16385_v28 }
 0x8a4   : > { %8647 = vmatmul.mubr.bf16.vlgmr.msra.gmra.mrb[12].mxu1 %v5942_v13  ;;  %v6112_v9 = vsel %vm2216_vm1, %v6111_v0, %v6107_v5  ;;  %v8884_v0 = vld [vmem:[#allocation6 + $0x1a0] sm:$0xff]  }
 0x8a5   : > { %v14213_v18 = vpop.permute.xlu0 %6331  ;;  %v6064_v60 = vpop.permute.xlu1 %6063  ;;  %8671 = vmatpush3.bf16.msra.mxu1 %v8880_v61  ;;  %8686 = vmatprep.mubr.msk.bf16.mxu1 %vm9466_vm9, %v16385_v28  ;;  %v16619_v61 = vld [vmem:[#allocation156_spill] sm:$0xff] }
 0x8a6   : > { %v6116_v44 = vrot.slane %v6064_v60, %v11115_v7  ;;  %7353 = vperm.xlu0 %8758, %v16614_v42   ;;  %7278 = vperm.xlu1 %8759, %v16615_v6  }
 0x8a7   : > { %8672 = vmatprep.subr.bf16.mxu1 %v16385_v28 }
 0x8a8   : > { %v6117_v19 = vsel %vm2223_vm2, %v6116_v44, %v6112_v9  ;;  %v16623_v44 = vld [vmem:[#allocation75_spill] sm:$0xff] }
 0x8a9   : > { %v14225_v31 = vpop.permute.xlu0 %6337  ;;  %v6070_v47 = vpop.permute.xlu1 %6069  ;;  %8673 = vmatpush3.bf16.msra.mxu1 %v8881_v45  ;;  %v6122_v11 = vsel %vm2230_vm3, %v6121_v52, %v6117_v19  ;;  %v16622_v45 = vld [vmem:[#allocation229_spill] sm:$0xff]  ;;  %v8885_v52 = vld [vmem:[#allocation6 + $0x1a8] sm:$0xff]  }
 0x8aa   : > { %v6126_v29 = vrot.slane %v6070_v47, %v11122_v1  ;;  %7359 = vperm.xlu0 %8758, %v16616_v14   ;;  %7284 = vperm.xlu1 %8759, %v16617_v62  }
 0x8ab   : > { %8674 = vmatprep.subr.bf16.mxu1 %v16385_v28 }
 0x8ac   : > { %v6127_v41 = vsel %vm2237_vm4, %v6126_v29, %v6122_v11  ;;  %v16625_v29 = vld [vmem:[#allocation83_spill] sm:$0xff] }
 0x8ad   : > { %v14235_v50 = vpop.permute.xlu0 %6343  ;;  %v6076_v32 = vpop.permute.xlu1 %6075  ;;  %8675 = vmatpush3.bf16.msra.mxu1 %v8882_v48  ;;  %v6132_v38 = vsel %vm16620_vm11, %v6131_v2, %v6127_v41  ;;  %v16624_v48 = vld [vmem:[#allocation228_spill] sm:$0xff]  ;;  %v8886_v2 = vld [vmem:[#allocation6 + $0x1b0] sm:$0xff]   ;;  %vm16630_vm11 = vcmask 786112  }
 0x8ae   : > { %v6136_v34 = vrot.slane %v6076_v32, %v11145_v3  ;;  %7365 = vperm.xlu0 %8758, %v16618_v4   ;;  %7290 = vperm.xlu1 %8759, %v16619_v61  }
 0x8af   : > { %8676 = vmatprep.subr.bf16.mxu1 %v16385_v28 }
 0x8b0   : > { %v6137_v37 = vsel %vm16621_vm5, %v6136_v34, %v6132_v38  ;;  %v16629_v34 = vld [vmem:[#allocation58_spill] sm:$0xff] }
 0x8b1   : > { %v14245_v13 = vpop.permute.xlu0 %6542  ;;  %v6082_v5 = vpop.permute.xlu1 %6081  ;;  %8677 = vmatpush3.bf16.msra.mxu1 %v8883_v16  ;;  %v6142_v42 = vsel %vm2258_vm7, %v6141_v33, %v6137_v37  ;;  %v16628_v16 = vld [vmem:[#allocation88_spill] sm:$0xff]  ;;  %v8887_v33 = vld [vmem:[#allocation6 + $0x1b8] sm:$0xff]  }
 0x8b2   : > { %v6146_v60 = vrot.slane %v6082_v5, %v11157_v30  ;;  %7371 = vperm.xlu0 %8758, %v16622_v45   ;;  %7296 = vperm.xlu1 %8759, %v16623_v44   ;;  %v6181_v45 = vrot.slane %v14154_v57, %v16213_v63 }
 0x8b3   : > { %8678 = vmatprep.subr.bf16.mxu1 %v16385_v28 }
 0x8b4   : > { %v6147_v6 = vsel %vm2265_vm8, %v6146_v60, %v6142_v42  ;;  %v16632_v60 = vld [vmem:[#allocation91_spill] sm:$0xff] }
 0x8b5   : > { %v14255_v9 = vpop.permute.xlu0 %6548  ;;  %v6088_v19 = vpop.permute.xlu1 %6087  ;;  %8679 = vmatpush3.bf16.msra.mxu1 %v8884_v0  ;;  %v6152_v14 = vsel %vm16626_vm10, %v6151_v36, %v6147_v6  ;;  %v16631_v0 = vld [vmem:[#allocation176_spill] sm:$0xff] }
 0x8b6   : > { %v6156_v47 = vrot.slane %v6088_v19, %v11169_v25  ;;  %7377 = vperm.xlu0 %8758, %v16624_v48   ;;  %7302 = vperm.xlu1 %8759, %v16625_v29   ;;  %v8888_v19 = vld [vmem:[#allocation6 + $0x1c0] sm:$0xff]   ;;  %v6352_v29 = vrot.slane %v14164_v51, %v11104_v20 }
 0x8b7   : > { %8680 = vmatprep.subr.bf16.mxu1 %v16385_v28 }
 0x8b8   : > { %v6157_v62 = vsel %vm16627_vm0, %v6156_v47, %v6152_v14  ;;  %v16634_v47 = vld [vmem:[#allocation97_spill] sm:$0xff] }
 0x8b9   : > { %v14265_v11 = vpop.permute.xlu0 %6554  ;;  %v6094_v41 = vpop.permute.xlu1 %6093  ;;  %8681 = vmatpush3.bf16.msra.mxu1 %v8885_v52  ;;  %v6162_v4 = vsel %vm16630_vm11, %v6161_v26, %v6157_v62  ;;  %v16633_v52 = vld [vmem:[#allocation180_spill] sm:$0xff] }
 0x8ba   : > { %v6166_v32 = vrot.slane %v6094_v41, %v11199_v55  ;;  %7383 = vperm.xlu0 %8758, %v16628_v16   ;;  %7308 = vperm.xlu1 %8759, %v16629_v34   ;;  %v8889_v26 = vld [vmem:[#allocation6 + $0x1c8] sm:$0xff]   ;;  %v6362_v34 = vrot.slane %v14174_v43, %v11118_v35  ;;  %v6372_v43 = vrot.slane %v14184_v23, %v11150_v24 }
 0x8bb   : > { %8682 = vmatprep.subr.bf16.mxu1 %v16385_v28  ;;  %v6382_v23 = vrot.slane %v14194_v46, %v11160_v21  ;;  %v6392_v46 = vrot.slane %v14204_v59, %v11188_v15  ;;  %v6402_v59 = vrot.slane %v14213_v18, %v11218_v22  ;;  %v6412_v18 = vrot.slane %v14225_v31, %v11231_v53 }
 0x8bc   : > { %v6167_v61 = vsel %vm2293_vm12, %v6166_v32, %v6162_v4  ;;  %v16636_v32 = vld [vmem:[#allocation106_spill] sm:$0xff] }
 0x8bd   : > { %v14275_v38 = vpop.permute.xlu0 %6560  ;;  %v6100_v37 = vpop.permute.xlu1 %6099  ;;  %8683 = vmatpush3.bf16.msra.mxu1 %v8886_v2  ;;  %v6172_v44 = vsel %vm2300_vm13, %v6171_v8, %v6167_v61  ;;  %v16635_v2 = vld [vmem:[#allocation219_spill] sm:$0xff]  ;;  %v8890_v8 = vld [vmem:[#allocation6 + $0x1d0] sm:$0xff]  }
 0x8be   : > { %v6176_v5 = vrot.slane %v6100_v37, %v16204_v54  ;;  %7389 = vperm.xlu0 %8758, %v16631_v0   ;;  %7314 = vperm.xlu1 %8759, %v16632_v60  }
 0x8bf   : > { %8684 = vmatprep.subr.bf16.mxu1 %v16385_v28 }
 0x8c0   : > { %v6177_v40 = vsel %vm2307_vm14, %v6176_v5, %v6172_v44  ;;  %v16638_v5 = vld [vmem:[#allocation84_spill] sm:$0xff] }
 0x8c1   : > { %v14285_v42 = vpop.permute.xlu0 %6566  ;;  %v6299_v6 = vpop.permute.xlu1 %6298  ;;  %v6182_v36 = vsel %vm2314_vm15, %v6181_v45, %v6177_v40  ;;  %8685 = vmatpush3.bf16.msra.mxu1 %v8887_v33  ;;  %v16637_v33 = vld [vmem:[#allocation35_spill] sm:$0xff]  ;;  %v8891_v40 = vld [vmem:[#allocation6 + $0x1d8] sm:$0xff]  }
 0x8c2   : > { %7395 = vperm.xlu0 %8758, %v16633_v52   ;;  %7320 = vperm.xlu1 %8759, %v16634_v47   ;;  %v6183_v48 = vpack.c.b16 %v6182_v36, %v6182_v36  ;;  %v6348_v57 = vrot.slane %v6299_v6, %v11108_v27  ;;  %v16639_v36 = vld [vmem:[#allocation163_spill] sm:$0xff] }
 0x8c4   : > { %8667 = vmatmul.mubr.bf16.vlgmr.msra.gmra.mrb[16].mxu0 %v6183_v48  ;;  %v6353_v16 = vsel %vm2216_vm1, %v6352_v29, %v6348_v57  ;;  %v8892_v29 = vld [vmem:[#allocation6 + $0x1e0] sm:$0xff]  }
 0x8c5   : > { %v14293_v14 = vpop.permute.xlu0 %6572  ;;  %v6305_v62 = vpop.permute.xlu1 %6304  ;;  %8691 = vmatpush3.bf16.msra.mxu0 %v8888_v19  ;;  %8706 = vmatprep.mubr.msk.bf16.mxu0 %vm9466_vm9, %v16385_v28  ;;  %v16640_v19 = vld [vmem:[#allocation223_spill] sm:$0xff]  ;;  %vm16641_vm9 = vcmask 392512  }
 0x8c6   : > { %v6357_v41 = vrot.slane %v6305_v62, %v11115_v7  ;;  %7401 = vperm.xlu0 %8758, %v16635_v2   ;;  %7326 = vperm.xlu1 %8759, %v16636_v32  }
 0x8c7   : > { %8692 = vmatprep.subr.bf16.mxu0 %v16385_v28 }
 0x8c8   : > { %v6358_v51 = vsel %vm2223_vm2, %v6357_v41, %v6353_v16  ;;  %v16643_v41 = vld [vmem:[#allocation224_spill] sm:$0xff] }
 0x8c9   : > { %v14305_v4 = vpop.permute.xlu0 %6578  ;;  %v6311_v61 = vpop.permute.xlu1 %6310  ;;  %8693 = vmatpush3.bf16.msra.mxu0 %v8889_v26  ;;  %v6363_v0 = vsel %vm2230_vm3, %v6362_v34, %v6358_v51  ;;  %v16642_v26 = vld [vmem:[#allocation169_spill] sm:$0xff]  ;;  %v8893_v34 = vld [vmem:[#allocation6 + $0x1e8] sm:$0xff]  }
 0x8ca   : > { %v6367_v37 = vrot.slane %v6311_v61, %v11122_v1  ;;  %7407 = vperm.xlu0 %8758, %v16637_v33   ;;  %7332 = vperm.xlu1 %8759, %v16638_v5  }
 0x8cb   : > { %8694 = vmatprep.subr.bf16.mxu0 %v16385_v28 }
 0x8cc   : > { %v6368_v60 = vsel %vm2237_vm4, %v6367_v37, %v6363_v0  ;;  %v16645_v37 = vld [vmem:[#allocation225_spill] sm:$0xff] }
 0x8cd   : > { %v14315_v45 = vpop.permute.xlu0 %6584  ;;  %v6317_v44 = vpop.permute.xlu1 %6316  ;;  %8695 = vmatpush3.bf16.msra.mxu0 %v8890_v8  ;;  %v6373_v52 = vsel %vm16641_vm9, %v6372_v43, %v6368_v60  ;;  %v16644_v8 = vld [vmem:[#allocation167_spill] sm:$0xff]  ;;  %v8894_v43 = vld [vmem:[#allocation6 + $0x1f0] sm:$0xff]  }
 0x8ce   : > { %v6377_v6 = vrot.slane %v6317_v44, %v11145_v3  ;;  %7413 = vperm.xlu0 %8758, %v16639_v36   ;;  %7338 = vperm.xlu1 %8759, %v16640_v19  }
 0x8cf   : > { %8696 = vmatprep.subr.bf16.mxu0 %v16385_v28 }
 0x8d0   : > { %v6378_v47 = vsel %vm16621_vm5, %v6377_v6, %v6373_v52  ;;  %v16647_v6 = vld [vmem:[#allocation226_spill] sm:$0xff] }
 0x8d1   : > { %v14325_v48 = vpop.permute.xlu0 %7227  ;;  %v6323_v57 = vpop.permute.xlu1 %6322  ;;  %8697 = vmatpush3.bf16.msra.mxu0 %v8891_v40  ;;  %v6383_v2 = vsel %vm2258_vm7, %v6382_v23, %v6378_v47  ;;  %v16646_v40 = vld [vmem:[#allocation171_spill] sm:$0xff]  ;;  %v8895_v23 = vld [vmem:[#allocation6 + $0x1f8] sm:$0xff]  }
 0x8d2   : > { %v6387_v62 = vrot.slane %v6323_v57, %v11157_v30  ;;  %7419 = vperm.xlu0 %8758, %v16642_v26   ;;  %7344 = vperm.xlu1 %8759, %v16643_v41   ;;  %v6422_v26 = vrot.slane %v14235_v50, %v16213_v63 }
 0x8d3   : > { %8698 = vmatprep.subr.bf16.mxu0 %v16385_v28 }
 0x8d4   : > { %v6388_v32 = vsel %vm2265_vm8, %v6387_v62, %v6383_v2  ;;  %v16649_v62 = vld [vmem:[#allocation227_spill] sm:$0xff] }
 0x8d5   : > { %v14335_v16 = vpop.permute.xlu0 %7233  ;;  %v6329_v51 = vpop.permute.xlu1 %6328  ;;  %8699 = vmatpush3.bf16.msra.mxu0 %v8892_v29  ;;  %v6393_v33 = vsel %vm16626_vm10, %v6392_v46, %v6388_v32  ;;  %v16648_v29 = vld [vmem:[#allocation166_spill] sm:$0xff] }
 0x8d6   : > { %v6397_v61 = vrot.slane %v6329_v51, %v11169_v25  ;;  %7425 = vperm.xlu0 %8758, %v16644_v8   ;;  %7350 = vperm.xlu1 %8759, %v16645_v37   ;;  %v16650_v51 = vld [vmem:[#allocation164_spill] sm:$0xff] }
 0x8d7   : > { %8700 = vmatprep.subr.bf16.mxu0 %v16385_v28 }
 0x8d8   : > { %v6398_v5 = vsel %vm16627_vm0, %v6397_v61, %v6393_v33  ;;  %v6593_v33 = vrot.slane %v14245_v13, %v11104_v20  ;;  %v16656_v13 = vld [vmem:[#allocation102_spill] sm:$0xff] }
 0x8d9   : > { %v14345_v0 = vpop.permute.xlu0 %7239  ;;  %v6335_v60 = vpop.permute.xlu1 %6334  ;;  %8701 = vmatpush3.bf16.msra.mxu0 %v8893_v34  ;;  %v6403_v36 = vsel %vm16630_vm11, %v6402_v59, %v6398_v5  ;;  %v16651_v34 = vld [vmem:[#allocation98_spill] sm:$0xff] }
 0x8da   : > { %v6407_v44 = vrot.slane %v6335_v60, %v11199_v55  ;;  %7431 = vperm.xlu0 %8758, %v16646_v40   ;;  %7356 = vperm.xlu1 %8759, %v16647_v6   ;;  %v16653_v59 = vld [vmem:[#allocation170_spill] sm:$0xff]  ;;  %v16654_v60 = vld [vmem:[#allocation177_spill] sm:$0xff] }
 0x8db   : > { %8702 = vmatprep.subr.bf16.mxu0 %v16385_v28 }
 0x8dc   : > { %v6408_v19 = vsel %vm2293_vm12, %v6407_v44, %v6403_v36  ;;  %v6603_v36 = vrot.slane %v14255_v9, %v11118_v35  ;;  %v16658_v9 = vld [vmem:[#allocation110_spill] sm:$0xff] }
 0x8dd   : > { %v14355_v52 = vpop.permute.xlu0 %7245  ;;  %v6341_v47 = vpop.permute.xlu1 %6340  ;;  %8703 = vmatpush3.bf16.msra.mxu0 %v8894_v43  ;;  %v6413_v41 = vsel %vm2300_vm13, %v6412_v18, %v6408_v19  ;;  %v16655_v18 = vld [vmem:[#allocation185_spill] sm:$0xff] }
 0x8de   : > { %v6417_v57 = vrot.slane %v6341_v47, %v16204_v54  ;;  %7437 = vperm.xlu0 %8758, %v16648_v29   ;;  %7362 = vperm.xlu1 %8759, %v16649_v62   ;;  %v6613_v62 = vrot.slane %v14265_v11, %v11150_v24  ;;  %v16660_v11 = vld [vmem:[#allocation78_spill] sm:$0xff] }
 0x8df   : > { %8704 = vmatprep.subr.bf16.mxu0 %v16385_v28  ;;  %v16652_v28 = vmov 0  }
 0x8e0   : > { %v6418_v31 = vsel %vm2307_vm14, %v6417_v57, %v6413_v41  ;;  %v16657_v41 = vld [vmem:[#allocation179_spill] sm:$0xff] }
 0x8e1   : > { %v14365_v2 = vpop.permute.xlu0 %7251  ;;  %v6540_v32 = vpop.permute.xlu1 %6539  ;;  %v6423_v46 = vsel %vm2314_vm15, %v6422_v26, %v6418_v31  ;;  %8705 = vmatpush3.bf16.msra.mxu0 %v8895_v23 }
 0x8e2   : > { %7443 = vperm.xlu0 %8758, %v16650_v51   ;;  %7368 = vperm.xlu1 %8759, %v16651_v34   ;;  %v6424_v61 = vpack.c.b16 %v6423_v46, %v6423_v46  ;;  %v6589_v8 = vrot.slane %v6540_v32, %v11108_v27  ;;  %v6623_v34 = vrot.slane %v14275_v38, %v11160_v21  ;;  %v16662_v38 = vld [vmem:[#allocation72_spill] sm:$0xff] }
 0x8e4   : > { %8687 = vmatmul.mubr.bf16.vlgmr.msra.gmra.mrb[16].mxu1 %v6424_v61  ;;  %v6594_v43 = vsel %vm2216_vm1, %v6593_v33, %v6589_v8  ;;  %v16659_v8 = vld [vmem:[#allocation187_spill] sm:$0xff] }
 0x8e5   : > { %v14371_v50 = vpop.permute.xlu0 %7257  ;;  %v6546_v37 = vpop.permute.xlu1 %6545  ;;  %7012 = vmatprep.mubr.bf16.mxu1 %v16652_v28 }
 0x8e6   : > { %v6598_v5 = vrot.slane %v6546_v37, %v11115_v7  ;;  %7449 = vperm.xlu0 %8758, %v16653_v59   ;;  %7374 = vperm.xlu1 %8759, %v16654_v60   ;;  %v6633_v60 = vrot.slane %v14285_v42, %v11188_v15  ;;  %v16663_v42 = vld [vmem:[#allocation172_spill] sm:$0xff] }
 0x8e8   : > { %v6599_v44 = vsel %vm2223_vm2, %v6598_v5, %v6594_v43 }
 0x8e9   : > { %v14381_v40 = vpop.permute.xlu0 %7263  ;;  %v6552_v6 = vpop.permute.xlu1 %6551  ;;  %v6604_v47 = vsel %vm2230_vm3, %v6603_v36, %v6599_v44  ;;  %v16661_v44 = vld [vmem:[#allocation178_spill] sm:$0xff] }
 0x8ea   : > { %v6608_v19 = vrot.slane %v6552_v6, %v11122_v1  ;;  %7455 = vperm.xlu0 %8758, %v16655_v18   ;;  %7380 = vperm.xlu1 %8759, %v16656_v13  }
 0x8ec   : > { %v6609_v23 = vsel %vm2237_vm4, %v6608_v19, %v6604_v47 }
 0x8ed   : > { %v14390_v57 = vpop.permute.xlu0 %7269  ;;  %v6558_v29 = vpop.permute.xlu1 %6557  ;;  %v6614_v31 = vsel %vm16641_vm9, %v6613_v62, %v6609_v23  ;;  %v6643_v23 = vrot.slane %v14293_v14, %v11218_v22  ;;  %v16666_v14 = vld [vmem:[#allocation182_spill] sm:$0xff]  ;;  %vm16679_vm9 = vcmask 1041409  }
 0x8ee   : > { %v6618_v26 = vrot.slane %v6558_v29, %v11145_v3  ;;  %7461 = vperm.xlu0 %8758, %v16657_v41   ;;  %7386 = vperm.xlu1 %8759, %v16658_v9  }
 0x8f0   : > { %v6619_v32 = vsel %vm16621_vm5, %v6618_v26, %v6614_v31  ;;  %v16664_v26 = vld [vmem:[#allocation230_spill] sm:$0xff]  ;;  %vm16687_vm5 = vcmask 392512  }
 0x8f1   : > { %v14399_v46 = vpop.permute.xlu0 %7275  ;;  %v6564_v51 = vpop.permute.xlu1 %6563  ;;  %v6624_v37 = vsel %vm2258_vm7, %v6623_v34, %v6619_v32 }
 0x8f2   : > { %v6628_v61 = vrot.slane %v6564_v51, %v11157_v30  ;;  %7467 = vperm.xlu0 %8758, %v16659_v8   ;;  %7392 = vperm.xlu1 %8759, %v16660_v11   ;;  %v6653_v51 = vrot.slane %v14305_v4, %v11231_v53  ;;  %v6663_v11 = vrot.slane %v14315_v45, %v16213_v63  ;;  %v16668_v4 = vld [vmem:[#allocation165_spill] sm:$0xff]  ;;  %v16669_v45 = vld [vmem:[#allocation174_spill] sm:$0xff] }
 0x8f4   : > { %v6629_v33 = vsel %vm2265_vm8, %v6628_v61, %v6624_v37  ;;  %v16665_v61 = vld [vmem:[#allocation203_spill] sm:$0xff] }
 0x8f5   : > { %v14408_v5 = vpop.permute.xlu0 %7281  ;;  %v6570_v59 = vpop.permute.xlu1 %6569  ;;  %v6634_v36 = vsel %vm16626_vm10, %v6633_v60, %v6629_v33  ;;  %vm16688_vm10 = vcmask 458112  }
 0x8f6   : > { %v6638_v43 = vrot.slane %v6570_v59, %v11169_v25  ;;  %7473 = vperm.xlu0 %8758, %v16661_v44   ;;  %7398 = vperm.xlu1 %8759, %v16662_v38  }
 0x8f7   : > { %v5062_v6 = vpop.f32.mrb[4].mxu1 }
 0x8f8   : > { %v8568_v19 = vpop.f32.mrb[5].mxu1  ;;  %v6639_v18 = vsel %vm16627_vm0, %v6638_v43, %v6634_v36  ;;  %v16667_v43 = vld [vmem:[#allocation188_spill] sm:$0xff]  ;;  %vm16693_vm0 = vcmask 654912  }
 0x8f9   : > { %v14417_v13 = vpop.permute.xlu0 %7287  ;;  %v5065_v47 = vpop.f32.mrb[6].mxu1  ;;  %v6644_v9 = vsel %vm16630_vm11, %v6643_v23, %v6639_v18  ;;  %v16670_v18 = vld [vmem:[#allocation193_spill] sm:$0xff]  ;;  %vm16694_vm11 = vcmask 720512  }
 0x8fa   : > { %v6576_v29 = vpop.permute.xlu1 %6575  ;;  %7479 = vperm.xlu0 %8758, %v16663_v42   ;;  %v8569_v62 = vpop.f32.mrb[7].mxu1  ;;  %7404 = vperm.xlu1 %8759, %v16664_v26   ;;  %v16672_v42 = vld [vmem:[#allocation207_spill] sm:$0xff] }
 0x8fb   : > { %v6648_v41 = vrot.slane %v6576_v29, %v11199_v55  ;;  %v16671_v29 = vld [vmem:[#allocation186_spill] sm:$0xff] }
 0x8fd   : > { %v6649_v31 = vsel %vm2293_vm12, %v6648_v41, %v6644_v9  ;;  %v14426_v32 = vpop.permute.xlu0 %7293  ;;  %v16673_v41 = vld [vmem:[#allocation201_spill] sm:$0xff]  ;;  %v16674_v9 = vld [vmem:[#allocation162_spill] sm:$0xff] }
 0x8fe   : > { %v6582_v34 = vpop.permute.xlu1 %6581  ;;  %7485 = vperm.xlu0 %8758, %v16665_v61   ;;  %7410 = vperm.xlu1 %8759, %v16666_v14   ;;  %v6654_v37 = vsel %vm2300_vm13, %v6653_v51, %v6649_v31 }
 0x8ff   : > { %v6658_v8 = vrot.slane %v6582_v34, %v16204_v54  ;;  %v16676_v34 = vld [vmem:[#allocation206_spill] sm:$0xff] }
 0x901   : > { %v6659_v33 = vsel %vm2307_vm14, %v6658_v8, %v6654_v37  ;;  %v14437_v59 = vpop.permute.xlu0 %7299  ;;  %v16677_v8 = vld [vmem:[#allocation216_spill] sm:$0xff] }
 0x902   : > { %v14439_v60 = vpop.permute.xlu1 %7224  ;;  %7491 = vperm.xlu0 %8758, %v16667_v43   ;;  %7416 = vperm.xlu1 %8759, %v16668_v4   ;;  %v6664_v44 = vsel %vm2314_vm15, %v6663_v11, %v6659_v33  ;;  %v16678_v11 = vld [vmem:[#allocation183_spill] sm:$0xff] }
 0x903   : > { %v6665_v38 = vpack.c.b16 %v6664_v44, %v6664_v44 }
 0x905   : > { %8707 = vmatmul.mubr.bf16.vlgmr.msra.gmra.mrb[20].mxu0 %v6665_v38  ;;  %v14444_v36 = vpop.permute.xlu0 %7305 }
 0x906   : > { %v14446_v19 = vpop.permute.xlu1 %7230  ;;  %7497 = vperm.xlu0 %8758, %v16669_v45   ;;  %7422 = vperm.xlu1 %8759, %v16670_v18  }
 0x907   : > { %7053 = vmatprep.mubr.bf16.mxu0 %v16652_v28  ;;  %v16675_v28 = vld [vmem:[#allocation181_spill] sm:$0xff] }
 0x909   : > { %v14451_v47 = vpop.permute.xlu0 %7311 }
 0x90a   : > { %v14453_v23 = vpop.permute.xlu1 %7236  ;;  %7503 = vperm.xlu0 %8758, %v16671_v29   ;;  %7428 = vperm.xlu1 %8759, %v16672_v42   ;;  %v16680_v29 = vld [vmem:[#allocation173_spill] sm:$0xff] }
 0x90d   : > { %v14457_v62 = vpop.permute.xlu0 %7317 }
 0x90e   : > { %v14459_v26 = vpop.permute.xlu1 %7242  ;;  %7509 = vperm.xlu0 %8758, %v16673_v41   ;;  %7434 = vperm.xlu1 %8759, %v16674_v9   ;;  %v16681_v9 = vld [vmem:[#allocation195_spill] sm:$0xff] }
 0x911   : > { %v14463_v31 = vpop.permute.xlu0 %7323 }
 0x912   : > { %v14465_v51 = vpop.permute.xlu1 %7248  ;;  %7515 = vperm.xlu0 %8758, %v16675_v28   ;;  %7440 = vperm.xlu1 %8759, %v16676_v34  }
 0x915   : > { %v14469_v61 = vpop.permute.xlu0 %7329 }
 0x916   : > { %v14471_v14 = vpop.permute.xlu1 %7254  ;;  %7521 = vperm.xlu0 %8758, %v16677_v8   ;;  %7446 = vperm.xlu1 %8759, %v16678_v11   ;;  %v7693_v11 = vrot.slane %v14399_v46, %v11104_v20  ;;  %v16684_v46 = vld [vmem:[#allocation197_spill] sm:$0xff] }
 0x917   : > { %v5303_v37 = vpop.f32.mrb[8].mxu0 }
 0x918   : > { %v6763_v33 = vrot.slane %v5303_v37, 7  ;;  %v8588_v43 = vpop.f32.mrb[9].mxu0 }
 0x919   : > { %v14475_v4 = vpop.permute.xlu0 %7335  ;;  %v5306_v44 = vpop.f32.mrb[10].mxu0 }
 0x91a   : > { %v6764_v38 = vsel %vm16679_vm9, %v6763_v33, %v5062_v6  ;;  %v14478_v45 = vpop.permute.xlu1 %7260  ;;  %7527 = vperm.xlu0 %8758, %v13672_v49   ;;  %v8589_v18 = vpop.f32.mrb[11].mxu0  ;;  %7452 = vperm.xlu1 %8759, %v16680_v29   ;;  %v16682_v6 = vld [vmem:[#allocation211_spill] sm:$0xff]  ;;  %vm16695_vm9 = vcmask 1042434  }
 0x91b   : > { %v7703_v18 = vrot.slane %v14408_v5, %v11118_v35  ;;  %v16686_v5 = vld [vmem:[#allocation196_spill] sm:$0xff] }
 0x91d   : > { %v14482_v42 = vpop.permute.xlu0 %7341 }
 0x91e   : > { %v14484_v41 = vpop.permute.xlu1 %7266  ;;  %7533 = vperm.xlu0 %8758, %v13696_v17   ;;  %7458 = vperm.xlu1 %8759, %v16681_v9   ;;  %v16683_v17 = vld [vmem:[#allocation189_spill] sm:$0xff] }
 0x921   : > { %v14488_v28 = vpop.permute.xlu0 %7347 }
 0x922   : > { %v7273_v34 = vpop.permute.xlu1 %7272  ;;  %7539 = vperm.xlu0 %8758, %v13711_v12   ;;  %7464 = vperm.xlu1 %8759, %v16682_v6  }
 0x923   : > { %v7689_v49 = vrot.slane %v7273_v34, %v11108_v27 }
 0x925   : > { %v14493_v8 = vpop.permute.xlu0 %7353  ;;  %v7694_v43 = vsel %vm2216_vm1, %v7693_v11, %v7689_v49  ;;  %v7713_v49 = vrot.slane %v14417_v13, %v11150_v24  ;;  %v16690_v13 = vld [vmem:[#allocation212_spill] sm:$0xff] }
 0x926   : > { %v7279_v37 = vpop.permute.xlu1 %7278  ;;  %7545 = vperm.xlu0 %8758, %v13741_v56   ;;  %7470 = vperm.xlu1 %8759, %v16683_v17  }
 0x927   : > { %v7698_v33 = vrot.slane %v7279_v37, %v11115_v7  ;;  %v16685_v37 = vld [vmem:[#allocation135_spill] sm:$0xff] }
 0x929   : > { %v7699_v12 = vsel %vm2223_vm2, %v7698_v33, %v7694_v43  ;;  %v14502_v44 = vpop.permute.xlu0 %7359 }
 0x92a   : > { %v7285_v29 = vpop.permute.xlu1 %7284  ;;  %7563 = vperm.xlu0 %8758, %v13811_v58   ;;  %7476 = vperm.xlu1 %8759, %v16684_v46   ;;  %v7704_v9 = vsel %vm2230_vm3, %v7703_v18, %v7699_v12  ;;  %v7723_v12 = vrot.slane %v14426_v32, %v11160_v21  ;;  %v16692_v32 = vld [vmem:[#allocation191_spill] sm:$0xff] }
 0x92b   : > { %v7708_v56 = vrot.slane %v7285_v29, %v11122_v1  ;;  %v16689_v29 = vld [vmem:[#allocation137_spill] sm:$0xff] }
 0x92d   : > { %v7709_v34 = vsel %vm2237_vm4, %v7708_v56, %v7704_v9  ;;  %v14511_v6 = vpop.permute.xlu0 %7365 }
 0x92e   : > { %v7291_v11 = vpop.permute.xlu1 %7290  ;;  %7569 = vperm.xlu0 %8758, %v16685_v37   ;;  %7482 = vperm.xlu1 %8759, %v16686_v5   ;;  %v7714_v17 = vsel %vm16687_vm5, %v7713_v49, %v7709_v34  ;;  %v7733_v34 = vrot.slane %v14437_v59, %v11188_v15  ;;  %v16691_v37 = vld [vmem:[#allocation118_spill] sm:$0xff]  ;;  %v7743_v59 = vrot.slane %v14444_v36, %v11218_v22  ;;  %vm16698_vm5 = vcmask 786112  }
 0x92f   : > { %v7718_v58 = vrot.slane %v7291_v11, %v11145_v3  ;;  %v7753_v36 = vrot.slane %v14451_v47, %v11231_v53  ;;  %v7619_v47 = vrot.slane %v14446_v19, %v11115_v7  ;;  %v8901_v19 = vld [vmem:[#allocation14 + $0xc] ss:$16 sps:$4 sm:$0xff]  }
 0x930   : > { %7021 = vmatprep.subr.bf16.mxu0 %v8901_v19 }
 0x931   : > { %v7719_v33 = vsel %vm16688_vm10, %v7718_v58, %v7714_v17  ;;  %v14520_v43 = vpop.permute.xlu0 %7371  ;;  %vm16707_vm10 = vcmask 392512  }
 0x932   : > { %v7297_v18 = vpop.permute.xlu1 %7296  ;;  %7575 = vperm.xlu0 %8758, %v16689_v29   ;;  %7488 = vperm.xlu1 %8759, %v16690_v13   ;;  %v7724_v56 = vsel %vm2258_vm7, %v7723_v12, %v7719_v33 }
 0x933   : > { %v7728_v46 = vrot.slane %v7297_v18, %v11157_v30 }
 0x935   : > { %v7729_v9 = vsel %vm2265_vm8, %v7728_v46, %v7724_v56  ;;  %v14529_v11 = vpop.permute.xlu0 %7377 }
 0x936   : > { %v7303_v49 = vpop.permute.xlu1 %7302  ;;  %7581 = vperm.xlu0 %8758, %v16691_v37   ;;  %7494 = vperm.xlu1 %8759, %v16692_v32   ;;  %v7734_v17 = vsel %vm16693_vm0, %v7733_v34, %v7729_v9  ;;  %v16696_v37 = vld [vmem:[#allocation119_spill] sm:$0xff]  ;;  %v16697_v32 = vld [vmem:[#allocation33_spill] sm:$0xff]  ;;  %vm16708_vm0 = vcmask 458112  }
 0x937   : > { %v7738_v5 = vrot.slane %v7303_v49, %v11169_v25  ;;  %v5544_v58 = vpop.f32.mrb[8].mxu1 }
 0x938   : > { %v6765_v18 = vrot.slane %v5544_v58, 6  ;;  %v8608_v29 = vpop.f32.mrb[9].mxu1 }
 0x939   : > { %v7739_v33 = vsel %vm16694_vm11, %v7738_v5, %v7734_v17  ;;  %v14538_v12 = vpop.permute.xlu0 %7383  ;;  %v5547_v13 = vpop.f32.mrb[10].mxu1  ;;  %vm16709_vm11 = vmmov %vm16707_vm10 }
 0x93a   : > { %v14543_v46 = vsel %vm16695_vm9, %v6765_v18, %v6764_v38  ;;  %v7309_v56 = vpop.permute.xlu1 %7308  ;;  %7587 = vperm.xlu0 %8758, %v16696_v37   ;;  %v8609_v49 = vpop.f32.mrb[11].mxu1  ;;  %7500 = vperm.xlu1 %8759, %v16697_v32   ;;  %v7744_v34 = vsel %vm16698_vm5, %v7743_v59, %v7739_v33  ;;  %v16699_v38 = vld [vmem:[#allocation129_spill] sm:$0xff]  ;;  %v16700_v18 = vld [vmem:[#allocation200_spill] sm:$0xff]  ;;  %v7763_v13 = vrot.slane %v14457_v62, %v16213_v63  ;;  %vm16711_vm9 = vmmov %vm16708_vm0  ;;  %vm16713_vm5 = vcmask 654912  }
 0x93b   : > { %v7748_v9 = vrot.slane %v7309_v56, %v11199_v55  ;;  %v7610_v33 = vrot.slane %v14439_v60, %v11108_v27  ;;  %v7614_v62 = vrot.slane %v14325_v48, %v11104_v20  ;;  %v7772_v60 = vrot.slane %v14463_v31, %v11104_v20 }
 0x93c   : > { %v7629_v48 = vrot.slane %v14453_v23, %v11122_v1  ;;  %v8905_v23 = vld [vmem:[#allocation14 + $0x28] ss:$16 sps:$4 sm:$0xff]  }
 0x93d   : > { %v7749_v5 = vsel %vm2293_vm12, %v7748_v9, %v7744_v34  ;;  %v14550_v58 = vpop.permute.xlu0 %7389  ;;  %v16701_v9 = vld [vmem:[#allocation209_spill] sm:$0xff]  ;;  %v16702_v34 = vld [vmem:[#allocation202_spill] sm:$0xff] }
 0x93e   : > { %v7315_v17 = vpop.permute.xlu1 %7314  ;;  %7548 = vperm.xlu0 %8758, %v16699_v38   ;;  %7506 = vperm.xlu1 %8759, %v16700_v18   ;;  %v7754_v56 = vsel %vm2300_vm13, %v7753_v36, %v7749_v5  ;;  %v8896_v36 = vld [vmem:[#allocation14] ss:$16 sps:$4 sm:$0xff]   ;;  %v8899_v38 = vld [vmem:[#allocation14 + $0x8] ss:$16 sps:$4 sm:$0xff]   ;;  %v7615_v18 = vsel %vm2216_vm1, %v7614_v62, %v7610_v33  ;;  %v7624_v33 = vrot.slane %v14335_v16, %v11118_v35 }
 0x93f   : > { %v7758_v29 = vrot.slane %v7315_v17, %v16204_v54  ;;  %v8898_v17 = vld [vmem:[#allocation14 + $0x4] ss:$16 sps:$4 sm:$0xff]   ;;  %7022 = vmatpush1.bf16.msra.mxu0 %v8899_v38 }
 0x940   : > { %6980 = vmatprep.subr.bf16.mxu1 %v8898_v17  ;;  %v16706_v38 = vld [vmem:[#allocation218_spill] sm:$0xff] }
 0x941   : > { %v7759_v59 = vsel %vm2307_vm14, %v7758_v29, %v7754_v56  ;;  %v14563_v37 = vpop.permute.xlu0 %7395  ;;  %v8904_v56 = vld [vmem:[#allocation14 + $0x24] ss:$16 sps:$4 sm:$0xff]   ;;  %6981 = vmatpush1.bf16.msra.mxu1 %v8896_v36  ;;  %v7639_v36 = vrot.slane %v14459_v26, %v11145_v3  ;;  %v8911_v26 = vld [vmem:[#allocation14 + $0x48] ss:$16 sps:$4 sm:$0xff]  }
 0x942   : > { %v14568_v49 = vsel %vm2314_vm15, %v7763_v13, %v7759_v59  ;;  %v7321_v32 = vpop.permute.xlu1 %7320  ;;  %7551 = vperm.xlu0 %8758, %v16701_v9   ;;  %7512 = vperm.xlu1 %8759, %v16702_v34   ;;  %v7620_v59 = vsel %vm2223_vm2, %v7619_v47, %v7615_v18  ;;  %v16703_v9 = vld [vmem:[#allocation131_spill] sm:$0xff]  ;;  %v7782_v47 = vrot.slane %v14469_v61, %v11118_v35  ;;  %v16705_v61 = vld [vmem:[#allocation184_spill] sm:$0xff] }
 0x943   : > { %v7768_v5 = vrot.slane %v7321_v32, %v11108_v27  ;;  %v16704_v32 = vld [vmem:[#allocation217_spill] sm:$0xff]  ;;  %6982 = vmatprep.subr.bf16.mxu1 %v8904_v56 }
 0x944   : > { %v8907_v34 = vld [vmem:[#allocation14 + $0x2c] ss:$16 sps:$4 sm:$0xff]  }
 0x945   : > { %v7773_v29 = vsel %vm2216_vm1, %v7772_v60, %v7768_v5  ;;  %v14579_v13 = vpop.permute.xlu0 %7401  ;;  %v8902_v60 = vld [vmem:[#allocation14 + $0x20] ss:$16 sps:$4 sm:$0xff]   ;;  %v7625_v5 = vsel %vm2230_vm3, %v7624_v33, %v7620_v59  ;;  %7023 = vmatprep.subr.bf16.mxu0 %v8907_v34  ;;  %v8913_v56 = vld [vmem:[#allocation14 + $0x4c] ss:$16 sps:$4 sm:$0xff]  }
 0x946   : > { %v7327_v31 = vpop.permute.xlu1 %7326  ;;  %7554 = vperm.xlu0 %8758, %v16703_v9   ;;  %7518 = vperm.xlu1 %8759, %v16704_v32   ;;  %v8910_v9 = vld [vmem:[#allocation14 + $0x44] ss:$16 sps:$4 sm:$0xff]   ;;  %v7630_v16 = vsel %vm2237_vm4, %v7629_v48, %v7625_v5  ;;  %v8908_v32 = vld [vmem:[#allocation14 + $0x40] ss:$16 sps:$4 sm:$0xff]   ;;  %v7792_v48 = vrot.slane %v14475_v4, %v11150_v24 }
 0x947   : > { %v7777_v62 = vrot.slane %v7327_v31, %v11115_v7  ;;  %6983 = vmatpush1.bf16.msra.mxu1 %v8902_v60  ;;  %7024 = vmatpush1.bf16.msra.mxu0 %v8905_v23  ;;  %v7649_v60 = vrot.slane %v14465_v51, %v11157_v30  ;;  %v16710_v4 = vld [vmem:[#allocation204_spill] sm:$0xff]  ;;  %v8919_v23 = vld [vmem:[#allocation14 + $0x6c] ss:$16 sps:$4 sm:$0xff]   ;;  %v8917_v51 = vld [vmem:[#allocation14 + $0x68] ss:$16 sps:$4 sm:$0xff]  }
 0x948   : > { %6984 = vmatprep.subr.bf16.mxu1 %v8910_v9  ;;  %7025 = vmatprep.subr.bf16.mxu0 %v8913_v56  ;;  %v7644_v9 = vrot.slane %v14355_v52, %v11160_v21  ;;  %v7659_v56 = vrot.slane %v14471_v14, %v11169_v25 }
 0x949   : > { %v7778_v17 = vsel %vm2223_vm2, %v7777_v62, %v7773_v29  ;;  %v14593_v18 = vpop.permute.xlu0 %7407  ;;  %v7634_v29 = vrot.slane %v14345_v0, %v11150_v24 }
 0x94a   : > { %v7783_v19 = vsel %vm2230_vm3, %v7782_v47, %v7778_v17  ;;  %v7333_v31 = vpop.permute.xlu1 %7332  ;;  %7557 = vperm.xlu0 %8758, %v16705_v61   ;;  %7524 = vperm.xlu1 %8759, %v16706_v38   ;;  %v8916_v47 = vld [vmem:[#allocation14 + $0x64] ss:$16 sps:$4 sm:$0xff]  }
 0x94b   : > { %v7787_v59 = vrot.slane %v7333_v31, %v11122_v1  ;;  %v7635_v34 = vsel %vm16707_vm10, %v7634_v29, %v7630_v16  ;;  %6985 = vmatpush1.bf16.msra.mxu1 %v8908_v32  ;;  %7026 = vmatpush1.bf16.msra.mxu0 %v8911_v26  ;;  %v8922_v38 = vld [vmem:[#allocation14 + $0x84] ss:$16 sps:$4 sm:$0xff]   ;;  %v8925_v32 = vld [vmem:[#allocation14 + $0x8c] ss:$16 sps:$4 sm:$0xff]   ;;  %vm16714_vm10 = vcmask 720512  }
 0x94c   : > { %v7640_v0 = vsel %vm16708_vm0, %v7639_v36, %v7635_v34  ;;  %v7802_v36 = vrot.slane %v14482_v42, %v11160_v21  ;;  %6986 = vmatprep.subr.bf16.mxu1 %v8916_v47  ;;  %7027 = vmatprep.subr.bf16.mxu0 %v8919_v23  ;;  %v16712_v42 = vld [vmem:[#allocation66_spill] sm:$0xff]  ;;  %v8923_v47 = vld [vmem:[#allocation14 + $0x88] ss:$16 sps:$4 sm:$0xff]   ;;  %vm16715_vm0 = vmmov %vm16713_vm5 }
 0x94d   : > { %v7788_v33 = vsel %vm2237_vm4, %v7787_v59, %v7783_v19  ;;  %v14608_v62 = vpop.permute.xlu0 %7413  ;;  %v8914_v19 = vld [vmem:[#allocation14 + $0x60] ss:$16 sps:$4 sm:$0xff]   ;;  %v7645_v31 = vsel %vm2258_vm7, %v7644_v9, %v7640_v0  ;;  %v8931_v9 = vld [vmem:[#allocation14 + $0xac] ss:$16 sps:$4 sm:$0xff]  }
 0x94e   : > { %v7793_v5 = vsel %vm16709_vm11, %v7792_v48, %v7788_v33  ;;  %v7339_v17 = vpop.permute.xlu1 %7338  ;;  %7605 = vperm.xlu0 %8758, %v13964_v10   ;;  %7530 = vperm.xlu1 %8759, %v16710_v4   ;;  %v7650_v52 = vsel %vm2265_vm8, %v7649_v60, %v7645_v31  ;;  %v7654_v48 = vrot.slane %v14365_v2, %v11188_v15  ;;  %v8920_v34 = vld [vmem:[#allocation14 + $0x80] ss:$16 sps:$4 sm:$0xff]   ;;  %vm16717_vm11 = vcmask 786112  }
 0x94f   : > { %v7797_v16 = vrot.slane %v7339_v17, %v11145_v3  ;;  %6987 = vmatpush1.bf16.msra.mxu1 %v8914_v19  ;;  %v7812_v33 = vrot.slane %v14488_v28, %v11188_v15  ;;  %7028 = vmatpush1.bf16.msra.mxu0 %v8917_v51  ;;  %v7669_v17 = vrot.slane %v14478_v45, %v11199_v55  ;;  %v16716_v28 = vld [vmem:[#allocation192_spill] sm:$0xff]  ;;  %v8929_v45 = vld [vmem:[#allocation14 + $0xa8] ss:$16 sps:$4 sm:$0xff]  }
 0x950   : > { %6988 = vmatprep.subr.bf16.mxu1 %v8922_v38  ;;  %v7655_v14 = vsel %vm16713_vm5, %v7654_v48, %v7650_v52  ;;  %7029 = vmatprep.subr.bf16.mxu0 %v8925_v32  ;;  %v8926_v51 = vld [vmem:[#allocation14 + $0xa0] ss:$16 sps:$4 sm:$0xff]   ;;  %v7822_v31 = vrot.slane %v14493_v8, %v11218_v22  ;;  %vm16719_vm5 = vmmov %vm16717_vm11 }
 0x951   : > { %v7798_v10 = vsel %vm16711_vm9, %v7797_v16, %v7793_v5  ;;  %v14623_v61 = vpop.permute.xlu0 %7419  ;;  %v8928_v5 = vld [vmem:[#allocation14 + $0xa4] ss:$16 sps:$4 sm:$0xff]   ;;  %v7660_v2 = vsel %vm16714_vm10, %v7659_v56, %v7655_v14  ;;  %v7664_v16 = vrot.slane %v14371_v50, %v11218_v22  ;;  %vm16718_vm9 = vmmov %vm16714_vm10  ;;  %v7832_v14 = vrot.slane %v14502_v44, %v11231_v53 }
 0x952   : > { %v7803_v29 = vsel %vm2258_vm7, %v7802_v36, %v7798_v10  ;;  %v7345_v59 = vpop.permute.xlu1 %7344  ;;  %7536 = vperm.xlu1 %8759, %v16712_v42   ;;  %v7679_v42 = vrot.slane %v14484_v41, %v16204_v54  ;;  %v7684_v44 = vrot.slane %v14390_v57, %v16213_v63  ;;  %vm16722_vm10 = vcmask 1041409  }
 0x953   : > { %v7807_v26 = vrot.slane %v7345_v59, %v11157_v30  ;;  %6989 = vmatpush1.bf16.msra.mxu1 %v8920_v34  ;;  %7030 = vmatpush1.bf16.msra.mxu0 %v8923_v47  ;;  %v7665_v52 = vsel %vm16717_vm11, %v7664_v16, %v7660_v2  ;;  %v16720_v34 = vld [vmem:[#allocation133_spill] sm:$0xff]  ;;  %vm16727_vm11 = vcmask 392512  }
 0x954   : > { %6990 = vmatprep.subr.bf16.mxu1 %v8928_v5  ;;  %7031 = vmatprep.subr.bf16.mxu0 %v8931_v9  ;;  %v7670_v59 = vsel %vm2293_vm12, %v7669_v17, %v7665_v52  ;;  %v8937_v16 = vld [vmem:[#allocation14 + $0xcc] ss:$16 sps:$4 sm:$0xff]  }
 0x955   : > { %v7808_v0 = vsel %vm2265_vm8, %v7807_v26, %v7803_v29  ;;  %v14637_v60 = vpop.permute.xlu0 %7425 }
 0x956   : > { %v7813_v4 = vsel %vm16715_vm0, %v7812_v33, %v7808_v0  ;;  %v7351_v23 = vpop.permute.xlu1 %7350  ;;  %7542 = vperm.xlu1 %8759, %v16716_v28   ;;  %v7674_v33 = vrot.slane %v14381_v40, %v11231_v53  ;;  %v8932_v40 = vld [vmem:[#allocation14 + $0xc0] ss:$16 sps:$4 sm:$0xff]   ;;  %v8935_v28 = vld [vmem:[#allocation14 + $0xc8] ss:$16 sps:$4 sm:$0xff]   ;;  %vm16724_vm0 = vcmask 1042434  }
 0x957   : > { %v7817_v19 = vrot.slane %v7351_v23, %v11169_v25  ;;  %v5785_v36 = vpop.f32.mrb[12].mxu0  ;;  %6991 = vmatpush1.bf16.msra.mxu1 %v8926_v51  ;;  %7032 = vmatpush1.bf16.msra.mxu0 %v8929_v45  ;;  %v8934_v23 = vld [vmem:[#allocation14 + $0xc4] ss:$16 sps:$4 sm:$0xff]   ;;  %v8943_v51 = vld [vmem:[#allocation14 + $0xec] ss:$16 sps:$4 sm:$0xff]  }
 0x958   : > { %v6767_v10 = vrot.slane %v5785_v36, 5  ;;  %v8628_v38 = vpop.f32.mrb[13].mxu0  ;;  %v7675_v41 = vsel %vm2300_vm13, %v7674_v33, %v7670_v59  ;;  %v7842_v36 = vrot.slane %v14511_v6, %v16213_v63  ;;  %6992 = vmatprep.subr.bf16.mxu1 %v8934_v23  ;;  %7033 = vmatprep.subr.bf16.mxu0 %v8937_v16  ;;  %v8938_v45 = vld [vmem:[#allocation14 + $0xe0] ss:$16 sps:$4 sm:$0xff]   ;;  %v8941_v6 = vld [vmem:[#allocation14 + $0xe8] ss:$16 sps:$4 sm:$0xff]   ;;  %v7851_v59 = vrot.slane %v14520_v43, %v11104_v20 }
 0x959   : > { %v7818_v56 = vsel %vm16718_vm9, %v7817_v19, %v7813_v4  ;;  %v14651_v29 = vpop.permute.xlu0 %7431  ;;  %v5788_v50 = vpop.f32.mrb[14].mxu0  ;;  %v7680_v5 = vsel %vm2307_vm14, %v7679_v42, %v7675_v41  ;;  %v16721_v4 = vld [vmem:[#allocation208_spill] sm:$0xff]  ;;  %v7861_v43 = vrot.slane %v14529_v11, %v11118_v35  ;;  %vm16728_vm9 = vcmask 458112  }
 0x95a   : > { %v14658_v8 = vsel %vm2873_vm6, %v6767_v10, %v14543_v46  ;;  %v7823_v32 = vsel %vm16719_vm5, %v7822_v31, %v7818_v56  ;;  %v7357_v48 = vpop.permute.xlu1 %7356  ;;  %v8629_v26 = vpop.f32.mrb[15].mxu0  ;;  %7560 = vperm.xlu1 %8759, %v16720_v34   ;;  %v8940_v19 = vld [vmem:[#allocation14 + $0xe4] ss:$16 sps:$4 sm:$0xff]   ;;  %v7685_v31 = vsel %vm2314_vm15, %v7684_v44, %v7680_v5  ;;  %v16725_v34 = vld [vmem:[#allocation213_spill] sm:$0xff]  ;;  %v16726_v5 = vld [vmem:[#allocation199_spill] sm:$0xff]  ;;  %v7881_v44 = vrot.slane %v14550_v58, %v11160_v21 }
 0x95b   : > { %v7827_v47 = vrot.slane %v7357_v48, %v11199_v55  ;;  %6993 = vmatpush1.bf16.msra.mxu1 %v8932_v40  ;;  %v8239_v57 = vsel %vm16722_vm10, %v14568_v49, %v7685_v31  ;;  %v16723_v50 = vld [vmem:[#allocation194_spill] sm:$0xff]  ;;  %7034 = vmatpush1.bf16.msra.mxu0 %v8935_v28  ;;  %v7891_v31 = vrot.slane %v14563_v37, %v11188_v15  ;;  %vm16730_vm5 = vcmask 654912   ;;  %v16731_v58 = vld [vmem:[#allocation120_spill] sm:$0xff] }
 0x95c   : > { %6994 = vmatprep.subr.bf16.mxu1 %v8940_v19  ;;  %7035 = vmatprep.subr.bf16.mxu0 %v8943_v51  ;;  %vm16732_vm10 = vcmask 720512  }
 0x95d   : > { %v7828_v46 = vsel %vm2293_vm12, %v7827_v47, %v7823_v32  ;;  %v14669_v0 = vpop.permute.xlu0 %7437 }
 0x95e   : > { %v7833_v2 = vsel %vm2300_vm13, %v7832_v14, %v7828_v46  ;;  %v7363_v17 = vpop.permute.xlu1 %7362  ;;  %7566 = vperm.xlu1 %8759, %v16721_v4  }
 0x95f   : > { %v7837_v9 = vrot.slane %v7363_v17, %v16204_v54  ;;  %6995 = vmatpush1.bf16.msra.mxu1 %v8938_v45  ;;  %7036 = vmatpush1.bf16.msra.mxu0 %v8941_v6  ;;  %v7871_v17 = vrot.slane %v14538_v12, %v11150_v24  ;;  %v16729_v12 = vld [vmem:[#allocation215_spill] sm:$0xff] }
 0x961   : > { %v7838_v10 = vsel %vm2307_vm14, %v7837_v9, %v7833_v2  ;;  %v14681_v38 = vpop.permute.xlu0 %7443 }
 0x962   : > { %v7843_v52 = vsel %vm2314_vm15, %v7842_v36, %v7838_v10  ;;  %v7369_v56 = vpop.permute.xlu1 %7368  ;;  %7572 = vperm.xlu1 %8759, %v16723_v50  }
 0x963   : > { %v14690_v42 = vsel %vm16724_vm0, %v7843_v52, %v8239_v57  ;;  %v7847_v32 = vrot.slane %v7369_v56, %v11108_v27  ;;  %v7901_v56 = vrot.slane %v14579_v13, %v11218_v22  ;;  %vm16733_vm0 = vcmask 1044484  }
 0x965   : > { %v7852_v48 = vsel %vm2216_vm1, %v7851_v59, %v7847_v32  ;;  %v14694_v49 = vpop.permute.xlu0 %7449 }
 0x966   : > { %v7375_v26 = vpop.permute.xlu1 %7374  ;;  %7578 = vperm.xlu1 %8759, %v16725_v34  }
 0x967   : > { %v7856_v33 = vrot.slane %v7375_v26, %v11115_v7 }
 0x969   : > { %v7857_v47 = vsel %vm2223_vm2, %v7856_v33, %v7852_v48  ;;  %v14701_v14 = vpop.permute.xlu0 %7455 }
 0x96a   : > { %v7862_v41 = vsel %vm2230_vm3, %v7861_v43, %v7857_v47  ;;  %v7381_v46 = vpop.permute.xlu1 %7380  ;;  %7584 = vperm.xlu1 %8759, %v16726_v5   ;;  %v16735_v43 = vld [vmem:[#allocation198_spill] sm:$0xff]  ;;  %v7911_v47 = vrot.slane %v14593_v18, %v11231_v53 }
 0x96b   : > { %v7866_v2 = vrot.slane %v7381_v46, %v11122_v1 }
 0x96d   : > { %v7867_v4 = vsel %vm2237_vm4, %v7866_v2, %v7862_v41  ;;  %v14709_v40 = vpop.permute.xlu0 %7461 }
 0x96e   : > { %v7872_v11 = vsel %vm16727_vm11, %v7871_v17, %v7867_v4  ;;  %v7387_v23 = vpop.permute.xlu1 %7386  ;;  %7590 = vperm.xlu1 %8759, %v13910_v39   ;;  %vm16734_vm11 = vcmask 786112   ;;  %v7921_v4 = vrot.slane %v14608_v62, %v16213_v63 }
 0x96f   : > { %v7876_v28 = vrot.slane %v7387_v23, %v11145_v3 }
 0x971   : > { %v7877_v9 = vsel %vm16728_vm9, %v7876_v28, %v7872_v11  ;;  %v14719_v36 = vpop.permute.xlu0 %7467  ;;  %v7930_v28 = vrot.slane %v14623_v61, %v11104_v20 }
 0x972   : > { %v7882_v16 = vsel %vm2258_vm7, %v7881_v44, %v7877_v9  ;;  %v7393_v19 = vpop.permute.xlu1 %7392  ;;  %7593 = vperm.xlu1 %8759, %v16729_v12  }
 0x973   : > { %v7886_v51 = vrot.slane %v7393_v19, %v11157_v30 }
 0x975   : > { %v7887_v39 = vsel %vm2265_vm8, %v7886_v51, %v7882_v16  ;;  %v14730_v59 = vpop.permute.xlu0 %7473 }
 0x976   : > { %v7892_v10 = vsel %vm16730_vm5, %v7891_v31, %v7887_v39  ;;  %v7399_v45 = vpop.permute.xlu1 %7398  ;;  %7596 = vperm.xlu1 %8759, %v16731_v58  }
 0x977   : > { %v7896_v57 = vrot.slane %v7399_v45, %v11169_v25  ;;  %v6026_v52 = vpop.f32.mrb[12].mxu1 }
 0x978   : > { %v6769_v50 = vrot.slane %v6026_v52, 4  ;;  %v8648_v6 = vpop.f32.mrb[13].mxu1 }
 0x979   : > { %v7897_v32 = vsel %vm16732_vm10, %v7896_v57, %v7892_v10  ;;  %v6029_v37 = vpop.f32.mrb[14].mxu1  ;;  %v14745_v2 = vpop.permute.xlu0 %7479 }
 0x97a   : > { %v14735_v48 = vsel %vm16733_vm0, %v6769_v50, %v14658_v8  ;;  %v7902_v26 = vsel %vm16734_vm11, %v7901_v56, %v7897_v32  ;;  %v7405_v34 = vpop.permute.xlu1 %7404  ;;  %v8649_v33 = vpop.f32.mrb[15].mxu1  ;;  %7599 = vperm.xlu1 %8759, %v16735_v43   ;;  %v16736_v8 = vld [vmem:[#allocation121_spill] sm:$0xff] }
 0x97b   : > { %v7906_v13 = vrot.slane %v7405_v34, %v11199_v55 }
 0x97d   : > { %v7907_v41 = vsel %vm2293_vm12, %v7906_v13, %v7902_v26  ;;  %v14763_v62 = vpop.permute.xlu0 %7485 }
 0x97e   : > { %v7912_v46 = vsel %vm2300_vm13, %v7911_v47, %v7907_v41  ;;  %v7411_v5 = vpop.permute.xlu1 %7410  ;;  %7602 = vperm.xlu1 %8759, %v16736_v8  }
 0x97f   : > { %v7916_v17 = vrot.slane %v7411_v5, %v16204_v54 }
 0x981   : > { %v7917_v11 = vsel %vm2307_vm14, %v7916_v17, %v7912_v46  ;;  %v14779_v39 = vpop.permute.xlu0 %7491 }
 0x982   : > { %v7922_v23 = vsel %vm2314_vm15, %v7921_v4, %v7917_v11  ;;  %v7417_v18 = vpop.permute.xlu1 %7416 }
 0x983   : > { %v14756_v44 = vsel %vm2873_vm6, %v7922_v23, %v14690_v42  ;;  %v7926_v9 = vrot.slane %v7417_v18, %v11108_v27  ;;  %v7940_v42 = vrot.slane %v14637_v60, %v11118_v35 }
 0x985   : > { %v7931_v16 = vsel %vm2216_vm1, %v7930_v28, %v7926_v9 }
 0x986   : > { %v7423_v19 = vpop.permute.xlu1 %7422 }
 0x987   : > { %v7935_v61 = vrot.slane %v7423_v19, %v11115_v7 }
 0x989   : > { %v7936_v12 = vsel %vm2223_vm2, %v7935_v61, %v7931_v16 }
 0x98a   : > { %v7941_v51 = vsel %vm2230_vm3, %v7940_v42, %v7936_v12  ;;  %v7429_v31 = vpop.permute.xlu1 %7428 }
 0x98b   : > { %v7945_v10 = vrot.slane %v7429_v31, %v11122_v1 }
 0x98c   : > { %9368 = shalt.err (!%p9365_p6)  }
 0x98d   : > { %s9369_s26 = scalar_lea.vmem %s168_s17, 512  ;;  %p9376_p12 = scmp.lt.s32.totalorder %s168_s17, %s9590_s20 }
 0x98e   : > { %p9370_p7 = scmp.ne.s32.totalorder %s168_s17, %s9369_s26  ;;  %p9377_p13 = scmp.lt.s32.totalorder %s9347_s28, %s9369_s26 }
 0x990   : > { %p9371_p8 = pnand %p9370_p7, %p8728_p11  ;;  %p9378_p10 = por %p9377_p13, %p9376_p12 }
 0x992   : > { %p9372_p9 = pneg %p9371_p8 }
 0x994   : > { %p9379_p1 = pnand %p9378_p10, %p9372_p9 }
 0x996   : > { %9382 = shalt.err (!%p9379_p1)  }
 0x997   : > { %8727 = dma.hbm_to_vmem [thread:$0]  (%p8728_p11), %s14775_s16, 512, %s168_s17, %s159_s1  ;;  %v7950_v60 = vrot.slane %v14651_v29, %v11150_v24  ;;  %v7946_v45 = vsel %vm2237_vm4, %v7945_v10, %v7941_v51  ;;  %vm16737_vm6 = vcmask 392512   ;;  %v7435_v57 = vpop.permute.xlu1 %7434  ;;  %v7960_v56 = vrot.slane %v14669_v0, %v11160_v21  ;;  %v14809_v50 = vpop.permute.xlu0 %7497 }
 0x998   : > { %v7955_v52 = vrot.slane %v7435_v57, %v11145_v3  ;;  %v7970_v29 = vrot.slane %v14681_v38, %v11188_v15  ;;  %v6267_v47 = vpop.f32.mrb[16].mxu0  ;;  %v7980_v41 = vrot.slane %v14694_v49, %v11218_v22  ;;  %vm16738_vm0 = vcmask 1045509   ;;  %s8473_s0 = sshll.u32 %s9446_s18, 3  ;;  %s16765_s18 = smov %s14760_s29 }
 0x999   : > { %v7951_v58 = vsel %vm16737_vm6, %v7950_v60, %v7946_v45  ;;  %v6771_v46 = vrot.slane %v6267_v47, 3  ;;  %v8668_v5 = vpop.f32.mrb[17].mxu0  ;;  %v7990_v28 = vrot.slane %v14701_v14, %v11231_v53  ;;  %v8009_v14 = vrot.slane %v14719_v36, %v11104_v20  ;;  %s8247_s30 = scalar_lea.vmem [#allocation16], %s8473_s0  ;;  %p16766_p10 = scmp.ge.s32.totalorder %s14760_s29, 7 }
 0x99a   : > { %v7956_v6 = vsel %vm16728_vm9, %v7955_v52, %v7951_v58  ;;  %v6270_v17 = vpop.f32.mrb[18].mxu0  ;;  %vm16739_vm6 = vcmask 1044484   ;;  %v8019_v57 = vrot.slane %v14730_v59, %v11118_v35  ;;  %vm16740_vm9 = vcmask 392512   ;;  %s9467_s11 = smov (%p16766_p10), [#allocation15]   ;;  %s9468_s5 = smov (%p16766_p10), [#allocation16]  }
 0x99b   : > { %v7961_v32 = vsel %vm2258_vm7, %v7960_v56, %v7956_v6  ;;  %v7441_v37 = vpop.permute.xlu1 %7440  ;;  %v14818_v13 = vpop.permute.xlu0 %7503  ;;  %v6772_v38 = vsel %vm16738_vm0, %v6771_v46, %v14735_v48  ;;  %v8000_v48 = vrot.slane %v14709_v40, %v16213_v63  ;;  %v16742_v46 = vld [vmem:[#allocation161_spill] sm:$0xff]  ;;  %vm16745_vm0 = vcmask 720512   ;;  %s8254_s12 = sshll.u32 (%p16766_p10), %s9467_s11, 4  ;;  %s8266_s13 = sshll.u32 (%p16766_p10), %s9468_s5, 4  ;;  %s8255_s12 = int_to_ptr.vmem [resolvable:$true] %s8254_s12  ;;  %s15004_s13 = int_to_ptr.vmem [resolvable:$true] %s8266_s13 }
 0x99c   : > { %v7965_v26 = vrot.slane %v7441_v37, %v11157_v30  ;;  %v8669_v23 = vpop.f32.mrb[19].mxu0  ;;  %s9384_s15 = scalar_lea.vmem (%p16766_p10), %s8255_s12, 896  ;;  %p9389_p0 = scmp.lt.s32.totalorder (%p16766_p10), %s8255_s12, %s8255_s12 }
 0x99d   :  { %p9385_p11 = scmp.ne.s32.totalorder (%p16766_p10), %s8255_s12, %s9384_s15  ;;  %p9390_p2 = scmp.lt.s32.totalorder (%p16766_p10), %s9384_s15, %s9384_s15 }
 0x99e   : > { %v7966_v34 = vsel %vm2265_vm8, %v7965_v26, %v7961_v32 }
 0x99f   : > { %v7971_v33 = vsel %vm16730_vm5, %v7970_v29, %v7966_v34  ;;  %v7447_v43 = vpop.permute.xlu1 %7446  ;;  %v14830_v9 = vpop.permute.xlu0 %7509  ;;  %vm16741_vm5 = vcmask 458112   ;;  %p9391_p3 = por (%p16766_p10), %p9390_p2, %p9389_p0 }
 0x9a0   : > { %v7975_v0 = vrot.slane %v7447_v43, %v11169_v25 }
 0x9a1   :  { %p9392_p4 = pnand (%p16766_p10), %p9391_p3, %p9385_p11 }
 0x9a2   : > { %v7976_v8 = vsel %vm16732_vm10, %v7975_v0, %v7971_v33  ;;  %v8039_v33 = vrot.slane %v14763_v62, %v11160_v21  ;;  %vm16743_vm10 = vcmask 654912  }
 0x9a3   : > { %v7981_v4 = vsel %vm16734_vm11, %v7980_v41, %v7976_v8  ;;  %v7453_v11 = vpop.permute.xlu1 %7452  ;;  %v14841_v31 = vpop.permute.xlu0 %7515  ;;  %v8049_v8 = vrot.slane %v14779_v39, %v11188_v15  ;;  %vm16746_vm11 = vcmask 1046534  }
 0x9a4   : > { %v7985_v18 = vrot.slane %v7453_v11, %v11199_v55 }
 0x9a6   : > { %v7986_v49 = vsel %vm2293_vm12, %v7985_v18, %v7981_v4 }
 0x9a7   : > { %v7991_v16 = vsel %vm2300_vm13, %v7990_v28, %v7986_v49  ;;  %v7459_v19 = vpop.permute.xlu1 %7458  ;;  %v14850_v52 = vpop.permute.xlu0 %7521  ;;  %v16744_v28 = vld [vmem:[#allocation36_spill] sm:$0xff] }
 0x9a8   : > { %v7995_v61 = vrot.slane %v7459_v19, %v16204_v54 }
 0x9aa   : > { %v7996_v42 = vsel %vm2307_vm14, %v7995_v61, %v7991_v16  ;;  %v8059_v16 = vrot.slane %v14809_v50, %v11218_v22 }
 0x9ab   : > { %v8001_v12 = vsel %vm2314_vm15, %v8000_v48, %v7996_v42  ;;  %v7465_v51 = vpop.permute.xlu1 %7464  ;;  %v14859_v34 = vpop.permute.xlu0 %7527 }
 0x9ac   : > { %v8242_v10 = vsel %vm16739_vm6, %v8001_v12, %v14756_v44  ;;  %v8005_v60 = vrot.slane %v7465_v51, %v11108_v27  ;;  %v8029_v44 = vrot.slane %v14745_v2, %v11150_v24  ;;  %v14870_v2 = vld [vmem:[%s15047_s6] sm:$0x3f]  ;;  %vm16747_vm6 = vcmask 786112  }
 0x9ad   : > { %v231_v5 = vrot.slane %v14870_v2, %v16742_v46 }
 0x9ae   : > { %v8010_v45 = vsel %vm2216_vm1, %v8009_v14, %v8005_v60 }
 0x9af   : > { %v7471_v58 = vpop.permute.xlu1 %7470  ;;  %v14876_v17 = vpop.permute.xlu0 %7533  ;;  %v531_v49 = vadd.f32 %v16744_v28, %v231_v5 }
 0x9b0   : > { %v8014_v40 = vrot.slane %v7471_v58, %v11115_v7 }
 0x9b1   : > { %v8372_v58 = vmul.f32 -1.442695, %v531_v49 }
 0x9b2   : > { %v8015_v56 = vsel %vm2223_vm2, %v8014_v40, %v8010_v45  ;;  %v8069_v40 = vrot.slane %v14818_v13, %v11231_v53 }
 0x9b3   : > { %v8020_v36 = vsel %vm2230_vm3, %v8019_v57, %v8015_v56  ;;  %v7477_v6 = vpop.permute.xlu1 %7476  ;;  %v14887_v60 = vpop.permute.xlu0 %7539  ;;  %9202 = vpow2.f32 %v8372_v58 }
 0x9b4   : > { %v8024_v32 = vrot.slane %v7477_v6, %v11122_v1 }
 0x9b6   : > { %v8025_v37 = vsel %vm2237_vm4, %v8024_v32, %v8020_v36 }
 0x9b7   : > { %v8030_v26 = vsel %vm16740_vm9, %v8029_v44, %v8025_v37  ;;  %v7483_v29 = vpop.permute.xlu1 %7482  ;;  %v6508_v18 = vpop.f32.mrb[16].mxu1  ;;  %vm16748_vm9 = vcmask 1045509  }
 0x9b8   : > { %v8034_v59 = vrot.slane %v7483_v29, %v11145_v3  ;;  %v6773_v19 = vrot.slane %v6508_v18, 2  ;;  %v8688_v61 = vpop.f32.mrb[17].mxu1  ;;  %v14897_v6 = vpop.permute.xlu0 %7545 }
 0x9b9   : > { %v6511_v39 = vpop.f32.mrb[18].mxu1  ;;  %v8088_v61 = vrot.slane %v14841_v31, %v11104_v20 }
 0x9ba   : > { %v8035_v43 = vsel %vm16741_vm5, %v8034_v59, %v8030_v26  ;;  %v6774_v42 = vsel %vm16746_vm11, %v6773_v19, %v6772_v38  ;;  %v8689_v14 = vpop.f32.mrb[19].mxu1  ;;  %v8079_v38 = vrot.slane %v14830_v9, %v16213_v63  ;;  %vm16749_vm5 = vcmask 1047559  }
 0x9bb   : > { %v8040_v0 = vsel %vm2258_vm7, %v8039_v33, %v8035_v43  ;;  %v7489_v47 = vpop.permute.xlu1 %7488  ;;  %vm16752_vm11 = vcmask 654912  }
 0x9bc   : > { %v8044_v41 = vrot.slane %v7489_v47, %v11157_v30  ;;  %v7564_v29 = vpop.permute.xlu0 %7563 }
 0x9bd   : > { %v9203_v59 = vpop.eup %9202 }
 0x9be   : > { %v8045_v62 = vsel %vm2265_vm8, %v8044_v41, %v8040_v0  ;;  %v620_v43 = vadd.f32 1.0, %v9203_v59  ;;  %v8167_v59 = vrot.slane %v7564_v29, %v11104_v20 }
 0x9bf   : > { %v8050_v4 = vsel %vm16743_vm10, %v8049_v8, %v8045_v62  ;;  %v7495_v11 = vpop.permute.xlu1 %7494  ;;  %vm16750_vm10 = vcmask 392512  }
 0x9c0   : > { %v8054_v23 = vrot.slane %v7495_v11, %v11169_v25  ;;  %v7570_v0 = vpop.permute.xlu0 %7569  ;;  %9204 = vrcp.f32 %v620_v43 }
 0x9c2   : > { %v8055_v48 = vsel %vm16745_vm0, %v8054_v23, %v8050_v4  ;;  %vm16751_vm0 = vcmask 458112  }
 0x9c3   : > { %v8060_v12 = vsel %vm16747_vm6, %v8059_v16, %v8055_v48  ;;  %v7501_v51 = vpop.permute.xlu1 %7500  ;;  %vm16753_vm6 = vcmask 720512  }
 0x9c4   : > { %v8064_v45 = vrot.slane %v7501_v51, %v11199_v55  ;;  %v7576_v9 = vpop.permute.xlu0 %7575 }
 0x9c6   : > { %v8065_v50 = vsel %vm2293_vm12, %v8064_v45, %v8060_v12 }
 0x9c7   : > { %v8070_v57 = vsel %vm2300_vm13, %v8069_v40, %v8065_v50  ;;  %v7507_v56 = vpop.permute.xlu1 %7506 }
 0x9c8   : > { %v8074_v36 = vrot.slane %v7507_v56, %v16204_v54  ;;  %v14904_v8 = vpop.permute.xlu0 %7581 }
 0x9ca   : > { %v8075_v32 = vsel %vm2307_vm14, %v8074_v36, %v8070_v57  ;;  %v8108_v57 = vrot.slane %v14859_v34, %v11150_v24 }
 0x9cb   : > { %v8080_v44 = vsel %vm2314_vm15, %v8079_v38, %v8075_v32  ;;  %v7513_v37 = vpop.permute.xlu1 %7512 }
 0x9cc   : > { %v14902_v13 = vsel %vm16748_vm9, %v8080_v44, %v8242_v10  ;;  %v9205_v10 = vpop.eup %9204  ;;  %v8084_v18 = vrot.slane %v7513_v37, %v11108_v27  ;;  %v14911_v12 = vpop.permute.xlu0 %7587  ;;  %v8118_v37 = vrot.slane %v14876_v17, %v11160_v21  ;;  %vm16756_vm9 = vmmov %vm16751_vm0 }
 0x9ce   : > { %v8089_v51 = vsel %vm2216_vm1, %v8088_v61, %v8084_v18  ;;  %v8187_v18 = vrot.slane %v7576_v9, %v11150_v24 }
 0x9cf   : > { %v7519_v26 = vpop.permute.xlu1 %7518 }
 0x9d0   : > { %v8093_v16 = vrot.slane %v7519_v26, %v11115_v7  ;;  %v7549_v56 = vpop.permute.xlu0 %7548 }
 0x9d2   : > { %v8094_v14 = vsel %vm2223_vm2, %v8093_v16, %v8089_v51 }
 0x9d3   : > { %v7525_v33 = vpop.permute.xlu1 %7524 }
 0x9d4   : > { %v8103_v45 = vrot.slane %v7525_v33, %v11122_v1  ;;  %v7552_v43 = vpop.permute.xlu0 %7551 }
 0x9d7   : > { %v7531_v47 = vpop.permute.xlu1 %7530 }
 0x9d8   : > { %v6749_v5 = vpop.f32.mrb[20].mxu0  ;;  %v8113_v50 = vrot.slane %v7531_v47, %v11145_v3 }
 0x9d9   : > { %v6775_v62 = vrot.slane %v6749_v5, 1  ;;  %v8708_v4 = vpop.f32.mrb[21].mxu0 }
 0x9da   : > { %v6752_v11 = vpop.f32.mrb[22].mxu0 }
 0x9db   : > { %v7537_v41 = vpop.permute.xlu1 %7536  ;;  %v6776_v28 = vsel %vm16749_vm5, %v6775_v62, %v6774_v42  ;;  %v8709_v49 = vpop.f32.mrb[23].mxu0  ;;  %v8098_v42 = vrot.slane %v14850_v52, %v11118_v35 }
 0x9dc   : > { %v6778_v19 = vmul.f32 %v9205_v10, %v6776_v28  ;;  %v8123_v44 = vrot.slane %v7537_v41, %v11157_v30 }
 0x9dd   : > { %v8099_v40 = vsel %vm2230_vm3, %v8098_v42, %v8094_v14 }
 0x9de   : > { %v6787_v48 = vpack.c.bf16 %v6778_v19, %v6778_v19  ;;  %v8104_v31 = vsel %vm2237_vm4, %v8103_v45, %v8099_v40 }
 0x9df   : > { %v7543_v46 = vpop.permute.xlu1 %7542  ;;  %v8109_v38 = vsel %vm16750_vm10, %v8108_v57, %v8104_v31 }
 0x9e0   : > { %7013 = vmatmul.mubr.bf16.vlgmr.msra.gmra.mrb[0].mxu1 %v6787_v48  ;;  %7054 = vmatmul.mubr.bf16.vlgmr.msra.gmra.mrb[4].mxu0 %v6787_v48  ;;  %v8114_v32 = vsel %vm16751_vm0, %v8113_v50, %v8109_v38  ;;  %v8133_v5 = vrot.slane %v7543_v46, %v11169_v25  ;;  %v8138_v46 = vrot.slane %v14897_v6, %v11218_v22 }
 0x9e1   : > { %v8119_v34 = vsel %vm2258_vm7, %v8118_v37, %v8114_v32  ;;  %v8197_v6 = vrot.slane %v14904_v8, %v11160_v21  ;;  %v6779_v37 = vld [vmem:[%s9641_s27] sm:$0xff] }
 0x9e2   : > { %v8124_v47 = vsel %vm2265_vm8, %v8123_v44, %v8119_v34 }
 0x9e3   : > { %v7561_v23 = vpop.permute.xlu1 %7560 }
 0x9e4   : > { %v8163_v52 = vrot.slane %v7561_v23, %v11108_v27  ;;  %v8128_v27 = vrot.slane %v14887_v60, %v11188_v15  ;;  %v7555_v23 = vpop.permute.xlu0 %7554 }
 0x9e5   : > { %v8153_v21 = vrot.slane %v7555_v23, %v16204_v54 }
 0x9e6   : > { %v8168_v62 = vsel %vm2216_vm1, %v8167_v59, %v8163_v52  ;;  %v8129_v29 = vsel %vm16752_vm11, %v8128_v27, %v8124_v47  ;;  %vm16754_vm1 = vcmask 786112   ;;  %v16761_v52 = vld [vmem:[#allocation168_spill] sm:$0xff]  ;;  %v6780_v59 = vld [vmem:[%s9641_s27 + $0x8] sm:$0xff]  ;;  %v16763_v47 = vld [vmem:[#allocation127_spill] sm:$0xff] }
 0x9e7   : > { %v7567_v39 = vpop.permute.xlu1 %7566  ;;  %v8134_v4 = vsel %vm16753_vm6, %v8133_v5, %v8129_v29  ;;  %v247_v5 = vrot.slane %v14870_v2, %v16763_v47 }
 0x9e8   : > { %v8172_v26 = vrot.slane %v7567_v39, %v11115_v7  ;;  %v8177_v7 = vrot.slane %v7570_v0, %v11118_v35  ;;  %v8139_v35 = vsel %vm16754_vm1, %v8138_v46, %v8134_v4  ;;  %v8143_v0 = vrot.slane %v7549_v56, %v11199_v55  ;;  %v7558_v24 = vpop.permute.xlu0 %7557 }
 0x9e9   : > { %v8158_v31 = vrot.slane %v7558_v24, %v16213_v63 }
 0x9ea   : > { %v8173_v41 = vsel %vm2223_vm2, %v8172_v26, %v8168_v62  ;;  %vm16755_vm2 = vmmov %vm16750_vm10  ;;  %v8144_v19 = vsel %vm2293_vm12, %v8143_v0, %v8139_v35 }
 0x9eb   : > { %v7573_v58 = vpop.permute.xlu1 %7572  ;;  %v8178_v11 = vsel %vm2230_vm3, %v8177_v7, %v8173_v41  ;;  %vm16757_vm3 = vmmov %vm16752_vm11  ;;  %v6782_v41 = vld [vmem:[%s9641_s27 + $0x18] sm:$0xff] }
 0x9ec   : > { %v8182_v17 = vrot.slane %v7573_v58, %v11122_v1 }
 0x9ee   : > { %v8183_v10 = vsel %vm2237_vm4, %v8182_v17, %v8178_v11  ;;  %vm16758_vm4 = vmmov %vm16753_vm6 }
 0x9ef   : > { %v7579_v36 = vpop.permute.xlu1 %7578  ;;  %v8188_v28 = vsel %vm16755_vm2, %v8187_v18, %v8183_v10  ;;  %v8716_v10 = vadd.f32 %v6782_v41, %v247_v5 }
 0x9f0   : > { %v8192_v60 = vrot.slane %v7579_v36, %v11145_v3  ;;  %v8148_v3 = vrot.slane %v7552_v43, %v11231_v53 }
 0x9f2   : > { %v8193_v49 = vsel %vm16756_vm9, %v8192_v60, %v8188_v28  ;;  %v8149_v48 = vsel %vm2300_vm13, %v8148_v3, %v8144_v19  ;;  %v16764_v60 = vld [vmem:[#allocation210_spill] sm:$0xff] }
 0x9f3   : > { %v7585_v33 = vpop.permute.xlu1 %7584  ;;  %v8198_v9 = vsel %vm2258_vm7, %v8197_v6, %v8193_v49  ;;  %v8154_v42 = vsel %vm2307_vm14, %v8153_v21, %v8149_v48  ;;  %vm16759_vm7 = vmmov %vm16754_vm1  ;;  %v243_v18 = vrot.slane %v14870_v2, %v16764_v60 }
 0x9f4   : > { %v8202_v16 = vrot.slane %v7585_v33, %v11157_v30  ;;  %v8207_v30 = vrot.slane %v14911_v12, %v11188_v15  ;;  %v8159_v12 = vsel %vm2314_vm15, %v8158_v31, %v8154_v42 }
 0x9f6   : > { %v8203_v39 = vsel %vm2265_vm8, %v8202_v16, %v8198_v9  ;;  %vm16760_vm8 = vcmask 1046534   ;;  %v172_v9 = vld [vmem:[#allocation3] sm:$0xff] }
 0x9f7   : > { %v7591_v20 = vpop.permute.xlu1 %7590  ;;  %v8208_v58 = vsel %vm16757_vm3, %v8207_v30, %v8203_v39  ;;  %v8244_v38 = vsel %vm16760_vm8, %v8159_v12, %v14902_v13 }
 0x9f8   : > { %v8212_v51 = vrot.slane %v7591_v20, %v11169_v25  ;;  %v7606_v25 = vpop.permute.xlu0 %7605 }
 0x9fa   : > { %v8213_v50 = vsel %vm16758_vm4, %v8212_v51, %v8208_v58 }
 0x9fb   : > { %v7594_v1 = vpop.permute.xlu1 %7593 }
 0x9fc   : > { %v8217_v8 = vrot.slane %v7594_v1, %v11218_v22  ;;  %v6781_v1 = vld [vmem:[%s9641_s27 + $0x10] sm:$0xff]  ;;  %s7093_s27 = scalar_lea.vmem [#allocation15], %s8473_s0 }
 0x9fd   : > { %v8714_v0 = vadd.f32 %v6781_v1, %v243_v18 }
 0x9fe   : > { %v8218_v15 = vsel %vm16759_vm7, %v8217_v8, %v8213_v50 }
 0x9ff   : > { %v7597_v61 = vpop.permute.xlu1 %7596 }
 0xa00   : > { %v8222_v45 = vrot.slane %v7597_v61, %v11199_v55 }
 0xa02   : > { %v8223_v55 = vsel %vm2293_vm12, %v8222_v45, %v8218_v15 }
 0xa03   : > { %v7600_v14 = vpop.permute.xlu1 %7599 }
 0xa04   : > { %v8227_v40 = vrot.slane %v7600_v14, %v11231_v53  ;;  %v8237_v53 = vrot.slane %v7606_v25, %v16213_v63  ;;  %v16762_v63 = vld [vmem:[#allocation205_spill] sm:$0xff] }
 0xa05   : > { %v239_v26 = vrot.slane %v14870_v2, %v16762_v63 }
 0xa06   : > { %v8228_v56 = vsel %vm2300_vm13, %v8227_v40, %v8223_v55 }
 0xa07   : > { %v7603_v22 = vpop.permute.xlu1 %7602  ;;  %v8712_v43 = vadd.f32 %v6780_v59, %v239_v26 }
 0xa08   : > { %v8232_v57 = vrot.slane %v7603_v22, %v16204_v54  ;;  %v235_v54 = vrot.slane %v14870_v2, %v16761_v52 }
 0xa0a   : > { %v8233_v36 = vsel %vm2307_vm14, %v8232_v57, %v8228_v56  ;;  %v8710_v33 = vadd.f32 %v6779_v37, %v235_v54 }
 0xa0b   : > { %v8238_v32 = vsel %vm2314_vm15, %v8237_v53, %v8233_v36 }
 0xa0c   : > { %v8245_v44 = vsel %vm16749_vm5, %v8238_v32, %v8244_v38 }
 0xa0d   : > { %8248 = vst [vmem:[%s8247_s30] sm:$0xff] %v8245_v44 }
 0xab3   : > { %v7014_v34 = vpop.f32.mrb[0].mxu1  ;;  %v7055_v13 = vpop.f32.mrb[4].mxu0 }
 0xab4   : > { %v8711_v62 = vadd.f32 %v8710_v33, %v7014_v34  ;;  %v7016_v27 = vpop.f32.mrb[1].mxu1  ;;  %v7057_v17 = vpop.f32.mrb[5].mxu0  ;;  %v8715_v49 = vadd.f32 %v8714_v0, %v7055_v13 }
 0xab5   : > { %v8713_v7 = vadd.f32 %v8712_v43, %v7016_v27  ;;  %v7018_v20 = vpop.f32.mrb[2].mxu1  ;;  %v7059_v29 = vpop.f32.mrb[6].mxu0  ;;  %v8717_v35 = vadd.f32 %v8716_v10, %v7057_v17 }
 0xab6   : > { %v8470_v4 = vmul.f32 -1.442695, %v8711_v62  ;;  %v7019_v11 = vpop.f32.mrb[3].mxu1  ;;  %v7060_v46 = vpop.f32.mrb[7].mxu0 }
 0xab7   : > { %v8471_v23 = vmul.f32 -1.442695, %v8713_v7  ;;  %v8472_v28 = vmul.f32 -1.442695, %v8717_v35 }
 0xab8   : > { %9206 = vpow2.f32 %v8470_v4 }
 0xab9   : > { %9208 = vpow2.f32 %v8471_v23 }
 0xaba   : > { %9210 = vpow2.f32 %v8472_v28 }
 0xabb   : > { %9212 = vtanh.f32 %v8715_v49 }
 0xac2   : > { %v9207_v16 = vpop.eup %9206 }
 0xac3   : > { %v9209_v6 = vpop.eup %9208  ;;  %v7069_v19 = vadd.f32 1.0, %v9207_v16 }
 0xac4   : > { %v7075_v61 = vadd.f32 1.0, %v9209_v6  ;;  %v9211_v3 = vpop.eup %9210 }
 0xac5   : > { %9214 = vrcp.f32 %v7069_v19  ;;  %v9213_v24 = vpop.eup %9212  ;;  %v7082_v51 = vadd.f32 1.0, %v9211_v3 }
 0xac6   : > { %9216 = vrcp.f32 %v7075_v61 }
 0xac7   : > { %9218 = vrcp.f32 %v7082_v51 }
 0xacf   : > { %v9215_v48 = vpop.eup %9214 }
 0xad0   : > { %v9217_v2 = vpop.eup %9216  ;;  %v7086_v39 = vmul.f32 %v9215_v48, %v9213_v24 }
 0xad1   : > { %v7085_v30 = vmul.f32 %v9217_v2, %v172_v9  ;;  %v9219_v8 = vpop.eup %9218 }
 0xad3   : > { %v7087_v21 = vadd.f32 %v7086_v39, %v7085_v30 }
 0xad5   : > { %9220 = vtanh.f32 %v7087_v21  ;;  %7091 = vst [vmem:[#allocation3] sm:$0xff] %v7087_v21 }
 0xadc   :  { %125 = sbr.rel (!%p16766_p10) target bundleno = 116 (0x74), region = 107 }
 0xadf   : > { %v9221_v14 = vpop.eup %9220 }
 0xae0   : > { %v7089_v45 = vmul.f32 %v9221_v14, %v9219_v8 }
 0xae2   : > { %7090 = vst [vmem:[#allocation2] sm:$0xff] %v7089_v45  ;;  %7094 = vst [vmem:[%s7093_s27] sm:$0xff] %v7089_v45 }
 0xae3   :  { %9395 = shalt.err (!%p9392_p4)
}
 0xae4   :  { %s9396_s2 = scalar_lea.hbm %s15050_s9, 896 }
 0xae5   :  { %p9397_p5 = scmp.ne.s32.totalorder %s15050_s9, %s9396_s2  ;;  %p9400_p6 = scmp.lt.u32.totalorder %s9396_s2, %s15050_s9 }
 0xae7   :  { %p9402_p7 = pnand %p9400_p6, %p9397_p5 }
 0xae9   :  { %9405 = shalt.err (!%p9402_p7)
}
 0xaea   :  { %8260 = dma.vmem_to_hbm [thread:$0]  %s8255_s12, 896, %s15050_s9, [#allocation8], %s9449_s23, %s9449_s23, %s9450_s24  }
 0xaeb   :  { %s9406_s28 = scalar_lea.vmem %s15004_s13, 896  ;;  %p9411_p9 = scmp.lt.s32.totalorder %s15004_s13, %s15004_s13 }
 0xaec   :  { %p9407_p8 = scmp.ne.s32.totalorder %s15004_s13, %s9406_s28  ;;  %p9412_p12 = scmp.lt.s32.totalorder %s9406_s28, %s9406_s28 }
 0xaee   :  { %p9413_p13 = por %p9412_p12, %p9411_p9 }
 0xaf0   :  { %p9414_p1 = pnand %p9413_p13, %p9407_p8 }
 0xaf2   :  { %9417 = shalt.err (!%p9414_p1)
}
 0xaf3   :  { %s9418_s19 = scalar_lea.hbm %s15051_s10, 896 }
 0xaf4   :  { %p9419_p10 = scmp.ne.s32.totalorder %s15051_s10, %s9418_s19  ;;  %p9422_p11 = scmp.lt.u32.totalorder %s9418_s19, %s15051_s10 }
 0xaf6   :  { %p9424_p0 = pnand %p9422_p11, %p9419_p10 }
 0xaf8   :  { %9427 = shalt.err (!%p9424_p0)
}
 0xaf9   :  { %8272 = dma.vmem_to_hbm [thread:$0]  %s15004_s13, 896, %s15051_s10, [#allocation17], %s9449_s23, %s9449_s23, %s9450_s24  }
 0xafa   :  { %9440 = dma.done.wait [#allocation8], 896  }
 0xafb   :  { %9441 = vsyncadd [#allocation8], 4294966400 }
 0xafc   :  { %9442 = dma.done.wait [#allocation17], 896  }
 0xafd   :  { %9443 = vsyncadd [#allocation17], 4294966400 }
 0xafe   :  { %8279 = vsyncpa [#allocation7], 1 }
 0xaff   :  { %8280 = vsyncpa [#allocation10], 1 }
 0xb00   :  { %8281 = vsyncpa [#allocation13], 1 }
 0xb01   :  { %8282 = vsyncpa [#allocation8], 1 }
 0xb02   :  { %8283 = vsyncpa [#allocation17], 1 }
 0xb03   :  { %8284 = vsyncmov [#allocation5] }
 0xb06   :  { %s8285_s14 = vpop.sfrf %8284 }
 0xb07   :  { %p8474_p2 = scmp.ne.s32.totalorder %s8285_s14, 0 }
 0xb09   :  { %8289 = shalt.err (%p8474_p2)  }
 0xb0a   :  { %8291 = vsyncmov [#allocation5 + $0x1] }
 0xb0d   :  { %s8292_s0 = vpop.sfrf %8291 }
 0xb0e   :  { %p8475_p3 = scmp.ne.s32.totalorder %s8292_s0, 0 }
 0xb10   :  { %8296 = shalt.err (%p8475_p3)  }

</bundles_post_ra>
